<compile_context>
chip_gen: v7x
topology: tpu7x:2x2x1
jax: 0.10.0
libtpu: 0.0.40
codegen_flags: <defaults>
</compile_context>

<pallas_src>
import functools

import jax
import jax.numpy as jnp
from jax import lax
from jax.experimental import pallas as pl
from jax.experimental.pallas import tpu as pltpu

C = 728          # channel count fixed by MiddleFlow(728 -> 728)
CP = 768         # padded to a multiple of 128 lanes
EPS = 1e-5       # PyTorch BatchNorm2d default eps


def _round_up(v, m):
    return (v + m - 1) // m * m


# ----------------------------------------------------------------------------
# Fused kernel.  Grid = (batch, block): one DwSepConv block (depthwise 3x3
# dilated conv + BN + ReLU -> 1x1 pointwise conv + BN + ReLU -> BN + ReLU) per
# inner grid step, activations resident in VMEM scratch across the inner axis,
# identity shortcut added on the last block.
# ----------------------------------------------------------------------------
def _middle_flow_kernel(x_ref, dww_ref, dwb_ref, pww_ref, pwb_ref, sc_ref,
                        bc_ref, o_ref, xbuf, dwout, *, H, W, d, col0):
    blk = pl.program_id(1)
    Hb, Wb, CPn = xbuf.shape

    # ---- blk == 0: refresh the zero halo and load relu(x) into the valid
    # region (rows [d, d+H), cols [col0, col0+W), col0 a multiple of 8 so all
    # activation writes are sublane-aligned).
    @pl.when(blk == 0)
    def _init():
        zrow = jnp.zeros((d, Wb, CPn), jnp.float32)
        xbuf[0:d] = zrow                                   # top halo rows
        xbuf[d + H:Hb] = zrow                              # bottom halo rows
        zcol = jnp.zeros((H, d, CPn), jnp.float32)
        xbuf[d:d + H, col0 - d:col0, :] = zcol             # left column strip
        xbuf[d:d + H, col0 + W:col0 + W + d, :] = zcol     # right column strip
        # Leading ReLU of conv_residual (relu(0)=0, so the zero halo is valid).
        xbuf[d:d + H, col0:col0 + W, :] = jnp.maximum(x_ref[0], 0.0)

    # ---- dilated 3x3 depthwise conv + folded BN_a + ReLU, one output row at a
    # time: the (W, CP) accumulator stays in vregs for all 9 taps; taps are
    # read as per-row ref slices so no large value stays live across the loop.
    wdw = dww_ref[0]                                # (9, CP), BN_a scale folded
    w_tap = [wdw[k:k + 1, :] for k in range(9)]     # hoisted (1, CP) tap rows
    bdw = dwb_ref[0]                                # (1, CP), folded BN_a shift
    for h in range(H):
        acc = jnp.zeros((W, CPn), jnp.float32)
        for kh in range(3):
            r = h + kh * d
            for kw in range(3):
                c = col0 + (kw - 1) * d
                acc = acc + xbuf[r, c:c + W, :] * w_tap[kh * 3 + kw]
        dwout[h * W:(h + 1) * W, :] = (
            jnp.maximum(acc + bdw, 0.0).astype(jnp.bfloat16))

    # ---- 1x1 pointwise conv on the MXU (bf16 in / f32 acc), fused with the
    # folded BN_b + ReLU and the standalone BN_c + ReLU.
    y = jnp.dot(dwout[...], pww_ref[0], preferred_element_type=jnp.float32)
    y = jnp.maximum(y + pwb_ref[0], 0.0)               # BN_b (folded) + ReLU
    y = jnp.maximum(y * sc_ref[0] + bc_ref[0], 0.0)    # BN_c + ReLU
    y3 = y.reshape(H, W, CPn)

    @pl.when(blk < 2)
    def _feed():
        xbuf[d:d + H, col0:col0 + W, :] = y3           # next block's input

    @pl.when(blk == 2)
    def _finish():
        o_ref[0] = x_ref[0] + y3                       # identity shortcut add


# ----------------------------------------------------------------------------
# MiddleFlow forward (Pallas) -- thin NCHW<->NHWC glue in plain JAX
# ----------------------------------------------------------------------------
def middle_flow_pallas(x_nchw, pal, d):
    N, Cin, H, W = x_nchw.shape
    assert Cin == C
    assert W % 8 == 0, "W must be a multiple of 8 (sublane tile)"
    x_nhwc = jnp.transpose(x_nchw, (0, 2, 3, 1)).astype(jnp.float32)
    x_nhwc = jnp.pad(x_nhwc, ((0, 0), (0, 0), (0, 0), (0, CP - C)))

    col0 = _round_up(d, 8)                 # aligned start column of valid data
    Wb = _round_up(col0 + W + d, 8)        # zero halo on both sides
    Hb = H + 2 * d

    kern = functools.partial(_middle_flow_kernel, H=H, W=W, d=d, col0=col0)
    xmap = lambda n, b: (n, 0, 0, 0)       # input/output: follow batch only
    wmap = lambda n, b: (b, 0, 0)          # weights: streamed per block
    out = pl.pallas_call(
        kern,
        out_shape=jax.ShapeDtypeStruct((N, H, W, CP), jnp.float32),
        grid=(N, 3),
        in_specs=[
            pl.BlockSpec((1, H, W, CP), xmap),
            pl.BlockSpec((1, 9, CP), wmap),      # depthwise taps (s_a folded)
            pl.BlockSpec((1, 1, CP), wmap),      # depthwise bias (BN_a shift)
            pl.BlockSpec((1, CP, CP), wmap),     # pointwise weights, bf16 (s_b folded)
            pl.BlockSpec((1, 1, CP), wmap),      # pointwise bias (BN_b shift)
            pl.BlockSpec((1, 1, CP), wmap),      # BN_c scale
            pl.BlockSpec((1, 1, CP), wmap),      # BN_c shift
        ],
        out_specs=pl.BlockSpec((1, H, W, CP), xmap),
        scratch_shapes=[
            pltpu.VMEM((Hb, Wb, CP), jnp.float32),   # zero-halo activation buffer
            pltpu.VMEM((H * W, CP), jnp.bfloat16),   # depthwise out / matmul LHS
        ],
        compiler_params=pltpu.CompilerParams(
            dimension_semantics=("parallel", "arbitrary"),
            vmem_limit_bytes=32 * 1024 * 1024),
    )(x_nhwc, pal['dw_w'], pal['dw_b'], pal['pw_w'], pal['pw_b'],
      pal['s_c'], pal['b_c'])

    return jnp.transpose(out[..., :C], (0, 3, 1, 2))


# ----------------------------------------------------------------------------
# Deterministic parameter construction (raw for the reference, prepped/folded
# and channel-padded for the Pallas kernel)
# ----------------------------------------------------------------------------
def make_params(key):
    keys = jax.random.split(key, 48)
    it = iter(keys)

    def bn_raw():
        gamma = jax.random.uniform(next(it), (C,), jnp.float32, 0.5, 1.5)
        beta = jax.random.normal(next(it), (C,), jnp.float32) * 0.1
        mean = jax.random.normal(next(it), (C,), jnp.float32) * 0.1
        var = jax.random.uniform(next(it), (C,), jnp.float32, 0.5, 1.5)
        return gamma, beta, mean, var

    def fold(bn):
        g, b, m, v = bn
        s = g / jnp.sqrt(v + EPS)
        return s, b - m * s

    def cpad(v):
        return jnp.pad(v, (0, CP - C))

    raw = {'dw_w': [], 'pw_w': [], 'bn_a': [], 'bn_b': [], 'bn_c': []}
    dww, dwb, pww, pwb, scs, bcs = [], [], [], [], [], []
    for _ in range(3):
        dw = jax.random.normal(next(it), (3, 3, C), jnp.float32) * 0.1
        pw = jax.random.normal(next(it), (C, C), jnp.float32) / jnp.sqrt(C)
        bn_a, bn_b, bn_c = bn_raw(), bn_raw(), bn_raw()
        raw['dw_w'].append(dw)
        raw['pw_w'].append(pw)
        raw['bn_a'].append(bn_a)
        raw['bn_b'].append(bn_b)
        raw['bn_c'].append(bn_c)

        s_a, sh_a = fold(bn_a)
        s_b, sh_b = fold(bn_b)
        s_c, sh_c = fold(bn_c)
        # Fold BN_a scale into the depthwise taps, BN_b scale into the
        # pointwise columns; keep the shifts as bias adds.
        dww.append(jnp.pad((dw * s_a).reshape(9, C), ((0, 0), (0, CP - C))))
        dwb.append(cpad(sh_a))
        pww.append(jnp.pad(pw * s_b[None, :],
                           ((0, CP - C), (0, CP - C))).astype(jnp.bfloat16))
        pwb.append(cpad(sh_b))
        scs.append(cpad(s_c))
        bcs.append(cpad(sh_c))

    pal = {
        'dw_w': jnp.stack(dww),                 # (3, 9, CP) f32
        'dw_b': jnp.stack(dwb)[:, None, :],     # (3, 1, CP) f32
        'pw_w': jnp.stack(pww),                 # (3, CP, CP) bf16
        'pw_b': jnp.stack(pwb)[:, None, :],     # (3, 1, CP) f32
        's_c': jnp.stack(scs)[:, None, :],      # (3, 1, CP) f32
        'b_c': jnp.stack(bcs)[:, None, :],      # (3, 1, CP) f32
    }
    return raw, pal


# ----------------------------------------------------------------------------
# Pure-JAX reference (mirrors the PyTorch module, eval-mode BN)
# ----------------------------------------------------------------------------
def _bn_nchw(x, p):
    g, b, m, v = p
    inv = g / jnp.sqrt(v + EPS)
    return x * inv[None, :, None, None] + (b - m * inv)[None, :, None, None]


def ref_middle_flow(x, raw, d):
    y = jax.nn.relu(x)
    for i in range(3):
        w_dw = jnp.transpose(raw['dw_w'][i], (2, 0, 1))[:, None, :, :]
        y = lax.conv_general_dilated(
            y, w_dw, (1, 1), [(d, d), (d, d)], rhs_dilation=(d, d),
            feature_group_count=C,
            dimension_numbers=('NCHW', 'OIHW', 'NCHW'))
        y = jax.nn.relu(_bn_nchw(y, raw['bn_a'][i]))
        w_pw = jnp.transpose(raw['pw_w'][i])[:, :, None, None]
        y = lax.conv_general_dilated(
            y, w_pw, (1, 1), [(0, 0), (0, 0)],
            dimension_numbers=('NCHW', 'OIHW', 'NCHW'))
        y = jax.nn.relu(_bn_nchw(y, raw['bn_b'][i]))
        y = jax.nn.relu(_bn_nchw(y, raw['bn_c'][i]))
    return x + y


if __name__ == "__main__":
    key = jax.random.PRNGKey(0)
    kp, kx = jax.random.split(key)
    raw, pal = make_params(kp)

    mf_d = 2                                 # dilation of the middle flow
    x = jax.random.normal(kx, (2, C, 8, 8), jnp.float32)   # NCHW, like PyTorch

    out = middle_flow_pallas(x, pal, mf_d)
    out = jax.block_until_ready(out)

    ref = ref_middle_flow(x, raw, mf_d)
    assert out.shape == x.shape
    max_err = float(jnp.max(jnp.abs(out - ref)))
    assert max_err < 5e-2, f"max abs err {max_err}"
    print("KERNEL_OK")
</pallas_src>

<mosaic_0001>
module attributes {stable_mosaic.version = 11 : i64} {
  func.func @_middle_flow_kernel(%arg0: i32, %arg1: i32, %arg2: memref<1x8x8x768xf32, #tpu.memory_space<vmem>>, %arg3: memref<1x9x768xf32, #tpu.memory_space<vmem>>, %arg4: memref<1x1x768xf32, #tpu.memory_space<vmem>>, %arg5: memref<1x768x768xbf16, #tpu.memory_space<vmem>>, %arg6: memref<1x1x768xf32, #tpu.memory_space<vmem>>, %arg7: memref<1x1x768xf32, #tpu.memory_space<vmem>>, %arg8: memref<1x1x768xf32, #tpu.memory_space<vmem>>, %arg9: memref<1x8x8x768xf32, #tpu.memory_space<vmem>>, %arg10: memref<12x24x768xf32, #tpu.memory_space<vmem>>, %arg11: memref<64x768xbf16, #tpu.memory_space<vmem>>) attributes {dimension_semantics = [#tpu.dimension_semantics<parallel>, #tpu.dimension_semantics<arbitrary>], iteration_bounds = array<i64: 2, 3>, scalar_prefetch = 0 : i64, scratch_operands = 2 : i64, tpu.core_type = #tpu.core_type<tc>, window_params = [{transform_indices = @transform_0, window_bounds = array<i64: 1, 8, 8, 768>}, {transform_indices = @transform_1, window_bounds = array<i64: 1, 9, 768>}, {transform_indices = @transform_2, window_bounds = array<i64: 1, 1, 768>}, {transform_indices = @transform_3, window_bounds = array<i64: 1, 768, 768>}, {transform_indices = @transform_4, window_bounds = array<i64: 1, 1, 768>}, {transform_indices = @transform_5, window_bounds = array<i64: 1, 1, 768>}, {transform_indices = @transform_6, window_bounds = array<i64: 1, 1, 768>}, {transform_indices = @transform_7, window_bounds = array<i64: 1, 8, 8, 768>}]} {
    %c0_i32 = arith.constant 0 : i32
    %0 = arith.cmpi eq, %arg1, %c0_i32 : i32
    %1 = arith.extui %0 : i1 to i32
    %c0_i32_0 = arith.constant 0 : i32
    %2 = arith.cmpi ne, %1, %c0_i32_0 : i32
    scf.if %2 {
      %cst_256 = arith.constant 0.000000e+00 : f32
      %459 = vector.broadcast %cst_256 : f32 to vector<2x24x768xf32>
      %c0_257 = arith.constant 0 : index
      %c0_258 = arith.constant 0 : index
      %c0_259 = arith.constant 0 : index
      %460 = vector.load %arg10[%c0_257, %c0_258, %c0_259] : memref<12x24x768xf32, #tpu.memory_space<vmem>>, vector<2x24x768xf32>
      tpu.vector_store %arg10[%c0_257, %c0_258, %c0_259], %459 {strides = array<i32>} : memref<12x24x768xf32, #tpu.memory_space<vmem>>, vector<2x24x768xf32>,
      %c10_260 = arith.constant 10 : index
      %c0_261 = arith.constant 0 : index
      %c0_262 = arith.constant 0 : index
      %461 = vector.load %arg10[%c10_260, %c0_261, %c0_262] : memref<12x24x768xf32, #tpu.memory_space<vmem>>, vector<2x24x768xf32>
      tpu.vector_store %arg10[%c10_260, %c0_261, %c0_262], %459 {strides = array<i32>} : memref<12x24x768xf32, #tpu.memory_space<vmem>>, vector<2x24x768xf32>,
      %cst_263 = arith.constant 0.000000e+00 : f32
      %462 = vector.broadcast %cst_263 : f32 to vector<8x2x768xf32>
      %c2_264 = arith.constant 2 : index
      %c6_265 = arith.constant 6 : index
      %c0_266 = arith.constant 0 : index
      %463 = vector.load %arg10[%c2_264, %c6_265, %c0_266] : memref<12x24x768xf32, #tpu.memory_space<vmem>>, vector<8x2x768xf32>
      tpu.vector_store %arg10[%c2_264, %c6_265, %c0_266], %462 {strides = array<i32>} : memref<12x24x768xf32, #tpu.memory_space<vmem>>, vector<8x2x768xf32>,
      %c2_267 = arith.constant 2 : index
      %c16_268 = arith.constant 16 : index
      %c0_269 = arith.constant 0 : index
      %464 = vector.load %arg10[%c2_267, %c16_268, %c0_269] : memref<12x24x768xf32, #tpu.memory_space<vmem>>, vector<8x2x768xf32>
      tpu.vector_store %arg10[%c2_267, %c16_268, %c0_269], %462 {strides = array<i32>} : memref<12x24x768xf32, #tpu.memory_space<vmem>>, vector<8x2x768xf32>,
      %c0_270 = arith.constant 0 : index
      %c0_271 = arith.constant 0 : index
      %c0_272 = arith.constant 0 : index
      %c0_273 = arith.constant 0 : index
      %465 = vector.load %arg2[%c0_270, %c0_271, %c0_272, %c0_273] : memref<1x8x8x768xf32, #tpu.memory_space<vmem>>, vector<1x8x8x768xf32>
      %466 = vector.shape_cast %465 : vector<1x8x8x768xf32> to vector<8x8x768xf32>
      %cst_274 = arith.constant 0.000000e+00 : f32
      %467 = vector.broadcast %cst_274 : f32 to vector<8x8x768xf32>
      %468 = arith.maximumf %466, %467 : vector<8x8x768xf32>
      %c2_275 = arith.constant 2 : index
      %c8_276 = arith.constant 8 : index
      %c0_277 = arith.constant 0 : index
      %469 = vector.load %arg10[%c2_275, %c8_276, %c0_277] : memref<12x24x768xf32, #tpu.memory_space<vmem>>, vector<8x8x768xf32>
      tpu.vector_store %arg10[%c2_275, %c8_276, %c0_277], %468 {strides = array<i32>} : memref<12x24x768xf32, #tpu.memory_space<vmem>>, vector<8x8x768xf32>,
    } else {
    }
    %c0 = arith.constant 0 : index
    %c0_1 = arith.constant 0 : index
    %c0_2 = arith.constant 0 : index
    %3 = vector.load %arg3[%c0, %c0_1, %c0_2] : memref<1x9x768xf32, #tpu.memory_space<vmem>>, vector<1x9x768xf32>
    %4 = vector.shape_cast %3 : vector<1x9x768xf32> to vector<9x768xf32>
    %5 = vector.extract_strided_slice %4 {offsets = [0, 0], sizes = [1, 768], strides = [1, 1]} : vector<9x768xf32> to vector<1x768xf32>
    %6 = vector.extract_strided_slice %4 {offsets = [1, 0], sizes = [1, 768], strides = [1, 1]} : vector<9x768xf32> to vector<1x768xf32>
    %7 = vector.extract_strided_slice %4 {offsets = [2, 0], sizes = [1, 768], strides = [1, 1]} : vector<9x768xf32> to vector<1x768xf32>
    %8 = vector.extract_strided_slice %4 {offsets = [3, 0], sizes = [1, 768], strides = [1, 1]} : vector<9x768xf32> to vector<1x768xf32>
    %9 = vector.extract_strided_slice %4 {offsets = [4, 0], sizes = [1, 768], strides = [1, 1]} : vector<9x768xf32> to vector<1x768xf32>
    %10 = vector.extract_strided_slice %4 {offsets = [5, 0], sizes = [1, 768], strides = [1, 1]} : vector<9x768xf32> to vector<1x768xf32>
    %11 = vector.extract_strided_slice %4 {offsets = [6, 0], sizes = [1, 768], strides = [1, 1]} : vector<9x768xf32> to vector<1x768xf32>
    %12 = vector.extract_strided_slice %4 {offsets = [7, 0], sizes = [1, 768], strides = [1, 1]} : vector<9x768xf32> to vector<1x768xf32>
    %13 = vector.extract_strided_slice %4 {offsets = [8, 0], sizes = [1, 768], strides = [1, 1]} : vector<9x768xf32> to vector<1x768xf32>
    %c0_3 = arith.constant 0 : index
    %c0_4 = arith.constant 0 : index
    %c0_5 = arith.constant 0 : index
    %14 = vector.load %arg4[%c0_3, %c0_4, %c0_5] : memref<1x1x768xf32, #tpu.memory_space<vmem>>, vector<1x1x768xf32>
    %15 = vector.shape_cast %14 : vector<1x1x768xf32> to vector<1x768xf32>
    %cst = arith.constant 0.000000e+00 : f32
    %16 = vector.broadcast %cst : f32 to vector<8x768xf32>
    %c0_6 = arith.constant 0 : index
    %c6 = arith.constant 6 : index
    %c0_7 = arith.constant 0 : index
    %17 = vector.load %arg10[%c0_6, %c6, %c0_7] : memref<12x24x768xf32, #tpu.memory_space<vmem>>, vector<1x8x768xf32>
    %18 = vector.shape_cast %17 : vector<1x8x768xf32> to vector<8x768xf32>
    %19 = vector.broadcast %5 : vector<1x768xf32> to vector<8x768xf32>
    %20 = arith.mulf %18, %19 : vector<8x768xf32>
    %21 = arith.addf %16, %20 : vector<8x768xf32>
    %c0_8 = arith.constant 0 : index
    %c8 = arith.constant 8 : index
    %c0_9 = arith.constant 0 : index
    %22 = vector.load %arg10[%c0_8, %c8, %c0_9] : memref<12x24x768xf32, #tpu.memory_space<vmem>>, vector<1x8x768xf32>
    %23 = vector.shape_cast %22 : vector<1x8x768xf32> to vector<8x768xf32>
    %24 = vector.broadcast %6 : vector<1x768xf32> to vector<8x768xf32>
    %25 = arith.mulf %23, %24 : vector<8x768xf32>
    %26 = arith.addf %21, %25 : vector<8x768xf32>
    %c0_10 = arith.constant 0 : index
    %c10 = arith.constant 10 : index
    %c0_11 = arith.constant 0 : index
    %27 = vector.load %arg10[%c0_10, %c10, %c0_11] : memref<12x24x768xf32, #tpu.memory_space<vmem>>, vector<1x8x768xf32>
    %28 = vector.shape_cast %27 : vector<1x8x768xf32> to vector<8x768xf32>
    %29 = vector.broadcast %7 : vector<1x768xf32> to vector<8x768xf32>
    %30 = arith.mulf %28, %29 : vector<8x768xf32>
    %31 = arith.addf %26, %30 : vector<8x768xf32>
    %c2 = arith.constant 2 : index
    %c6_12 = arith.constant 6 : index
    %c0_13 = arith.constant 0 : index
    %32 = vector.load %arg10[%c2, %c6_12, %c0_13] : memref<12x24x768xf32, #tpu.memory_space<vmem>>, vector<1x8x768xf32>
    %33 = vector.shape_cast %32 : vector<1x8x768xf32> to vector<8x768xf32>
    %34 = vector.broadcast %8 : vector<1x768xf32> to vector<8x768xf32>
    %35 = arith.mulf %33, %34 : vector<8x768xf32>
    %36 = arith.addf %31, %35 : vector<8x768xf32>
    %c2_14 = arith.constant 2 : index
    %c8_15 = arith.constant 8 : index
    %c0_16 = arith.constant 0 : index
    %37 = vector.load %arg10[%c2_14, %c8_15, %c0_16] : memref<12x24x768xf32, #tpu.memory_space<vmem>>, vector<1x8x768xf32>
    %38 = vector.shape_cast %37 : vector<1x8x768xf32> to vector<8x768xf32>
    %39 = vector.broadcast %9 : vector<1x768xf32> to vector<8x768xf32>
    %40 = arith.mulf %38, %39 : vector<8x768xf32>
    %41 = arith.addf %36, %40 : vector<8x768xf32>
    %c2_17 = arith.constant 2 : index
    %c10_18 = arith.constant 10 : index
    %c0_19 = arith.constant 0 : index
    %42 = vector.load %arg10[%c2_17, %c10_18, %c0_19] : memref<12x24x768xf32, #tpu.memory_space<vmem>>, vector<1x8x768xf32>
    %43 = vector.shape_cast %42 : vector<1x8x768xf32> to vector<8x768xf32>
    %44 = vector.broadcast %10 : vector<1x768xf32> to vector<8x768xf32>
    %45 = arith.mulf %43, %44 : vector<8x768xf32>
    %46 = arith.addf %41, %45 : vector<8x768xf32>
    %c4 = arith.constant 4 : index
    %c6_20 = arith.constant 6 : index
    %c0_21 = arith.constant 0 : index
    %47 = vector.load %arg10[%c4, %c6_20, %c0_21] : memref<12x24x768xf32, #tpu.memory_space<vmem>>, vector<1x8x768xf32>
    %48 = vector.shape_cast %47 : vector<1x8x768xf32> to vector<8x768xf32>
    %49 = vector.broadcast %11 : vector<1x768xf32> to vector<8x768xf32>
    %50 = arith.mulf %48, %49 : vector<8x768xf32>
    %51 = arith.addf %46, %50 : vector<8x768xf32>
    %c4_22 = arith.constant 4 : index
    %c8_23 = arith.constant 8 : index
    %c0_24 = arith.constant 0 : index
    %52 = vector.load %arg10[%c4_22, %c8_23, %c0_24] : memref<12x24x768xf32, #tpu.memory_space<vmem>>, vector<1x8x768xf32>
    %53 = vector.shape_cast %52 : vector<1x8x768xf32> to vector<8x768xf32>
    %54 = vector.broadcast %12 : vector<1x768xf32> to vector<8x768xf32>
    %55 = arith.mulf %53, %54 : vector<8x768xf32>
    %56 = arith.addf %51, %55 : vector<8x768xf32>
    %c4_25 = arith.constant 4 : index
    %c10_26 = arith.constant 10 : index
    %c0_27 = arith.constant 0 : index
    %57 = vector.load %arg10[%c4_25, %c10_26, %c0_27] : memref<12x24x768xf32, #tpu.memory_space<vmem>>, vector<1x8x768xf32>
    %58 = vector.shape_cast %57 : vector<1x8x768xf32> to vector<8x768xf32>
    %59 = vector.broadcast %13 : vector<1x768xf32> to vector<8x768xf32>
    %60 = arith.mulf %58, %59 : vector<8x768xf32>
    %61 = arith.addf %56, %60 : vector<8x768xf32>
    %62 = vector.broadcast %15 : vector<1x768xf32> to vector<8x768xf32>
    %63 = arith.addf %61, %62 : vector<8x768xf32>
    %cst_28 = arith.constant 0.000000e+00 : f32
    %64 = vector.broadcast %cst_28 : f32 to vector<8x768xf32>
    %65 = arith.maximumf %63, %64 : vector<8x768xf32>
    %66 = arith.truncf %65 : vector<8x768xf32> to vector<8x768xbf16>
    %c0_29 = arith.constant 0 : index
    %c0_30 = arith.constant 0 : index
    %67 = vector.load %arg11[%c0_29, %c0_30] : memref<64x768xbf16, #tpu.memory_space<vmem>>, vector<8x768xbf16>
    tpu.vector_store %arg11[%c0_29, %c0_30], %66 {strides = array<i32>} : memref<64x768xbf16, #tpu.memory_space<vmem>>, vector<8x768xbf16>,
    %cst_31 = arith.constant 0.000000e+00 : f32
    %68 = vector.broadcast %cst_31 : f32 to vector<8x768xf32>
    %c1 = arith.constant 1 : index
    %c6_32 = arith.constant 6 : index
    %c0_33 = arith.constant 0 : index
    %69 = vector.load %arg10[%c1, %c6_32, %c0_33] : memref<12x24x768xf32, #tpu.memory_space<vmem>>, vector<1x8x768xf32>
    %70 = vector.shape_cast %69 : vector<1x8x768xf32> to vector<8x768xf32>
    %71 = vector.broadcast %5 : vector<1x768xf32> to vector<8x768xf32>
    %72 = arith.mulf %70, %71 : vector<8x768xf32>
    %73 = arith.addf %68, %72 : vector<8x768xf32>
    %c1_34 = arith.constant 1 : index
    %c8_35 = arith.constant 8 : index
    %c0_36 = arith.constant 0 : index
    %74 = vector.load %arg10[%c1_34, %c8_35, %c0_36] : memref<12x24x768xf32, #tpu.memory_space<vmem>>, vector<1x8x768xf32>
    %75 = vector.shape_cast %74 : vector<1x8x768xf32> to vector<8x768xf32>
    %76 = vector.broadcast %6 : vector<1x768xf32> to vector<8x768xf32>
    %77 = arith.mulf %75, %76 : vector<8x768xf32>
    %78 = arith.addf %73, %77 : vector<8x768xf32>
    %c1_37 = arith.constant 1 : index
    %c10_38 = arith.constant 10 : index
    %c0_39 = arith.constant 0 : index
    %79 = vector.load %arg10[%c1_37, %c10_38, %c0_39] : memref<12x24x768xf32, #tpu.memory_space<vmem>>, vector<1x8x768xf32>
    %80 = vector.shape_cast %79 : vector<1x8x768xf32> to vector<8x768xf32>
    %81 = vector.broadcast %7 : vector<1x768xf32> to vector<8x768xf32>
    %82 = arith.mulf %80, %81 : vector<8x768xf32>
    %83 = arith.addf %78, %82 : vector<8x768xf32>
    %c3 = arith.constant 3 : index
    %c6_40 = arith.constant 6 : index
    %c0_41 = arith.constant 0 : index
    %84 = vector.load %arg10[%c3, %c6_40, %c0_41] : memref<12x24x768xf32, #tpu.memory_space<vmem>>, vector<1x8x768xf32>
    %85 = vector.shape_cast %84 : vector<1x8x768xf32> to vector<8x768xf32>
    %86 = vector.broadcast %8 : vector<1x768xf32> to vector<8x768xf32>
    %87 = arith.mulf %85, %86 : vector<8x768xf32>
    %88 = arith.addf %83, %87 : vector<8x768xf32>
    %c3_42 = arith.constant 3 : index
    %c8_43 = arith.constant 8 : index
    %c0_44 = arith.constant 0 : index
    %89 = vector.load %arg10[%c3_42, %c8_43, %c0_44] : memref<12x24x768xf32, #tpu.memory_space<vmem>>, vector<1x8x768xf32>
    %90 = vector.shape_cast %89 : vector<1x8x768xf32> to vector<8x768xf32>
    %91 = vector.broadcast %9 : vector<1x768xf32> to vector<8x768xf32>
    %92 = arith.mulf %90, %91 : vector<8x768xf32>
    %93 = arith.addf %88, %92 : vector<8x768xf32>
    %c3_45 = arith.constant 3 : index
    %c10_46 = arith.constant 10 : index
    %c0_47 = arith.constant 0 : index
    %94 = vector.load %arg10[%c3_45, %c10_46, %c0_47] : memref<12x24x768xf32, #tpu.memory_space<vmem>>, vector<1x8x768xf32>
    %95 = vector.shape_cast %94 : vector<1x8x768xf32> to vector<8x768xf32>
    %96 = vector.broadcast %10 : vector<1x768xf32> to vector<8x768xf32>
    %97 = arith.mulf %95, %96 : vector<8x768xf32>
    %98 = arith.addf %93, %97 : vector<8x768xf32>
    %c5 = arith.constant 5 : index
    %c6_48 = arith.constant 6 : index
    %c0_49 = arith.constant 0 : index
    %99 = vector.load %arg10[%c5, %c6_48, %c0_49] : memref<12x24x768xf32, #tpu.memory_space<vmem>>, vector<1x8x768xf32>
    %100 = vector.shape_cast %99 : vector<1x8x768xf32> to vector<8x768xf32>
    %101 = vector.broadcast %11 : vector<1x768xf32> to vector<8x768xf32>
    %102 = arith.mulf %100, %101 : vector<8x768xf32>
    %103 = arith.addf %98, %102 : vector<8x768xf32>
    %c5_50 = arith.constant 5 : index
    %c8_51 = arith.constant 8 : index
    %c0_52 = arith.constant 0 : index
    %104 = vector.load %arg10[%c5_50, %c8_51, %c0_52] : memref<12x24x768xf32, #tpu.memory_space<vmem>>, vector<1x8x768xf32>
    %105 = vector.shape_cast %104 : vector<1x8x768xf32> to vector<8x768xf32>
    %106 = vector.broadcast %12 : vector<1x768xf32> to vector<8x768xf32>
    %107 = arith.mulf %105, %106 : vector<8x768xf32>
    %108 = arith.addf %103, %107 : vector<8x768xf32>
    %c5_53 = arith.constant 5 : index
    %c10_54 = arith.constant 10 : index
    %c0_55 = arith.constant 0 : index
    %109 = vector.load %arg10[%c5_53, %c10_54, %c0_55] : memref<12x24x768xf32, #tpu.memory_space<vmem>>, vector<1x8x768xf32>
    %110 = vector.shape_cast %109 : vector<1x8x768xf32> to vector<8x768xf32>
    %111 = vector.broadcast %13 : vector<1x768xf32> to vector<8x768xf32>
    %112 = arith.mulf %110, %111 : vector<8x768xf32>
    %113 = arith.addf %108, %112 : vector<8x768xf32>
    %114 = vector.broadcast %15 : vector<1x768xf32> to vector<8x768xf32>
    %115 = arith.addf %113, %114 : vector<8x768xf32>
    %cst_56 = arith.constant 0.000000e+00 : f32
    %116 = vector.broadcast %cst_56 : f32 to vector<8x768xf32>
    %117 = arith.maximumf %115, %116 : vector<8x768xf32>
    %118 = arith.truncf %117 : vector<8x768xf32> to vector<8x768xbf16>
    %c8_57 = arith.constant 8 : index
    %c0_58 = arith.constant 0 : index
    %119 = vector.load %arg11[%c8_57, %c0_58] : memref<64x768xbf16, #tpu.memory_space<vmem>>, vector<8x768xbf16>
    tpu.vector_store %arg11[%c8_57, %c0_58], %118 {strides = array<i32>} : memref<64x768xbf16, #tpu.memory_space<vmem>>, vector<8x768xbf16>,
    %cst_59 = arith.constant 0.000000e+00 : f32
    %120 = vector.broadcast %cst_59 : f32 to vector<8x768xf32>
    %c2_60 = arith.constant 2 : index
    %c6_61 = arith.constant 6 : index
    %c0_62 = arith.constant 0 : index
    %121 = vector.load %arg10[%c2_60, %c6_61, %c0_62] : memref<12x24x768xf32, #tpu.memory_space<vmem>>, vector<1x8x768xf32>
    %122 = vector.shape_cast %121 : vector<1x8x768xf32> to vector<8x768xf32>
    %123 = vector.broadcast %5 : vector<1x768xf32> to vector<8x768xf32>
    %124 = arith.mulf %122, %123 : vector<8x768xf32>
    %125 = arith.addf %120, %124 : vector<8x768xf32>
    %c2_63 = arith.constant 2 : index
    %c8_64 = arith.constant 8 : index
    %c0_65 = arith.constant 0 : index
    %126 = vector.load %arg10[%c2_63, %c8_64, %c0_65] : memref<12x24x768xf32, #tpu.memory_space<vmem>>, vector<1x8x768xf32>
    %127 = vector.shape_cast %126 : vector<1x8x768xf32> to vector<8x768xf32>
    %128 = vector.broadcast %6 : vector<1x768xf32> to vector<8x768xf32>
    %129 = arith.mulf %127, %128 : vector<8x768xf32>
    %130 = arith.addf %125, %129 : vector<8x768xf32>
    %c2_66 = arith.constant 2 : index
    %c10_67 = arith.constant 10 : index
    %c0_68 = arith.constant 0 : index
    %131 = vector.load %arg10[%c2_66, %c10_67, %c0_68] : memref<12x24x768xf32, #tpu.memory_space<vmem>>, vector<1x8x768xf32>
    %132 = vector.shape_cast %131 : vector<1x8x768xf32> to vector<8x768xf32>
    %133 = vector.broadcast %7 : vector<1x768xf32> to vector<8x768xf32>
    %134 = arith.mulf %132, %133 : vector<8x768xf32>
    %135 = arith.addf %130, %134 : vector<8x768xf32>
    %c4_69 = arith.constant 4 : index
    %c6_70 = arith.constant 6 : index
    %c0_71 = arith.constant 0 : index
    %136 = vector.load %arg10[%c4_69, %c6_70, %c0_71] : memref<12x24x768xf32, #tpu.memory_space<vmem>>, vector<1x8x768xf32>
    %137 = vector.shape_cast %136 : vector<1x8x768xf32> to vector<8x768xf32>
    %138 = vector.broadcast %8 : vector<1x768xf32> to vector<8x768xf32>
    %139 = arith.mulf %137, %138 : vector<8x768xf32>
    %140 = arith.addf %135, %139 : vector<8x768xf32>
    %c4_72 = arith.constant 4 : index
    %c8_73 = arith.constant 8 : index
    %c0_74 = arith.constant 0 : index
    %141 = vector.load %arg10[%c4_72, %c8_73, %c0_74] : memref<12x24x768xf32, #tpu.memory_space<vmem>>, vector<1x8x768xf32>
    %142 = vector.shape_cast %141 : vector<1x8x768xf32> to vector<8x768xf32>
    %143 = vector.broadcast %9 : vector<1x768xf32> to vector<8x768xf32>
    %144 = arith.mulf %142, %143 : vector<8x768xf32>
    %145 = arith.addf %140, %144 : vector<8x768xf32>
    %c4_75 = arith.constant 4 : index
    %c10_76 = arith.constant 10 : index
    %c0_77 = arith.constant 0 : index
    %146 = vector.load %arg10[%c4_75, %c10_76, %c0_77] : memref<12x24x768xf32, #tpu.memory_space<vmem>>, vector<1x8x768xf32>
    %147 = vector.shape_cast %146 : vector<1x8x768xf32> to vector<8x768xf32>
    %148 = vector.broadcast %10 : vector<1x768xf32> to vector<8x768xf32>
    %149 = arith.mulf %147, %148 : vector<8x768xf32>
    %150 = arith.addf %145, %149 : vector<8x768xf32>
    %c6_78 = arith.constant 6 : index
    %c6_79 = arith.constant 6 : index
    %c0_80 = arith.constant 0 : index
    %151 = vector.load %arg10[%c6_78, %c6_79, %c0_80] : memref<12x24x768xf32, #tpu.memory_space<vmem>>, vector<1x8x768xf32>
    %152 = vector.shape_cast %151 : vector<1x8x768xf32> to vector<8x768xf32>
    %153 = vector.broadcast %11 : vector<1x768xf32> to vector<8x768xf32>
    %154 = arith.mulf %152, %153 : vector<8x768xf32>
    %155 = arith.addf %150, %154 : vector<8x768xf32>
    %c6_81 = arith.constant 6 : index
    %c8_82 = arith.constant 8 : index
    %c0_83 = arith.constant 0 : index
    %156 = vector.load %arg10[%c6_81, %c8_82, %c0_83] : memref<12x24x768xf32, #tpu.memory_space<vmem>>, vector<1x8x768xf32>
    %157 = vector.shape_cast %156 : vector<1x8x768xf32> to vector<8x768xf32>
    %158 = vector.broadcast %12 : vector<1x768xf32> to vector<8x768xf32>
    %159 = arith.mulf %157, %158 : vector<8x768xf32>
    %160 = arith.addf %155, %159 : vector<8x768xf32>
    %c6_84 = arith.constant 6 : index
    %c10_85 = arith.constant 10 : index
    %c0_86 = arith.constant 0 : index
    %161 = vector.load %arg10[%c6_84, %c10_85, %c0_86] : memref<12x24x768xf32, #tpu.memory_space<vmem>>, vector<1x8x768xf32>
    %162 = vector.shape_cast %161 : vector<1x8x768xf32> to vector<8x768xf32>
    %163 = vector.broadcast %13 : vector<1x768xf32> to vector<8x768xf32>
    %164 = arith.mulf %162, %163 : vector<8x768xf32>
    %165 = arith.addf %160, %164 : vector<8x768xf32>
    %166 = vector.broadcast %15 : vector<1x768xf32> to vector<8x768xf32>
    %167 = arith.addf %165, %166 : vector<8x768xf32>
    %cst_87 = arith.constant 0.000000e+00 : f32
    %168 = vector.broadcast %cst_87 : f32 to vector<8x768xf32>
    %169 = arith.maximumf %167, %168 : vector<8x768xf32>
    %170 = arith.truncf %169 : vector<8x768xf32> to vector<8x768xbf16>
    %c16 = arith.constant 16 : index
    %c0_88 = arith.constant 0 : index
    %171 = vector.load %arg11[%c16, %c0_88] : memref<64x768xbf16, #tpu.memory_space<vmem>>, vector<8x768xbf16>
    tpu.vector_store %arg11[%c16, %c0_88], %170 {strides = array<i32>} : memref<64x768xbf16, #tpu.memory_space<vmem>>, vector<8x768xbf16>,
    %cst_89 = arith.constant 0.000000e+00 : f32
    %172 = vector.broadcast %cst_89 : f32 to vector<8x768xf32>
    %c3_90 = arith.constant 3 : index
    %c6_91 = arith.constant 6 : index
    %c0_92 = arith.constant 0 : index
    %173 = vector.load %arg10[%c3_90, %c6_91, %c0_92] : memref<12x24x768xf32, #tpu.memory_space<vmem>>, vector<1x8x768xf32>
    %174 = vector.shape_cast %173 : vector<1x8x768xf32> to vector<8x768xf32>
    %175 = vector.broadcast %5 : vector<1x768xf32> to vector<8x768xf32>
    %176 = arith.mulf %174, %175 : vector<8x768xf32>
    %177 = arith.addf %172, %176 : vector<8x768xf32>
    %c3_93 = arith.constant 3 : index
    %c8_94 = arith.constant 8 : index
    %c0_95 = arith.constant 0 : index
    %178 = vector.load %arg10[%c3_93, %c8_94, %c0_95] : memref<12x24x768xf32, #tpu.memory_space<vmem>>, vector<1x8x768xf32>
    %179 = vector.shape_cast %178 : vector<1x8x768xf32> to vector<8x768xf32>
    %180 = vector.broadcast %6 : vector<1x768xf32> to vector<8x768xf32>
    %181 = arith.mulf %179, %180 : vector<8x768xf32>
    %182 = arith.addf %177, %181 : vector<8x768xf32>
    %c3_96 = arith.constant 3 : index
    %c10_97 = arith.constant 10 : index
    %c0_98 = arith.constant 0 : index
    %183 = vector.load %arg10[%c3_96, %c10_97, %c0_98] : memref<12x24x768xf32, #tpu.memory_space<vmem>>, vector<1x8x768xf32>
    %184 = vector.shape_cast %183 : vector<1x8x768xf32> to vector<8x768xf32>
    %185 = vector.broadcast %7 : vector<1x768xf32> to vector<8x768xf32>
    %186 = arith.mulf %184, %185 : vector<8x768xf32>
    %187 = arith.addf %182, %186 : vector<8x768xf32>
    %c5_99 = arith.constant 5 : index
    %c6_100 = arith.constant 6 : index
    %c0_101 = arith.constant 0 : index
    %188 = vector.load %arg10[%c5_99, %c6_100, %c0_101] : memref<12x24x768xf32, #tpu.memory_space<vmem>>, vector<1x8x768xf32>
    %189 = vector.shape_cast %188 : vector<1x8x768xf32> to vector<8x768xf32>
    %190 = vector.broadcast %8 : vector<1x768xf32> to vector<8x768xf32>
    %191 = arith.mulf %189, %190 : vector<8x768xf32>
    %192 = arith.addf %187, %191 : vector<8x768xf32>
    %c5_102 = arith.constant 5 : index
    %c8_103 = arith.constant 8 : index
    %c0_104 = arith.constant 0 : index
    %193 = vector.load %arg10[%c5_102, %c8_103, %c0_104] : memref<12x24x768xf32, #tpu.memory_space<vmem>>, vector<1x8x768xf32>
    %194 = vector.shape_cast %193 : vector<1x8x768xf32> to vector<8x768xf32>
    %195 = vector.broadcast %9 : vector<1x768xf32> to vector<8x768xf32>
    %196 = arith.mulf %194, %195 : vector<8x768xf32>
    %197 = arith.addf %192, %196 : vector<8x768xf32>
    %c5_105 = arith.constant 5 : index
    %c10_106 = arith.constant 10 : index
    %c0_107 = arith.constant 0 : index
    %198 = vector.load %arg10[%c5_105, %c10_106, %c0_107] : memref<12x24x768xf32, #tpu.memory_space<vmem>>, vector<1x8x768xf32>
    %199 = vector.shape_cast %198 : vector<1x8x768xf32> to vector<8x768xf32>
    %200 = vector.broadcast %10 : vector<1x768xf32> to vector<8x768xf32>
    %201 = arith.mulf %199, %200 : vector<8x768xf32>
    %202 = arith.addf %197, %201 : vector<8x768xf32>
    %c7 = arith.constant 7 : index
    %c6_108 = arith.constant 6 : index
    %c0_109 = arith.constant 0 : index
    %203 = vector.load %arg10[%c7, %c6_108, %c0_109] : memref<12x24x768xf32, #tpu.memory_space<vmem>>, vector<1x8x768xf32>
    %204 = vector.shape_cast %203 : vector<1x8x768xf32> to vector<8x768xf32>
    %205 = vector.broadcast %11 : vector<1x768xf32> to vector<8x768xf32>
    %206 = arith.mulf %204, %205 : vector<8x768xf32>
    %207 = arith.addf %202, %206 : vector<8x768xf32>
    %c7_110 = arith.constant 7 : index
    %c8_111 = arith.constant 8 : index
    %c0_112 = arith.constant 0 : index
    %208 = vector.load %arg10[%c7_110, %c8_111, %c0_112] : memref<12x24x768xf32, #tpu.memory_space<vmem>>, vector<1x8x768xf32>
    %209 = vector.shape_cast %208 : vector<1x8x768xf32> to vector<8x768xf32>
    %210 = vector.broadcast %12 : vector<1x768xf32> to vector<8x768xf32>
    %211 = arith.mulf %209, %210 : vector<8x768xf32>
    %212 = arith.addf %207, %211 : vector<8x768xf32>
    %c7_113 = arith.constant 7 : index
    %c10_114 = arith.constant 10 : index
    %c0_115 = arith.constant 0 : index
    %213 = vector.load %arg10[%c7_113, %c10_114, %c0_115] : memref<12x24x768xf32, #tpu.memory_space<vmem>>, vector<1x8x768xf32>
    %214 = vector.shape_cast %213 : vector<1x8x768xf32> to vector<8x768xf32>
    %215 = vector.broadcast %13 : vector<1x768xf32> to vector<8x768xf32>
    %216 = arith.mulf %214, %215 : vector<8x768xf32>
    %217 = arith.addf %212, %216 : vector<8x768xf32>
    %218 = vector.broadcast %15 : vector<1x768xf32> to vector<8x768xf32>
    %219 = arith.addf %217, %218 : vector<8x768xf32>
    %cst_116 = arith.constant 0.000000e+00 : f32
    %220 = vector.broadcast %cst_116 : f32 to vector<8x768xf32>
    %221 = arith.maximumf %219, %220 : vector<8x768xf32>
    %222 = arith.truncf %221 : vector<8x768xf32> to vector<8x768xbf16>
    %c24 = arith.constant 24 : index
    %c0_117 = arith.constant 0 : index
    %223 = vector.load %arg11[%c24, %c0_117] : memref<64x768xbf16, #tpu.memory_space<vmem>>, vector<8x768xbf16>
    tpu.vector_store %arg11[%c24, %c0_117], %222 {strides = array<i32>} : memref<64x768xbf16, #tpu.memory_space<vmem>>, vector<8x768xbf16>,
    %cst_118 = arith.constant 0.000000e+00 : f32
    %224 = vector.broadcast %cst_118 : f32 to vector<8x768xf32>
    %c4_119 = arith.constant 4 : index
    %c6_120 = arith.constant 6 : index
    %c0_121 = arith.constant 0 : index
    %225 = vector.load %arg10[%c4_119, %c6_120, %c0_121] : memref<12x24x768xf32, #tpu.memory_space<vmem>>, vector<1x8x768xf32>
    %226 = vector.shape_cast %225 : vector<1x8x768xf32> to vector<8x768xf32>
    %227 = vector.broadcast %5 : vector<1x768xf32> to vector<8x768xf32>
    %228 = arith.mulf %226, %227 : vector<8x768xf32>
    %229 = arith.addf %224, %228 : vector<8x768xf32>
    %c4_122 = arith.constant 4 : index
    %c8_123 = arith.constant 8 : index
    %c0_124 = arith.constant 0 : index
    %230 = vector.load %arg10[%c4_122, %c8_123, %c0_124] : memref<12x24x768xf32, #tpu.memory_space<vmem>>, vector<1x8x768xf32>
    %231 = vector.shape_cast %230 : vector<1x8x768xf32> to vector<8x768xf32>
    %232 = vector.broadcast %6 : vector<1x768xf32> to vector<8x768xf32>
    %233 = arith.mulf %231, %232 : vector<8x768xf32>
    %234 = arith.addf %229, %233 : vector<8x768xf32>
    %c4_125 = arith.constant 4 : index
    %c10_126 = arith.constant 10 : index
    %c0_127 = arith.constant 0 : index
    %235 = vector.load %arg10[%c4_125, %c10_126, %c0_127] : memref<12x24x768xf32, #tpu.memory_space<vmem>>, vector<1x8x768xf32>
    %236 = vector.shape_cast %235 : vector<1x8x768xf32> to vector<8x768xf32>
    %237 = vector.broadcast %7 : vector<1x768xf32> to vector<8x768xf32>
    %238 = arith.mulf %236, %237 : vector<8x768xf32>
    %239 = arith.addf %234, %238 : vector<8x768xf32>
    %c6_128 = arith.constant 6 : index
    %c6_129 = arith.constant 6 : index
    %c0_130 = arith.constant 0 : index
    %240 = vector.load %arg10[%c6_128, %c6_129, %c0_130] : memref<12x24x768xf32, #tpu.memory_space<vmem>>, vector<1x8x768xf32>
    %241 = vector.shape_cast %240 : vector<1x8x768xf32> to vector<8x768xf32>
    %242 = vector.broadcast %8 : vector<1x768xf32> to vector<8x768xf32>
    %243 = arith.mulf %241, %242 : vector<8x768xf32>
    %244 = arith.addf %239, %243 : vector<8x768xf32>
    %c6_131 = arith.constant 6 : index
    %c8_132 = arith.constant 8 : index
    %c0_133 = arith.constant 0 : index
    %245 = vector.load %arg10[%c6_131, %c8_132, %c0_133] : memref<12x24x768xf32, #tpu.memory_space<vmem>>, vector<1x8x768xf32>
    %246 = vector.shape_cast %245 : vector<1x8x768xf32> to vector<8x768xf32>
    %247 = vector.broadcast %9 : vector<1x768xf32> to vector<8x768xf32>
    %248 = arith.mulf %246, %247 : vector<8x768xf32>
    %249 = arith.addf %244, %248 : vector<8x768xf32>
    %c6_134 = arith.constant 6 : index
    %c10_135 = arith.constant 10 : index
    %c0_136 = arith.constant 0 : index
    %250 = vector.load %arg10[%c6_134, %c10_135, %c0_136] : memref<12x24x768xf32, #tpu.memory_space<vmem>>, vector<1x8x768xf32>
    %251 = vector.shape_cast %250 : vector<1x8x768xf32> to vector<8x768xf32>
    %252 = vector.broadcast %10 : vector<1x768xf32> to vector<8x768xf32>
    %253 = arith.mulf %251, %252 : vector<8x768xf32>
    %254 = arith.addf %249, %253 : vector<8x768xf32>
    %c8_137 = arith.constant 8 : index
    %c6_138 = arith.constant 6 : index
    %c0_139 = arith.constant 0 : index
    %255 = vector.load %arg10[%c8_137, %c6_138, %c0_139] : memref<12x24x768xf32, #tpu.memory_space<vmem>>, vector<1x8x768xf32>
    %256 = vector.shape_cast %255 : vector<1x8x768xf32> to vector<8x768xf32>
    %257 = vector.broadcast %11 : vector<1x768xf32> to vector<8x768xf32>
    %258 = arith.mulf %256, %257 : vector<8x768xf32>
    %259 = arith.addf %254, %258 : vector<8x768xf32>
    %c8_140 = arith.constant 8 : index
    %c8_141 = arith.constant 8 : index
    %c0_142 = arith.constant 0 : index
    %260 = vector.load %arg10[%c8_140, %c8_141, %c0_142] : memref<12x24x768xf32, #tpu.memory_space<vmem>>, vector<1x8x768xf32>
    %261 = vector.shape_cast %260 : vector<1x8x768xf32> to vector<8x768xf32>
    %262 = vector.broadcast %12 : vector<1x768xf32> to vector<8x768xf32>
    %263 = arith.mulf %261, %262 : vector<8x768xf32>
    %264 = arith.addf %259, %263 : vector<8x768xf32>
    %c8_143 = arith.constant 8 : index
    %c10_144 = arith.constant 10 : index
    %c0_145 = arith.constant 0 : index
    %265 = vector.load %arg10[%c8_143, %c10_144, %c0_145] : memref<12x24x768xf32, #tpu.memory_space<vmem>>, vector<1x8x768xf32>
    %266 = vector.shape_cast %265 : vector<1x8x768xf32> to vector<8x768xf32>
    %267 = vector.broadcast %13 : vector<1x768xf32> to vector<8x768xf32>
    %268 = arith.mulf %266, %267 : vector<8x768xf32>
    %269 = arith.addf %264, %268 : vector<8x768xf32>
    %270 = vector.broadcast %15 : vector<1x768xf32> to vector<8x768xf32>
    %271 = arith.addf %269, %270 : vector<8x768xf32>
    %cst_146 = arith.constant 0.000000e+00 : f32
    %272 = vector.broadcast %cst_146 : f32 to vector<8x768xf32>
    %273 = arith.maximumf %271, %272 : vector<8x768xf32>
    %274 = arith.truncf %273 : vector<8x768xf32> to vector<8x768xbf16>
    %c32 = arith.constant 32 : index
    %c0_147 = arith.constant 0 : index
    %275 = vector.load %arg11[%c32, %c0_147] : memref<64x768xbf16, #tpu.memory_space<vmem>>, vector<8x768xbf16>
    tpu.vector_store %arg11[%c32, %c0_147], %274 {strides = array<i32>} : memref<64x768xbf16, #tpu.memory_space<vmem>>, vector<8x768xbf16>,
    %cst_148 = arith.constant 0.000000e+00 : f32
    %276 = vector.broadcast %cst_148 : f32 to vector<8x768xf32>
    %c5_149 = arith.constant 5 : index
    %c6_150 = arith.constant 6 : index
    %c0_151 = arith.constant 0 : index
    %277 = vector.load %arg10[%c5_149, %c6_150, %c0_151] : memref<12x24x768xf32, #tpu.memory_space<vmem>>, vector<1x8x768xf32>
    %278 = vector.shape_cast %277 : vector<1x8x768xf32> to vector<8x768xf32>
    %279 = vector.broadcast %5 : vector<1x768xf32> to vector<8x768xf32>
    %280 = arith.mulf %278, %279 : vector<8x768xf32>
    %281 = arith.addf %276, %280 : vector<8x768xf32>
    %c5_152 = arith.constant 5 : index
    %c8_153 = arith.constant 8 : index
    %c0_154 = arith.constant 0 : index
    %282 = vector.load %arg10[%c5_152, %c8_153, %c0_154] : memref<12x24x768xf32, #tpu.memory_space<vmem>>, vector<1x8x768xf32>
    %283 = vector.shape_cast %282 : vector<1x8x768xf32> to vector<8x768xf32>
    %284 = vector.broadcast %6 : vector<1x768xf32> to vector<8x768xf32>
    %285 = arith.mulf %283, %284 : vector<8x768xf32>
    %286 = arith.addf %281, %285 : vector<8x768xf32>
    %c5_155 = arith.constant 5 : index
    %c10_156 = arith.constant 10 : index
    %c0_157 = arith.constant 0 : index
    %287 = vector.load %arg10[%c5_155, %c10_156, %c0_157] : memref<12x24x768xf32, #tpu.memory_space<vmem>>, vector<1x8x768xf32>
    %288 = vector.shape_cast %287 : vector<1x8x768xf32> to vector<8x768xf32>
    %289 = vector.broadcast %7 : vector<1x768xf32> to vector<8x768xf32>
    %290 = arith.mulf %288, %289 : vector<8x768xf32>
    %291 = arith.addf %286, %290 : vector<8x768xf32>
    %c7_158 = arith.constant 7 : index
    %c6_159 = arith.constant 6 : index
    %c0_160 = arith.constant 0 : index
    %292 = vector.load %arg10[%c7_158, %c6_159, %c0_160] : memref<12x24x768xf32, #tpu.memory_space<vmem>>, vector<1x8x768xf32>
    %293 = vector.shape_cast %292 : vector<1x8x768xf32> to vector<8x768xf32>
    %294 = vector.broadcast %8 : vector<1x768xf32> to vector<8x768xf32>
    %295 = arith.mulf %293, %294 : vector<8x768xf32>
    %296 = arith.addf %291, %295 : vector<8x768xf32>
    %c7_161 = arith.constant 7 : index
    %c8_162 = arith.constant 8 : index
    %c0_163 = arith.constant 0 : index
    %297 = vector.load %arg10[%c7_161, %c8_162, %c0_163] : memref<12x24x768xf32, #tpu.memory_space<vmem>>, vector<1x8x768xf32>
    %298 = vector.shape_cast %297 : vector<1x8x768xf32> to vector<8x768xf32>
    %299 = vector.broadcast %9 : vector<1x768xf32> to vector<8x768xf32>
    %300 = arith.mulf %298, %299 : vector<8x768xf32>
    %301 = arith.addf %296, %300 : vector<8x768xf32>
    %c7_164 = arith.constant 7 : index
    %c10_165 = arith.constant 10 : index
    %c0_166 = arith.constant 0 : index
    %302 = vector.load %arg10[%c7_164, %c10_165, %c0_166] : memref<12x24x768xf32, #tpu.memory_space<vmem>>, vector<1x8x768xf32>
    %303 = vector.shape_cast %302 : vector<1x8x768xf32> to vector<8x768xf32>
    %304 = vector.broadcast %10 : vector<1x768xf32> to vector<8x768xf32>
    %305 = arith.mulf %303, %304 : vector<8x768xf32>
    %306 = arith.addf %301, %305 : vector<8x768xf32>
    %c9 = arith.constant 9 : index
    %c6_167 = arith.constant 6 : index
    %c0_168 = arith.constant 0 : index
    %307 = vector.load %arg10[%c9, %c6_167, %c0_168] : memref<12x24x768xf32, #tpu.memory_space<vmem>>, vector<1x8x768xf32>
    %308 = vector.shape_cast %307 : vector<1x8x768xf32> to vector<8x768xf32>
    %309 = vector.broadcast %11 : vector<1x768xf32> to vector<8x768xf32>
    %310 = arith.mulf %308, %309 : vector<8x768xf32>
    %311 = arith.addf %306, %310 : vector<8x768xf32>
    %c9_169 = arith.constant 9 : index
    %c8_170 = arith.constant 8 : index
    %c0_171 = arith.constant 0 : index
    %312 = vector.load %arg10[%c9_169, %c8_170, %c0_171] : memref<12x24x768xf32, #tpu.memory_space<vmem>>, vector<1x8x768xf32>
    %313 = vector.shape_cast %312 : vector<1x8x768xf32> to vector<8x768xf32>
    %314 = vector.broadcast %12 : vector<1x768xf32> to vector<8x768xf32>
    %315 = arith.mulf %313, %314 : vector<8x768xf32>
    %316 = arith.addf %311, %315 : vector<8x768xf32>
    %c9_172 = arith.constant 9 : index
    %c10_173 = arith.constant 10 : index
    %c0_174 = arith.constant 0 : index
    %317 = vector.load %arg10[%c9_172, %c10_173, %c0_174] : memref<12x24x768xf32, #tpu.memory_space<vmem>>, vector<1x8x768xf32>
    %318 = vector.shape_cast %317 : vector<1x8x768xf32> to vector<8x768xf32>
    %319 = vector.broadcast %13 : vector<1x768xf32> to vector<8x768xf32>
    %320 = arith.mulf %318, %319 : vector<8x768xf32>
    %321 = arith.addf %316, %320 : vector<8x768xf32>
    %322 = vector.broadcast %15 : vector<1x768xf32> to vector<8x768xf32>
    %323 = arith.addf %321, %322 : vector<8x768xf32>
    %cst_175 = arith.constant 0.000000e+00 : f32
    %324 = vector.broadcast %cst_175 : f32 to vector<8x768xf32>
    %325 = arith.maximumf %323, %324 : vector<8x768xf32>
    %326 = arith.truncf %325 : vector<8x768xf32> to vector<8x768xbf16>
    %c40 = arith.constant 40 : index
    %c0_176 = arith.constant 0 : index
    %327 = vector.load %arg11[%c40, %c0_176] : memref<64x768xbf16, #tpu.memory_space<vmem>>, vector<8x768xbf16>
    tpu.vector_store %arg11[%c40, %c0_176], %326 {strides = array<i32>} : memref<64x768xbf16, #tpu.memory_space<vmem>>, vector<8x768xbf16>,
    %cst_177 = arith.constant 0.000000e+00 : f32
    %328 = vector.broadcast %cst_177 : f32 to vector<8x768xf32>
    %c6_178 = arith.constant 6 : index
    %c6_179 = arith.constant 6 : index
    %c0_180 = arith.constant 0 : index
    %329 = vector.load %arg10[%c6_178, %c6_179, %c0_180] : memref<12x24x768xf32, #tpu.memory_space<vmem>>, vector<1x8x768xf32>
    %330 = vector.shape_cast %329 : vector<1x8x768xf32> to vector<8x768xf32>
    %331 = vector.broadcast %5 : vector<1x768xf32> to vector<8x768xf32>
    %332 = arith.mulf %330, %331 : vector<8x768xf32>
    %333 = arith.addf %328, %332 : vector<8x768xf32>
    %c6_181 = arith.constant 6 : index
    %c8_182 = arith.constant 8 : index
    %c0_183 = arith.constant 0 : index
    %334 = vector.load %arg10[%c6_181, %c8_182, %c0_183] : memref<12x24x768xf32, #tpu.memory_space<vmem>>, vector<1x8x768xf32>
    %335 = vector.shape_cast %334 : vector<1x8x768xf32> to vector<8x768xf32>
    %336 = vector.broadcast %6 : vector<1x768xf32> to vector<8x768xf32>
    %337 = arith.mulf %335, %336 : vector<8x768xf32>
    %338 = arith.addf %333, %337 : vector<8x768xf32>
    %c6_184 = arith.constant 6 : index
    %c10_185 = arith.constant 10 : index
    %c0_186 = arith.constant 0 : index
    %339 = vector.load %arg10[%c6_184, %c10_185, %c0_186] : memref<12x24x768xf32, #tpu.memory_space<vmem>>, vector<1x8x768xf32>
    %340 = vector.shape_cast %339 : vector<1x8x768xf32> to vector<8x768xf32>
    %341 = vector.broadcast %7 : vector<1x768xf32> to vector<8x768xf32>
    %342 = arith.mulf %340, %341 : vector<8x768xf32>
    %343 = arith.addf %338, %342 : vector<8x768xf32>
    %c8_187 = arith.constant 8 : index
    %c6_188 = arith.constant 6 : index
    %c0_189 = arith.constant 0 : index
    %344 = vector.load %arg10[%c8_187, %c6_188, %c0_189] : memref<12x24x768xf32, #tpu.memory_space<vmem>>, vector<1x8x768xf32>
    %345 = vector.shape_cast %344 : vector<1x8x768xf32> to vector<8x768xf32>
    %346 = vector.broadcast %8 : vector<1x768xf32> to vector<8x768xf32>
    %347 = arith.mulf %345, %346 : vector<8x768xf32>
    %348 = arith.addf %343, %347 : vector<8x768xf32>
    %c8_190 = arith.constant 8 : index
    %c8_191 = arith.constant 8 : index
    %c0_192 = arith.constant 0 : index
    %349 = vector.load %arg10[%c8_190, %c8_191, %c0_192] : memref<12x24x768xf32, #tpu.memory_space<vmem>>, vector<1x8x768xf32>
    %350 = vector.shape_cast %349 : vector<1x8x768xf32> to vector<8x768xf32>
    %351 = vector.broadcast %9 : vector<1x768xf32> to vector<8x768xf32>
    %352 = arith.mulf %350, %351 : vector<8x768xf32>
    %353 = arith.addf %348, %352 : vector<8x768xf32>
    %c8_193 = arith.constant 8 : index
    %c10_194 = arith.constant 10 : index
    %c0_195 = arith.constant 0 : index
    %354 = vector.load %arg10[%c8_193, %c10_194, %c0_195] : memref<12x24x768xf32, #tpu.memory_space<vmem>>, vector<1x8x768xf32>
    %355 = vector.shape_cast %354 : vector<1x8x768xf32> to vector<8x768xf32>
    %356 = vector.broadcast %10 : vector<1x768xf32> to vector<8x768xf32>
    %357 = arith.mulf %355, %356 : vector<8x768xf32>
    %358 = arith.addf %353, %357 : vector<8x768xf32>
    %c10_196 = arith.constant 10 : index
    %c6_197 = arith.constant 6 : index
    %c0_198 = arith.constant 0 : index
    %359 = vector.load %arg10[%c10_196, %c6_197, %c0_198] : memref<12x24x768xf32, #tpu.memory_space<vmem>>, vector<1x8x768xf32>
    %360 = vector.shape_cast %359 : vector<1x8x768xf32> to vector<8x768xf32>
    %361 = vector.broadcast %11 : vector<1x768xf32> to vector<8x768xf32>
    %362 = arith.mulf %360, %361 : vector<8x768xf32>
    %363 = arith.addf %358, %362 : vector<8x768xf32>
    %c10_199 = arith.constant 10 : index
    %c8_200 = arith.constant 8 : index
    %c0_201 = arith.constant 0 : index
    %364 = vector.load %arg10[%c10_199, %c8_200, %c0_201] : memref<12x24x768xf32, #tpu.memory_space<vmem>>, vector<1x8x768xf32>
    %365 = vector.shape_cast %364 : vector<1x8x768xf32> to vector<8x768xf32>
    %366 = vector.broadcast %12 : vector<1x768xf32> to vector<8x768xf32>
    %367 = arith.mulf %365, %366 : vector<8x768xf32>
    %368 = arith.addf %363, %367 : vector<8x768xf32>
    %c10_202 = arith.constant 10 : index
    %c10_203 = arith.constant 10 : index
    %c0_204 = arith.constant 0 : index
    %369 = vector.load %arg10[%c10_202, %c10_203, %c0_204] : memref<12x24x768xf32, #tpu.memory_space<vmem>>, vector<1x8x768xf32>
    %370 = vector.shape_cast %369 : vector<1x8x768xf32> to vector<8x768xf32>
    %371 = vector.broadcast %13 : vector<1x768xf32> to vector<8x768xf32>
    %372 = arith.mulf %370, %371 : vector<8x768xf32>
    %373 = arith.addf %368, %372 : vector<8x768xf32>
    %374 = vector.broadcast %15 : vector<1x768xf32> to vector<8x768xf32>
    %375 = arith.addf %373, %374 : vector<8x768xf32>
    %cst_205 = arith.constant 0.000000e+00 : f32
    %376 = vector.broadcast %cst_205 : f32 to vector<8x768xf32>
    %377 = arith.maximumf %375, %376 : vector<8x768xf32>
    %378 = arith.truncf %377 : vector<8x768xf32> to vector<8x768xbf16>
    %c48 = arith.constant 48 : index
    %c0_206 = arith.constant 0 : index
    %379 = vector.load %arg11[%c48, %c0_206] : memref<64x768xbf16, #tpu.memory_space<vmem>>, vector<8x768xbf16>
    tpu.vector_store %arg11[%c48, %c0_206], %378 {strides = array<i32>} : memref<64x768xbf16, #tpu.memory_space<vmem>>, vector<8x768xbf16>,
    %cst_207 = arith.constant 0.000000e+00 : f32
    %380 = vector.broadcast %cst_207 : f32 to vector<8x768xf32>
    %c7_208 = arith.constant 7 : index
    %c6_209 = arith.constant 6 : index
    %c0_210 = arith.constant 0 : index
    %381 = vector.load %arg10[%c7_208, %c6_209, %c0_210] : memref<12x24x768xf32, #tpu.memory_space<vmem>>, vector<1x8x768xf32>
    %382 = vector.shape_cast %381 : vector<1x8x768xf32> to vector<8x768xf32>
    %383 = vector.broadcast %5 : vector<1x768xf32> to vector<8x768xf32>
    %384 = arith.mulf %382, %383 : vector<8x768xf32>
    %385 = arith.addf %380, %384 : vector<8x768xf32>
    %c7_211 = arith.constant 7 : index
    %c8_212 = arith.constant 8 : index
    %c0_213 = arith.constant 0 : index
    %386 = vector.load %arg10[%c7_211, %c8_212, %c0_213] : memref<12x24x768xf32, #tpu.memory_space<vmem>>, vector<1x8x768xf32>
    %387 = vector.shape_cast %386 : vector<1x8x768xf32> to vector<8x768xf32>
    %388 = vector.broadcast %6 : vector<1x768xf32> to vector<8x768xf32>
    %389 = arith.mulf %387, %388 : vector<8x768xf32>
    %390 = arith.addf %385, %389 : vector<8x768xf32>
    %c7_214 = arith.constant 7 : index
    %c10_215 = arith.constant 10 : index
    %c0_216 = arith.constant 0 : index
    %391 = vector.load %arg10[%c7_214, %c10_215, %c0_216] : memref<12x24x768xf32, #tpu.memory_space<vmem>>, vector<1x8x768xf32>
    %392 = vector.shape_cast %391 : vector<1x8x768xf32> to vector<8x768xf32>
    %393 = vector.broadcast %7 : vector<1x768xf32> to vector<8x768xf32>
    %394 = arith.mulf %392, %393 : vector<8x768xf32>
    %395 = arith.addf %390, %394 : vector<8x768xf32>
    %c9_217 = arith.constant 9 : index
    %c6_218 = arith.constant 6 : index
    %c0_219 = arith.constant 0 : index
    %396 = vector.load %arg10[%c9_217, %c6_218, %c0_219] : memref<12x24x768xf32, #tpu.memory_space<vmem>>, vector<1x8x768xf32>
    %397 = vector.shape_cast %396 : vector<1x8x768xf32> to vector<8x768xf32>
    %398 = vector.broadcast %8 : vector<1x768xf32> to vector<8x768xf32>
    %399 = arith.mulf %397, %398 : vector<8x768xf32>
    %400 = arith.addf %395, %399 : vector<8x768xf32>
    %c9_220 = arith.constant 9 : index
    %c8_221 = arith.constant 8 : index
    %c0_222 = arith.constant 0 : index
    %401 = vector.load %arg10[%c9_220, %c8_221, %c0_222] : memref<12x24x768xf32, #tpu.memory_space<vmem>>, vector<1x8x768xf32>
    %402 = vector.shape_cast %401 : vector<1x8x768xf32> to vector<8x768xf32>
    %403 = vector.broadcast %9 : vector<1x768xf32> to vector<8x768xf32>
    %404 = arith.mulf %402, %403 : vector<8x768xf32>
    %405 = arith.addf %400, %404 : vector<8x768xf32>
    %c9_223 = arith.constant 9 : index
    %c10_224 = arith.constant 10 : index
    %c0_225 = arith.constant 0 : index
    %406 = vector.load %arg10[%c9_223, %c10_224, %c0_225] : memref<12x24x768xf32, #tpu.memory_space<vmem>>, vector<1x8x768xf32>
    %407 = vector.shape_cast %406 : vector<1x8x768xf32> to vector<8x768xf32>
    %408 = vector.broadcast %10 : vector<1x768xf32> to vector<8x768xf32>
    %409 = arith.mulf %407, %408 : vector<8x768xf32>
    %410 = arith.addf %405, %409 : vector<8x768xf32>
    %c11 = arith.constant 11 : index
    %c6_226 = arith.constant 6 : index
    %c0_227 = arith.constant 0 : index
    %411 = vector.load %arg10[%c11, %c6_226, %c0_227] : memref<12x24x768xf32, #tpu.memory_space<vmem>>, vector<1x8x768xf32>
    %412 = vector.shape_cast %411 : vector<1x8x768xf32> to vector<8x768xf32>
    %413 = vector.broadcast %11 : vector<1x768xf32> to vector<8x768xf32>
    %414 = arith.mulf %412, %413 : vector<8x768xf32>
    %415 = arith.addf %410, %414 : vector<8x768xf32>
    %c11_228 = arith.constant 11 : index
    %c8_229 = arith.constant 8 : index
    %c0_230 = arith.constant 0 : index
    %416 = vector.load %arg10[%c11_228, %c8_229, %c0_230] : memref<12x24x768xf32, #tpu.memory_space<vmem>>, vector<1x8x768xf32>
    %417 = vector.shape_cast %416 : vector<1x8x768xf32> to vector<8x768xf32>
    %418 = vector.broadcast %12 : vector<1x768xf32> to vector<8x768xf32>
    %419 = arith.mulf %417, %418 : vector<8x768xf32>
    %420 = arith.addf %415, %419 : vector<8x768xf32>
    %c11_231 = arith.constant 11 : index
    %c10_232 = arith.constant 10 : index
    %c0_233 = arith.constant 0 : index
    %421 = vector.load %arg10[%c11_231, %c10_232, %c0_233] : memref<12x24x768xf32, #tpu.memory_space<vmem>>, vector<1x8x768xf32>
    %422 = vector.shape_cast %421 : vector<1x8x768xf32> to vector<8x768xf32>
    %423 = vector.broadcast %13 : vector<1x768xf32> to vector<8x768xf32>
    %424 = arith.mulf %422, %423 : vector<8x768xf32>
    %425 = arith.addf %420, %424 : vector<8x768xf32>
    %426 = vector.broadcast %15 : vector<1x768xf32> to vector<8x768xf32>
    %427 = arith.addf %425, %426 : vector<8x768xf32>
    %cst_234 = arith.constant 0.000000e+00 : f32
    %428 = vector.broadcast %cst_234 : f32 to vector<8x768xf32>
    %429 = arith.maximumf %427, %428 : vector<8x768xf32>
    %430 = arith.truncf %429 : vector<8x768xf32> to vector<8x768xbf16>
    %c56 = arith.constant 56 : index
    %c0_235 = arith.constant 0 : index
    %431 = vector.load %arg11[%c56, %c0_235] : memref<64x768xbf16, #tpu.memory_space<vmem>>, vector<8x768xbf16>
    tpu.vector_store %arg11[%c56, %c0_235], %430 {strides = array<i32>} : memref<64x768xbf16, #tpu.memory_space<vmem>>, vector<8x768xbf16>,
    %c0_236 = arith.constant 0 : index
    %c0_237 = arith.constant 0 : index
    %432 = vector.load %arg11[%c0_236, %c0_237] : memref<64x768xbf16, #tpu.memory_space<vmem>>, vector<64x768xbf16>
    %c0_238 = arith.constant 0 : index
    %c0_239 = arith.constant 0 : index
    %c0_240 = arith.constant 0 : index
    %433 = vector.load %arg5[%c0_238, %c0_239, %c0_240] : memref<1x768x768xbf16, #tpu.memory_space<vmem>>, vector<1x768x768xbf16>
    %434 = vector.shape_cast %433 : vector<1x768x768xbf16> to vector<768x768xbf16>
    %cst_241 = arith.constant dense<0.000000e+00> : vector<64x768xf32>
    %435 = tpu.matmul %432, %434, %cst_241 {dimension_numbers = #tpu.dot_dimension_numbers<[1], [0], [0], [1], [0, 0, 1, 1], [], []>} : vector<64x768xbf16>, vector<768x768xbf16>, vector<64x768xf32> -> vector<64x768xf32>
    %c0_242 = arith.constant 0 : index
    %c0_243 = arith.constant 0 : index
    %c0_244 = arith.constant 0 : index
    %436 = vector.load %arg6[%c0_242, %c0_243, %c0_244] : memref<1x1x768xf32, #tpu.memory_space<vmem>>, vector<1x1x768xf32>
    %437 = vector.shape_cast %436 : vector<1x1x768xf32> to vector<1x768xf32>
    %438 = vector.broadcast %437 : vector<1x768xf32> to vector<64x768xf32>
    %439 = arith.addf %435, %438 : vector<64x768xf32>
    %cst_245 = arith.constant 0.000000e+00 : f32
    %440 = vector.broadcast %cst_245 : f32 to vector<64x768xf32>
    %441 = arith.maximumf %439, %440 : vector<64x768xf32>
    %c0_246 = arith.constant 0 : index
    %c0_247 = arith.constant 0 : index
    %c0_248 = arith.constant 0 : index
    %442 = vector.load %arg7[%c0_246, %c0_247, %c0_248] : memref<1x1x768xf32, #tpu.memory_space<vmem>>, vector<1x1x768xf32>
    %443 = vector.shape_cast %442 : vector<1x1x768xf32> to vector<1x768xf32>
    %444 = vector.broadcast %443 : vector<1x768xf32> to vector<64x768xf32>
    %445 = arith.mulf %441, %444 : vector<64x768xf32>
    %c0_249 = arith.constant 0 : index
    %c0_250 = arith.constant 0 : index
    %c0_251 = arith.constant 0 : index
    %446 = vector.load %arg8[%c0_249, %c0_250, %c0_251] : memref<1x1x768xf32, #tpu.memory_space<vmem>>, vector<1x1x768xf32>
    %447 = vector.shape_cast %446 : vector<1x1x768xf32> to vector<1x768xf32>
    %448 = vector.broadcast %447 : vector<1x768xf32> to vector<64x768xf32>
    %449 = arith.addf %445, %448 : vector<64x768xf32>
    %cst_252 = arith.constant 0.000000e+00 : f32
    %450 = vector.broadcast %cst_252 : f32 to vector<64x768xf32>
    %451 = arith.maximumf %449, %450 : vector<64x768xf32>
    %452 = vector.shape_cast %451 : vector<64x768xf32> to vector<8x8x768xf32>
    %c2_i32 = arith.constant 2 : i32
    %453 = arith.cmpi slt, %arg1, %c2_i32 : i32
    %454 = arith.extui %453 : i1 to i32
    %c0_i32_253 = arith.constant 0 : i32
    %455 = arith.cmpi ne, %454, %c0_i32_253 : i32
    scf.if %455 {
      %c2_256 = arith.constant 2 : index
      %c8_257 = arith.constant 8 : index
      %c0_258 = arith.constant 0 : index
      %459 = vector.load %arg10[%c2_256, %c8_257, %c0_258] : memref<12x24x768xf32, #tpu.memory_space<vmem>>, vector<8x8x768xf32>
      tpu.vector_store %arg10[%c2_256, %c8_257, %c0_258], %452 {strides = array<i32>} : memref<12x24x768xf32, #tpu.memory_space<vmem>>, vector<8x8x768xf32>,
    } else {
    }
    %c2_i32_254 = arith.constant 2 : i32
    %456 = arith.cmpi eq, %arg1, %c2_i32_254 : i32
    %457 = arith.extui %456 : i1 to i32
    %c0_i32_255 = arith.constant 0 : i32
    %458 = arith.cmpi ne, %457, %c0_i32_255 : i32
    scf.if %458 {
      %c0_256 = arith.constant 0 : index
      %c0_257 = arith.constant 0 : index
      %c0_258 = arith.constant 0 : index
      %c0_259 = arith.constant 0 : index
      %459 = vector.load %arg2[%c0_256, %c0_257, %c0_258, %c0_259] : memref<1x8x8x768xf32, #tpu.memory_space<vmem>>, vector<1x8x8x768xf32>
      %460 = vector.shape_cast %459 : vector<1x8x8x768xf32> to vector<8x8x768xf32>
      %461 = arith.addf %460, %452 : vector<8x8x768xf32>
      %c0_260 = arith.constant 0 : index
      %c0_261 = arith.constant 0 : index
      %c0_262 = arith.constant 0 : index
      %c0_263 = arith.constant 0 : index
      %462 = vector.load %arg9[%c0_260, %c0_261, %c0_262, %c0_263] : memref<1x8x8x768xf32, #tpu.memory_space<vmem>>, vector<1x8x8x768xf32>
      %463 = vector.shape_cast %462 : vector<1x8x8x768xf32> to vector<8x8x768xf32>
      %464 = vector.shape_cast %461 : vector<8x8x768xf32> to vector<1x8x8x768xf32>
      tpu.vector_store %arg9[%c0_260, %c0_261, %c0_262, %c0_263], %464 {strides = array<i32>} : memref<1x8x8x768xf32, #tpu.memory_space<vmem>>, vector<1x8x8x768xf32>,
    } else {
    }
    return
  }
  func.func @transform_0(%arg0: i32, %arg1: i32) -> (i32, i32, i32, i32) {
    %c0_i32 = arith.constant 0 : i32
    %c0_i32_0 = arith.constant 0 : i32
    %c0_i32_1 = arith.constant 0 : i32
    %c0_i32_2 = arith.constant 0 : i32
    return %arg0, %c0_i32, %c0_i32_0, %c0_i32_1 : i32, i32, i32, i32
  }
  func.func @transform_1(%arg0: i32, %arg1: i32) -> (i32, i32, i32) {
    %c0_i32 = arith.constant 0 : i32
    %c0_i32_0 = arith.constant 0 : i32
    %c0_i32_1 = arith.constant 0 : i32
    return %arg1, %c0_i32, %c0_i32_0 : i32, i32, i32
  }
  func.func @transform_2(%arg0: i32, %arg1: i32) -> (i32, i32, i32) {
    %c0_i32 = arith.constant 0 : i32
    %c0_i32_0 = arith.constant 0 : i32
    %c0_i32_1 = arith.constant 0 : i32
    return %arg1, %c0_i32, %c0_i32_0 : i32, i32, i32
  }
  func.func @transform_3(%arg0: i32, %arg1: i32) -> (i32, i32, i32) {
    %c0_i32 = arith.constant 0 : i32
    %c0_i32_0 = arith.constant 0 : i32
    %c0_i32_1 = arith.constant 0 : i32
    return %arg1, %c0_i32, %c0_i32_0 : i32, i32, i32
  }
  func.func @transform_4(%arg0: i32, %arg1: i32) -> (i32, i32, i32) {
    %c0_i32 = arith.constant 0 : i32
    %c0_i32_0 = arith.constant 0 : i32
    %c0_i32_1 = arith.constant 0 : i32
    return %arg1, %c0_i32, %c0_i32_0 : i32, i32, i32
  }
  func.func @transform_5(%arg0: i32, %arg1: i32) -> (i32, i32, i32) {
    %c0_i32 = arith.constant 0 : i32
    %c0_i32_0 = arith.constant 0 : i32
    %c0_i32_1 = arith.constant 0 : i32
    return %arg1, %c0_i32, %c0_i32_0 : i32, i32, i32
  }
  func.func @transform_6(%arg0: i32, %arg1: i32) -> (i32, i32, i32) {
    %c0_i32 = arith.constant 0 : i32
    %c0_i32_0 = arith.constant 0 : i32
    %c0_i32_1 = arith.constant 0 : i32
    return %arg1, %c0_i32, %c0_i32_0 : i32, i32, i32
  }
  func.func @transform_7(%arg0: i32, %arg1: i32) -> (i32, i32, i32, i32) {
    %c0_i32 = arith.constant 0 : i32
    %c0_i32_0 = arith.constant 0 : i32
    %c0_i32_1 = arith.constant 0 : i32
    %c0_i32_2 = arith.constant 0 : i32
    return %arg0, %c0_i32, %c0_i32_0, %c0_i32_1 : i32, i32, i32, i32
  }
}

</mosaic_0001>

<bundles_post_ra>
// kernel: tpu_custom_call.1
= control target key start
LH: loop header
LB: loop body
LE: loop exit
PB: predicated region body
PF: predicated region fallthrough
CT: control target
= control target key end

     0   :  { %s13144_s0 = inlined_call_operand.hbm [shape: f32[2,8,8,768], index: 0, kind: input, shape index: {}]   ;;  %s13145_s1 = inlined_call_operand.vmem [shape: f32[3,9,768], index: 1, kind: input, shape index: {}]   ;;  %s13146_s2 = inlined_call_operand.hbm [shape: f32[3,1,768], index: 2, kind: input, shape index: {}]   ;;  %s13147_s3 = inlined_call_operand.hbm [shape: bf16[3,768,768], index: 3, kind: input, shape index: {}]   ;;  %s13148_s4 = inlined_call_operand.hbm [shape: f32[3,1,768], index: 4, kind: input, shape index: {}]   ;;  %s13149_s5 = inlined_call_operand.hbm [shape: f32[3,1,768], index: 5, kind: input, shape index: {}]   ;;  %s13150_s6 = inlined_call_operand.hbm [shape: f32[3,1,768], index: 6, kind: input, shape index: {}]   ;;  %s13151_s7 = inlined_call_operand.hbm [shape: f32[2,8,8,768], index: 7, kind: output, shape index: {}]  }
   0x1   :  { %13231 = sst [smem:[#allocation53_spill]] %s13144_s0 }
   0x2   :  { %13232 = sst [smem:[#allocation54_spill]] %s13145_s1 }
   0x3   :  { %13233 = sst [smem:[#allocation55_spill]] %s13146_s2 }
   0x4   :  { %13234 = sst [smem:[#allocation56_spill]] %s13148_s4 }
   0x5   :  { %13235 = sst [smem:[#allocation57_spill]] %s13150_s6 }
   0x6   :  { %13236 = sst [smem:[#allocation58_spill]] %s13151_s7 }
   0x7   :  { %12 = vsyncpa [#allocation5], 0 }
   0x8   :  { %14 = vsyncpa [#allocation5 + $0x1], 0 }
   0x9   :  { %15 = vsyncpa [#allocation8], 0 }
   0xa   :  { %17 = vsyncpa [#allocation8 + $0x1], 0 }
   0xb   :  { %18 = vsyncpa [#allocation11], 0 }
   0xc   :  { %20 = vsyncpa [#allocation11 + $0x1], 0 }
   0xd   :  { %21 = vsyncpa [#allocation14], 0 }
   0xe   :  { %23 = vsyncpa [#allocation14 + $0x1], 0 }
   0xf   :  { %24 = vsyncpa [#allocation6], 0 }
  0x10   :  { %26 = vsyncpa [#allocation6 + $0x1], 0  ;;  %s9887_s24 = smov 0   ;;  %s9889_s25 = smov 0  }
  0x11   :  { %s9891_s26 = smov 0   ;;  %s9893_s27 = smov 0  }
  0x12   :  { %s9895_s28 = smov 0   ;;  %s9897_s29 = smov 0  }
  0x13   :  { %s9899_s30 = smov 0   ;;  %s9901_s8 = smov 0  }
  0x14   :  { %s9903_s9 = smov 0   ;;  %s9905_s10 = smov 0  }
  0x15   :  { %s9907_s11 = smov 0  }
  0x16 LB: > { %13237 = sst [smem:[#allocation21_spill]] %s9795_s25  ;;  %s41_s12 = sadd.s32 1, %s9823_s9  ;;  %s9831_s11 = sphi %s9907_s11, %s32_s11   ;;  %s9827_s10 = sphi %s9905_s10, %s13462_s10   ;;  %s9823_s9 = sphi %s9903_s9, %s13466_s9   ;;  %s9819_s8 = sphi %s9901_s8, %s13460_s8   ;;  %s9815_s30 = sphi %s9899_s30, %s13465_s30   ;;  %s9811_s29 = sphi %s9897_s29, %s13459_s29   ;;  %s9807_s28 = sphi %s9895_s28, %s13464_s28   ;;  %s9803_s27 = sphi %s9893_s27, %s13463_s27   ;;  %s9799_s26 = sphi %s9891_s26, %s13457_s26   ;;  %s9795_s25 = sphi %s9889_s25, %s13456_s25   ;;  %s9791_s24 = sphi %s9887_s24, %s13455_s24  }
  0x17   : > { %13238 = sst [smem:[#allocation22_spill]] %s9799_s26  ;;  %p13156_p0 = scmp.eq.s32.totalorder %s9831_s11, 0 }
  0x18   : > { %13239 = sst [smem:[#allocation23_spill]] %s9811_s29  ;;  %p9944_p1 = scmp.ge.s32.totalorder %s41_s12, 3 }
  0x19   : > { %13240 = sst [smem:[#allocation24_spill]] %s9815_s30  ;;  %s103_s14 = sadd.s32 1, %s9799_s26 }
  0x1a   : > { %13241 = sst [smem:[#allocation25_spill]] %s9819_s8  ;;  %p110_p2 = scmp.ne.s32.totalorder %s9799_s26, %s9795_s25 }
  0x1b   : > { %13242 = sst [smem:[#allocation26_spill]] %s9827_s10  ;;  %s13468_s12 = smov (%p9944_p1, %s41_s12), 0 }
  0x1c   : > { %s13243_s13 = scalar_select %p9944_p1, 1, 0 }
  0x1d   : > { %13244 = sst [smem:[#allocation27_spill]] %s13468_s12  ;;  %p112_p4 = por %p110_p2, %p13156_p0 }
  0x1e   : > { %s100_s15 = ssub.s32 %s9823_s9, %s13468_s12  ;;  %p13155_p5 = scmp.lt.s32.totalorder %s9831_s11, 6 }
  0x1f   : > { %p101_p6 = scmp.eq.s32.totalorder %s100_s15, 0  ;;  %s9964_s17 = sand.u32 1, %s9799_s26  }
  0x20   : > { %s9970_s19 = smul.u32 6, %s9964_s17  ;;  %p9974_p7 = pnand %p13155_p5, %p112_p4 }
  0x21   : > { %s9967_s18 = scalar_select %p101_p6, %s9799_s26, %s103_s14  }
  0x22   : > { %s13246_s20 = scalar_select %p9974_p7, 1, 0 }
  0x23   : > { %13245 = sst [smem:[#allocation28_spill]] %s9967_s18  ;;  %s9979_s21 = smul.u32 96, %s9823_s9 }
  0x24   : > { %s13247_s2 = sld [smem:[#allocation55_spill]]  ;;  %s303_s14 = scalar_lea.vmem [#allocation7], %s9970_s19 }
  0x25   : > { %s311_s16 = sshll.u32 %s303_s14, 4  ;;  %s13248_s12 = sand.u32 1, %s9831_s11   ;;  %s9989_s16 = int_to_ptr.vmem [resolvable:$true] %s311_s16 }
  0x26   : > { %s9994_s18 = scalar_lea.sflag [#allocation8], %s13248_s12  ;;  %p10000_p11 = pneg %p9974_p7 }
  0x2a   : > { %s9986_s15 = scalar_lea.hbm %s13247_s2, %s9979_s21  ;;  %s9522_s14 = scalar_lea.hbm %s13247_s2, 288 }
  0x2b   : > { %s9517_s26 = scalar_lea.hbm %s9986_s15, 96  ;;  %p9523_p2 = scmp.lt.u32.totalorder %s9986_s15, %s13247_s2 }
  0x2c   : > { %p9518_p10 = scmp.ne.s32.totalorder %s9986_s15, %s9517_s26  ;;  %p9524_p4 = scmp.lt.u32.totalorder %s9522_s14, %s9517_s26 }
  0x2d   : > { %p9526_p5 = scmp.lt.u32.totalorder %s9517_s26, %s9986_s15 }
  0x2e   : > { %p9520_p12 = pnand %p10000_p11, %p9518_p10  ;;  %p9525_p6 = por %p9524_p4, %p9523_p2 }
  0x30   : > { %p9521_p13 = pneg %p9520_p12  ;;  %p9527_p3 = por %p9526_p5, %p9525_p6 }
  0x32   : > { %p9528_p0 = pnand %p9527_p3, %p9521_p13 }
  0x34   : > { %9531 = shalt.err (!%p9528_p0)
}
  0x35   : > { %s9532_s12 = scalar_lea.vmem %s9989_s16, 96  ;;  %s9833_s22 = smov [#allocation7]  }
  0x36   : > { %p9533_p10 = scmp.ne.s32.totalorder %s9989_s16, %s9532_s12  ;;  %s9537_s23 = sshll.u32 %s9833_s22, 4  ;;  %s9538_s23 = int_to_ptr.vmem [resolvable:$false] %s9537_s23 }
  0x37   : > { %s9539_s1 = scalar_lea.vmem %s9538_s23, 192  ;;  %p9540_p9 = scmp.lt.s32.totalorder %s9989_s16, %s9538_s23 }
  0x38   : > { %p9535_p12 = pnand %p9533_p10, %p10000_p11  ;;  %p9541_p1 = scmp.lt.s32.totalorder %s9539_s1, %s9532_s12 }
  0x3a   : > { %p9536_p8 = pneg %p9535_p12  ;;  %p9542_p2 = por %p9541_p1, %p9540_p9 }
  0x3c   : > { %p9543_p4 = pnand %p9542_p2, %p9536_p8 }
  0x3e   : > { %9546 = shalt.err (!%p9543_p4)
}
  0x3f   : > { %8922 = dma.hbm_to_vmem [thread:$0]  (!%p9974_p7), %s9986_s15, 96, %s9989_s16, %s9994_s18  }
  0x40   : > { %p13250_p0 = scmp.lt.s32.totalorder %s9831_s11, 7  ;;  %p13251_p3 = scmp.ge.s32.totalorder %s9831_s11, 1 }
  0x41   : > { %s13254_s4 = sld [smem:[#allocation56_spill]]  ;;  %s343_s22 = scalar_lea.vmem [#allocation10], %s9970_s19 }
  0x42   : > { %p10028_p5 = pnand %p13251_p3, %p13250_p0  ;;  %s351_s23 = sshll.u32 %s343_s22, 4  ;;  %s352_s23 = int_to_ptr.vmem [resolvable:$true] %s351_s23 }
  0x43   : > { %s13255_s1 = sand.u32 1, %s9831_s11  }
  0x44   : > { %s13252_s26 = scalar_select %p10028_p5, 1, 0 }
  0x45   : > { %s10041_s16 = scalar_lea.sflag [#allocation11], %s13255_s1 }
  0x46   : > { %13253 = sst [smem:[#allocation29_spill]] %s13252_s26 }
  0x47   : > { %s10036_s12 = scalar_lea.hbm %s13254_s4, %s9979_s21  ;;  %s9552_s8 = scalar_lea.hbm %s13254_s4, 288 }
  0x48   : > { %s9547_s15 = scalar_lea.hbm %s10036_s12, 96  ;;  %p9553_p13 = scmp.lt.u32.totalorder %s10036_s12, %s13254_s4 }
  0x49   : > { %p9548_p1 = scmp.ne.s32.totalorder %s10036_s12, %s9547_s15  ;;  %p9554_p6 = scmp.lt.u32.totalorder %s9552_s8, %s9547_s15 }
  0x4a   : > { %p9556_p12 = scmp.lt.u32.totalorder %s9547_s15, %s10036_s12 }
  0x4b   : > { %p9550_p8 = pnand %p9548_p1, %p10000_p11  ;;  %p9555_p10 = por %p9554_p6, %p9553_p13 }
  0x4d   : > { %p9551_p9 = pneg %p9550_p8  ;;  %p9557_p2 = por %p9556_p12, %p9555_p10 }
  0x4f   : > { %p9558_p4 = pnand %p9557_p2, %p9551_p9 }
  0x51   : > { %9561 = shalt.err (!%p9558_p4)
}
  0x52   : > { %s9562_s22 = scalar_lea.vmem %s352_s23, 96  ;;  %s9834_s1 = smov [#allocation10]  }
  0x53   : > { %p9563_p0 = scmp.ne.s32.totalorder %s352_s23, %s9562_s22  ;;  %s9567_s6 = sshll.u32 %s9834_s1, 4  ;;  %s9568_s6 = int_to_ptr.vmem [resolvable:$false] %s9567_s6 }
  0x54   : > { %s9569_s2 = scalar_lea.vmem %s9568_s6, 192  ;;  %p9570_p8 = scmp.lt.s32.totalorder %s352_s23, %s9568_s6 }
  0x55   : > { %p9565_p3 = pnand %p9563_p0, %p10000_p11  ;;  %p9571_p5 = scmp.lt.s32.totalorder %s9569_s2, %s9562_s22 }
  0x57   : > { %p9566_p1 = pneg %p9565_p3  ;;  %p9572_p7 = por %p9571_p5, %p9570_p8 }
  0x59   : > { %p9573_p6 = pnand %p9572_p7, %p9566_p1 }
  0x5b   : > { %9576 = shalt.err (!%p9573_p6)
}
  0x5c   : > { %p13256_p13 = scmp.ne.s32.totalorder %s13246_s20, 0  ;;  %s10062_s6 = sadd.s32 4294967295, %s9831_s11  }
  0x5d   : > { %13257 = sst [smem:[#allocation30_spill]] %s10062_s6  ;;  %s8398_s30 = sadd.s32 4294967294, %s9831_s11  }
  0x5e   : > { %8928 = dma.hbm_to_vmem [thread:$0]  (!%p13256_p13), %s10036_s12, 96, %s352_s23, %s10041_s16  }
  0x5f   : > { %s44_s26 = sadd.s32 1, %s9827_s10  ;;  %s51_s15 = sadd.s32 1, %s9811_s29 }
  0x60   : > { %p13258_p7 = scmp.ne.s32.totalorder %s13243_s13, 0  ;;  %p58_p5 = scmp.ne.s32.totalorder %s9811_s29, %s9807_s28 }
  0x61   : > { %p64_p9 = scmp.ne.s32.totalorder %s9807_s28, %s9803_s27  ;;  %p65_p12 = scmp.eq.s32.totalorder %s10062_s6, 0 }
  0x62   : > { %s13470_s26 = smov (!%p13258_p7, %s44_s26), %s9827_s10  ;;  %p13259_p2 = scmp.eq.s32.totalorder %s9831_s11, 0 }
  0x63   : > { %p46_p10 = scmp.ge.s32.totalorder %s13470_s26, 2  ;;  %p244_p0 = scmp.eq.s32.totalorder %s10062_s6, 5 }
  0x64   : > { %p10077_p4 = por %p13259_p2, %p58_p5  ;;  %p10087_p3 = por %p65_p12, %p64_p9 }
  0x65   : > { %s13472_s26 = smov (%p46_p10, %s13470_s26), 0  ;;  %p13263_p1 = scmp.ne.s32.totalorder %s9795_s25, %s9791_s24 }
  0x66   : > { %13261 = sst [smem:[#allocation31_spill]] %s13472_s26  ;;  %s48_s8 = ssub.s32 %s9827_s10, %s13472_s26 }
  0x67   : > { %s13262_s13 = scalar_select %p10087_p3, 1, 0 }
  0x68   : > { %p10094_p8 = por %p13263_p1, %p65_p12  ;;  %p10100_p6 = por %p244_p0, %p58_p5 }
  0x69   : > { %p49_p7 = scmp.eq.s32.totalorder %s48_s8, 0  ;;  %p250_p10 = scmp.eq.s32.totalorder %s8398_s30, 5 }
  0x6a   : > { %s13264_s23 = scalar_select %p10094_p8, 1, 0 }
  0x6b   : > { %s13265_s14 = scalar_select %p10100_p6, 1, 0 }
  0x6c   : > { %s270_s22 = sand.u32 1, %s9811_s29   ;;  %s8886_s1 = smul.u32 6144, %s9827_s10 }
  0x6d   : > { %s10107_s2 = scalar_select %p49_p7, %s9811_s29, %s51_s15  }
  0x6e   : > { %p10112_p2 = por %p250_p10, %p64_p9  ;;  %s8885_s24 = smul.u32 384, %s270_s22 }
  0x6f   : > { %13266 = sst [smem:[#allocation32_spill]] %s10107_s2  ;;  %s13268_s0 = sld [smem:[#allocation53_spill]] }
  0x70   : > { %s13267_s4 = scalar_select %p10112_p2, 1, 0 }
  0x71   : > { %p13269_p5 = scmp.lt.s32.totalorder %s9831_s11, 6  ;;  %s274_s15 = scalar_lea.vmem [#allocation4], %s8885_s24 }
  0x72   : > { %s281_s8 = sshll.u32 %s274_s15, 4  ;;  %s8889_s10 = smul.u32 2304, %s9964_s17  ;;  %s10129_s8 = int_to_ptr.vmem [resolvable:$true] %s281_s8 }
  0x73   : > { %p10125_p12 = pnand %p13269_p5, %p10077_p4  ;;  %s10132_s25 = scalar_lea.sflag [#allocation5], %s270_s22 }
  0x75   : > { %s10119_s26 = scalar_lea.hbm %s13268_s0, %s8886_s1  ;;  %p9579_p0 = pneg %p10125_p12 }
  0x76   : > { %s9577_s6 = scalar_lea.hbm %s10119_s26, 6144  ;;  %s9582_s2 = scalar_lea.hbm %s13268_s0, 12288 }
  0x77   : > { %p9578_p9 = scmp.ne.s32.totalorder %s10119_s26, %s9577_s6  ;;  %p9583_p7 = scmp.lt.u32.totalorder %s10119_s26, %s13268_s0 }
  0x78   : > { %p9584_p10 = scmp.lt.u32.totalorder %s9582_s2, %s9577_s6  ;;  %p9586_p2 = scmp.lt.u32.totalorder %s9577_s6, %s10119_s26 }
  0x79   : > { %p9580_p1 = pnand %p9579_p0, %p9578_p9 }
  0x7a   : > { %p9585_p5 = por %p9584_p10, %p9583_p7 }
  0x7b   : > { %p9581_p4 = pneg %p9580_p1 }
  0x7c   : > { %p9587_p6 = por %p9586_p2, %p9585_p5 }
  0x7e   : > { %p9588_p8 = pnand %p9587_p6, %p9581_p4 }
  0x80   : > { %9591 = shalt.err (!%p9588_p8)
}
  0x81   : > { %s9592_s22 = scalar_lea.vmem %s10129_s8, 6144  ;;  %s9835_s15 = smov [#allocation4]  }
  0x82   : > { %p9593_p9 = scmp.ne.s32.totalorder %s10129_s8, %s9592_s22  ;;  %s9597_s12 = sshll.u32 %s9835_s15, 4  ;;  %s9598_s12 = int_to_ptr.vmem [resolvable:$false] %s9597_s12 }
  0x83   : > { %s9599_s29 = scalar_lea.vmem %s9598_s12, 12288  ;;  %p9600_p13 = scmp.lt.s32.totalorder %s10129_s8, %s9598_s12 }
  0x84   : > { %p9595_p1 = pnand %p9593_p9, %p9579_p0  ;;  %p9601_p7 = scmp.lt.s32.totalorder %s9599_s29, %s9592_s22 }
  0x86   : > { %p9596_p3 = pneg %p9595_p1  ;;  %p9602_p10 = por %p9601_p7, %p9600_p13 }
  0x88   : > { %p9603_p2 = pnand %p9602_p10, %p9596_p3 }
  0x8a   : > { %9606 = shalt.err (!%p9603_p2)
}
  0x8b   : > { %s9836_s2 = smov 768   ;;  %s9837_s6 = smov 48  }
  0x8c   : > { %8919 = dma.hbm_to_vmem [thread:$0]  (!%p10125_p12), %s10119_s26, 6144, %s10129_s8, %s10132_s25, %s9836_s2, %s9836_s2, %s9837_s6  }
  0x8d   : > { %s8890_s1 = smul.u32 36864, %s9823_s9  ;;  %s322_s24 = scalar_lea.vmem [#allocation9], %s8889_s10 }
  0x8e   : > { %s329_s15 = sshll.u32 %s322_s24, 4  ;;  %s9612_s10 = scalar_lea.hbm %s13147_s3, 110592  ;;  %s10168_s15 = int_to_ptr.vmem [resolvable:$true] %s329_s15 }
  0x8f   : > { %s10166_s29 = scalar_lea.hbm %s13147_s3, %s8890_s1 }
  0x90   : > { %s9607_s0 = scalar_lea.hbm %s10166_s29, 36864  ;;  %p9613_p6 = scmp.lt.u32.totalorder %s10166_s29, %s13147_s3 }
  0x91   : > { %p9608_p13 = scmp.ne.s32.totalorder %s10166_s29, %s9607_s0  ;;  %p9614_p12 = scmp.lt.u32.totalorder %s9612_s10, %s9607_s0 }
  0x92   : > { %p9616_p4 = scmp.lt.u32.totalorder %s9607_s0, %s10166_s29 }
  0x93   : > { %p9610_p3 = pnand %p9608_p13, %p10000_p11  ;;  %p9615_p0 = por %p9614_p12, %p9613_p6 }
  0x95   : > { %p9611_p8 = pneg %p9610_p3  ;;  %p9617_p5 = por %p9616_p4, %p9615_p0 }
  0x97   : > { %p9618_p9 = pnand %p9617_p5, %p9611_p8 }
  0x99   : > { %9621 = shalt.err (!%p9618_p9)
}
  0x9a   : > { %s9622_s2 = scalar_lea.vmem %s10168_s15, 36864  ;;  %s9838_s6 = smov [#allocation9]  }
  0x9b   : > { %p9623_p1 = scmp.ne.s32.totalorder %s10168_s15, %s9622_s2  ;;  %s9627_s1 = sshll.u32 %s9838_s6, 4  ;;  %s9628_s1 = int_to_ptr.vmem [resolvable:$false] %s9627_s1 }
  0x9c   : > { %s9629_s24 = scalar_lea.vmem %s9628_s1, 73728  ;;  %p9630_p2 = scmp.lt.s32.totalorder %s10168_s15, %s9628_s1 }
  0x9d   : > { %p9625_p7 = pnand %p9623_p1, %p10000_p11  ;;  %p9631_p13 = scmp.lt.s32.totalorder %s9629_s24, %s9622_s2 }
  0x9f   : > { %p9626_p10 = pneg %p9625_p7  ;;  %p9632_p3 = por %p9631_p13, %p9630_p2 }
  0xa1   : > { %p9633_p6 = pnand %p9632_p3, %p9626_p10 }
  0xa3   : > { %9636 = shalt.err (!%p9633_p6)
}
  0xa4   : > { %s9839_s0 = smov 384   ;;  %s9840_s12 = smov 24  }
  0xa5   : > { %p13271_p8 = scmp.ne.s32.totalorder %s13246_s20, 0  ;;  %s10196_s30 = scalar_lea.hbm %s13149_s5, %s9979_s21 }
  0xa6   : > { %s362_s10 = scalar_lea.vmem [#allocation12], %s9970_s19  ;;  %s9637_s25 = scalar_lea.hbm %s10196_s30, 96 }
  0xa7   : > { %8925 = dma.hbm_to_vmem [thread:$0]  (!%p13271_p8), %s10166_s29, 36864, %s10168_s15, %s9994_s18, %s9839_s0, %s9839_s0, %s9840_s12  }
  0xa8   : > { %s370_s8 = sshll.u32 %s362_s10, 4  ;;  %p9638_p12 = scmp.ne.s32.totalorder %s10196_s30, %s9637_s25  ;;  %s371_s8 = int_to_ptr.vmem [resolvable:$true] %s370_s8 }
  0xa9   : > { %s9642_s18 = scalar_lea.hbm %s13149_s5, 288  ;;  %p9643_p5 = scmp.lt.u32.totalorder %s10196_s30, %s13149_s5 }
  0xaa   : > { %p9640_p0 = pnand %p9638_p12, %p10000_p11  ;;  %p9644_p9 = scmp.lt.u32.totalorder %s9642_s18, %s9637_s25 }
  0xab   : > { %p9646_p7 = scmp.lt.u32.totalorder %s9637_s25, %s10196_s30 }
  0xac   : > { %p9641_p4 = pneg %p9640_p0  ;;  %p9645_p1 = por %p9644_p9, %p9643_p5 }
  0xae   : > { %p9647_p10 = por %p9646_p7, %p9645_p1 }
  0xb0   : > { %p9648_p2 = pnand %p9647_p10, %p9641_p4 }
  0xb2   : > { %9651 = shalt.err (!%p9648_p2)
}
  0xb3   : > { %s9652_s1 = scalar_lea.vmem %s371_s8, 96  ;;  %s9841_s24 = smov [#allocation12]  }
  0xb4   : > { %p9653_p13 = scmp.ne.s32.totalorder %s371_s8, %s9652_s1  ;;  %s9657_s0 = sshll.u32 %s9841_s24, 4  ;;  %s9658_s0 = int_to_ptr.vmem [resolvable:$false] %s9657_s0 }
  0xb5   : > { %s9659_s12 = scalar_lea.vmem %s9658_s0, 192  ;;  %p9660_p12 = scmp.lt.s32.totalorder %s371_s8, %s9658_s0 }
  0xb6   : > { %p9655_p3 = pnand %p9653_p13, %p10000_p11  ;;  %p9661_p0 = scmp.lt.s32.totalorder %s9659_s12, %s9652_s1 }
  0xb8   : > { %p9656_p6 = pneg %p9655_p3  ;;  %p9662_p8 = por %p9661_p0, %p9660_p12 }
  0xba   : > { %p9663_p5 = pnand %p9662_p8, %p9656_p6 }
  0xbc   : > { %9666 = shalt.err (!%p9663_p5)
}
  0xbd   : > { %p13272_p9 = scmp.ne.s32.totalorder %s13246_s20, 0  ;;  %s13273_s10 = sld [smem:[#allocation57_spill]] }
  0xbe   : > { %s381_s6 = scalar_lea.vmem [#allocation13], %s9970_s19  ;;  %s378_s15 = scalar_lea.sflag [#allocation14], %s9964_s17 }
  0xbf   : > { %8931 = dma.hbm_to_vmem [thread:$0]  (!%p13272_p9), %s10196_s30, 96, %s371_s8, %s10041_s16  }
  0xc0   : > { %s389_s18 = sshll.u32 %s381_s6, 4  ;;  %s390_s18 = int_to_ptr.vmem [resolvable:$true] %s389_s18 }
  0xc3   : > { %s13274_s2 = smov %s13273_s10  ;;  %s10221_s25 = scalar_lea.hbm %s13273_s10, %s9979_s21 }
  0xc4   : > { %s9667_s29 = scalar_lea.hbm %s10221_s25, 96  ;;  %s9672_s30 = scalar_lea.hbm %s13274_s2, 288 }
  0xc5   : > { %p9668_p8 = scmp.ne.s32.totalorder %s10221_s25, %s9667_s29  ;;  %p9673_p7 = scmp.lt.u32.totalorder %s10221_s25, %s13274_s2 }
  0xc6   : > { %p9674_p10 = scmp.lt.u32.totalorder %s9672_s30, %s9667_s29  ;;  %p9676_p13 = scmp.lt.u32.totalorder %s9667_s29, %s10221_s25 }
  0xc7   : > { %p9670_p4 = pnand %p9668_p8, %p10000_p11 }
  0xc8   : > { %p9675_p2 = por %p9674_p10, %p9673_p7 }
  0xc9   : > { %p9671_p1 = pneg %p9670_p4 }
  0xca   : > { %p9677_p3 = por %p9676_p13, %p9675_p2 }
  0xcc   : > { %p9678_p6 = pnand %p9677_p3, %p9671_p1 }
  0xce   : > { %9681 = shalt.err (!%p9678_p6)
}
  0xcf   : > { %s9682_s17 = scalar_lea.vmem %s390_s18, 96  ;;  %s9842_s19 = smov [#allocation13]  }
  0xd0   : > { %p9683_p12 = scmp.ne.s32.totalorder %s390_s18, %s9682_s17  ;;  %s9687_s24 = sshll.u32 %s9842_s19, 4  ;;  %s9688_s24 = int_to_ptr.vmem [resolvable:$false] %s9687_s24 }
  0xd1   : > { %s9689_s0 = scalar_lea.vmem %s9688_s24, 192  ;;  %p9690_p8 = scmp.lt.s32.totalorder %s390_s18, %s9688_s24 }
  0xd2   : > { %p9685_p0 = pnand %p9683_p12, %p10000_p11  ;;  %p9691_p4 = scmp.lt.s32.totalorder %s9689_s0, %s9682_s17 }
  0xd4   : > { %p9686_p5 = pneg %p9685_p0  ;;  %p9692_p9 = por %p9691_p4, %p9690_p8 }
  0xd6   : > { %p9693_p7 = pnand %p9692_p9, %p9686_p5 }
  0xd8   : > { %9696 = shalt.err (!%p9693_p7)
}
  0xd9   : > { %p13275_p10 = scmp.ne.s32.totalorder %s13246_s20, 0  ;;  %s13276_s12 = sld [smem:[#allocation29_spill]] }
  0xdb   : > { %8934 = dma.hbm_to_vmem [thread:$0]  (!%p13275_p10), %s10221_s25, 96, %s390_s18, %s378_s15  }
  0xdf   : > { %p13277_p1 = scmp.ne.s32.totalorder %s13276_s12, 0 }
  0xe1   : > { %398 = sbr.rel (%p13277_p1) target bundleno = 1484 (0x5cc), region = 48 }
  0xe8   : > { %s10245_s7 = sand.u32 1, %s9807_s28   ;;  %p13278_p11 = scmp.ne.s32.totalorder %s13262_s13, 0 }
  0xe9   : > { %s8897_s22 = smul.u32 384, %s10245_s7  ;;  %s401_s26 = scalar_lea.sflag [#allocation5], %s10245_s7 }
  0xeb   : > { %s10249_s10 = scalar_lea.vmem [#allocation4], %s8897_s22 }
  0xec   : > { %9770 = dma.done.wait (%p13278_p11), %s401_s26, 6144  }
  0xed   : > { %9772 = vsyncadd (%p13278_p11), %s401_s26, 4294961152  ;;  %s13279_s20 = sld [smem:[#allocation30_spill]]  ;;  %s13280_s25 = sld [smem:[#allocation21_spill]] }
  0xee   : > { %p13281_p9 = scmp.ne.s32.totalorder %s13264_s23, 0 }
  0xf3   : > { %s409_s6 = sand.u32 1, %s13279_s20   ;;  %s411_s18 = sand.u32 1, %s13280_s25  }
  0xf4   : > { %s10257_s15 = smul.u32 6, %s411_s18  ;;  %s410_s29 = scalar_lea.sflag [#allocation8], %s409_s6 }
  0xf6   : > { %s10260_s1 = scalar_lea.vmem [#allocation7], %s10257_s15 }
  0xf7   : > { %9774 = dma.done.wait (%p13281_p9), %s410_s29, 36960  }
  0xf8   : > { %9776 = vsyncadd (%p13281_p9), %s410_s29, 4294930336  ;;  %s8899_s13 = smul.u32 2304, %s411_s18  ;;  %s428_s30 = scalar_lea.sflag [#allocation11], %s409_s6 }
  0xf9   : > { %s431_s8 = scalar_lea.vmem [#allocation10], %s10257_s15 }
  0xfa   : > { %s10266_s16 = scalar_lea.vmem [#allocation9], %s8899_s13 }
  0xfb   : > { %9778 = dma.done.wait (%p13281_p9), %s428_s30, 192  }
  0xfc   : > { %9780 = vsyncadd (%p13281_p9), %s428_s30, 4294967104  ;;  %s440_s21 = scalar_lea.vmem [#allocation12], %s10257_s15  ;;  %s446_s17 = scalar_lea.sflag [#allocation14], %s411_s18 }
  0xfd   : > { %s449_s19 = scalar_lea.vmem [#allocation13], %s10257_s15 }
  0xfe   : > { %9782 = dma.done.wait (%p13281_p9), %s446_s17, 96  }
  0xff   : > { %9784 = vsyncadd (%p13281_p9), %s446_s17, 4294967200  ;;  %s13282_s24 = sld [smem:[#allocation24_spill]]  ;;  %s13283_s25 = sld [smem:[#allocation54_spill]] }
 0x100   : > { %s10286_s29 = scalar_lea.vmem [#allocation15], %s8897_s22 }
 0x105   : > { %p510_p2 = scmp.lt.s32.totalorder %s13282_s24, 2  ;;  %p8409_p13 = scmp.ne.s32.totalorder %s13282_s24, 0 }
 0x106   : > { %v10290_v0 = vld [vmem:[%s10249_s10] sm:$0xff] (!%p8409_p13)  ;;  %v10293_v1 = vld [vmem:[%s10249_s10 + $0x8] sm:$0xff] (!%p8409_p13)  ;;  %v10296_v2 = vld [vmem:[%s10249_s10 + $0x10] sm:$0xff] (!%p8409_p13)  ;;  %v9843_v3 = vmov (!%p8409_p13), 0.0  }
 0x107   : > { %s511_s0 = scalar_select %p510_p2, %s13282_s24, 2 }
 0x108   : > { %518 = sbr.rel (%p8409_p13) target bundleno = 372 (0x174), region = 76  ;;  %519 = vst [vmem:[#allocation2] sm:$0xff] (!%p8409_p13), %v9843_v3  ;;  %520 = vst [vmem:[#allocation2 + $0x8] sm:$0xff] (!%p8409_p13), %v9843_v3  ;;  %v737_v4 = vmax.f32 (!%p8409_p13), %v10290_v0, 0.0  ;;  %v738_v5 = vmax.f32 (!%p8409_p13), %v10293_v1, 0.0  ;;  %v739_v6 = vmax.f32 (!%p8409_p13), %v10296_v2, 0.0 }
 0x109   : > { %s8900_s12 = smul.u32 96, %s511_s0  ;;  %521 = vst [vmem:[#allocation2 + $0x10] sm:$0xff] (!%p8409_p13), %v9843_v3  ;;  %522 = vst [vmem:[#allocation2 + $0x18] sm:$0xff] (!%p8409_p13), %v9843_v3  ;;  %v692_v7 = vld [vmem:[%s10249_s10 + $0x18] sm:$0xff] (!%p8409_p13)  ;;  %v693_v8 = vld [vmem:[%s10249_s10 + $0x20] sm:$0xff] (!%p8409_p13) }
 0x10a   : > { %523 = vst [vmem:[#allocation2 + $0x20] sm:$0xff] (!%p8409_p13), %v9843_v3  ;;  %524 = vst [vmem:[#allocation2 + $0x28] sm:$0xff] (!%p8409_p13), %v9843_v3  ;;  %v694_v9 = vld [vmem:[%s10249_s10 + $0x28] sm:$0xff] (!%p8409_p13)  ;;  %v740_v10 = vmax.f32 (!%p8409_p13), %v692_v7, 0.0  ;;  %v741_v11 = vmax.f32 (!%p8409_p13), %v693_v8, 0.0  ;;  %v695_v13 = vld [vmem:[%s10249_s10 + $0x30] sm:$0xff] (!%p8409_p13) }
 0x10b   : > { %s10284_s6 = scalar_lea.vmem %s13283_s25, %s8900_s12  ;;  %525 = vst [vmem:[#allocation2 + $0x30] sm:$0xff] (!%p8409_p13), %v9843_v3  ;;  %526 = vst [vmem:[#allocation2 + $0x38] sm:$0xff] (!%p8409_p13), %v9843_v3  ;;  %v742_v12 = vmax.f32 (!%p8409_p13), %v694_v9, 0.0  ;;  %v696_v14 = vld [vmem:[%s10249_s10 + $0x38] sm:$0xff] (!%p8409_p13)  ;;  %v697_v15 = vld [vmem:[%s10249_s10 + $0x40] sm:$0xff] (!%p8409_p13)  ;;  %v743_v16 = vmax.f32 (!%p8409_p13), %v695_v13, 0.0 }
 0x10c   : > { %527 = vst [vmem:[#allocation2 + $0x40] sm:$0xff] (!%p8409_p13), %v9843_v3  ;;  %528 = vst [vmem:[#allocation2 + $0x48] sm:$0xff] (!%p8409_p13), %v9843_v3  ;;  %v744_v17 = vmax.f32 (!%p8409_p13), %v696_v14, 0.0  ;;  %v745_v18 = vmax.f32 (!%p8409_p13), %v697_v15, 0.0  ;;  %v698_v19 = vld [vmem:[%s10249_s10 + $0x48] sm:$0xff] (!%p8409_p13)  ;;  %v699_v20 = vld [vmem:[%s10249_s10 + $0x50] sm:$0xff] (!%p8409_p13) }
 0x10d   : > { %529 = vst [vmem:[#allocation2 + $0x50] sm:$0xff] (!%p8409_p13), %v9843_v3  ;;  %530 = vst [vmem:[#allocation2 + $0x58] sm:$0xff] (!%p8409_p13), %v9843_v3  ;;  %v700_v21 = vld [vmem:[%s10249_s10 + $0x58] sm:$0xff] (!%p8409_p13)  ;;  %v746_v22 = vmax.f32 (!%p8409_p13), %v698_v19, 0.0  ;;  %v747_v23 = vmax.f32 (!%p8409_p13), %v699_v20, 0.0  ;;  %v701_v25 = vld [vmem:[%s10249_s10 + $0x60] sm:$0xff] (!%p8409_p13) }
 0x10e   : > { %531 = vst [vmem:[#allocation2 + $0x60] sm:$0xff] (!%p8409_p13), %v9843_v3  ;;  %532 = vst [vmem:[#allocation2 + $0x68] sm:$0xff] (!%p8409_p13), %v9843_v3  ;;  %v748_v24 = vmax.f32 (!%p8409_p13), %v700_v21, 0.0  ;;  %v702_v26 = vld [vmem:[%s10249_s10 + $0x68] sm:$0xff] (!%p8409_p13)  ;;  %v703_v27 = vld [vmem:[%s10249_s10 + $0x70] sm:$0xff] (!%p8409_p13)  ;;  %v749_v28 = vmax.f32 (!%p8409_p13), %v701_v25, 0.0 }
 0x10f   : > { %533 = vst [vmem:[#allocation2 + $0x70] sm:$0xff] %v9843_v3  ;;  %534 = vst [vmem:[#allocation2 + $0x78] sm:$0xff] %v9843_v3  ;;  %v750_v29 = vmax.f32 %v702_v26, 0.0  ;;  %v751_v30 = vmax.f32 %v703_v27, 0.0  ;;  %v704_v31 = vld [vmem:[%s10249_s10 + $0x78] sm:$0xff]  ;;  %v705_v32 = vld [vmem:[%s10249_s10 + $0x80] sm:$0xff] }
 0x110   : > { %535 = vst [vmem:[#allocation2 + $0x80] sm:$0xff] %v9843_v3  ;;  %536 = vst [vmem:[#allocation2 + $0x88] sm:$0xff] %v9843_v3  ;;  %v706_v33 = vld [vmem:[%s10249_s10 + $0x88] sm:$0xff]  ;;  %v752_v34 = vmax.f32 %v704_v31, 0.0  ;;  %v753_v35 = vmax.f32 %v705_v32, 0.0  ;;  %v707_v37 = vld [vmem:[%s10249_s10 + $0x90] sm:$0xff] }
 0x111   : > { %537 = vst [vmem:[#allocation2 + $0x90] sm:$0xff] %v9843_v3  ;;  %538 = vst [vmem:[#allocation2 + $0x98] sm:$0xff] %v9843_v3  ;;  %v754_v36 = vmax.f32 %v706_v33, 0.0  ;;  %v708_v38 = vld [vmem:[%s10249_s10 + $0x98] sm:$0xff]  ;;  %v709_v39 = vld [vmem:[%s10249_s10 + $0xa0] sm:$0xff]  ;;  %v755_v40 = vmax.f32 %v707_v37, 0.0 }
 0x112   : > { %539 = vst [vmem:[#allocation2 + $0xa0] sm:$0xff] %v9843_v3  ;;  %540 = vst [vmem:[#allocation2 + $0xa8] sm:$0xff] %v9843_v3  ;;  %v756_v41 = vmax.f32 %v708_v38, 0.0  ;;  %v757_v42 = vmax.f32 %v709_v39, 0.0  ;;  %v710_v43 = vld [vmem:[%s10249_s10 + $0xa8] sm:$0xff]  ;;  %v711_v44 = vld [vmem:[%s10249_s10 + $0xb0] sm:$0xff] }
 0x113   : > { %541 = vst [vmem:[#allocation2 + $0xb0] sm:$0xff] %v9843_v3  ;;  %542 = vst [vmem:[#allocation2 + $0xb8] sm:$0xff] %v9843_v3  ;;  %v712_v45 = vld [vmem:[%s10249_s10 + $0xb8] sm:$0xff]  ;;  %v758_v46 = vmax.f32 %v710_v43, 0.0  ;;  %v759_v47 = vmax.f32 %v711_v44, 0.0  ;;  %v713_v49 = vld [vmem:[%s10249_s10 + $0xc0] sm:$0xff] }
 0x114   : > { %543 = vst [vmem:[#allocation2 + $0xc0] sm:$0xff] %v9843_v3  ;;  %544 = vst [vmem:[#allocation2 + $0xc8] sm:$0xff] %v9843_v3  ;;  %v760_v48 = vmax.f32 %v712_v45, 0.0  ;;  %v714_v50 = vld [vmem:[%s10249_s10 + $0xc8] sm:$0xff]  ;;  %v715_v51 = vld [vmem:[%s10249_s10 + $0xd0] sm:$0xff]  ;;  %v761_v52 = vmax.f32 %v713_v49, 0.0 }
 0x115   : > { %545 = vst [vmem:[#allocation2 + $0xd0] sm:$0xff] %v9843_v3  ;;  %546 = vst [vmem:[#allocation2 + $0xd8] sm:$0xff] %v9843_v3  ;;  %v762_v53 = vmax.f32 %v714_v50, 0.0  ;;  %v763_v54 = vmax.f32 %v715_v51, 0.0  ;;  %v716_v55 = vld [vmem:[%s10249_s10 + $0xd8] sm:$0xff]  ;;  %v717_v56 = vld [vmem:[%s10249_s10 + $0xe0] sm:$0xff] }
 0x116   : > { %547 = vst [vmem:[#allocation2 + $0xe0] sm:$0xff] %v9843_v3  ;;  %548 = vst [vmem:[#allocation2 + $0xe8] sm:$0xff] %v9843_v3  ;;  %v718_v57 = vld [vmem:[%s10249_s10 + $0xe8] sm:$0xff]  ;;  %v764_v58 = vmax.f32 %v716_v55, 0.0  ;;  %v765_v59 = vmax.f32 %v717_v56, 0.0  ;;  %v719_v61 = vld [vmem:[%s10249_s10 + $0xf0] sm:$0xff] }
 0x117   : > { %549 = vst [vmem:[#allocation2 + $0xf0] sm:$0xff] %v9843_v3  ;;  %550 = vst [vmem:[#allocation2 + $0xf8] sm:$0xff] %v9843_v3  ;;  %v766_v60 = vmax.f32 %v718_v57, 0.0  ;;  %v720_v62 = vld [vmem:[%s10249_s10 + $0xf8] sm:$0xff]  ;;  %v721_v63 = vld [vmem:[%s10249_s10 + $0x100] sm:$0xff]  ;;  %v767_v0 = vmax.f32 %v719_v61, 0.0 }
 0x118   : > { %551 = vst [vmem:[#allocation2 + $0x100] sm:$0xff] %v9843_v3  ;;  %552 = vst [vmem:[#allocation2 + $0x108] sm:$0xff] %v9843_v3  ;;  %v768_v1 = vmax.f32 %v720_v62, 0.0  ;;  %v769_v2 = vmax.f32 %v721_v63, 0.0  ;;  %v725_v9 = vld [vmem:[%s10249_s10 + $0x120] sm:$0xff]  ;;  %v728_v15 = vld [vmem:[%s10249_s10 + $0x138] sm:$0xff] }
 0x119   : > { %553 = vst [vmem:[#allocation2 + $0x110] sm:$0xff] %v9843_v3  ;;  %554 = vst [vmem:[#allocation2 + $0x118] sm:$0xff] %v9843_v3  ;;  %v731_v21 = vld [vmem:[%s10249_s10 + $0x150] sm:$0xff]  ;;  %v734_v27 = vld [vmem:[%s10249_s10 + $0x168] sm:$0xff] }
 0x11a   : > { %556 = vst [vmem:[#allocation2 + $0x5a0] sm:$0xff] %v9843_v3  ;;  %557 = vst [vmem:[#allocation2 + $0x5a8] sm:$0xff] %v9843_v3 }
 0x11b   : > { %558 = vst [vmem:[#allocation2 + $0x5b0] sm:$0xff] %v9843_v3  ;;  %559 = vst [vmem:[#allocation2 + $0x5b8] sm:$0xff] %v9843_v3 }
 0x11c   : > { %560 = vst [vmem:[#allocation2 + $0x5c0] sm:$0xff] %v9843_v3  ;;  %561 = vst [vmem:[#allocation2 + $0x5c8] sm:$0xff] %v9843_v3 }
 0x11d   : > { %562 = vst [vmem:[#allocation2 + $0x5d0] sm:$0xff] %v9843_v3  ;;  %563 = vst [vmem:[#allocation2 + $0x5d8] sm:$0xff] %v9843_v3 }
 0x11e   : > { %564 = vst [vmem:[#allocation2 + $0x5e0] sm:$0xff] %v9843_v3  ;;  %565 = vst [vmem:[#allocation2 + $0x5e8] sm:$0xff] %v9843_v3 }
 0x11f   : > { %566 = vst [vmem:[#allocation2 + $0x5f0] sm:$0xff] %v9843_v3  ;;  %567 = vst [vmem:[#allocation2 + $0x5f8] sm:$0xff] %v9843_v3 }
 0x120   : > { %568 = vst [vmem:[#allocation2 + $0x600] sm:$0xff] %v9843_v3  ;;  %569 = vst [vmem:[#allocation2 + $0x608] sm:$0xff] %v9843_v3 }
 0x121   : > { %570 = vst [vmem:[#allocation2 + $0x610] sm:$0xff] %v9843_v3  ;;  %571 = vst [vmem:[#allocation2 + $0x618] sm:$0xff] %v9843_v3 }
 0x122   : > { %572 = vst [vmem:[#allocation2 + $0x620] sm:$0xff] %v9843_v3  ;;  %573 = vst [vmem:[#allocation2 + $0x628] sm:$0xff] %v9843_v3 }
 0x123   : > { %574 = vst [vmem:[#allocation2 + $0x630] sm:$0xff] %v9843_v3  ;;  %575 = vst [vmem:[#allocation2 + $0x638] sm:$0xff] %v9843_v3 }
 0x124   : > { %576 = vst [vmem:[#allocation2 + $0x640] sm:$0xff] %v9843_v3  ;;  %577 = vst [vmem:[#allocation2 + $0x648] sm:$0xff] %v9843_v3 }
 0x125   : > { %578 = vst [vmem:[#allocation2 + $0x650] sm:$0xff] %v9843_v3  ;;  %579 = vst [vmem:[#allocation2 + $0x658] sm:$0xff] %v9843_v3 }
 0x126   : > { %580 = vst [vmem:[#allocation2 + $0x660] sm:$0xff] %v9843_v3  ;;  %581 = vst [vmem:[#allocation2 + $0x668] sm:$0xff] %v9843_v3 }
 0x127   : > { %582 = vst [vmem:[#allocation2 + $0x670] sm:$0xff] %v9843_v3  ;;  %583 = vst [vmem:[#allocation2 + $0x678] sm:$0xff] %v9843_v3 }
 0x128   : > { %584 = vst [vmem:[#allocation2 + $0x680] sm:$0xff] %v9843_v3  ;;  %585 = vst [vmem:[#allocation2 + $0x688] sm:$0xff] %v9843_v3 }
 0x129   : > { %586 = vst [vmem:[#allocation2 + $0x690] sm:$0xff] %v9843_v3  ;;  %587 = vst [vmem:[#allocation2 + $0x698] sm:$0xff] %v9843_v3 }
 0x12a   : > { %588 = vst [vmem:[#allocation2 + $0x6a0] sm:$0xff] %v9843_v3  ;;  %589 = vst [vmem:[#allocation2 + $0x6a8] sm:$0xff] %v9843_v3 }
 0x12b   : > { %590 = vst [vmem:[#allocation2 + $0x6b0] sm:$0xff] %v9843_v3  ;;  %591 = vst [vmem:[#allocation2 + $0x6b8] sm:$0xff] %v9843_v3 }
 0x12c   : > { %593 = vst [vmem:[#allocation2 + $0x120] sm:$0xc0] %v9843_v3  ;;  %594 = vst [vmem:[#allocation2 + $0x128] sm:$0xc0] %v9843_v3 }
 0x12d   : > { %595 = vst [vmem:[#allocation2 + $0x130] sm:$0xc0] %v9843_v3  ;;  %596 = vst [vmem:[#allocation2 + $0x138] sm:$0xc0] %v9843_v3 }
 0x12e   : > { %597 = vst [vmem:[#allocation2 + $0x140] sm:$0xc0] %v9843_v3  ;;  %598 = vst [vmem:[#allocation2 + $0x148] sm:$0xc0] %v9843_v3 }
 0x12f   : > { %599 = vst [vmem:[#allocation2 + $0x1b0] sm:$0xc0] %v9843_v3  ;;  %600 = vst [vmem:[#allocation2 + $0x1b8] sm:$0xc0] %v9843_v3 }
 0x130   : > { %601 = vst [vmem:[#allocation2 + $0x1c0] sm:$0xc0] %v9843_v3  ;;  %602 = vst [vmem:[#allocation2 + $0x1c8] sm:$0xc0] %v9843_v3 }
 0x131   : > { %603 = vst [vmem:[#allocation2 + $0x1d0] sm:$0xc0] %v9843_v3  ;;  %604 = vst [vmem:[#allocation2 + $0x1d8] sm:$0xc0] %v9843_v3 }
 0x132   : > { %605 = vst [vmem:[#allocation2 + $0x240] sm:$0xc0] %v9843_v3  ;;  %606 = vst [vmem:[#allocation2 + $0x248] sm:$0xc0] %v9843_v3 }
 0x133   : > { %607 = vst [vmem:[#allocation2 + $0x250] sm:$0xc0] %v9843_v3  ;;  %608 = vst [vmem:[#allocation2 + $0x258] sm:$0xc0] %v9843_v3 }
 0x134   : > { %609 = vst [vmem:[#allocation2 + $0x260] sm:$0xc0] %v9843_v3  ;;  %610 = vst [vmem:[#allocation2 + $0x268] sm:$0xc0] %v9843_v3 }
 0x135   : > { %611 = vst [vmem:[#allocation2 + $0x2d0] sm:$0xc0] %v9843_v3  ;;  %612 = vst [vmem:[#allocation2 + $0x2d8] sm:$0xc0] %v9843_v3 }
 0x136   : > { %613 = vst [vmem:[#allocation2 + $0x2e0] sm:$0xc0] %v9843_v3  ;;  %614 = vst [vmem:[#allocation2 + $0x2e8] sm:$0xc0] %v9843_v3 }
 0x137   : > { %615 = vst [vmem:[#allocation2 + $0x2f0] sm:$0xc0] %v9843_v3  ;;  %616 = vst [vmem:[#allocation2 + $0x2f8] sm:$0xc0] %v9843_v3 }
 0x138   : > { %617 = vst [vmem:[#allocation2 + $0x360] sm:$0xc0] %v9843_v3  ;;  %618 = vst [vmem:[#allocation2 + $0x368] sm:$0xc0] %v9843_v3 }
 0x139   : > { %619 = vst [vmem:[#allocation2 + $0x370] sm:$0xc0] %v9843_v3  ;;  %620 = vst [vmem:[#allocation2 + $0x378] sm:$0xc0] %v9843_v3 }
 0x13a   : > { %621 = vst [vmem:[#allocation2 + $0x380] sm:$0xc0] %v9843_v3  ;;  %622 = vst [vmem:[#allocation2 + $0x388] sm:$0xc0] %v9843_v3 }
 0x13b   : > { %623 = vst [vmem:[#allocation2 + $0x3f0] sm:$0xc0] %v9843_v3  ;;  %624 = vst [vmem:[#allocation2 + $0x3f8] sm:$0xc0] %v9843_v3 }
 0x13c   : > { %625 = vst [vmem:[#allocation2 + $0x400] sm:$0xc0] %v9843_v3  ;;  %626 = vst [vmem:[#allocation2 + $0x408] sm:$0xc0] %v9843_v3 }
 0x13d   : > { %627 = vst [vmem:[#allocation2 + $0x410] sm:$0xc0] %v9843_v3  ;;  %628 = vst [vmem:[#allocation2 + $0x418] sm:$0xc0] %v9843_v3 }
 0x13e   : > { %629 = vst [vmem:[#allocation2 + $0x480] sm:$0xc0] %v9843_v3  ;;  %630 = vst [vmem:[#allocation2 + $0x488] sm:$0xc0] %v9843_v3 }
 0x13f   : > { %631 = vst [vmem:[#allocation2 + $0x490] sm:$0xc0] %v9843_v3  ;;  %632 = vst [vmem:[#allocation2 + $0x498] sm:$0xc0] %v9843_v3 }
 0x140   : > { %633 = vst [vmem:[#allocation2 + $0x4a0] sm:$0xc0] %v9843_v3  ;;  %634 = vst [vmem:[#allocation2 + $0x4a8] sm:$0xc0] %v9843_v3 }
 0x141   : > { %635 = vst [vmem:[#allocation2 + $0x510] sm:$0xc0] %v9843_v3  ;;  %636 = vst [vmem:[#allocation2 + $0x518] sm:$0xc0] %v9843_v3 }
 0x142   : > { %637 = vst [vmem:[#allocation2 + $0x520] sm:$0xc0] %v9843_v3  ;;  %638 = vst [vmem:[#allocation2 + $0x528] sm:$0xc0] %v9843_v3 }
 0x143   : > { %639 = vst [vmem:[#allocation2 + $0x530] sm:$0xc0] %v9843_v3  ;;  %640 = vst [vmem:[#allocation2 + $0x538] sm:$0xc0] %v9843_v3 }
 0x144   : > { %641 = vst [vmem:[#allocation2 + $0x180] sm:$0x3] %v9843_v3  ;;  %642 = vst [vmem:[#allocation2 + $0x188] sm:$0x3] %v9843_v3 }
 0x145   : > { %643 = vst [vmem:[#allocation2 + $0x190] sm:$0x3] %v9843_v3  ;;  %644 = vst [vmem:[#allocation2 + $0x198] sm:$0x3] %v9843_v3 }
 0x146   : > { %645 = vst [vmem:[#allocation2 + $0x1a0] sm:$0x3] %v9843_v3  ;;  %646 = vst [vmem:[#allocation2 + $0x1a8] sm:$0x3] %v9843_v3 }
 0x147   : > { %647 = vst [vmem:[#allocation2 + $0x210] sm:$0x3] %v9843_v3  ;;  %648 = vst [vmem:[#allocation2 + $0x218] sm:$0x3] %v9843_v3 }
 0x148   : > { %649 = vst [vmem:[#allocation2 + $0x220] sm:$0x3] %v9843_v3  ;;  %650 = vst [vmem:[#allocation2 + $0x228] sm:$0x3] %v9843_v3 }
 0x149   : > { %651 = vst [vmem:[#allocation2 + $0x230] sm:$0x3] %v9843_v3  ;;  %652 = vst [vmem:[#allocation2 + $0x238] sm:$0x3] %v9843_v3 }
 0x14a   : > { %653 = vst [vmem:[#allocation2 + $0x2a0] sm:$0x3] %v9843_v3  ;;  %654 = vst [vmem:[#allocation2 + $0x2a8] sm:$0x3] %v9843_v3 }
 0x14b   : > { %655 = vst [vmem:[#allocation2 + $0x2b0] sm:$0x3] %v9843_v3  ;;  %656 = vst [vmem:[#allocation2 + $0x2b8] sm:$0x3] %v9843_v3 }
 0x14c   : > { %657 = vst [vmem:[#allocation2 + $0x2c0] sm:$0x3] %v9843_v3  ;;  %658 = vst [vmem:[#allocation2 + $0x2c8] sm:$0x3] %v9843_v3 }
 0x14d   : > { %659 = vst [vmem:[#allocation2 + $0x330] sm:$0x3] %v9843_v3  ;;  %660 = vst [vmem:[#allocation2 + $0x338] sm:$0x3] %v9843_v3 }
 0x14e   : > { %661 = vst [vmem:[#allocation2 + $0x340] sm:$0x3] %v9843_v3  ;;  %662 = vst [vmem:[#allocation2 + $0x348] sm:$0x3] %v9843_v3 }
 0x14f   : > { %663 = vst [vmem:[#allocation2 + $0x350] sm:$0x3] %v9843_v3  ;;  %664 = vst [vmem:[#allocation2 + $0x358] sm:$0x3] %v9843_v3 }
 0x150   : > { %665 = vst [vmem:[#allocation2 + $0x3c0] sm:$0x3] %v9843_v3  ;;  %666 = vst [vmem:[#allocation2 + $0x3c8] sm:$0x3] %v9843_v3 }
 0x151   : > { %667 = vst [vmem:[#allocation2 + $0x3d0] sm:$0x3] %v9843_v3  ;;  %668 = vst [vmem:[#allocation2 + $0x3d8] sm:$0x3] %v9843_v3 }
 0x152   : > { %669 = vst [vmem:[#allocation2 + $0x3e0] sm:$0x3] %v9843_v3  ;;  %670 = vst [vmem:[#allocation2 + $0x3e8] sm:$0x3] %v9843_v3 }
 0x153   : > { %671 = vst [vmem:[#allocation2 + $0x450] sm:$0x3] %v9843_v3  ;;  %672 = vst [vmem:[#allocation2 + $0x458] sm:$0x3] %v9843_v3 }
 0x154   : > { %673 = vst [vmem:[#allocation2 + $0x460] sm:$0x3] %v9843_v3  ;;  %674 = vst [vmem:[#allocation2 + $0x468] sm:$0x3] %v9843_v3 }
 0x155   : > { %675 = vst [vmem:[#allocation2 + $0x470] sm:$0x3] %v9843_v3  ;;  %676 = vst [vmem:[#allocation2 + $0x478] sm:$0x3] %v9843_v3 }
 0x156   : > { %677 = vst [vmem:[#allocation2 + $0x4e0] sm:$0x3] %v9843_v3  ;;  %678 = vst [vmem:[#allocation2 + $0x4e8] sm:$0x3] %v9843_v3 }
 0x157   : > { %679 = vst [vmem:[#allocation2 + $0x4f0] sm:$0x3] %v9843_v3  ;;  %680 = vst [vmem:[#allocation2 + $0x4f8] sm:$0x3] %v9843_v3 }
 0x158   : > { %681 = vst [vmem:[#allocation2 + $0x500] sm:$0x3] %v9843_v3  ;;  %682 = vst [vmem:[#allocation2 + $0x508] sm:$0x3] %v9843_v3 }
 0x159   : > { %683 = vst [vmem:[#allocation2 + $0x570] sm:$0x3] %v9843_v3  ;;  %684 = vst [vmem:[#allocation2 + $0x578] sm:$0x3] %v9843_v3 }
 0x15a   : > { %685 = vst [vmem:[#allocation2 + $0x580] sm:$0x3] %v9843_v3  ;;  %686 = vst [vmem:[#allocation2 + $0x588] sm:$0x3] %v9843_v3 }
 0x15b   : > { %687 = vst [vmem:[#allocation2 + $0x590] sm:$0x3] %v9843_v3  ;;  %688 = vst [vmem:[#allocation2 + $0x598] sm:$0x3] %v9843_v3  ;;  %v722_v3 = vld [vmem:[%s10249_s10 + $0x108] sm:$0xff] }
 0x15c   : > { %785 = vst [vmem:[#allocation2 + $0x150] sm:$0xff] %v737_v4  ;;  %786 = vst [vmem:[#allocation2 + $0x158] sm:$0xff] %v738_v5  ;;  %v723_v4 = vld [vmem:[%s10249_s10 + $0x110] sm:$0xff]  ;;  %v724_v5 = vld [vmem:[%s10249_s10 + $0x118] sm:$0xff] }
 0x15d   : > { %787 = vst [vmem:[#allocation2 + $0x160] sm:$0xff] %v739_v6  ;;  %788 = vst [vmem:[#allocation2 + $0x168] sm:$0xff] %v740_v10  ;;  %v770_v6 = vmax.f32 %v722_v3, 0.0  ;;  %v771_v7 = vmax.f32 %v723_v4, 0.0  ;;  %v772_v8 = vmax.f32 %v724_v5, 0.0  ;;  %v726_v10 = vld [vmem:[%s10249_s10 + $0x128] sm:$0xff] }
 0x15e   : > { %789 = vst [vmem:[#allocation2 + $0x170] sm:$0xff] %v741_v11  ;;  %790 = vst [vmem:[#allocation2 + $0x178] sm:$0xff] %v742_v12  ;;  %v727_v11 = vld [vmem:[%s10249_s10 + $0x130] sm:$0xff]  ;;  %v773_v12 = vmax.f32 %v725_v9, 0.0  ;;  %v774_v13 = vmax.f32 %v726_v10, 0.0 }
 0x15f   : > { %791 = vst [vmem:[#allocation2 + $0x1e0] sm:$0xff] %v743_v16  ;;  %792 = vst [vmem:[#allocation2 + $0x1e8] sm:$0xff] %v744_v17  ;;  %v775_v14 = vmax.f32 %v727_v11, 0.0  ;;  %v729_v16 = vld [vmem:[%s10249_s10 + $0x140] sm:$0xff]  ;;  %v730_v17 = vld [vmem:[%s10249_s10 + $0x148] sm:$0xff] }
 0x160   : > { %793 = vst [vmem:[#allocation2 + $0x1f0] sm:$0xff] %v745_v18  ;;  %794 = vst [vmem:[#allocation2 + $0x1f8] sm:$0xff] %v746_v22  ;;  %v776_v18 = vmax.f32 %v728_v15, 0.0  ;;  %v777_v19 = vmax.f32 %v729_v16, 0.0  ;;  %v778_v20 = vmax.f32 %v730_v17, 0.0  ;;  %v732_v22 = vld [vmem:[%s10249_s10 + $0x158] sm:$0xff] }
 0x161   : > { %795 = vst [vmem:[#allocation2 + $0x200] sm:$0xff] %v747_v23  ;;  %796 = vst [vmem:[#allocation2 + $0x208] sm:$0xff] %v748_v24  ;;  %v733_v23 = vld [vmem:[%s10249_s10 + $0x160] sm:$0xff]  ;;  %v779_v24 = vmax.f32 %v731_v21, 0.0  ;;  %v780_v25 = vmax.f32 %v732_v22, 0.0 }
 0x162   : > { %797 = vst [vmem:[#allocation2 + $0x270] sm:$0xff] %v749_v28  ;;  %798 = vst [vmem:[#allocation2 + $0x278] sm:$0xff] %v750_v29  ;;  %v781_v26 = vmax.f32 %v733_v23, 0.0  ;;  %v735_v28 = vld [vmem:[%s10249_s10 + $0x170] sm:$0xff]  ;;  %v736_v29 = vld [vmem:[%s10249_s10 + $0x178] sm:$0xff] }
 0x163   : > { %799 = vst [vmem:[#allocation2 + $0x280] sm:$0xff] %v751_v30  ;;  %800 = vst [vmem:[#allocation2 + $0x288] sm:$0xff] %v752_v34  ;;  %v782_v30 = vmax.f32 %v734_v27, 0.0  ;;  %v783_v31 = vmax.f32 %v735_v28, 0.0  ;;  %v784_v32 = vmax.f32 %v736_v29, 0.0 }
 0x164   : > { %801 = vst [vmem:[#allocation2 + $0x290] sm:$0xff] %v753_v35  ;;  %802 = vst [vmem:[#allocation2 + $0x298] sm:$0xff] %v754_v36 }
 0x165   : > { %803 = vst [vmem:[#allocation2 + $0x300] sm:$0xff] %v755_v40  ;;  %804 = vst [vmem:[#allocation2 + $0x308] sm:$0xff] %v756_v41 }
 0x166   : > { %805 = vst [vmem:[#allocation2 + $0x310] sm:$0xff] %v757_v42  ;;  %806 = vst [vmem:[#allocation2 + $0x318] sm:$0xff] %v758_v46 }
 0x167   : > { %807 = vst [vmem:[#allocation2 + $0x320] sm:$0xff] %v759_v47  ;;  %808 = vst [vmem:[#allocation2 + $0x328] sm:$0xff] %v760_v48 }
 0x168   : > { %809 = vst [vmem:[#allocation2 + $0x390] sm:$0xff] %v761_v52  ;;  %810 = vst [vmem:[#allocation2 + $0x398] sm:$0xff] %v762_v53 }
 0x169   : > { %811 = vst [vmem:[#allocation2 + $0x3a0] sm:$0xff] %v763_v54  ;;  %812 = vst [vmem:[#allocation2 + $0x3a8] sm:$0xff] %v764_v58 }
 0x16a   : > { %813 = vst [vmem:[#allocation2 + $0x3b0] sm:$0xff] %v765_v59  ;;  %814 = vst [vmem:[#allocation2 + $0x3b8] sm:$0xff] %v766_v60 }
 0x16b   : > { %815 = vst [vmem:[#allocation2 + $0x420] sm:$0xff] %v767_v0  ;;  %816 = vst [vmem:[#allocation2 + $0x428] sm:$0xff] %v768_v1 }
 0x16c   : > { %817 = vst [vmem:[#allocation2 + $0x430] sm:$0xff] %v769_v2  ;;  %818 = vst [vmem:[#allocation2 + $0x438] sm:$0xff] %v770_v6 }
 0x16d   : > { %819 = vst [vmem:[#allocation2 + $0x440] sm:$0xff] %v771_v7  ;;  %820 = vst [vmem:[#allocation2 + $0x448] sm:$0xff] %v772_v8 }
 0x16e   : > { %821 = vst [vmem:[#allocation2 + $0x4b0] sm:$0xff] %v773_v12  ;;  %822 = vst [vmem:[#allocation2 + $0x4b8] sm:$0xff] %v774_v13 }
 0x16f   : > { %823 = vst [vmem:[#allocation2 + $0x4c0] sm:$0xff] %v775_v14  ;;  %824 = vst [vmem:[#allocation2 + $0x4c8] sm:$0xff] %v776_v18 }
 0x170   : > { %825 = vst [vmem:[#allocation2 + $0x4d0] sm:$0xff] %v777_v19  ;;  %826 = vst [vmem:[#allocation2 + $0x4d8] sm:$0xff] %v778_v20 }
 0x171   : > { %827 = vst [vmem:[#allocation2 + $0x540] sm:$0xff] %v779_v24  ;;  %828 = vst [vmem:[#allocation2 + $0x548] sm:$0xff] %v780_v25 }
 0x172   : > { %829 = vst [vmem:[#allocation2 + $0x550] sm:$0xff] %v781_v26  ;;  %830 = vst [vmem:[#allocation2 + $0x558] sm:$0xff] %v782_v30 }
 0x173   : > { %831 = vst [vmem:[#allocation2 + $0x560] sm:$0xff] %v783_v31  ;;  %832 = vst [vmem:[#allocation2 + $0x568] sm:$0xff] %v784_v32 }
 0x174 PF: > { %v9036_v33 = vld [vmem:[%s10266_s16 + $0x4] ss:$24 sps:$4 sm:$0xff]   ;;  %v9040_v35 = vld [vmem:[%s10266_s16] ss:$24 sps:$4 sm:$0xff]   ;;  %v9042_v37 = vld [vmem:[%s10266_s16 + $0x34] ss:$24 sps:$4 sm:$0xff]   ;;  %v858_v3 = vlaneseq }
 0x175   : > { %v9038_v34 = vld [vmem:[%s10266_s16 + $0x304] ss:$24 sps:$4 sm:$0xff]   ;;  %7065 = vmatprep.subr.bf16.mxu1 %v9036_v33  ;;  %v9041_v36 = vld [vmem:[%s10266_s16 + $0x300] ss:$24 sps:$4 sm:$0xff]   ;;  %v9044_v38 = vld [vmem:[%s10266_s16 + $0x334] ss:$24 sps:$4 sm:$0xff]  }
 0x176   : > { %7138 = vmatprep.subr.bf16.mxu0 %v9038_v34  ;;  %7066 = vmatpush1.bf16.msra.mxu1 %v9040_v35  ;;  %v9046_v39 = vld [vmem:[%s10266_s16 + $0x30] ss:$24 sps:$4 sm:$0xff]   ;;  %v9048_v41 = vld [vmem:[%s10266_s16 + $0x64] ss:$24 sps:$4 sm:$0xff]   ;;  %v9052_v43 = vld [vmem:[%s10266_s16 + $0x60] ss:$24 sps:$4 sm:$0xff]  }
 0x177   : > { %7139 = vmatpush1.bf16.msra.mxu0 %v9041_v36  ;;  %7067 = vmatprep.subr.bf16.mxu1 %v9042_v37  ;;  %v9047_v40 = vld [vmem:[%s10266_s16 + $0x330] ss:$24 sps:$4 sm:$0xff]   ;;  %v9050_v42 = vld [vmem:[%s10266_s16 + $0x364] ss:$24 sps:$4 sm:$0xff]   ;;  %v9053_v44 = vld [vmem:[%s10266_s16 + $0x360] ss:$24 sps:$4 sm:$0xff]  }
 0x178   : > { %7140 = vmatprep.subr.bf16.mxu0 %v9044_v38  ;;  %v9054_v45 = vld [vmem:[%s10266_s16 + $0x94] ss:$24 sps:$4 sm:$0xff]   ;;  %v9058_v47 = vld [vmem:[%s10266_s16 + $0x90] ss:$24 sps:$4 sm:$0xff]   ;;  %v9060_v49 = vld [vmem:[%s10266_s16 + $0xc4] ss:$24 sps:$4 sm:$0xff]  }
 0x179   : > { %v9056_v46 = vld [vmem:[%s10266_s16 + $0x394] ss:$24 sps:$4 sm:$0xff]   ;;  %v9059_v48 = vld [vmem:[%s10266_s16 + $0x390] ss:$24 sps:$4 sm:$0xff]   ;;  %v9062_v50 = vld [vmem:[%s10266_s16 + $0x3c4] ss:$24 sps:$4 sm:$0xff]  }
 0x17a   : > { %7068 = vmatpush1.bf16.msra.mxu1 %v9046_v39  ;;  %v9064_v51 = vld [vmem:[%s10266_s16 + $0xc0] ss:$24 sps:$4 sm:$0xff]   ;;  %v9066_v53 = vld [vmem:[%s10266_s16 + $0xf4] ss:$24 sps:$4 sm:$0xff]   ;;  %v9070_v55 = vld [vmem:[%s10266_s16 + $0xf0] ss:$24 sps:$4 sm:$0xff]  }
 0x17b   : > { %7141 = vmatpush1.bf16.msra.mxu0 %v9047_v40  ;;  %7069 = vmatprep.subr.bf16.mxu1 %v9048_v41  ;;  %v9065_v52 = vld [vmem:[%s10266_s16 + $0x3c0] ss:$24 sps:$4 sm:$0xff]   ;;  %v9068_v54 = vld [vmem:[%s10266_s16 + $0x3f4] ss:$24 sps:$4 sm:$0xff]   ;;  %v9071_v56 = vld [vmem:[%s10266_s16 + $0x3f0] ss:$24 sps:$4 sm:$0xff]  }
 0x17c   : > { %7142 = vmatprep.subr.bf16.mxu0 %v9050_v42  ;;  %v9072_v57 = vld [vmem:[%s10266_s16 + $0x124] ss:$24 sps:$4 sm:$0xff]   ;;  %v9076_v59 = vld [vmem:[%s10266_s16 + $0x120] ss:$24 sps:$4 sm:$0xff]   ;;  %v9078_v61 = vld [vmem:[%s10266_s16 + $0x154] ss:$24 sps:$4 sm:$0xff]  }
 0x17d   : > { %v9074_v58 = vld [vmem:[%s10266_s16 + $0x424] ss:$24 sps:$4 sm:$0xff]   ;;  %v9077_v60 = vld [vmem:[%s10266_s16 + $0x420] ss:$24 sps:$4 sm:$0xff]   ;;  %v9080_v62 = vld [vmem:[%s10266_s16 + $0x454] ss:$24 sps:$4 sm:$0xff]  }
 0x17e   : > { %7070 = vmatpush1.bf16.msra.mxu1 %v9052_v43  ;;  %v9082_v63 = vld [vmem:[%s10266_s16 + $0x150] ss:$24 sps:$4 sm:$0xff]   ;;  %v9084_v1 = vld [vmem:[%s10266_s16 + $0x184] ss:$24 sps:$4 sm:$0xff]   ;;  %v9088_v4 = vld [vmem:[%s10266_s16 + $0x180] ss:$24 sps:$4 sm:$0xff]  }
 0x17f   : > { %7143 = vmatpush1.bf16.msra.mxu0 %v9053_v44  ;;  %7071 = vmatprep.subr.bf16.mxu1 %v9054_v45  ;;  %v9083_v0 = vld [vmem:[%s10266_s16 + $0x450] ss:$24 sps:$4 sm:$0xff]   ;;  %v9086_v2 = vld [vmem:[%s10266_s16 + $0x484] ss:$24 sps:$4 sm:$0xff]   ;;  %v9089_v5 = vld [vmem:[%s10266_s16 + $0x480] ss:$24 sps:$4 sm:$0xff]  }
 0x180   : > { %7144 = vmatprep.subr.bf16.mxu0 %v9056_v46  ;;  %v9090_v6 = vld [vmem:[%s10266_s16 + $0x1b4] ss:$24 sps:$4 sm:$0xff]   ;;  %v859_v8 = vshrl.u32 %v858_v3, 7  ;;  %v9094_v9 = vld [vmem:[%s10266_s16 + $0x1b0] ss:$24 sps:$4 sm:$0xff]   ;;  %v10577_v26 = vld [vmem:[%s10284_s6 + $0x8] sm:$0xff] }
 0x181   : > { %v9092_v7 = vld [vmem:[%s10266_s16 + $0x4b4] ss:$24 sps:$4 sm:$0xff]   ;;  %v9095_v10 = vld [vmem:[%s10266_s16 + $0x4b0] ss:$24 sps:$4 sm:$0xff]   ;;  %v9096_v11 = vld [vmem:[%s10266_s16 + $0x1e4] ss:$24 sps:$4 sm:$0xff]  }
 0x182   : > { %7072 = vmatpush1.bf16.msra.mxu1 %v9058_v47  ;;  %v9098_v12 = vld [vmem:[%s10266_s16 + $0x4e4] ss:$24 sps:$4 sm:$0xff]   ;;  %v10556_v13 = vsub.s32 0, %v859_v8  ;;  %v10558_v14 = vsub.s32 1, %v859_v8  ;;  %v10560_v15 = vsub.s32 2, %v859_v8  ;;  %v10564_v18 = vsub.s32 3, %v859_v8 }
 0x183   : > { %7145 = vmatpush1.bf16.msra.mxu0 %v9059_v48  ;;  %7073 = vmatprep.subr.bf16.mxu1 %v9060_v49  ;;  %v9100_v16 = vld [vmem:[%s10266_s16 + $0x1e0] ss:$24 sps:$4 sm:$0xff]   ;;  %v10566_v19 = vsub.s32 4, %v859_v8  ;;  %v9102_v20 = vld [vmem:[%s10266_s16 + $0x214] ss:$24 sps:$4 sm:$0xff]   ;;  %v10569_v21 = vsub.s32 5, %v859_v8 }
 0x184   : > { %7146 = vmatprep.subr.bf16.mxu0 %v9062_v50  ;;  %13284 = vst [vmem:[#allocation33_spill] sm:$0xff] %v10556_v13  ;;  %13285 = vst [vmem:[#allocation34_spill] sm:$0xff] %v10558_v14  ;;  %v9101_v17 = vld [vmem:[%s10266_s16 + $0x4e0] ss:$24 sps:$4 sm:$0xff]   ;;  %v10571_v22 = vsub.s32 6, %v859_v8  ;;  %v10583_v30 = vrot.slane %v10577_v26, %v10556_v13  ;;  %v10587_v31 = vrot.slane %v10577_v26, %v10558_v14  ;;  %v907_v35 = vld [vmem:[#allocation2 + $0x38] sm:$0xff] }
 0x185   : > { %13286 = vst [vmem:[#allocation35_spill] sm:$0xff] %v10560_v15  ;;  %13287 = vst [vmem:[#allocation36_spill] sm:$0xff] %v10564_v18  ;;  %v9104_v23 = vld [vmem:[%s10266_s16 + $0x514] ss:$24 sps:$4 sm:$0xff]   ;;  %v9106_v24 = vld [vmem:[%s10266_s16 + $0x210] ss:$24 sps:$4 sm:$0xff]   ;;  %v10591_v32 = vrot.slane %v10577_v26, %v10560_v15  ;;  %v10595_v33 = vrot.slane %v10577_v26, %v10564_v18  ;;  %v10599_v37 = vrot.slane %v10577_v26, %v10566_v19 }
 0x186   : > { %7074 = vmatpush1.bf16.msra.mxu1 %v9064_v51  ;;  %13288 = vst [vmem:[#allocation37_spill] sm:$0xff] %v10566_v19  ;;  %13289 = vst [vmem:[#allocation38_spill] sm:$0xff] %v10569_v21  ;;  %v9107_v25 = vld [vmem:[%s10266_s16 + $0x510] ss:$24 sps:$4 sm:$0xff]   ;;  %v9108_v27 = vld [vmem:[%s10266_s16 + $0x244] ss:$24 sps:$4 sm:$0xff]   ;;  %v10603_v38 = vrot.slane %v10577_v26, %v10569_v21  ;;  %v10607_v39 = vrot.slane %v10577_v26, %v10571_v22  ;;  %v937_v43 = vmul.f32 %v10587_v31, %v907_v35 }
 0x187   : > { %7147 = vmatpush1.bf16.msra.mxu0 %v9065_v52  ;;  %7075 = vmatprep.subr.bf16.mxu1 %v9066_v53  ;;  %13290 = vst [vmem:[#allocation39_spill] sm:$0xff] %v10571_v22  ;;  %v9110_v28 = vld [vmem:[%s10266_s16 + $0x544] ss:$24 sps:$4 sm:$0xff]   ;;  %v847_v29 = vld [vmem:[#allocation2 + $0x8] sm:$0xc0]  ;;  %vm1032_vm0 = vcmask 1043456  }
 0x188   : > { %7148 = vmatprep.subr.bf16.mxu0 %v9068_v54  ;;  %v853_v34 = vld [vmem:[#allocation2 + $0x38] sm:$0x3f]  ;;  %13291 = vst [vmem:[#allocation40_spill] sm:$0xff] %v10603_v38  ;;  %13292 = vst [vmem:[#allocation41_spill] sm:$0xff] %v10607_v39  ;;  %v883_v41 = vmul.f32 %v10583_v30, %v847_v29  ;;  %v979_v44 = vld [vmem:[#allocation2 + $0x68] sm:$0x3] }
 0x189   : > { %v973_v36 = vld [vmem:[#allocation2 + $0x38] sm:$0xfc]  ;;  %v10610_v40 = vld [vmem:[%s10284_s6 + $0x38] ss:$0 sm:$0xff]  ;;  %v889_v42 = vmul.f32 %v10583_v30, %v853_v34  ;;  %v1077_v45 = vld [vmem:[#allocation2 + $0x128] sm:$0xc0]  ;;  %v1015_v50 = vmul.f32 %v10591_v32, %v979_v44 }
 0x18a   : > { %7076 = vmatpush1.bf16.msra.mxu1 %v9070_v55  ;;  %v1083_v46 = vld [vmem:[#allocation2 + $0x158] sm:$0x3f]  ;;  %v9112_v47 = vld [vmem:[%s10266_s16 + $0x240] ss:$24 sps:$4 sm:$0xff]   ;;  %v1009_v49 = vmul.f32 %v10591_v32, %v973_v36  ;;  %v1113_v51 = vmul.f32 %v10595_v33, %v1077_v45  ;;  %v1209_v54 = vld [vmem:[#allocation2 + $0x188] sm:$0x3] }
 0x18b   : > { %7149 = vmatpush1.bf16.msra.mxu0 %v9071_v56  ;;  %7077 = vmatprep.subr.bf16.mxu1 %v9072_v57  ;;  %v9113_v48 = vld [vmem:[%s10266_s16 + $0x540] ss:$24 sps:$4 sm:$0xff]   ;;  %v1137_v52 = vld [vmem:[#allocation2 + $0x158] sm:$0xff]  ;;  %v10620_v55 = vsub.s32 7, %v859_v8  ;;  %v949_v57 = vrot.slane %v937_v43, 2  ;;  %s13358_s23 = sld [smem:[#allocation24_spill]] }
 0x18c   : > { %7150 = vmatprep.subr.bf16.mxu0 %v9074_v58  ;;  %v1203_v53 = vld [vmem:[#allocation2 + $0x158] sm:$0xfc]  ;;  %v10624_v58 = vmul.f32 %v10599_v37, %v1137_v52  ;;  %v1656_v36 = vld [vmem:[#allocation2 + $0xc8] sm:$0xff] }
 0x18d   : > { %13293 = vst [vmem:[#allocation42_spill] sm:$0xff] %v10620_v55  ;;  %v9114_v56 = vld [vmem:[%s10266_s16 + $0x274] ss:$24 sps:$4 sm:$0xff]   ;;  %v967_v8 = vadd.f32 %v949_v57, %v889_v42 }
 0x18e   : > { %7078 = vmatpush1.bf16.msra.mxu1 %v9076_v59  ;;  %v10627_v59 = vmul.f32 %v10603_v38, %v1203_v53  ;;  %v1432_v3 = vld [vmem:[#allocation2 + $0x278] sm:$0xfc]  ;;  %v1179_v34 = vrot.slane %v10624_v58, 2  ;;  %v1704_v42 = vld [vmem:[#allocation2 + $0xf8] sm:$0x3] }
 0x18f   : > { %7151 = vmatpush1.bf16.msra.mxu0 %v9077_v60  ;;  %7079 = vmatprep.subr.bf16.mxu1 %v9078_v61  ;;  %v1245_v60 = vmul.f32 %v10603_v38, %v1209_v54  ;;  %v1306_v61 = vld [vmem:[#allocation2 + $0x248] sm:$0xc0]  ;;  %v1783_v54 = vld [vmem:[#allocation2 + $0x1e8] sm:$0x3f] }
 0x190   : > { %7152 = vmatprep.subr.bf16.mxu0 %v9080_v62  ;;  %v1312_v62 = vld [vmem:[#allocation2 + $0x278] sm:$0x3f] }
 0x191   : > { %p8704_p3 = scmp.ge.s32.totalorder %s13358_s23, 2 }
 0x192   : > { %7080 = vmatpush1.bf16.msra.mxu1 %v9082_v63  ;;  %v1034_v63 = vrot.slane %v1009_v49, 4  ;;  %v1777_v49 = vld [vmem:[#allocation2 + $0x1b8] sm:$0xc0] }
 0x193   : > { %7153 = vmatpush1.bf16.msra.mxu0 %v9083_v0  ;;  %7081 = vmatprep.subr.bf16.mxu1 %v9084_v1  ;;  %v1041_v0 = vrot.slane %v1015_v50, 4  ;;  %v1119_v1 = vmul.f32 %v10595_v33, %v1083_v46 }
 0x194   : > { %7154 = vmatprep.subr.bf16.mxu0 %v9086_v2  ;;  %v10632_v2 = vmul.f32 %v10607_v39, %v1306_v61  ;;  %v1716_v61 = vmul.f32 %v1704_v42, %v10591_v32  ;;  %v9130_v42 = vld [vmem:[%s10266_s16 + $0x2d0] ss:$24 sps:$4 sm:$0xff]  }
 0x196   : > { %7082 = vmatpush1.bf16.msra.mxu1 %v9088_v4  ;;  %v1438_v4 = vld [vmem:[#allocation2 + $0x2a8] sm:$0x3] }
 0x197   : > { %7155 = vmatpush1.bf16.msra.mxu0 %v9089_v5  ;;  %7083 = vmatprep.subr.bf16.mxu1 %v9090_v6  ;;  %v9116_v5 = vld [vmem:[%s10266_s16 + $0x574] ss:$24 sps:$4 sm:$0xff]   ;;  %v1474_v35 = vmul.f32 %v10610_v40, %v1438_v4  ;;  %v1855_v4 = vld [vmem:[#allocation2 + $0x1e8] sm:$0xfc] }
 0x198   : > { %7156 = vmatprep.subr.bf16.mxu0 %v9092_v7  ;;  %v10636_v6 = vld [vmem:[%s10260_s1] sm:$0x3f]  ;;  %v961_v7 = vadd.f32 %v949_v57, %v883_v41 }
 0x199   : > { %v1698_v41 = vld [vmem:[#allocation2 + $0xc8] sm:$0xfc]  ;;  %v10662_v46 = vrot.slane %v10636_v6, %v10558_v14  ;;  %v1499_v52 = vrot.slane %v1474_v35, 4 }
 0x19a   : > { %7084 = vmatpush1.bf16.msra.mxu1 %v9094_v9  ;;  %v1263_v9 = vrot.slane %v10627_v59, 4  ;;  %v9124_v57 = vld [vmem:[%s10266_s16 + $0x2a0] ss:$24 sps:$4 sm:$0xff]   ;;  %v1662_v59 = vmul.f32 %v1656_v36, %v10587_v31  ;;  %v1867_v36 = vmul.f32 %v1855_v4, %v10603_v38 }
 0x19b   : > { %7157 = vmatpush1.bf16.msra.mxu0 %v9095_v10  ;;  %7085 = vmatprep.subr.bf16.mxu1 %v9096_v11  ;;  %v10640_v10 = vmul.f32 %v10607_v39, %v1312_v62  ;;  %v1366_v11 = vld [vmem:[#allocation2 + $0x278] sm:$0xff]  ;;  %13295 = vst [vmem:[#allocation44_spill] sm:$0xff] %v10662_v46  ;;  %v1813_v62 = vld [vmem:[#allocation2 + $0x1e8] sm:$0xff] }
 0x19c   : > { %7158 = vmatprep.subr.bf16.mxu0 %v9098_v12  ;;  %v9118_v12 = vld [vmem:[%s10266_s16 + $0x270] ss:$24 sps:$4 sm:$0xff]  }
 0x19e   : > { %7086 = vmatpush1.bf16.msra.mxu1 %v9100_v16  ;;  %v9119_v16 = vld [vmem:[%s10266_s16 + $0x570] ss:$24 sps:$4 sm:$0xff]  }
 0x19f   : > { %7159 = vmatpush1.bf16.msra.mxu0 %v9101_v17  ;;  %7087 = vmatprep.subr.bf16.mxu1 %v9102_v20  ;;  %v1042_v17 = vsel %vm1032_vm0, %v1034_v63, %v1041_v0  ;;  %v1270_v20 = vrot.slane %v1245_v60, 4  ;;  %v1710_v60 = vmul.f32 %v1698_v41, %v10591_v32  ;;  %v1940_v41 = vld [vmem:[#allocation2 + $0x308] sm:$0x3f] }
 0x1a0   : > { %7160 = vmatprep.subr.bf16.mxu0 %v9104_v23  ;;  %v10647_v23 = vrot.slane %v10577_v26, %v10620_v55  ;;  %v1070_v29 = vadd.f32 %v1042_v17, %v967_v8  ;;  %v9120_v26 = vld [vmem:[%s10266_s16 + $0x2a4] ss:$24 sps:$4 sm:$0xff]   ;;  %v1741_v8 = vrot.slane %v1716_v61, 4  ;;  %v1861_v17 = vld [vmem:[#allocation2 + $0x218] sm:$0x3] }
 0x1a1   : > { %v1271_v43 = vsel %vm1032_vm0, %v1263_v9, %v1270_v20  ;;  %v9128_v20 = vld [vmem:[%s10266_s16 + $0x5d4] ss:$24 sps:$4 sm:$0xff]  }
 0x1a2   : > { %7088 = vmatpush1.bf16.msra.mxu1 %v9106_v24  ;;  %13294 = vst [vmem:[#allocation43_spill] sm:$0xff] %v10647_v23  ;;  %v10650_v24 = vmul.f32 %v10610_v40, %v1432_v3  ;;  %v10657_v44 = vmul.f32 %v10647_v23, %v1366_v11  ;;  %v1789_v3 = vmul.f32 %v1777_v49, %v10595_v33 }
 0x1a3   : > { %7161 = vmatpush1.bf16.msra.mxu0 %v9107_v25  ;;  %7089 = vmatprep.subr.bf16.mxu1 %v9108_v27  ;;  %v1620_v25 = vld [vmem:[#allocation2 + $0x98] sm:$0xc0]  ;;  %v1626_v27 = vld [vmem:[#allocation2 + $0xc8] sm:$0x3f]  ;;  %v1795_v11 = vmul.f32 %v1783_v54, %v10595_v33 }
 0x1a4   : > { %7162 = vmatprep.subr.bf16.mxu0 %v9110_v28  ;;  %v1064_v28 = vadd.f32 %v1034_v63, %v961_v7  ;;  %v1492_v45 = vrot.slane %v10650_v24, 4  ;;  %v1632_v53 = vmul.f32 %v1620_v25, %v10583_v30  ;;  %v1638_v58 = vmul.f32 %v1626_v27, %v10583_v30  ;;  %v9125_v63 = vld [vmem:[%s10266_s16 + $0x5a0] ss:$24 sps:$4 sm:$0xff]  }
 0x1a5   : > { %v1734_v7 = vrot.slane %v1710_v60, 4  ;;  %v1952_v60 = vmul.f32 %v1940_v41, %v10607_v39 }
 0x1a6   : > { %7090 = vmatpush1.bf16.msra.mxu1 %v9112_v47  ;;  %v9122_v47 = vld [vmem:[%s10266_s16 + $0x5a4] ss:$24 sps:$4 sm:$0xff]   ;;  %v1125_v50 = vadd.f32 %v1113_v51, %v1064_v28  ;;  %v1408_v28 = vrot.slane %v10657_v44, 2 }
 0x1a7   : > { %7163 = vmatpush1.bf16.msra.mxu0 %v9113_v48  ;;  %7091 = vmatprep.subr.bf16.mxu1 %v9114_v56  ;;  %v1131_v48 = vadd.f32 %v1119_v1, %v1070_v29  ;;  %v9126_v56 = vld [vmem:[%s10266_s16 + $0x2d4] ss:$24 sps:$4 sm:$0xff]   ;;  %v1500_v1 = vsel %vm1032_vm0, %v1492_v45, %v1499_v52  ;;  %v1819_v29 = vmul.f32 %v1813_v62, %v10599_v37  ;;  %v1970_v44 = vld [vmem:[#allocation2 + $0x308] sm:$0xff] }
 0x1a8   : > { %7164 = vmatprep.subr.bf16.mxu0 %v9116_v5  ;;  %v1191_v0 = vadd.f32 %v1179_v34, %v1125_v50  ;;  %v1674_v5 = vrot.slane %v1662_v59, 2  ;;  %v1742_v35 = vsel %vm1032_vm0, %v1734_v7, %v1741_v8  ;;  %v9131_v50 = vld [vmem:[%s10266_s16 + $0x5d0] ss:$24 sps:$4 sm:$0xff]  }
 0x1a9   : > { %v1197_v51 = vadd.f32 %v1179_v34, %v1131_v48  ;;  %v1934_v34 = vld [vmem:[#allocation2 + $0x2d8] sm:$0xc0] }
 0x1aa   : > { %7092 = vmatpush1.bf16.msra.mxu1 %v9118_v12  ;;  %v1293_v25 = vadd.f32 %v1263_v9, %v1191_v0  ;;  %v1686_v12 = vadd.f32 %v1674_v5, %v1632_v53  ;;  %v1831_v9 = vrot.slane %v1819_v29, 2  ;;  %v1891_v53 = vrot.slane %v1867_v36, 4 }
 0x1ab   : > { %7165 = vmatpush1.bf16.msra.mxu0 %v9119_v16  ;;  %7093 = vmatprep.subr.bf16.mxu1 %v9120_v26  ;;  %v1299_v27 = vadd.f32 %v1271_v43, %v1197_v51  ;;  %v1692_v16 = vadd.f32 %v1674_v5, %v1638_v58  ;;  %v1873_v43 = vmul.f32 %v1861_v17, %v10603_v38  ;;  %v2018_v58 = vld [vmem:[#allocation2 + $0x338] sm:$0x3]  ;;  %v10697_v5 = vld [vmem:[%s10284_s6] sm:$0xff] }
 0x1ac   : > { %7166 = vmatprep.subr.bf16.mxu0 %v9122_v47  ;;  %v1354_v26 = vadd.f32 %v10632_v2, %v1293_v25  ;;  %v2012_v47 = vld [vmem:[#allocation2 + $0x308] sm:$0xfc]  ;;  %v1764_v48 = vadd.f32 %v1734_v7, %v1686_v12  ;;  %v1946_v54 = vmul.f32 %v1934_v34, %v10607_v39  ;;  %v846_v17 = vld [vmem:[#allocation2] sm:$0xc0]  ;;  %v10707_v29 = vrot.slane %v10697_v5, %v10558_v14  ;;  %v972_v34 = vld [vmem:[#allocation2 + $0x30] sm:$0xfc] }
 0x1ad   : > { %v1360_v49 = vadd.f32 %v10640_v10, %v1299_v27  ;;  %v1770_v52 = vadd.f32 %v1742_v35, %v1692_v16  ;;  %v1898_v10 = vrot.slane %v1873_v43, 4  ;;  %v978_v12 = vld [vmem:[#allocation2 + $0x60] sm:$0x3]  ;;  %v10711_v16 = vrot.slane %v10697_v5, %v10560_v15 }
 0x1ae   : > { %7094 = vmatpush1.bf16.msra.mxu1 %v9124_v57  ;;  %v1420_v2 = vadd.f32 %v1408_v28, %v1354_v26  ;;  %v1801_v61 = vadd.f32 %v1789_v3, %v1764_v48  ;;  %v1976_v57 = vmul.f32 %v1970_v44, %v10647_v23  ;;  %v1076_v44 = vld [vmem:[#allocation2 + $0x120] sm:$0xc0] }
 0x1af   : > { %7167 = vmatpush1.bf16.msra.mxu0 %v9125_v63  ;;  %7095 = vmatprep.subr.bf16.mxu1 %v9126_v56  ;;  %v1426_v59 = vadd.f32 %v1408_v28, %v1360_v49  ;;  %v1807_v62 = vadd.f32 %v1795_v11, %v1770_v52  ;;  %v2024_v63 = vmul.f32 %v10610_v40, %v2012_v47 }
 0x1b0   : > { %7168 = vmatprep.subr.bf16.mxu0 %v9128_v20  ;;  %v1522_v0 = vadd.f32 %v1492_v45, %v1420_v2  ;;  %v1899_v4 = vsel %vm1032_vm0, %v1891_v53, %v1898_v10  ;;  %v2030_v56 = vmul.f32 %v10610_v40, %v2018_v58  ;;  %v1843_v7 = vadd.f32 %v1831_v9, %v1801_v61  ;;  %v852_v45 = vld [vmem:[#allocation2 + $0x30] sm:$0x3f] }
 0x1b1   : > { %v1528_v51 = vadd.f32 %v1500_v1, %v1426_v59  ;;  %v1849_v8 = vadd.f32 %v1831_v9, %v1807_v62  ;;  %v1988_v3 = vrot.slane %v1976_v57, 2  ;;  %v2048_v11 = vrot.slane %v2024_v63, 4  ;;  %v906_v40 = vld [vmem:[#allocation2 + $0x30] sm:$0xff] }
 0x1b2   : > { %7096 = vmatpush1.bf16.msra.mxu1 %v9130_v42  ;;  %v1565_v20 = vadd.f32 %v10662_v46, %v1522_v0  ;;  %v2055_v24 = vrot.slane %v2030_v56, 4  ;;  %v10703_v1 = vrot.slane %v10697_v5, %v10556_v13  ;;  %v1921_v27 = vadd.f32 %v1891_v53, %v1843_v7  ;;  %v1082_v59 = vld [vmem:[#allocation2 + $0x150] sm:$0x3f]  ;;  %v1208_v7 = vld [vmem:[#allocation2 + $0x180] sm:$0x3] }
 0x1b3   : > { %7169 = vmatpush1.bf16.msra.mxu0 %v9131_v50  ;;  %v1571_v25 = vadd.f32 %v10662_v46, %v1528_v51  ;;  %v1927_v28 = vadd.f32 %v1899_v4, %v1849_v8  ;;  %v936_v43 = vmul.f32 %v10707_v29, %v906_v40  ;;  %v1008_v50 = vmul.f32 %v10711_v16, %v972_v34  ;;  %v1202_v56 = vld [vmem:[#allocation2 + $0x150] sm:$0xfc]  ;;  %v1305_v40 = vld [vmem:[#allocation2 + $0x240] sm:$0xc0] }
 0x1b4   : > { %v1577_v35 = vmax.f32 %v1565_v20, 0.0  ;;  %v2056_v41 = vsel %vm1032_vm0, %v2048_v11, %v2055_v24  ;;  %v882_v42 = vmul.f32 %v10703_v1, %v846_v17  ;;  %v1958_v26 = vadd.f32 %v1946_v54, %v1921_v27  ;;  %v1136_v54 = vld [vmem:[#allocation2 + $0x150] sm:$0xff] }
 0x1b5   : > { %v1583_v36 = vmax.f32 %v1571_v25, 0.0  ;;  %v1964_v49 = vadd.f32 %v1952_v60, %v1927_v28  ;;  %v888_v9 = vmul.f32 %v10703_v1, %v852_v45  ;;  %v1014_v48 = vmul.f32 %v10711_v16, %v978_v12  ;;  %v1311_v27 = vld [vmem:[#allocation2 + $0x270] sm:$0x3f] }
 0x1b6   : > { %v10721_v52 = vrot.slane %v10697_v5, %v10564_v18  ;;  %v2000_v53 = vadd.f32 %v1988_v3, %v1958_v26  ;;  %v948_v2 = vrot.slane %v936_v43, 2  ;;  %v10725_v10 = vrot.slane %v10697_v5, %v10566_v19  ;;  %v10738_v28 = vld [vmem:[%s10284_s6 + $0x30] ss:$0 sm:$0xff] }
 0x1b7   : > { %v1589_v47 = vpack.c.bf16 %v1583_v36, %v1577_v35  ;;  %v2006_v58 = vadd.f32 %v1988_v3, %v1964_v49  ;;  %v1033_v61 = vrot.slane %v1008_v50, 4  ;;  %v1039_v62 = vrot.slane %v1014_v48, 4 }
 0x1b8   : > { %13296 = vst [vmem:[#allocation45_spill] sm:$0xff] %v10725_v10  ;;  %v1112_v57 = vmul.f32 %v10721_v52, %v1076_v44  ;;  %v2078_v63 = vadd.f32 %v2048_v11, %v2000_v53  ;;  %v960_v51 = vadd.f32 %v948_v2, %v882_v42  ;;  %v966_v4 = vadd.f32 %v948_v2, %v888_v9  ;;  %v1431_v42 = vld [vmem:[#allocation2 + $0x270] sm:$0xfc]  ;;  %v1437_v44 = vld [vmem:[#allocation2 + $0x2a0] sm:$0x3] }
 0x1b9   : > { %v1601_v60 = vrot.slane %v1589_v47, 3  ;;  %v2084_v0 = vadd.f32 %v2056_v41, %v2006_v58  ;;  %v1040_v8 = vsel %vm1032_vm0, %v1033_v61, %v1039_v62  ;;  %v1118_v3 = vmul.f32 %v10721_v52, %v1082_v59  ;;  %v1365_v41 = vld [vmem:[#allocation2 + $0x270] sm:$0xff]  ;;  %v1625_v2 = vld [vmem:[#allocation2 + $0xc0] sm:$0x3f] }
 0x1ba   : > { %v1166_v17 = vmul.f32 %v10725_v10, %v1136_v54  ;;  %v10733_v20 = vrot.slane %v10697_v5, %v10569_v21  ;;  %v2090_v25 = vadd.f32 %v2078_v63, %v10662_v46  ;;  %v1063_v24 = vadd.f32 %v1033_v61, %v960_v51  ;;  %v1619_v47 = vld [vmem:[#allocation2 + $0x90] sm:$0xc0]  ;;  %v9134_v62 = vld [vmem:[%s10266_s16 + $0x604] ss:$24 sps:$4 sm:$0xff]  }
 0x1bb   : > { %1613 = vst [vmem:[#allocation3 + $0x8] sm:$0xf] %v1601_v60  ;;  %v2096_v11 = vadd.f32 %v2084_v0, %v10662_v46  ;;  %v1069_v45 = vadd.f32 %v1040_v8, %v966_v4  ;;  %v10744_v36 = vrot.slane %v10697_v5, %v10571_v22  ;;  %v10750_v61 = vrot.slane %v10697_v5, %v10620_v55  ;;  %v1655_v4 = vld [vmem:[#allocation2 + $0xc0] sm:$0xff] }
 0x1bc   : > { %13297 = vst [vmem:[#allocation46_spill] sm:$0xff] %v10733_v20  ;;  %v1178_v34 = vrot.slane %v1166_v17, 2  ;;  %v1238_v12 = vmul.f32 %v10733_v20, %v1202_v56  ;;  %v1244_v35 = vmul.f32 %v10733_v20, %v1208_v7  ;;  %v2102_v26 = vmax.f32 %v2090_v25, 0.0  ;;  %v1697_v56 = vld [vmem:[#allocation2 + $0xc0] sm:$0xfc]  ;;  %7211 = vmatprep.subr.bf16.mxu0 %v9134_v62 }
 0x1bd   : > { %13298 = vst [vmem:[#allocation47_spill] sm:$0xff] %v10744_v36  ;;  %v2108_v49 = vmax.f32 %v2096_v11, 0.0  ;;  %v1124_v9 = vadd.f32 %v1112_v57, %v1063_v24  ;;  %v1130_v43 = vadd.f32 %v1118_v3, %v1069_v45  ;;  %v1341_v53 = vmul.f32 %v10744_v36, %v1305_v40  ;;  %13299 = vst [vmem:[#allocation48_spill] sm:$0xff] %v10750_v61  ;;  %v9137_v7 = vld [vmem:[%s10266_s16 + $0xc] ss:$24 sps:$4 sm:$0xff]  }
 0x1be   : > { %v1262_v50 = vrot.slane %v1238_v12, 4  ;;  %v1268_v48 = vrot.slane %v1244_v35, 4  ;;  %v1347_v58 = vmul.f32 %v10744_v36, %v1311_v27  ;;  %v1467_v63 = vmul.f32 %v10738_v28, %v1431_v42  ;;  %v1703_v25 = vld [vmem:[#allocation2 + $0xf0] sm:$0x3]  ;;  %v1776_v11 = vld [vmem:[#allocation2 + $0x1b0] sm:$0xc0]  ;;  %7284 = vmatprep.subr.bf16.mxu1 %v9137_v7 }
 0x1bf   : > { %v2114_v59 = vpack.c.bf16 %v2108_v49, %v2102_v26  ;;  %v1190_v54 = vadd.f32 %v1178_v34, %v1124_v9  ;;  %v1196_v60 = vadd.f32 %v1178_v34, %v1130_v43  ;;  %v1473_v0 = vmul.f32 %v10738_v28, %v1437_v44  ;;  %v1782_v34 = vld [vmem:[#allocation2 + $0x1e0] sm:$0x3f] }
 0x1c0   : > { %v1269_v57 = vsel %vm1032_vm0, %v1262_v50, %v1268_v48  ;;  %v10758_v51 = vrot.slane %v10636_v6, %v10556_v13  ;;  %v1395_v5 = vmul.f32 %v10750_v61, %v1365_v41  ;;  %v1491_v24 = vrot.slane %v1467_v63, 4  ;;  %v1812_v49 = vld [vmem:[#allocation2 + $0x1e0] sm:$0xff] }
 0x1c1   : > { %v2126_v8 = vrot.slane %v2114_v59, 7  ;;  %v1292_v3 = vadd.f32 %v1262_v50, %v1190_v54  ;;  %v1298_v17 = vadd.f32 %v1269_v57, %v1196_v60  ;;  %v1497_v45 = vrot.slane %v1473_v0, 4  ;;  %v1854_v9 = vld [vmem:[#allocation2 + $0x1e0] sm:$0xfc] }
 0x1c2   : > { %13300 = vst [vmem:[#allocation49_spill] sm:$0xff] %v10758_v51  ;;  %v1631_v40 = vmul.f32 %v1619_v47, %v10703_v1  ;;  %v1637_v27 = vmul.f32 %v1625_v2, %v10703_v1  ;;  %v1407_v42 = vrot.slane %v1395_v5, 2  ;;  %v1661_v26 = vmul.f32 %v1655_v4, %v10707_v29  ;;  %v1939_v7 = vld [vmem:[#allocation2 + $0x300] sm:$0x3f] }
 0x1c3   : > { %2138 = vst [vmem:[#allocation3 + $0x8] sm:$0xf0] %v2126_v8  ;;  %v1353_v12 = vadd.f32 %v1341_v53, %v1292_v3  ;;  %v1359_v35 = vadd.f32 %v1347_v58, %v1298_v17  ;;  %v1498_v41 = vsel %vm1032_vm0, %v1491_v24, %v1497_v45  ;;  %v1709_v43 = vmul.f32 %v1697_v56, %v10711_v16  ;;  %v1860_v53 = vld [vmem:[#allocation2 + $0x210] sm:$0x3]  ;;  %v1933_v56 = vld [vmem:[#allocation2 + $0x2d0] sm:$0xc0] }
 0x1c4   : > { %v1715_v44 = vmul.f32 %v1703_v25, %v10711_v16  ;;  %v1788_v47 = vmul.f32 %v1776_v11, %v10721_v52  ;;  %v1673_v2 = vrot.slane %v1661_v26, 2  ;;  %v1794_v59 = vmul.f32 %v1782_v34, %v10721_v52  ;;  %v1969_v8 = vld [vmem:[#allocation2 + $0x300] sm:$0xff] }
 0x1c5   : > { %v1419_v50 = vadd.f32 %v1407_v42, %v1353_v12  ;;  %v1425_v48 = vadd.f32 %v1407_v42, %v1359_v35  ;;  %v1733_v58 = vrot.slane %v1709_v43, 4  ;;  %v1818_v60 = vmul.f32 %v1812_v49, %v10725_v10  ;;  %v2017_v35 = vld [vmem:[#allocation2 + $0x330] sm:$0x3] }
 0x1c6   : > { %v1739_v54 = vrot.slane %v1715_v44, 4  ;;  %v1866_v62 = vmul.f32 %v1854_v9, %v10733_v20  ;;  %v1685_v0 = vadd.f32 %v1673_v2, %v1631_v40  ;;  %v1691_v4 = vadd.f32 %v1673_v2, %v1637_v27 }
 0x1c7   : > { %v1521_v57 = vadd.f32 %v1491_v24, %v1419_v50  ;;  %v1527_v63 = vadd.f32 %v1498_v41, %v1425_v48  ;;  %v1830_v17 = vrot.slane %v1818_v60, 2  ;;  %v1872_v5 = vmul.f32 %v1860_v53, %v10733_v20  ;;  %v2011_v24 = vld [vmem:[#allocation2 + $0x300] sm:$0xfc]  ;;  %v10780_v50 = vld [vmem:[%s10284_s6 + $0x18] sm:$0xff]  ;;  %v855_v60 = vld [vmem:[#allocation2 + $0x48] sm:$0x3f] }
 0x1c8   : > { %v1740_v3 = vsel %vm1032_vm0, %v1733_v58, %v1739_v54  ;;  %v1890_v25 = vrot.slane %v1866_v62, 4  ;;  %v1763_v34 = vadd.f32 %v1733_v58, %v1685_v0  ;;  %v1945_v42 = vmul.f32 %v1933_v56, %v10744_v36  ;;  %v849_v54 = vld [vmem:[#allocation2 + $0x18] sm:$0xc0]  ;;  %v909_v62 = vld [vmem:[#allocation2 + $0x48] sm:$0xff] }
 0x1c9   : > { %v1564_v11 = vadd.f32 %v10758_v51, %v1521_v57  ;;  %v1570_v45 = vadd.f32 %v10758_v51, %v1527_v63  ;;  %v1769_v12 = vadd.f32 %v1740_v3, %v1691_v4  ;;  %v1896_v27 = vrot.slane %v1872_v5, 4  ;;  %v1863_v20 = vld [vmem:[#allocation2 + $0x228] sm:$0x3] }
 0x1ca   : > { %v5282_v40 = vld [vmem:[#allocation3 + $0x8] sm:$0xff]  ;;  %v1951_v26 = vmul.f32 %v1939_v7, %v10744_v36  ;;  %v1975_v49 = vmul.f32 %v1969_v8, %v10750_v61  ;;  %v1800_v43 = vadd.f32 %v1788_v47, %v1763_v34  ;;  %v2023_v53 = vmul.f32 %v10738_v28, %v2011_v24  ;;  %v981_v8 = vld [vmem:[#allocation2 + $0x78] sm:$0x3]  ;;  %v1857_v36 = vld [vmem:[#allocation2 + $0x1f8] sm:$0xfc] }
 0x1cb   : > { %7097 = vmatprep.mubr.bf16.mxu1 %v5282_v40  ;;  %v1576_v9 = vmax.f32 %v1564_v11, 0.0  ;;  %v1582_v41 = vmax.f32 %v1570_v45, 0.0  ;;  %v1806_v44 = vadd.f32 %v1794_v59, %v1769_v12  ;;  %v1897_v48 = vsel %vm1032_vm0, %v1890_v25, %v1896_v27  ;;  %v975_v47 = vld [vmem:[#allocation2 + $0x48] sm:$0xfc] }
 0x1cc   : > { %v1987_v2 = vrot.slane %v1975_v49, 2  ;;  %v2029_v58 = vmul.f32 %v10738_v28, %v2017_v35  ;;  %v1842_v63 = vadd.f32 %v1830_v17, %v1800_v43  ;;  %v10787_v4 = vrot.slane %v10780_v50, %v10556_v13  ;;  %v1079_v35 = vld [vmem:[#allocation2 + $0x138] sm:$0xc0]  ;;  %v1085_v40 = vld [vmem:[#allocation2 + $0x168] sm:$0x3f] }
 0x1cd   : > { %v1588_v57 = vpack.c.bf16 %v1582_v41, %v1576_v9  ;;  %v1848_v0 = vadd.f32 %v1830_v17, %v1806_v44  ;;  %v2047_v59 = vrot.slane %v2023_v53, 4  ;;  %v10791_v7 = vrot.slane %v10780_v50, %v10558_v14  ;;  %v1139_v41 = vld [vmem:[#allocation2 + $0x168] sm:$0xff] }
 0x1ce   : > { %v2053_v56 = vrot.slane %v2029_v58, 4  ;;  %v10795_v28 = vrot.slane %v10780_v50, %v10560_v15  ;;  %v1920_v5 = vadd.f32 %v1890_v25, %v1842_v63  ;;  %v885_v17 = vmul.f32 %v10787_v4, %v849_v54  ;;  %v1205_v53 = vld [vmem:[#allocation2 + $0x168] sm:$0xfc] }
 0x1cf   : > { %v1600_v3 = vrot.slane %v1588_v57, 3  ;;  %v1926_v11 = vadd.f32 %v1897_v48, %v1848_v0  ;;  %v891_v34 = vmul.f32 %v10787_v4, %v855_v60  ;;  %v939_v12 = vmul.f32 %v10791_v7, %v909_v62  ;;  %v1211_v62 = vld [vmem:[#allocation2 + $0x198] sm:$0x3] }
 0x1d0   : > { %v2054_v45 = vsel %vm1032_vm0, %v2047_v59, %v2053_v56  ;;  %v1011_v24 = vmul.f32 %v10795_v28, %v975_v47  ;;  %v1957_v27 = vadd.f32 %v1945_v42, %v1920_v5  ;;  %v1017_v9 = vmul.f32 %v10795_v28, %v981_v8 }
 0x1d1   : > { %1612 = vst [vmem:[#allocation3] sm:$0xf] %v1600_v3  ;;  %v1963_v49 = vadd.f32 %v1951_v26, %v1926_v11  ;;  %v10805_v25 = vrot.slane %v10780_v50, %v10564_v18  ;;  %v951_v43 = vrot.slane %v939_v12, 2  ;;  %v10809_v48 = vrot.slane %v10780_v50, %v10566_v19  ;;  %v1308_v11 = vld [vmem:[#allocation2 + $0x258] sm:$0xc0] }
 0x1d2   : > { %v1036_v44 = vrot.slane %v1011_v24, 4  ;;  %v10813_v58 = vrot.slane %v10780_v50, %v10569_v21  ;;  %v1999_v42 = vadd.f32 %v1987_v2, %v1957_v27  ;;  %v1045_v54 = vrot.slane %v1017_v9, 4  ;;  %v10821_v12 = vld [vmem:[%s10284_s6 + $0x48] ss:$0 sm:$0xff]  ;;  %v1434_v9 = vld [vmem:[#allocation2 + $0x288] sm:$0xfc] }
 0x1d3   : > { %v2005_v26 = vadd.f32 %v1987_v2, %v1963_v49  ;;  %v1115_v60 = vmul.f32 %v10805_v25, %v1079_v35  ;;  %v963_v57 = vadd.f32 %v951_v43, %v885_v17  ;;  %v969_v63 = vadd.f32 %v951_v43, %v891_v34  ;;  %v1314_v17 = vld [vmem:[#allocation2 + $0x288] sm:$0x3f] }
 0x1d4   : > { %v1121_v0 = vmul.f32 %v10805_v25, %v1085_v40  ;;  %v1169_v47 = vmul.f32 %v10809_v48, %v1139_v41  ;;  %v2077_v56 = vadd.f32 %v2047_v59, %v1999_v42  ;;  %v1046_v3 = vsel %vm1032_vm0, %v1036_v44, %v1045_v54  ;;  %v1440_v42 = vld [vmem:[#allocation2 + $0x2b8] sm:$0x3] }
 0x1d5   : > { %v2083_v8 = vadd.f32 %v2054_v45, %v2005_v26  ;;  %v1241_v5 = vmul.f32 %v10813_v58, %v1205_v53  ;;  %v1066_v2 = vadd.f32 %v1036_v44, %v963_v57  ;;  %v1072_v24 = vadd.f32 %v1046_v3, %v969_v63  ;;  %v1368_v45 = vld [vmem:[#allocation2 + $0x288] sm:$0xff] }
 0x1d6   : > { %v1181_v27 = vrot.slane %v1169_v47, 2  ;;  %v1247_v35 = vmul.f32 %v10813_v58, %v1211_v62  ;;  %v2089_v34 = vadd.f32 %v2077_v56, %v10758_v51  ;;  %v10828_v59 = vrot.slane %v10780_v50, %v10571_v22  ;;  %v1622_v26 = vld [vmem:[#allocation2 + $0xa8] sm:$0xc0]  ;;  %v1628_v47 = vld [vmem:[#allocation2 + $0xd8] sm:$0x3f] }
 0x1d7   : > { %v2095_v40 = vadd.f32 %v2083_v8, %v10758_v51  ;;  %v1265_v49 = vrot.slane %v1241_v5, 4  ;;  %v1127_v41 = vadd.f32 %v1115_v60, %v1066_v2  ;;  %v1133_v43 = vadd.f32 %v1121_v0, %v1072_v24  ;;  %v1658_v56 = vld [vmem:[#allocation2 + $0xd8] sm:$0xff] }
 0x1d8   : > { %v1274_v53 = vrot.slane %v1247_v35, 4  ;;  %v10832_v44 = vrot.slane %v10780_v50, %v10620_v55  ;;  %v2101_v54 = vmax.f32 %v2089_v34, 0.0  ;;  %v1344_v57 = vmul.f32 %v10828_v59, %v1308_v11  ;;  %v1700_v5 = vld [vmem:[#allocation2 + $0xd8] sm:$0xfc]  ;;  %v1706_v11 = vld [vmem:[#allocation2 + $0x108] sm:$0x3] }
 0x1d9   : > { %v2107_v62 = vmax.f32 %v2095_v40, 0.0  ;;  %v1350_v63 = vmul.f32 %v10828_v59, %v1314_v17  ;;  %v1193_v8 = vadd.f32 %v1181_v27, %v1127_v41  ;;  %v1199_v3 = vadd.f32 %v1181_v27, %v1133_v43  ;;  %v1779_v17 = vld [vmem:[#allocation2 + $0x1c8] sm:$0xc0]  ;;  %v1785_v43 = vld [vmem:[#allocation2 + $0x1f8] sm:$0x3f] }
 0x1da   : > { %v1275_v60 = vsel %vm1032_vm0, %v1265_v49, %v1274_v53  ;;  %v1398_v0 = vmul.f32 %v10832_v44, %v1368_v45  ;;  %v1470_v50 = vmul.f32 %v10821_v12, %v1434_v9  ;;  %v1476_v24 = vmul.f32 %v10821_v12, %v1440_v42  ;;  %v1815_v53 = vld [vmem:[#allocation2 + $0x1f8] sm:$0xff] }
 0x1db   : > { %v2113_v2 = vpack.c.bf16 %v2107_v62, %v2101_v54  ;;  %v10842_v35 = vrot.slane %v10636_v6, %v10564_v18  ;;  %v1295_v34 = vadd.f32 %v1265_v49, %v1193_v8  ;;  %v1301_v40 = vadd.f32 %v1275_v60, %v1199_v3 }
 0x1dc   : > { %v1410_v41 = vrot.slane %v1398_v0, 2  ;;  %v1634_v27 = vmul.f32 %v1622_v26, %v10787_v4  ;;  %v1494_v51 = vrot.slane %v1470_v50, 4  ;;  %v1503_v54 = vrot.slane %v1476_v24, 4  ;;  %v1936_v50 = vld [vmem:[#allocation2 + $0x2e8] sm:$0xc0] }
 0x1dd   : > { %13301 = vst [vmem:[#allocation50_spill] sm:$0xff] %v10842_v35  ;;  %v2125_v45 = vrot.slane %v2113_v2, 7  ;;  %v1640_v9 = vmul.f32 %v1628_v47, %v10787_v4  ;;  %v1356_v62 = vadd.f32 %v1344_v57, %v1295_v34  ;;  %v1362_v42 = vadd.f32 %v1350_v63, %v1301_v40  ;;  %v1942_v24 = vld [vmem:[#allocation2 + $0x318] sm:$0x3f] }
 0x1de   : > { %v1664_v61 = vmul.f32 %v1658_v56, %v10791_v7  ;;  %v1712_v6 = vmul.f32 %v1700_v5, %v10795_v28  ;;  %v1504_v49 = vsel %vm1032_vm0, %v1494_v51, %v1503_v54  ;;  %v1718_v26 = vmul.f32 %v1706_v11, %v10795_v28 }
 0x1df   : > { %2137 = vst [vmem:[#allocation3] sm:$0xf0] %v2125_v45  ;;  %v1791_v8 = vmul.f32 %v1779_v17, %v10805_v25  ;;  %v1797_v3 = vmul.f32 %v1785_v43, %v10805_v25  ;;  %v1422_v60 = vadd.f32 %v1410_v41, %v1356_v62  ;;  %v1428_v0 = vadd.f32 %v1410_v41, %v1362_v42  ;;  %v1972_v45 = vld [vmem:[#allocation2 + $0x318] sm:$0xff] }
 0x1e0   : > { %v1676_v47 = vrot.slane %v1664_v61, 2  ;;  %v1736_v57 = vrot.slane %v1712_v6, 4  ;;  %v1745_v63 = vrot.slane %v1718_v26, 4  ;;  %v1821_v56 = vmul.f32 %v1815_v53, %v10809_v48  ;;  %v2014_v53 = vld [vmem:[#allocation2 + $0x318] sm:$0xfc] }
 0x1e1   : > { %v1869_v5 = vmul.f32 %v1857_v36, %v10813_v58  ;;  %v1875_v2 = vmul.f32 %v1863_v20, %v10813_v58  ;;  %v1524_v34 = vadd.f32 %v1494_v51, %v1422_v60  ;;  %v1530_v11 = vadd.f32 %v1504_v49, %v1428_v0  ;;  %v2020_v6 = vld [vmem:[#allocation2 + $0x348] sm:$0x3]  ;;  %v9135_v51 = vld [vmem:[%s10266_s16 + $0x8] ss:$24 sps:$4 sm:$0xff]  }
 0x1e2   : > { %v1688_v40 = vadd.f32 %v1676_v47, %v1634_v27  ;;  %v1694_v17 = vadd.f32 %v1676_v47, %v1640_v9  ;;  %v1746_v41 = vsel %vm1032_vm0, %v1736_v57, %v1745_v63  ;;  %v1833_v61 = vrot.slane %v1821_v56, 2  ;;  %v10864_v60 = vld [vmem:[%s10284_s6 + $0x10] sm:$0xff]  ;;  %v9143_v47 = vld [vmem:[%s10266_s16 + $0x3c] ss:$24 sps:$4 sm:$0xff]  }
 0x1e3   : > { %v1893_v43 = vrot.slane %v1869_v5, 4  ;;  %v1902_v54 = vrot.slane %v1875_v2, 4  ;;  %v1567_v36 = vadd.f32 %v10842_v35, %v1524_v34  ;;  %v1573_v20 = vadd.f32 %v10842_v35, %v1530_v11  ;;  %v848_v0 = vld [vmem:[#allocation2 + $0x10] sm:$0xc0]  ;;  %v854_v34 = vld [vmem:[#allocation2 + $0x40] sm:$0x3f] }
 0x1e4   : > { %v1766_v62 = vadd.f32 %v1736_v57, %v1688_v40  ;;  %v1772_v42 = vadd.f32 %v1746_v41, %v1694_v17  ;;  %v1948_v9 = vmul.f32 %v1936_v50, %v10828_v59  ;;  %v1954_v49 = vmul.f32 %v1942_v24, %v10828_v59  ;;  %v908_v17 = vld [vmem:[#allocation2 + $0x40] sm:$0xff] }
 0x1e5   : > { %v1903_v27 = vsel %vm1032_vm0, %v1893_v43, %v1902_v54  ;;  %v1978_v26 = vmul.f32 %v1972_v45, %v10832_v44  ;;  %v1579_v56 = vmax.f32 %v1567_v36, 0.0  ;;  %v1585_v5 = vmax.f32 %v1573_v20, 0.0  ;;  %v9141_v36 = vld [vmem:[%s10266_s16 + $0x38] ss:$24 sps:$4 sm:$0xff]  }
 0x1e6   : > { %v5281_v63 = vld [vmem:[#allocation3] sm:$0xff]  ;;  %v1803_v57 = vadd.f32 %v1791_v8, %v1766_v62  ;;  %v1809_v2 = vadd.f32 %v1797_v3, %v1772_v42  ;;  %v2026_v40 = vmul.f32 %v10821_v12, %v2014_v53  ;;  %v2032_v50 = vmul.f32 %v10821_v12, %v2020_v6  ;;  %v980_v42 = vld [vmem:[#allocation2 + $0x70] sm:$0x3] }
 0x1e7   : > { %7098 = vmatmul.mubr.bf16.vlgmr.msra.gmra.mrb[0].mxu1 %v5281_v63  ;;  %v1990_v11 = vrot.slane %v1978_v26, 2  ;;  %v10871_v24 = vrot.slane %v10864_v60, %v10556_v13  ;;  %v1591_v45 = vpack.c.bf16 %v1585_v5, %v1579_v56  ;;  %v10875_v8 = vrot.slane %v10864_v60, %v10558_v14  ;;  %v974_v3 = vld [vmem:[#allocation2 + $0x40] sm:$0xfc]  ;;  %v9149_v6 = vld [vmem:[%s10266_s16 + $0x6c] ss:$24 sps:$4 sm:$0xff]  }
 0x1e8   : > { %v1845_v41 = vadd.f32 %v1833_v61, %v1803_v57  ;;  %v1851_v54 = vadd.f32 %v1833_v61, %v1809_v2  ;;  %7285 = vmatpush1.bf16.msra.mxu1 %v9135_v51  ;;  %v2050_v20 = vrot.slane %v2026_v40, 4  ;;  %v2059_v53 = vrot.slane %v2032_v50, 4  ;;  %v1078_v5 = vld [vmem:[#allocation2 + $0x130] sm:$0xc0]  ;;  %v1084_v57 = vld [vmem:[#allocation2 + $0x160] sm:$0x3f] }
 0x1e9   : > { %v884_v12 = vmul.f32 %v10871_v24, %v848_v0  ;;  %v890_v62 = vmul.f32 %v10871_v24, %v854_v34  ;;  %7286 = vmatprep.subr.bf16.mxu1 %v9143_v47  ;;  %v1603_v26 = vrot.slane %v1591_v45, 3  ;;  %v938_v61 = vmul.f32 %v10875_v8, %v908_v17  ;;  %v1138_v40 = vld [vmem:[#allocation2 + $0x160] sm:$0xff]  ;;  %v9147_v45 = vld [vmem:[%s10266_s16 + $0x68] ss:$24 sps:$4 sm:$0xff]  }
 0x1ea   : > { %v1923_v63 = vadd.f32 %v1893_v43, %v1845_v41  ;;  %v1929_v56 = vadd.f32 %v1903_v27, %v1851_v54  ;;  %v2060_v51 = vsel %vm1032_vm0, %v2050_v20, %v2059_v53  ;;  %v10885_v2 = vrot.slane %v10864_v60, %v10560_v15  ;;  %v1204_v50 = vld [vmem:[#allocation2 + $0x160] sm:$0xfc]  ;;  %v1307_v14 = vld [vmem:[#allocation2 + $0x250] sm:$0xc0]  ;;  %v1784_v13 = vld [vmem:[#allocation2 + $0x1f0] sm:$0x3f] }
 0x1eb   : > { %v10889_v0 = vrot.slane %v10864_v60, %v10564_v18  ;;  %v10893_v47 = vrot.slane %v10864_v60, %v10566_v19  ;;  %1615 = vst [vmem:[#allocation3 + $0x18] sm:$0xf] %v1603_v26  ;;  %v950_v34 = vrot.slane %v938_v61, 2  ;;  %v10897_v17 = vrot.slane %v10864_v60, %v10569_v21  ;;  %v1210_v26 = vld [vmem:[#allocation2 + $0x190] sm:$0x3] }
 0x1ec   : > { %v1960_v43 = vadd.f32 %v1948_v9, %v1923_v63  ;;  %v1966_v27 = vadd.f32 %v1954_v49, %v1929_v56  ;;  %7287 = vmatpush1.bf16.msra.mxu1 %v9141_v36  ;;  %v1010_v41 = vmul.f32 %v10885_v2, %v974_v3  ;;  %v1016_v54 = vmul.f32 %v10885_v2, %v980_v42  ;;  %v9155_v9 = vld [vmem:[%s10266_s16 + $0x9c] ss:$24 sps:$4 sm:$0xff]  }
 0x1ed   : > { %v1114_v53 = vmul.f32 %v10889_v0, %v1078_v5  ;;  %v1120_v19 = vmul.f32 %v10889_v0, %v1084_v57  ;;  %7288 = vmatprep.subr.bf16.mxu1 %v9149_v6  ;;  %v962_v56 = vadd.f32 %v950_v34, %v884_v12  ;;  %v968_v61 = vadd.f32 %v950_v34, %v890_v62  ;;  %v1313_v6 = vld [vmem:[#allocation2 + $0x280] sm:$0x3f] }
 0x1ee   : > { %v2002_v49 = vadd.f32 %v1990_v11, %v1960_v43  ;;  %v2008_v63 = vadd.f32 %v1990_v11, %v1966_v27  ;;  %v1035_v21 = vrot.slane %v1010_v41, 4  ;;  %v1043_v36 = vrot.slane %v1016_v54, 4  ;;  %v9153_v11 = vld [vmem:[%s10266_s16 + $0x98] ss:$24 sps:$4 sm:$0xff]   ;;  %v10914_v12 = vld [vmem:[%s10284_s6 + $0x40] ss:$0 sm:$0xff] }
 0x1ef   : > { %v1168_v18 = vmul.f32 %v10893_v47, %v1138_v40  ;;  %v1240_v3 = vmul.f32 %v10897_v17, %v1204_v50  ;;  %v1246_v57 = vmul.f32 %v10897_v17, %v1210_v26  ;;  %v10910_v43 = vrot.slane %v10864_v60, %v10571_v22  ;;  %v1367_v26 = vld [vmem:[#allocation2 + $0x280] sm:$0xff] }
 0x1f0   : > { %v2080_v42 = vadd.f32 %v2050_v20, %v2002_v49  ;;  %v2086_v5 = vadd.f32 %v2060_v51, %v2008_v63  ;;  %7289 = vmatpush1.bf16.msra.mxu1 %v9147_v45  ;;  %v1044_v62 = vsel %vm1032_vm0, %v1035_v21, %v1043_v36  ;;  %v1065_v27 = vadd.f32 %v1035_v21, %v962_v56  ;;  %v9161_v20 = vld [vmem:[%s10266_s16 + $0xcc] ss:$24 sps:$4 sm:$0xff]   ;;  %v1433_v49 = vld [vmem:[#allocation2 + $0x280] sm:$0xfc] }
 0x1f1   : > { %v1180_v34 = vrot.slane %v1168_v18, 2  ;;  %v1264_v40 = vrot.slane %v1240_v3, 4  ;;  %7290 = vmatprep.subr.bf16.mxu1 %v9155_v9  ;;  %v1071_v41 = vadd.f32 %v1044_v62, %v968_v61  ;;  %v1272_v54 = vrot.slane %v1246_v57, 4  ;;  %v1439_v45 = vld [vmem:[#allocation2 + $0x2b0] sm:$0x3] }
 0x1f2   : > { %v2092_v51 = vadd.f32 %v2080_v42, %v10842_v35  ;;  %v2098_v50 = vadd.f32 %v2086_v5, %v10842_v35  ;;  %v1126_v63 = vadd.f32 %v1114_v53, %v1065_v27  ;;  %v1343_v22 = vmul.f32 %v10910_v43, %v1307_v14  ;;  %v1621_v21 = vld [vmem:[#allocation2 + $0xa0] sm:$0xc0]  ;;  %v9159_v42 = vld [vmem:[%s10266_s16 + $0xc8] ss:$24 sps:$4 sm:$0xff]  }
 0x1f3   : > { %v1349_v36 = vmul.f32 %v10910_v43, %v1313_v6  ;;  %v10924_v18 = vrot.slane %v10864_v60, %v10620_v55  ;;  %v1132_v3 = vadd.f32 %v1120_v19, %v1071_v41  ;;  %v1273_v61 = vsel %vm1032_vm0, %v1264_v40, %v1272_v54  ;;  %v1627_v6 = vld [vmem:[#allocation2 + $0xd0] sm:$0x3f]  ;;  %v9167_v60 = vld [vmem:[%s10266_s16 + $0xfc] ss:$24 sps:$4 sm:$0xff]   ;;  %v1778_v54 = vld [vmem:[#allocation2 + $0x1c0] sm:$0xc0] }
 0x1f4   : > { %v2104_v9 = vmax.f32 %v2092_v51, 0.0  ;;  %v2110_v56 = vmax.f32 %v2098_v50, 0.0  ;;  %7291 = vmatpush1.bf16.msra.mxu1 %v9153_v11  ;;  %v1192_v5 = vadd.f32 %v1180_v34, %v1126_v63  ;;  %v1469_v14 = vmul.f32 %v10914_v12, %v1433_v49  ;;  %v1657_v62 = vld [vmem:[#allocation2 + $0xd0] sm:$0xff]  ;;  %v9468_v55 = vld [vmem:[%s10260_s1] sm:$0x3f] }
 0x1f5   : > { %13302 = vst [vmem:[#allocation51_spill] sm:$0xff] %v10924_v18  ;;  %v1397_v53 = vmul.f32 %v10924_v18, %v1367_v26  ;;  %v1475_v57 = vmul.f32 %v10914_v12, %v1439_v45  ;;  %7292 = vmatprep.subr.bf16.mxu1 %v9161_v20  ;;  %v1198_v51 = vadd.f32 %v1180_v34, %v1132_v3  ;;  %v1699_v50 = vld [vmem:[#allocation2 + $0xd0] sm:$0xfc]  ;;  %v1705_v41 = vld [vmem:[#allocation2 + $0x100] sm:$0x3] }
 0x1f6   : > { %v2116_v27 = vpack.c.bf16 %v2110_v56, %v2104_v9  ;;  %v10934_v19 = vrot.slane %v9468_v55, %v10560_v15  ;;  %v1633_v11 = vmul.f32 %v1621_v21, %v10871_v24  ;;  %v1294_v26 = vadd.f32 %v1264_v40, %v1192_v5  ;;  %v1814_v55 = vld [vmem:[#allocation2 + $0x1f0] sm:$0xff]  ;;  %v9165_v56 = vld [vmem:[%s10266_s16 + $0xf8] ss:$24 sps:$4 sm:$0xff]  }
 0x1f7   : > { %v1409_v49 = vrot.slane %v1397_v53, 2  ;;  %v1493_v63 = vrot.slane %v1469_v14, 4  ;;  %v1501_v45 = vrot.slane %v1475_v57, 4  ;;  %v1300_v35 = vadd.f32 %v1273_v61, %v1198_v51  ;;  %v1856_v5 = vld [vmem:[#allocation2 + $0x1f0] sm:$0xfc] }
 0x1f8   : > { %13303 = vst [vmem:[#allocation52_spill] sm:$0xff] %v10934_v19  ;;  %v2128_v20 = vrot.slane %v2116_v27, 7  ;;  %v1639_v34 = vmul.f32 %v1627_v6, %v10871_v24  ;;  %v1663_v9 = vmul.f32 %v1657_v62, %v10875_v8  ;;  %7293 = vmatpush1.bf16.msra.mxu1 %v9159_v42  ;;  %v1355_v3 = vadd.f32 %v1343_v22, %v1294_v26  ;;  %v9173_v53 = vld [vmem:[%s10266_s16 + $0x12c] ss:$24 sps:$4 sm:$0xff]   ;;  %v1862_v42 = vld [vmem:[#allocation2 + $0x220] sm:$0x3] }
 0x1f9   : > { %v1502_v21 = vsel %vm1032_vm0, %v1493_v63, %v1501_v45  ;;  %v1711_v15 = vmul.f32 %v1699_v50, %v10885_v2  ;;  %v1717_v40 = vmul.f32 %v1705_v41, %v10885_v2  ;;  %7294 = vmatprep.subr.bf16.mxu1 %v9167_v60  ;;  %v1361_v14 = vadd.f32 %v1349_v36, %v1300_v35  ;;  %v1935_v45 = vld [vmem:[#allocation2 + $0x2e0] sm:$0xc0]  ;;  %v1941_v35 = vld [vmem:[#allocation2 + $0x310] sm:$0x3f] }
 0x1fa   : > { %2140 = vst [vmem:[#allocation3 + $0x18] sm:$0xf0] %v2128_v20  ;;  %v1675_v61 = vrot.slane %v1663_v9, 2  ;;  %v1790_v57 = vmul.f32 %v1778_v54, %v10889_v0  ;;  %v1796_v6 = vmul.f32 %v1784_v13, %v10889_v0  ;;  %v1421_v62 = vadd.f32 %v1409_v49, %v1355_v3  ;;  %v9171_v36 = vld [vmem:[%s10266_s16 + $0x128] ss:$24 sps:$4 sm:$0xff]  }
 0x1fb   : > { %v1735_v22 = vrot.slane %v1711_v15, 4  ;;  %v1743_v27 = vrot.slane %v1717_v40, 4  ;;  %v1820_v51 = vmul.f32 %v1814_v55, %v10893_v47  ;;  %v1427_v50 = vadd.f32 %v1409_v49, %v1361_v14  ;;  %v1971_v9 = vld [vmem:[#allocation2 + $0x310] sm:$0xff]  ;;  %v9179_v3 = vld [vmem:[%s10266_s16 + $0x15c] ss:$24 sps:$4 sm:$0xff]  }
 0x1fc   : > { %v1687_v41 = vadd.f32 %v1675_v61, %v1633_v11  ;;  %v1693_v26 = vadd.f32 %v1675_v61, %v1639_v34  ;;  %v1868_v60 = vmul.f32 %v1856_v5, %v10897_v17  ;;  %7295 = vmatpush1.bf16.msra.mxu1 %v9165_v56  ;;  %v1523_v20 = vadd.f32 %v1493_v63, %v1421_v62  ;;  %v2013_v40 = vld [vmem:[#allocation2 + $0x310] sm:$0xfc]  ;;  %v2019_v5 = vld [vmem:[#allocation2 + $0x340] sm:$0x3]  ;;  %v9177_v62 = vld [vmem:[%s10266_s16 + $0x158] ss:$24 sps:$4 sm:$0xff]  }
 0x1fd   : > { %v1744_v54 = vsel %vm1032_vm0, %v1735_v22, %v1743_v27  ;;  %v1832_v13 = vrot.slane %v1820_v51, 2  ;;  %v1874_v15 = vmul.f32 %v1862_v42, %v10897_v17  ;;  %7296 = vmatprep.subr.bf16.mxu1 %v9173_v53  ;;  %v1529_v55 = vadd.f32 %v1502_v21, %v1427_v50  ;;  %v2144_v51 = vld [vmem:[#allocation2 + $0x128] sm:$0xc0]  ;;  %v2150_v50 = vld [vmem:[#allocation2 + $0x158] sm:$0x3f] }
 0x1fe   : > { %v1765_v11 = vadd.f32 %v1735_v22, %v1687_v41  ;;  %v1771_v49 = vadd.f32 %v1744_v54, %v1693_v26  ;;  %v1892_v34 = vrot.slane %v1868_v60, 4  ;;  %v1566_v56 = vadd.f32 %v10934_v19, %v1523_v20  ;;  %v9185_v22 = vld [vmem:[%s10266_s16 + $0x18c] ss:$24 sps:$4 sm:$0xff]  }
 0x1ff   : > { %v1900_v14 = vrot.slane %v1874_v15, 4  ;;  %v1947_v63 = vmul.f32 %v1935_v45, %v10910_v43  ;;  %v1953_v61 = vmul.f32 %v1941_v35, %v10910_v43  ;;  %v1572_v42 = vadd.f32 %v10934_v19, %v1529_v55  ;;  %v2180_v35 = vld [vmem:[#allocation2 + $0x158] sm:$0xff]  ;;  %v2300_v55 = vld [vmem:[#allocation2 + $0x248] sm:$0xc0] }
 0x200   : > { %v1802_v27 = vadd.f32 %v1790_v57, %v1765_v11  ;;  %v1808_v53 = vadd.f32 %v1796_v6, %v1771_v49  ;;  %v1977_v21 = vmul.f32 %v1971_v9, %v10924_v18  ;;  %7297 = vmatpush1.bf16.msra.mxu1 %v9171_v36  ;;  %v1578_v26 = vmax.f32 %v1566_v56, 0.0  ;;  %v2222_v54 = vld [vmem:[#allocation2 + $0x158] sm:$0xfc]  ;;  %v2228_v9 = vld [vmem:[#allocation2 + $0x188] sm:$0x3] }
 0x201   : > { %v5284_v41 = vld [vmem:[#allocation3 + $0x18] sm:$0xff]  ;;  %v1901_v60 = vsel %vm1032_vm0, %v1892_v34, %v1900_v14  ;;  %v2025_v20 = vmul.f32 %v10914_v12, %v2013_v40  ;;  %v2031_v45 = vmul.f32 %v10914_v12, %v2019_v5  ;;  %7298 = vmatprep.subr.bf16.mxu1 %v9179_v3  ;;  %v1584_v57 = vmax.f32 %v1572_v42, 0.0  ;;  %v9183_v5 = vld [vmem:[%s10266_s16 + $0x188] ss:$24 sps:$4 sm:$0xff]  }
 0x202   : > { %7170 = vmatprep.mubr.bf16.mxu0 %v5284_v41  ;;  %v1844_v6 = vadd.f32 %v1832_v13, %v1802_v27  ;;  %v1850_v15 = vadd.f32 %v1832_v13, %v1808_v53  ;;  %v1989_v36 = vrot.slane %v1977_v21, 2  ;;  %v2156_v56 = vmul.f32 %v2144_v51, %v10583_v30  ;;  %v2306_v42 = vld [vmem:[#allocation2 + $0x278] sm:$0x3f]  ;;  %v9191_v53 = vld [vmem:[%s10266_s16 + $0x1bc] ss:$24 sps:$4 sm:$0xff]  }
 0x203   : > { %v2049_v11 = vrot.slane %v2025_v20, 4  ;;  %v2057_v49 = vrot.slane %v2031_v45, 4  ;;  %v2162_v40 = vmul.f32 %v2150_v50, %v10583_v30  ;;  %v1590_v14 = vpack.c.bf16 %v1584_v57, %v1578_v26  ;;  %v2336_v27 = vld [vmem:[#allocation2 + $0x278] sm:$0xff]  ;;  %v2384_v45 = vld [vmem:[#allocation2 + $0x2a8] sm:$0x3] }
 0x204   : > { %v1922_v12 = vadd.f32 %v1892_v34, %v1844_v6  ;;  %v1928_v3 = vadd.f32 %v1901_v60, %v1850_v15  ;;  %7299 = vmatpush1.bf16.msra.mxu1 %v9177_v62  ;;  %v2186_v41 = vmul.f32 %v2180_v35, %v10587_v31  ;;  %v2234_v21 = vmul.f32 %v2222_v54, %v10591_v32  ;;  %v2378_v60 = vld [vmem:[#allocation2 + $0x278] sm:$0xfc] }
 0x205   : > { %v2058_v13 = vsel %vm1032_vm0, %v2049_v11, %v2057_v49  ;;  %7300 = vmatprep.subr.bf16.mxu1 %v9185_v22  ;;  %v2240_v20 = vmul.f32 %v2228_v9, %v10591_v32  ;;  %v2312_v51 = vmul.f32 %v2300_v55, %v10595_v33  ;;  %v1602_v50 = vrot.slane %v1590_v14, 3  ;;  %v9189_v9 = vld [vmem:[%s10266_s16 + $0x1b8] ss:$24 sps:$4 sm:$0xff]   ;;  %v2457_v55 = vld [vmem:[#allocation2 + $0x368] sm:$0xc0] }
 0x206   : > { %v1959_v34 = vadd.f32 %v1947_v63, %v1922_v12  ;;  %v1965_v26 = vadd.f32 %v1953_v61, %v1928_v3  ;;  %v2198_v62 = vrot.slane %v2186_v41, 2  ;;  %v2258_v35 = vrot.slane %v2234_v21, 4  ;;  %v2463_v14 = vld [vmem:[#allocation2 + $0x398] sm:$0x3f] }
 0x207   : > { %v2265_v57 = vrot.slane %v2240_v20, 4  ;;  %v2318_v6 = vmul.f32 %v2306_v42, %v10595_v33  ;;  %v2342_v22 = vmul.f32 %v2336_v27, %v10599_v37  ;;  %1614 = vst [vmem:[#allocation3 + $0x10] sm:$0xf] %v1602_v50  ;;  %v2390_v12 = vmul.f32 %v2378_v60, %v10603_v38  ;;  %v2541_v20 = vld [vmem:[#allocation2 + $0x3c8] sm:$0x3] }
 0x208   : > { %v2001_v15 = vadd.f32 %v1989_v36, %v1959_v34  ;;  %v2007_v54 = vadd.f32 %v1989_v36, %v1965_v26  ;;  %7301 = vmatpush1.bf16.msra.mxu1 %v9183_v5  ;;  %v2210_v49 = vadd.f32 %v2198_v62, %v2156_v56  ;;  %v2216_v18 = vadd.f32 %v2198_v62, %v2162_v40  ;;  %v2493_v36 = vld [vmem:[#allocation2 + $0x398] sm:$0xff] }
 0x209   : > { %7302 = vmatprep.subr.bf16.mxu1 %v9191_v53  ;;  %v2266_v63 = vsel %vm1032_vm0, %v2258_v35, %v2265_v57  ;;  %v2354_v61 = vrot.slane %v2342_v22, 2  ;;  %v2396_v3 = vmul.f32 %v2384_v45, %v10603_v38  ;;  %v2535_v5 = vld [vmem:[#allocation2 + $0x398] sm:$0xfc]  ;;  %v2414_v56 = vrot.slane %v2390_v12, 4  ;;  %v10984_v45 = vld [vmem:[%s10284_s6 + $0x38] ss:$0 sm:$0xff] }
 0x20a   : > { %v2079_v41 = vadd.f32 %v2049_v11, %v2001_v15  ;;  %v2085_v42 = vadd.f32 %v2058_v13, %v2007_v54  ;;  %v2288_v27 = vadd.f32 %v2258_v35, %v2210_v49  ;;  %v2294_v21 = vadd.f32 %v2266_v63, %v2216_v18  ;;  %v2667_v11 = vld [vmem:[#allocation2 + $0x1b8] sm:$0xc0]  ;;  %v2673_v22 = vld [vmem:[#allocation2 + $0x1e8] sm:$0x3f] }
 0x20b   : > { %v2421_v40 = vrot.slane %v2396_v3, 4  ;;  %v2469_v50 = vmul.f32 %v2457_v55, %v10607_v39  ;;  %v2475_v53 = vmul.f32 %v2463_v14, %v10607_v39  ;;  %v2499_v13 = vmul.f32 %v2493_v36, %v10647_v23  ;;  %v2703_v15 = vld [vmem:[#allocation2 + $0x1e8] sm:$0xff] }
 0x20c   : > { %v2091_v34 = vadd.f32 %v2079_v41, %v10934_v19  ;;  %v2097_v26 = vadd.f32 %v2085_v42, %v10934_v19  ;;  %v2324_v62 = vadd.f32 %v2312_v51, %v2288_v27  ;;  %v2330_v60 = vadd.f32 %v2318_v6, %v2294_v21  ;;  %7303 = vmatpush1.bf16.msra.mxu1 %v9189_v9  ;;  %v2745_v51 = vld [vmem:[#allocation2 + $0x1e8] sm:$0xfc]  ;;  %v2751_v6 = vld [vmem:[#allocation2 + $0x218] sm:$0x3]  ;;  %v2823_v41 = vld [vmem:[#allocation2 + $0x2d8] sm:$0xc0] }
 0x20d   : > { %v2422_v18 = vsel %vm1032_vm0, %v2414_v56, %v2421_v40  ;;  %v2547_v35 = vmul.f32 %v10984_v45, %v2535_v5  ;;  %v2553_v57 = vmul.f32 %v10984_v45, %v2541_v20  ;;  %v2511_v63 = vrot.slane %v2499_v13, 2  ;;  %v2829_v5 = vld [vmem:[#allocation2 + $0x308] sm:$0x3f] }
 0x20e   : > { %v2103_v54 = vmax.f32 %v2091_v34, 0.0  ;;  %v2109_v49 = vmax.f32 %v2097_v26, 0.0  ;;  %v2366_v55 = vadd.f32 %v2354_v61, %v2324_v62  ;;  %v2372_v14 = vadd.f32 %v2354_v61, %v2330_v60  ;;  %v2859_v20 = vld [vmem:[#allocation2 + $0x308] sm:$0xff]  ;;  %v2907_v60 = vld [vmem:[#allocation2 + $0x338] sm:$0x3] }
 0x20f   : > { %v2571_v9 = vrot.slane %v2547_v35, 4  ;;  %v2578_v12 = vrot.slane %v2553_v57, 4  ;;  %v2679_v3 = vmul.f32 %v2667_v11, %v10583_v30  ;;  %v2685_v36 = vmul.f32 %v2673_v22, %v10583_v30  ;;  %v2901_v40 = vld [vmem:[#allocation2 + $0x308] sm:$0xfc]  ;;  %v2980_v35 = vld [vmem:[#allocation2 + $0x3f8] sm:$0xc0] }
 0x210   : > { %v2115_v42 = vpack.c.bf16 %v2109_v49, %v2103_v54  ;;  %v2444_v27 = vadd.f32 %v2414_v56, %v2366_v55  ;;  %v2450_v21 = vadd.f32 %v2422_v18, %v2372_v14  ;;  %v2709_v61 = vmul.f32 %v2703_v15, %v10587_v31  ;;  %v9195_v55 = vld [vmem:[%s10266_s16 + $0x1e8] ss:$24 sps:$4 sm:$0xff]  }
 0x211   : > { %v2579_v34 = vsel %vm1032_vm0, %v2571_v9, %v2578_v12  ;;  %v2757_v26 = vmul.f32 %v2745_v51, %v10591_v32  ;;  %v2763_v62 = vmul.f32 %v2751_v6, %v10591_v32  ;;  %v2835_v18 = vmul.f32 %v2823_v41, %v10595_v33  ;;  %v2986_v12 = vld [vmem:[#allocation2 + $0x428] sm:$0x3f] }
 0x212   : > { %v2127_v11 = vrot.slane %v2115_v42, 7  ;;  %v2481_v13 = vadd.f32 %v2469_v50, %v2444_v27  ;;  %v2487_v56 = vadd.f32 %v2475_v53, %v2450_v21  ;;  %v2721_v57 = vrot.slane %v2709_v61, 2  ;;  %v9197_v50 = vld [vmem:[%s10266_s16 + $0x1ec] ss:$24 sps:$4 sm:$0xff]   ;;  %v3016_v21 = vld [vmem:[#allocation2 + $0x428] sm:$0xff] }
 0x213   : > { %v2781_v22 = vrot.slane %v2757_v26, 4  ;;  %v2788_v54 = vrot.slane %v2763_v62, 4  ;;  %v2841_v49 = vmul.f32 %v2829_v5, %v10595_v33  ;;  %v2865_v51 = vmul.f32 %v2859_v20, %v10599_v37  ;;  %v3058_v62 = vld [vmem:[#allocation2 + $0x428] sm:$0xfc]  ;;  %7304 = vmatprep.subr.bf16.mxu1 %v9197_v50  ;;  %v2179_v50 = vld [vmem:[#allocation2 + $0x150] sm:$0xff] }
 0x214   : > { %2139 = vst [vmem:[#allocation3 + $0x10] sm:$0xf0] %v2127_v11  ;;  %v2523_v15 = vadd.f32 %v2511_v63, %v2481_v13  ;;  %v2529_v14 = vadd.f32 %v2511_v63, %v2487_v56  ;;  %v2913_v6 = vmul.f32 %v2901_v40, %v10603_v38  ;;  %v2733_v53 = vadd.f32 %v2721_v57, %v2679_v3  ;;  %v9203_v20 = vld [vmem:[%s10266_s16 + $0x21c] ss:$24 sps:$4 sm:$0xff]   ;;  %v9201_v56 = vld [vmem:[%s10266_s16 + $0x218] ss:$24 sps:$4 sm:$0xff]  }
 0x215   : > { %v2739_v42 = vadd.f32 %v2721_v57, %v2685_v36  ;;  %v2789_v41 = vsel %vm1032_vm0, %v2781_v22, %v2788_v54  ;;  %v2919_v27 = vmul.f32 %v2907_v60, %v10603_v38  ;;  %v2877_v63 = vrot.slane %v2865_v51, 2  ;;  %v3064_v36 = vld [vmem:[#allocation2 + $0x458] sm:$0x3]  ;;  %7305 = vmatpush1.bf16.msra.mxu1 %v9195_v55  ;;  %v9132_v57 = vld [vmem:[%s10266_s16 + $0x600] ss:$24 sps:$4 sm:$0xff]  }
 0x216   : > { %v2601_v5 = vadd.f32 %v2571_v9, %v2523_v15  ;;  %v2607_v61 = vadd.f32 %v2579_v34, %v2529_v14  ;;  %v2937_v26 = vrot.slane %v2913_v6, 4  ;;  %v2811_v40 = vadd.f32 %v2781_v22, %v2733_v53  ;;  %v9140_v60 = vld [vmem:[%s10266_s16 + $0x634] ss:$24 sps:$4 sm:$0xff]   ;;  %v2143_v14 = vld [vmem:[#allocation2 + $0x120] sm:$0xc0]  ;;  %7306 = vmatprep.subr.bf16.mxu1 %v9203_v20 }
 0x217   : > { %v2817_v11 = vadd.f32 %v2789_v41, %v2739_v42  ;;  %v2944_v13 = vrot.slane %v2919_v27, 4  ;;  %v2992_v3 = vmul.f32 %v2980_v35, %v10607_v39  ;;  %v2998_v34 = vmul.f32 %v2986_v12, %v10607_v39  ;;  %v2149_v55 = vld [vmem:[#allocation2 + $0x150] sm:$0x3f] }
 0x218   : > { %v2613_v54 = vadd.f32 %v2601_v5, %v10662_v46  ;;  %v2619_v9 = vadd.f32 %v2607_v61, %v10662_v46  ;;  %v3022_v15 = vmul.f32 %v3016_v21, %v10647_v23  ;;  %v2847_v22 = vadd.f32 %v2835_v18, %v2811_v40  ;;  %v2221_v53 = vld [vmem:[#allocation2 + $0x150] sm:$0xfc]  ;;  %v2227_v5 = vld [vmem:[#allocation2 + $0x180] sm:$0x3]  ;;  %v2299_v40 = vld [vmem:[#allocation2 + $0x240] sm:$0xc0] }
 0x219   : > { %v2853_v51 = vadd.f32 %v2841_v49, %v2817_v11  ;;  %v2945_v6 = vsel %vm1032_vm0, %v2937_v26, %v2944_v13  ;;  %v11013_v35 = vmul.f32 %v10984_v45, %v3058_v62  ;;  %v3076_v12 = vmul.f32 %v10984_v45, %v3064_v36  ;;  %7307 = vmatpush1.bf16.msra.mxu1 %v9201_v56  ;;  %v9138_v45 = vld [vmem:[%s10266_s16 + $0x630] ss:$24 sps:$4 sm:$0xff]  }
 0x21a   : > { %v2625_v42 = vmax.f32 %v2613_v54, 0.0  ;;  %v2631_v41 = vmax.f32 %v2619_v9, 0.0  ;;  %v3034_v27 = vrot.slane %v3022_v15, 2  ;;  %v2889_v61 = vadd.f32 %v2877_v63, %v2847_v22  ;;  %v2305_v22 = vld [vmem:[#allocation2 + $0x270] sm:$0x3f] }
 0x21b   : > { %v5283_v21 = vld [vmem:[#allocation3 + $0x10] sm:$0xff]  ;;  %v2895_v20 = vadd.f32 %v2877_v63, %v2853_v51  ;;  %v3094_v18 = vrot.slane %v11013_v35, 4  ;;  %v2155_v49 = vmul.f32 %v2143_v14, %v10703_v1  ;;  %v3101_v11 = vrot.slane %v3076_v12, 4 }
 0x21c   : > { %7171 = vmatmul.mubr.bf16.vlgmr.msra.gmra.mrb[0].mxu0 %v5283_v21  ;;  %v2637_v62 = vpack.c.bf16 %v2631_v41, %v2625_v42  ;;  %v2161_v13 = vmul.f32 %v2149_v55, %v10703_v1  ;;  %v2185_v54 = vmul.f32 %v2179_v50, %v10707_v29  ;;  %v2967_v36 = vadd.f32 %v2937_v26, %v2889_v61  ;;  %v2335_v14 = vld [vmem:[#allocation2 + $0x270] sm:$0xff]  ;;  %v2456_v61 = vld [vmem:[#allocation2 + $0x360] sm:$0xc0] }
 0x21d   : > { %7212 = vmatpush1.bf16.msra.mxu0 %v9132_v57  ;;  %v2973_v9 = vadd.f32 %v2945_v6, %v2895_v20  ;;  %v2233_v63 = vmul.f32 %v2221_v53, %v10711_v16  ;;  %v2239_v15 = vmul.f32 %v2227_v5, %v10711_v16  ;;  %v9146_v51 = vld [vmem:[%s10266_s16 + $0x664] ss:$24 sps:$4 sm:$0xff]   ;;  %v3102_v35 = vsel %vm1032_vm0, %v3094_v18, %v3101_v11  ;;  %v2383_v53 = vld [vmem:[#allocation2 + $0x2a0] sm:$0x3]  ;;  %v9144_v20 = vld [vmem:[%s10266_s16 + $0x660] ss:$24 sps:$4 sm:$0xff]  }
 0x21e   : > { %7213 = vmatprep.subr.bf16.mxu0 %v9140_v60  ;;  %v2649_v56 = vrot.slane %v2637_v62, 3  ;;  %v2197_v42 = vrot.slane %v2185_v54, 2  ;;  %v2311_v55 = vmul.f32 %v2299_v40, %v10721_v52  ;;  %v2377_v50 = vld [vmem:[#allocation2 + $0x270] sm:$0xfc]  ;;  %v3004_v57 = vadd.f32 %v2992_v3, %v2967_v36  ;;  %v13304_v3 = vld [vmem:[#allocation46_spill] sm:$0xff] }
 0x21f   : > { %v3010_v41 = vadd.f32 %v2998_v34, %v2973_v9  ;;  %v2257_v26 = vrot.slane %v2233_v63, 4  ;;  %v2263_v6 = vrot.slane %v2239_v15, 4  ;;  %v2317_v60 = vmul.f32 %v2305_v22, %v10721_v52  ;;  %v2462_v54 = vld [vmem:[#allocation2 + $0x390] sm:$0x3f]  ;;  %v9152_v36 = vld [vmem:[%s10266_s16 + $0x694] ss:$24 sps:$4 sm:$0xff]  }
 0x220   : > { %2661 = vst [vmem:[#allocation3 + $0x38] sm:$0xf] %v2649_v56  ;;  %v2209_v12 = vadd.f32 %v2197_v42, %v2155_v49  ;;  %v2215_v5 = vadd.f32 %v2197_v42, %v2161_v13  ;;  %v2341_v21 = vmul.f32 %v2335_v14, %v10725_v10  ;;  %v3046_v62 = vadd.f32 %v3034_v27, %v3004_v57  ;;  %v2492_v15 = vld [vmem:[#allocation2 + $0x390] sm:$0xff]  ;;  %v13305_v56 = vld [vmem:[#allocation47_spill] sm:$0xff] }
 0x221   : > { %7214 = vmatpush1.bf16.msra.mxu0 %v9138_v45  ;;  %v3052_v11 = vadd.f32 %v3034_v27, %v3010_v41  ;;  %v2264_v40 = vsel %vm1032_vm0, %v2257_v26, %v2263_v6  ;;  %v2389_v34 = vmul.f32 %v2377_v50, %v13304_v3  ;;  %v2395_v63 = vmul.f32 %v2383_v53, %v13304_v3  ;;  %v2534_v22 = vld [vmem:[#allocation2 + $0x390] sm:$0xfc]  ;;  %v2540_v57 = vld [vmem:[#allocation2 + $0x3c0] sm:$0x3] }
 0x222   : > { %7215 = vmatprep.subr.bf16.mxu0 %v9146_v51  ;;  %v2287_v9 = vadd.f32 %v2257_v26, %v2209_v12  ;;  %v2293_v49 = vadd.f32 %v2264_v40, %v2215_v5  ;;  %v2353_v13 = vrot.slane %v2341_v21, 2  ;;  %v3124_v45 = vadd.f32 %v3094_v18, %v3046_v62  ;;  %v9150_v6 = vld [vmem:[%s10266_s16 + $0x690] ss:$24 sps:$4 sm:$0xff]   ;;  %v9158_v12 = vld [vmem:[%s10266_s16 + $0x6c4] ss:$24 sps:$4 sm:$0xff]  }
 0x223   : > { %v3130_v14 = vadd.f32 %v3102_v35, %v3052_v11  ;;  %v2413_v27 = vrot.slane %v2389_v34, 4  ;;  %v2468_v42 = vmul.f32 %v2456_v61, %v13305_v56  ;;  %v2419_v51 = vrot.slane %v2395_v63, 4  ;;  %v13306_v21 = vld [vmem:[#allocation48_spill] sm:$0xff]  ;;  %v11041_v18 = vld [vmem:[%s10284_s6 + $0x30] ss:$0 sm:$0xff]  ;;  %v2702_v34 = vld [vmem:[#allocation2 + $0x1e0] sm:$0xff] }
 0x224   : > { %v2323_v50 = vadd.f32 %v2311_v55, %v2287_v9  ;;  %v2329_v41 = vadd.f32 %v2317_v60, %v2293_v49  ;;  %v2474_v26 = vmul.f32 %v2462_v54, %v13305_v56  ;;  %v3136_v5 = vadd.f32 %v3124_v45, %v10662_v46  ;;  %v2666_v61 = vld [vmem:[#allocation2 + $0x1b0] sm:$0xc0]  ;;  %v2672_v11 = vld [vmem:[#allocation2 + $0x1e0] sm:$0x3f]  ;;  %v2750_v45 = vld [vmem:[#allocation2 + $0x210] sm:$0x3] }
 0x225   : > { %7216 = vmatpush1.bf16.msra.mxu0 %v9144_v20  ;;  %v3142_v53 = vadd.f32 %v3130_v14, %v10662_v46  ;;  %v2498_v40 = vmul.f32 %v2492_v15, %v13306_v21  ;;  %v2546_v35 = vmul.f32 %v11041_v18, %v2534_v22  ;;  %v2420_v62 = vsel %vm1032_vm0, %v2413_v27, %v2419_v51  ;;  %v2744_v54 = vld [vmem:[#allocation2 + $0x1e0] sm:$0xfc] }
 0x226   : > { %7217 = vmatprep.subr.bf16.mxu0 %v9152_v36  ;;  %v2365_v55 = vadd.f32 %v2353_v13, %v2323_v50  ;;  %v2371_v60 = vadd.f32 %v2353_v13, %v2329_v41  ;;  %v2552_v20 = vmul.f32 %v11041_v18, %v2540_v57  ;;  %v3148_v9 = vmax.f32 %v3136_v5, 0.0  ;;  %v2822_v13 = vld [vmem:[#allocation2 + $0x2d0] sm:$0xc0]  ;;  %v9156_v50 = vld [vmem:[%s10266_s16 + $0x6c0] ss:$24 sps:$4 sm:$0xff]  }
 0x227   : > { %v3154_v49 = vmax.f32 %v3142_v53, 0.0  ;;  %v2510_v63 = vrot.slane %v2498_v40, 2  ;;  %v2570_v15 = vrot.slane %v2546_v35, 4  ;;  %v2678_v36 = vmul.f32 %v2666_v61, %v10703_v1  ;;  %v2828_v53 = vld [vmem:[#allocation2 + $0x300] sm:$0x3f] }
 0x228   : > { %v2443_v14 = vadd.f32 %v2413_v27, %v2365_v55  ;;  %v2449_v22 = vadd.f32 %v2420_v62, %v2371_v60  ;;  %v2576_v46 = vrot.slane %v2552_v20, 4  ;;  %v2684_v57 = vmul.f32 %v2672_v11, %v10703_v1  ;;  %v9164_v40 = vld [vmem:[%s10266_s16 + $0x6f4] ss:$24 sps:$4 sm:$0xff]  }
 0x229   : > { %7218 = vmatpush1.bf16.msra.mxu0 %v9150_v6  ;;  %v3160_v41 = vpack.c.bf16 %v3154_v49, %v3148_v9  ;;  %v2708_v51 = vmul.f32 %v2702_v34, %v10707_v29  ;;  %v2756_v5 = vmul.f32 %v2744_v54, %v10711_v16  ;;  %v2762_v61 = vmul.f32 %v2750_v45, %v10711_v16  ;;  %v2858_v60 = vld [vmem:[#allocation2 + $0x300] sm:$0xff]  ;;  %v2906_v34 = vld [vmem:[#allocation2 + $0x330] sm:$0x3] }
 0x22a   : > { %7219 = vmatprep.subr.bf16.mxu0 %v9158_v12  ;;  %v2480_v35 = vadd.f32 %v2468_v42, %v2443_v14  ;;  %v2486_v27 = vadd.f32 %v2474_v26, %v2449_v22  ;;  %v2577_v55 = vsel %vm1032_vm0, %v2570_v15, %v2576_v46  ;;  %v2900_v6 = vld [vmem:[#allocation2 + $0x300] sm:$0xfc]  ;;  %v2834_v11 = vmul.f32 %v2822_v13, %v10721_v52  ;;  %v9162_v26 = vld [vmem:[%s10266_s16 + $0x6f0] ss:$24 sps:$4 sm:$0xff]  }
 0x22b   : > { %v3172_v62 = vrot.slane %v3160_v41, 7  ;;  %v2720_v20 = vrot.slane %v2708_v51, 2  ;;  %v2780_v9 = vrot.slane %v2756_v5, 4  ;;  %v2786_v12 = vrot.slane %v2762_v61, 4  ;;  %v2979_v41 = vld [vmem:[#allocation2 + $0x3f0] sm:$0xc0] }
 0x22c   : > { %v2522_v54 = vadd.f32 %v2510_v63, %v2480_v35  ;;  %v2528_v49 = vadd.f32 %v2510_v63, %v2486_v27  ;;  %v2840_v42 = vmul.f32 %v2828_v53, %v10721_v52  ;;  %v2864_v45 = vmul.f32 %v2858_v60, %v10725_v10  ;;  %v9170_v51 = vld [vmem:[%s10266_s16 + $0x724] ss:$24 sps:$4 sm:$0xff]   ;;  %v3015_v35 = vld [vmem:[#allocation2 + $0x420] sm:$0xff] }
 0x22d   : > { %7220 = vmatpush1.bf16.msra.mxu0 %v9156_v50  ;;  %3184 = vst [vmem:[#allocation3 + $0x38] sm:$0xf0] %v3172_v62  ;;  %v2732_v46 = vadd.f32 %v2720_v20, %v2678_v36  ;;  %v2738_v14 = vadd.f32 %v2720_v20, %v2684_v57  ;;  %v2912_v22 = vmul.f32 %v2900_v6, %v13304_v3  ;;  %v2985_v50 = vld [vmem:[#allocation2 + $0x420] sm:$0x3f]  ;;  %v13307_v20 = vld [vmem:[#allocation49_spill] sm:$0xff] }
 0x22e   : > { %7221 = vmatprep.subr.bf16.mxu0 %v9164_v40  ;;  %v2600_v13 = vadd.f32 %v2570_v15, %v2522_v54  ;;  %v2606_v5 = vadd.f32 %v2577_v55, %v2528_v49  ;;  %v2787_v63 = vsel %vm1032_vm0, %v2780_v9, %v2786_v12  ;;  %v2918_v53 = vmul.f32 %v2906_v34, %v13304_v3  ;;  %v3057_v60 = vld [vmem:[#allocation2 + $0x420] sm:$0xfc]  ;;  %v3063_v55 = vld [vmem:[#allocation2 + $0x450] sm:$0x3] }
 0x22f   : > { %v2810_v27 = vadd.f32 %v2780_v9, %v2732_v46  ;;  %v2816_v36 = vadd.f32 %v2787_v63, %v2738_v14  ;;  %v2876_v57 = vrot.slane %v2864_v45, 2  ;;  %v2936_v61 = vrot.slane %v2912_v22, 4  ;;  %v9168_v62 = vld [vmem:[%s10266_s16 + $0x720] ss:$24 sps:$4 sm:$0xff]   ;;  %v9176_v54 = vld [vmem:[%s10266_s16 + $0x754] ss:$24 sps:$4 sm:$0xff]  }
 0x230   : > { %v2612_v6 = vadd.f32 %v2600_v13, %v13307_v20  ;;  %v2618_v40 = vadd.f32 %v2606_v5, %v13307_v20  ;;  %v2942_v10 = vrot.slane %v2918_v53, 4  ;;  %v2991_v15 = vmul.f32 %v2979_v41, %v13305_v56  ;;  %v2146_v46 = vld [vmem:[#allocation2 + $0x138] sm:$0xc0]  ;;  %v2152_v14 = vld [vmem:[#allocation2 + $0x168] sm:$0x3f] }
 0x231   : > { %7222 = vmatpush1.bf16.msra.mxu0 %v9162_v26  ;;  %v2846_v49 = vadd.f32 %v2834_v11, %v2810_v27  ;;  %v2852_v34 = vadd.f32 %v2840_v42, %v2816_v36  ;;  %v2997_v12 = vmul.f32 %v2985_v50, %v13305_v56  ;;  %v3021_v9 = vmul.f32 %v3015_v35, %v13306_v21  ;;  %v2182_v41 = vld [vmem:[#allocation2 + $0x168] sm:$0xff]  ;;  %v2230_v50 = vld [vmem:[#allocation2 + $0x198] sm:$0x3]  ;;  %v2302_v27 = vld [vmem:[#allocation2 + $0x258] sm:$0xc0] }
 0x232   : > { %7223 = vmatprep.subr.bf16.mxu0 %v9170_v51  ;;  %v2624_v45 = vmax.f32 %v2612_v6, 0.0  ;;  %v2630_v22 = vmax.f32 %v2618_v40, 0.0  ;;  %v2943_v13 = vsel %vm1032_vm0, %v2936_v61, %v2942_v10  ;;  %v3069_v5 = vmul.f32 %v11041_v18, %v3057_v60  ;;  %v2224_v63 = vld [vmem:[#allocation2 + $0x168] sm:$0xfc]  ;;  %v9174_v40 = vld [vmem:[%s10266_s16 + $0x750] ss:$24 sps:$4 sm:$0xff]  }
 0x233   : > { %v2888_v26 = vadd.f32 %v2876_v57, %v2846_v49  ;;  %v2894_v53 = vadd.f32 %v2876_v57, %v2852_v34  ;;  %v3033_v11 = vrot.slane %v3021_v9, 2  ;;  %v3075_v42 = vmul.f32 %v11041_v18, %v3063_v55  ;;  %v2308_v34 = vld [vmem:[#allocation2 + $0x288] sm:$0x3f]  ;;  %v2861_v56 = vld [vmem:[#allocation2 + $0x318] sm:$0xff] }
 0x234   : > { %v5288_v35 = vld [vmem:[#allocation3 + $0x38] sm:$0xff]  ;;  %v2636_v36 = vpack.c.bf16 %v2630_v22, %v2624_v45  ;;  %v3093_v51 = vrot.slane %v3069_v5, 4  ;;  %v2158_v6 = vmul.f32 %v2146_v46, %v10787_v4  ;;  %v2164_v10 = vmul.f32 %v2152_v14, %v10787_v4  ;;  %v2338_v18 = vld [vmem:[#allocation2 + $0x288] sm:$0xff] }
 0x235   : > { %7224 = vmatpush1.bf16.msra.mxu0 %v9168_v62  ;;  %7107 = vmatprep.mubr.bf16.mxu1 %v5288_v35  ;;  %v2966_v60 = vadd.f32 %v2936_v61, %v2888_v26  ;;  %v2972_v21 = vadd.f32 %v2943_v13, %v2894_v53  ;;  %v3099_v49 = vrot.slane %v3075_v42, 4  ;;  %v2188_v57 = vmul.f32 %v2182_v41, %v10791_v7  ;;  %v9182_v55 = vld [vmem:[%s10266_s16 + $0x784] ss:$24 sps:$4 sm:$0xff]   ;;  %v2386_v41 = vld [vmem:[#allocation2 + $0x2b8] sm:$0x3] }
 0x236   : > { %7225 = vmatprep.subr.bf16.mxu0 %v9176_v54  ;;  %v2648_v9 = vrot.slane %v2636_v36, 3  ;;  %v2236_v45 = vmul.f32 %v2224_v63, %v10795_v28  ;;  %v2242_v46 = vmul.f32 %v2230_v50, %v10795_v28  ;;  %v2314_v14 = vmul.f32 %v2302_v27, %v10805_v25  ;;  %v2380_v5 = vld [vmem:[#allocation2 + $0x288] sm:$0xfc]  ;;  %v9188_v36 = vld [vmem:[%s10266_s16 + $0x7b4] ss:$24 sps:$4 sm:$0xff]  }
 0x237   : > { %v3003_v62 = vadd.f32 %v2991_v15, %v2966_v60  ;;  %v3009_v22 = vadd.f32 %v2997_v12, %v2972_v21  ;;  %v3100_v61 = vsel %vm1032_vm0, %v3093_v51, %v3099_v49  ;;  %v2200_v13 = vrot.slane %v2188_v57, 2  ;;  %v9180_v63 = vld [vmem:[%s10266_s16 + $0x780] ss:$24 sps:$4 sm:$0xff]   ;;  %v2459_v21 = vld [vmem:[#allocation2 + $0x378] sm:$0xc0] }
 0x238   : > { %2660 = vst [vmem:[#allocation3 + $0x30] sm:$0xf] %v2648_v9  ;;  %v2260_v26 = vrot.slane %v2236_v45, 4  ;;  %v2269_v54 = vrot.slane %v2242_v46, 4  ;;  %v2320_v53 = vmul.f32 %v2308_v34, %v10805_v25  ;;  %v2344_v42 = vmul.f32 %v2338_v18, %v10809_v48  ;;  %v2465_v12 = vld [vmem:[#allocation2 + $0x3a8] sm:$0x3f] }
 0x239   : > { %7226 = vmatpush1.bf16.msra.mxu0 %v9174_v40  ;;  %v3045_v50 = vadd.f32 %v3033_v11, %v3003_v62  ;;  %v3051_v35 = vadd.f32 %v3033_v11, %v3009_v22  ;;  %v2212_v27 = vadd.f32 %v2200_v13, %v2158_v6  ;;  %v2218_v15 = vadd.f32 %v2200_v13, %v2164_v10  ;;  %v2495_v46 = vld [vmem:[#allocation2 + $0x3a8] sm:$0xff]  ;;  %v2543_v6 = vld [vmem:[#allocation2 + $0x3d8] sm:$0x3]  ;;  %v9186_v10 = vld [vmem:[%s10266_s16 + $0x7b0] ss:$24 sps:$4 sm:$0xff]  }
 0x23a   : > { %7227 = vmatprep.subr.bf16.mxu0 %v9182_v55  ;;  %v2270_v60 = vsel %vm1032_vm0, %v2260_v26, %v2269_v54  ;;  %v2356_v49 = vrot.slane %v2344_v42, 2  ;;  %v2392_v57 = vmul.f32 %v2380_v5, %v10813_v58  ;;  %v2398_v34 = vmul.f32 %v2386_v41, %v10813_v58  ;;  %v2537_v11 = vld [vmem:[#allocation2 + $0x3a8] sm:$0xfc]  ;;  %v2675_v54 = vld [vmem:[#allocation2 + $0x1f8] sm:$0x3f] }
 0x23b   : > { %v3123_v9 = vadd.f32 %v3093_v51, %v3045_v50  ;;  %v3129_v18 = vadd.f32 %v3100_v61, %v3051_v35  ;;  %v2290_v40 = vadd.f32 %v2260_v26, %v2212_v27  ;;  %v2296_v45 = vadd.f32 %v2270_v60, %v2218_v15  ;;  %v2669_v26 = vld [vmem:[#allocation2 + $0x1c8] sm:$0xc0]  ;;  %v2705_v42 = vld [vmem:[#allocation2 + $0x1f8] sm:$0xff]  ;;  %v11096_v15 = vld [vmem:[%s10284_s6 + $0x48] ss:$0 sm:$0xff] }
 0x23c   : > { %v2416_v62 = vrot.slane %v2392_v57, 4  ;;  %v2425_v22 = vrot.slane %v2398_v34, 4  ;;  %v2471_v55 = vmul.f32 %v2459_v21, %v10828_v59  ;;  %v2477_v13 = vmul.f32 %v2465_v12, %v10828_v59  ;;  %v2747_v50 = vld [vmem:[#allocation2 + $0x1f8] sm:$0xfc]  ;;  %v2753_v12 = vld [vmem:[#allocation2 + $0x228] sm:$0x3] }
 0x23d   : > { %7228 = vmatpush1.bf16.msra.mxu0 %v9180_v63  ;;  %v3135_v5 = vadd.f32 %v3123_v9, %v13307_v20  ;;  %v3141_v51 = vadd.f32 %v3129_v18, %v13307_v20  ;;  %v2326_v61 = vadd.f32 %v2314_v14, %v2290_v40  ;;  %v2332_v41 = vadd.f32 %v2320_v53, %v2296_v45  ;;  %v2825_v60 = vld [vmem:[#allocation2 + $0x2e8] sm:$0xc0]  ;;  %v9194_v57 = vld [vmem:[%s10266_s16 + $0x7e4] ss:$24 sps:$4 sm:$0xff]   ;;  %v2831_v18 = vld [vmem:[#allocation2 + $0x318] sm:$0x3f] }
 0x23e   : > { %7229 = vmatprep.subr.bf16.mxu0 %v9188_v36  ;;  %v2426_v35 = vsel %vm1032_vm0, %v2416_v62, %v2425_v22  ;;  %v2501_v27 = vmul.f32 %v2495_v46, %v10832_v44  ;;  %v2549_v63 = vmul.f32 %v11096_v15, %v2537_v11  ;;  %v2555_v21 = vmul.f32 %v11096_v15, %v2543_v6  ;;  %v9192_v3 = vld [vmem:[%s10266_s16 + $0x7e0] ss:$24 sps:$4 sm:$0xff]  }
 0x23f   : > { %v3147_v14 = vmax.f32 %v3135_v5, 0.0  ;;  %v3153_v53 = vmax.f32 %v3141_v51, 0.0  ;;  %v2368_v34 = vadd.f32 %v2356_v49, %v2326_v61  ;;  %v2374_v9 = vadd.f32 %v2356_v49, %v2332_v41  ;;  %v2903_v5 = vld [vmem:[#allocation2 + $0x318] sm:$0xfc] }
 0x240   : > { %v2513_v36 = vrot.slane %v2501_v27, 2  ;;  %v2573_v40 = vrot.slane %v2549_v63, 4  ;;  %v2582_v45 = vrot.slane %v2555_v21, 4  ;;  %v2681_v46 = vmul.f32 %v2669_v26, %v10787_v4  ;;  %v2909_v27 = vld [vmem:[#allocation2 + $0x348] sm:$0x3] }
 0x241   : > { %7230 = vmatpush1.bf16.msra.mxu0 %v9186_v10  ;;  %v3159_v22 = vpack.c.bf16 %v3153_v53, %v3147_v14  ;;  %v2446_v11 = vadd.f32 %v2416_v62, %v2368_v34  ;;  %v2452_v20 = vadd.f32 %v2426_v35, %v2374_v9  ;;  %v2687_v6 = vmul.f32 %v2675_v54, %v10787_v4  ;;  %v9200_v10 = vld [vmem:[%s10266_s16 + $0x814] ss:$24 sps:$4 sm:$0xff]   ;;  %v2982_v63 = vld [vmem:[#allocation2 + $0x408] sm:$0xc0]  ;;  %v9198_v21 = vld [vmem:[%s10266_s16 + $0x810] ss:$24 sps:$4 sm:$0xff]  }
 0x242   : > { %v2583_v51 = vsel %vm1032_vm0, %v2573_v40, %v2582_v45  ;;  %v2711_v49 = vmul.f32 %v2705_v42, %v10791_v7  ;;  %v2759_v61 = vmul.f32 %v2747_v50, %v10795_v28  ;;  %v2765_v41 = vmul.f32 %v2753_v12, %v10795_v28  ;;  %7231 = vmatprep.subr.bf16.mxu0 %v9194_v57  ;;  %v2988_v42 = vld [vmem:[#allocation2 + $0x438] sm:$0x3f] }
 0x243   : > { %v3171_v26 = vrot.slane %v3159_v22, 7  ;;  %v2483_v62 = vadd.f32 %v2471_v55, %v2446_v11  ;;  %v2489_v35 = vadd.f32 %v2477_v13, %v2452_v20  ;;  %v2837_v54 = vmul.f32 %v2825_v60, %v10805_v25  ;;  %v3018_v45 = vld [vmem:[#allocation2 + $0x438] sm:$0xff] }
 0x244   : > { %v2723_v14 = vrot.slane %v2711_v49, 2  ;;  %v2783_v53 = vrot.slane %v2759_v61, 4  ;;  %v2792_v34 = vrot.slane %v2765_v41, 4  ;;  %v2843_v9 = vmul.f32 %v2831_v18, %v10805_v25  ;;  %v3060_v41 = vld [vmem:[#allocation2 + $0x438] sm:$0xfc] }
 0x245   : > { %3183 = vst [vmem:[#allocation3 + $0x30] sm:$0xf0] %v3171_v26  ;;  %v2525_v50 = vadd.f32 %v2513_v36, %v2483_v62  ;;  %v2531_v12 = vadd.f32 %v2513_v36, %v2489_v35  ;;  %v2867_v57 = vmul.f32 %v2861_v56, %v10809_v48  ;;  %v2915_v22 = vmul.f32 %v2903_v5, %v10813_v58  ;;  %v3066_v26 = vld [vmem:[#allocation2 + $0x468] sm:$0x3]  ;;  %v2145_v5 = vld [vmem:[#allocation2 + $0x130] sm:$0xc0] }
 0x246   : > { %7232 = vmatpush1.bf16.msra.mxu0 %v9192_v3  ;;  %v2735_v20 = vadd.f32 %v2723_v14, %v2681_v46  ;;  %v2741_v55 = vadd.f32 %v2723_v14, %v2687_v6  ;;  %v2793_v13 = vsel %vm1032_vm0, %v2783_v53, %v2792_v34  ;;  %v2921_v60 = vmul.f32 %v2909_v27, %v10813_v58  ;;  %v2151_v3 = vld [vmem:[#allocation2 + $0x160] sm:$0x3f]  ;;  %v13308_v46 = vld [vmem:[#allocation50_spill] sm:$0xff]  ;;  %v2229_v34 = vld [vmem:[#allocation2 + $0x190] sm:$0x3] }
 0x247   : > { %7233 = vmatprep.subr.bf16.mxu0 %v9200_v10  ;;  %v2603_v11 = vadd.f32 %v2573_v40, %v2525_v50  ;;  %v2609_v49 = vadd.f32 %v2583_v51, %v2531_v12  ;;  %v2879_v18 = vrot.slane %v2867_v57, 2  ;;  %v2939_v61 = vrot.slane %v2915_v22, 4  ;;  %v2181_v51 = vld [vmem:[#allocation2 + $0x160] sm:$0xff]  ;;  %v2301_v57 = vld [vmem:[#allocation2 + $0x250] sm:$0xc0] }
 0x248   : > { %v2813_v62 = vadd.f32 %v2783_v53, %v2735_v20  ;;  %v2819_v36 = vadd.f32 %v2793_v13, %v2741_v55  ;;  %v2948_v35 = vrot.slane %v2921_v60, 4  ;;  %v2994_v56 = vmul.f32 %v2982_v63, %v10828_v59  ;;  %v2223_v10 = vld [vmem:[#allocation2 + $0x160] sm:$0xfc] }
 0x249   : > { %v2615_v6 = vadd.f32 %v2603_v11, %v13308_v46  ;;  %v2621_v14 = vadd.f32 %v2609_v49, %v13308_v46  ;;  %v3000_v27 = vmul.f32 %v2988_v42, %v10828_v59  ;;  %v3024_v40 = vmul.f32 %v3018_v45, %v10832_v44 }
 0x24a   : > { %7234 = vmatpush1.bf16.msra.mxu0 %v9198_v21  ;;  %v2849_v50 = vadd.f32 %v2837_v54, %v2813_v62  ;;  %v2855_v53 = vadd.f32 %v2843_v9, %v2819_v36  ;;  %v2949_v12 = vsel %vm1032_vm0, %v2939_v61, %v2948_v35  ;;  %v3072_v63 = vmul.f32 %v11096_v15, %v3060_v41  ;;  %v2307_v41 = vld [vmem:[#allocation2 + $0x280] sm:$0x3f] }
 0x24b   : > { %v2627_v22 = vmax.f32 %v2615_v6, 0.0  ;;  %v2633_v20 = vmax.f32 %v2621_v14, 0.0  ;;  %v3036_v55 = vrot.slane %v3024_v40, 2  ;;  %v3078_v13 = vmul.f32 %v11096_v15, %v3066_v26  ;;  %v2337_v36 = vld [vmem:[#allocation2 + $0x280] sm:$0xff] }
 0x24c   : > { %v5287_v60 = vld [vmem:[#allocation3 + $0x30] sm:$0xff]  ;;  %v2891_v42 = vadd.f32 %v2879_v18, %v2849_v50  ;;  %v2897_v11 = vadd.f32 %v2879_v18, %v2855_v53  ;;  %v3096_v45 = vrot.slane %v3072_v63, 4  ;;  %v2157_v49 = vmul.f32 %v2145_v5, %v10871_v24  ;;  %v2379_v26 = vld [vmem:[#allocation2 + $0x280] sm:$0xfc] }
 0x24d   : > { %7108 = vmatmul.mubr.bf16.gmra.mrb[4].mxu1 %v5287_v60  ;;  %v2639_v21 = vpack.c.bf16 %v2633_v20, %v2627_v22  ;;  %v3105_v54 = vrot.slane %v3078_v13, 4  ;;  %v2163_v9 = vmul.f32 %v2151_v3, %v10871_v24  ;;  %v2187_v62 = vmul.f32 %v2181_v51, %v10875_v8  ;;  %v2385_v18 = vld [vmem:[#allocation2 + $0x2b0] sm:$0x3]  ;;  %v2458_v63 = vld [vmem:[#allocation2 + $0x370] sm:$0xc0] }
 0x24e   : > { %v2969_v35 = vadd.f32 %v2939_v61, %v2891_v42  ;;  %v2975_v6 = vadd.f32 %v2949_v12, %v2897_v11  ;;  %v2235_v14 = vmul.f32 %v2223_v10, %v10885_v2  ;;  %v2241_v15 = vmul.f32 %v2229_v34, %v10885_v2  ;;  %v2464_v13 = vld [vmem:[#allocation2 + $0x3a0] sm:$0x3f] }
 0x24f   : > { %v2651_v40 = vrot.slane %v2639_v21, 3  ;;  %v3106_v5 = vsel %vm1032_vm0, %v3096_v45, %v3105_v54  ;;  %v2199_v50 = vrot.slane %v2187_v62, 2  ;;  %v2313_v53 = vmul.f32 %v2301_v57, %v10889_v0  ;;  %v2494_v62 = vld [vmem:[#allocation2 + $0x3a0] sm:$0xff] }
 0x250   : > { %v3006_v3 = vadd.f32 %v2994_v56, %v2969_v35  ;;  %v3012_v22 = vadd.f32 %v3000_v27, %v2975_v6  ;;  %v2259_v51 = vrot.slane %v2235_v14, 4  ;;  %v2267_v20 = vrot.slane %v2241_v15, 4  ;;  %v2536_v35 = vld [vmem:[#allocation2 + $0x3a0] sm:$0xfc]  ;;  %v2542_v6 = vld [vmem:[#allocation2 + $0x3d0] sm:$0x3] }
 0x251   : > { %2663 = vst [vmem:[#allocation3 + $0x48] sm:$0xf] %v2651_v40  ;;  %v2211_v61 = vadd.f32 %v2199_v50, %v2157_v49  ;;  %v2217_v12 = vadd.f32 %v2199_v50, %v2163_v9  ;;  %v2319_v10 = vmul.f32 %v2307_v41, %v10889_v0  ;;  %v2343_v34 = vmul.f32 %v2337_v36, %v10893_v47  ;;  %v2668_v14 = vld [vmem:[#allocation2 + $0x1c0] sm:$0xc0]  ;;  %v2674_v50 = vld [vmem:[#allocation2 + $0x1f0] sm:$0x3f] }
 0x252   : > { %v3048_v60 = vadd.f32 %v3036_v55, %v3006_v3  ;;  %v3054_v42 = vadd.f32 %v3036_v55, %v3012_v22  ;;  %v2268_v11 = vsel %vm1032_vm0, %v2259_v51, %v2267_v20  ;;  %v2391_v21 = vmul.f32 %v2379_v26, %v10897_v17  ;;  %v2704_v3 = vld [vmem:[#allocation2 + $0x1f0] sm:$0xff] }
 0x253   : > { %v2289_v57 = vadd.f32 %v2259_v51, %v2211_v61  ;;  %v2295_v54 = vadd.f32 %v2268_v11, %v2217_v12  ;;  %v2355_v56 = vrot.slane %v2343_v34, 2  ;;  %v2397_v27 = vmul.f32 %v2385_v18, %v10897_v17  ;;  %v2746_v22 = vld [vmem:[#allocation2 + $0x1f0] sm:$0xfc]  ;;  %v2752_v34 = vld [vmem:[#allocation2 + $0x220] sm:$0x3] }
 0x254   : > { %v3126_v49 = vadd.f32 %v3096_v45, %v3048_v60  ;;  %v3132_v9 = vadd.f32 %v3106_v5, %v3054_v42  ;;  %v2415_v41 = vrot.slane %v2391_v21, 4  ;;  %v2470_v36 = vmul.f32 %v2458_v63, %v10910_v43  ;;  %v13309_v45 = vld [vmem:[#allocation51_spill] sm:$0xff] }
 0x255   : > { %v2325_v55 = vadd.f32 %v2313_v53, %v2289_v57  ;;  %v2331_v15 = vadd.f32 %v2319_v10, %v2295_v54  ;;  %v2423_v40 = vrot.slane %v2397_v27, 4  ;;  %v2476_v26 = vmul.f32 %v2464_v13, %v10910_v43  ;;  %v11142_v5 = vld [vmem:[%s10284_s6 + $0x40] ss:$0 sm:$0xff]  ;;  %v2824_v13 = vld [vmem:[#allocation2 + $0x2e0] sm:$0xc0] }
 0x256   : > { %v3138_v18 = vadd.f32 %v3126_v49, %v13308_v46  ;;  %v3144_v51 = vadd.f32 %v3132_v9, %v13308_v46  ;;  %v2500_v20 = vmul.f32 %v2494_v62, %v13309_v45  ;;  %v2548_v63 = vmul.f32 %v11142_v5, %v2536_v35 }
 0x257   : > { %v2367_v61 = vadd.f32 %v2355_v56, %v2325_v55  ;;  %v2373_v12 = vadd.f32 %v2355_v56, %v2331_v15  ;;  %v2424_v53 = vsel %vm1032_vm0, %v2415_v41, %v2423_v40  ;;  %v2554_v10 = vmul.f32 %v11142_v5, %v2542_v6  ;;  %v2830_v55 = vld [vmem:[#allocation2 + $0x310] sm:$0x3f] }
 0x258   : > { %v3150_v60 = vmax.f32 %v3138_v18, 0.0  ;;  %v3156_v42 = vmax.f32 %v3144_v51, 0.0  ;;  %v2512_v11 = vrot.slane %v2500_v20, 2  ;;  %v2572_v21 = vrot.slane %v2548_v63, 4  ;;  %v2860_v6 = vld [vmem:[#allocation2 + $0x310] sm:$0xff] }
 0x259   : > { %v2445_v57 = vadd.f32 %v2415_v41, %v2367_v61  ;;  %v2451_v54 = vadd.f32 %v2424_v53, %v2373_v12  ;;  %v2580_v27 = vrot.slane %v2554_v10, 4  ;;  %v2680_v62 = vmul.f32 %v2668_v14, %v10871_v24  ;;  %v2902_v41 = vld [vmem:[#allocation2 + $0x310] sm:$0xfc]  ;;  %v2908_v20 = vld [vmem:[#allocation2 + $0x340] sm:$0x3] }
 0x25a   : > { %v3162_v49 = vpack.c.bf16 %v3156_v42, %v3150_v60  ;;  %v2686_v35 = vmul.f32 %v2674_v50, %v10871_v24  ;;  %v2710_v56 = vmul.f32 %v2704_v3, %v10875_v8  ;;  %v2758_v9 = vmul.f32 %v2746_v22, %v10885_v2  ;;  %v2981_v3 = vld [vmem:[#allocation2 + $0x400] sm:$0xc0]  ;;  %v3017_v10 = vld [vmem:[#allocation2 + $0x430] sm:$0xff] }
 0x25b   : > { %v2482_v15 = vadd.f32 %v2470_v36, %v2445_v57  ;;  %v2488_v40 = vadd.f32 %v2476_v26, %v2451_v54  ;;  %v2581_v18 = vsel %vm1032_vm0, %v2572_v21, %v2580_v27  ;;  %v2764_v51 = vmul.f32 %v2752_v34, %v10885_v2  ;;  %v2987_v26 = vld [vmem:[#allocation2 + $0x430] sm:$0x3f] }
 0x25c   : > { %v3174_v63 = vrot.slane %v3162_v49, 7  ;;  %v2722_v61 = vrot.slane %v2710_v56, 2  ;;  %v2782_v14 = vrot.slane %v2758_v9, 4  ;;  %v2836_v50 = vmul.f32 %v2824_v13, %v10889_v0  ;;  %v3059_v54 = vld [vmem:[#allocation2 + $0x430] sm:$0xfc] }
 0x25d   : > { %v2524_v12 = vadd.f32 %v2512_v11, %v2482_v15  ;;  %v2530_v22 = vadd.f32 %v2512_v11, %v2488_v40  ;;  %v2790_v53 = vrot.slane %v2764_v51, 4  ;;  %v2842_v36 = vmul.f32 %v2830_v55, %v10889_v0  ;;  %v9206_v13 = vld [vmem:[%s10266_s16 + $0x844] ss:$24 sps:$4 sm:$0xff]   ;;  %v3065_v55 = vld [vmem:[#allocation2 + $0x460] sm:$0x3] }
 0x25e   : > { %3186 = vst [vmem:[#allocation3 + $0x48] sm:$0xf0] %v3174_v63  ;;  %v2734_v34 = vadd.f32 %v2722_v61, %v2680_v62  ;;  %v2740_v60 = vadd.f32 %v2722_v61, %v2686_v35  ;;  %v2866_v42 = vmul.f32 %v2860_v6, %v10893_v47  ;;  %v2914_v57 = vmul.f32 %v2902_v41, %v10897_v17  ;;  %v9209_v27 = vld [vmem:[%s10266_s16 + $0x24c] ss:$24 sps:$4 sm:$0xff]   ;;  %v9204_v15 = vld [vmem:[%s10266_s16 + $0x840] ss:$24 sps:$4 sm:$0xff]  }
 0x25f   : > { %v2602_v11 = vadd.f32 %v2572_v21, %v2524_v12  ;;  %v2608_v49 = vadd.f32 %v2581_v18, %v2530_v22  ;;  %v2791_v56 = vsel %vm1032_vm0, %v2782_v14, %v2790_v53  ;;  %v2920_v9 = vmul.f32 %v2908_v20, %v10897_v17  ;;  %v9207_v62 = vld [vmem:[%s10266_s16 + $0x248] ss:$24 sps:$4 sm:$0xff]   ;;  %7235 = vmatprep.subr.bf16.mxu0 %v9206_v13  ;;  %v9212_v63 = vld [vmem:[%s10266_s16 + $0x874] ss:$24 sps:$4 sm:$0xff]   ;;  %v9213_v12 = vld [vmem:[%s10266_s16 + $0x278] ss:$24 sps:$4 sm:$0xff]  }
 0x260   : > { %v2812_v35 = vadd.f32 %v2782_v14, %v2734_v34  ;;  %v2818_v6 = vadd.f32 %v2791_v56, %v2740_v60  ;;  %v2878_v40 = vrot.slane %v2866_v42, 2  ;;  %v2938_v51 = vrot.slane %v2914_v57, 4  ;;  %7308 = vmatprep.subr.bf16.mxu1 %v9209_v27  ;;  %v9210_v41 = vld [vmem:[%s10266_s16 + $0x870] ss:$24 sps:$4 sm:$0xff]   ;;  %7236 = vmatpush1.bf16.msra.mxu0 %v9204_v15  ;;  %v9215_v22 = vld [vmem:[%s10266_s16 + $0x27c] ss:$24 sps:$4 sm:$0xff]  }
 0x261   : > { %v2614_v21 = vadd.f32 %v2602_v11, %v10934_v19  ;;  %v2620_v18 = vadd.f32 %v2608_v49, %v10934_v19  ;;  %v2946_v61 = vrot.slane %v2920_v9, 4  ;;  %v2993_v20 = vmul.f32 %v2981_v3, %v10910_v43  ;;  %7309 = vmatpush1.bf16.msra.mxu1 %v9207_v62  ;;  %v3190_v42 = vld [vmem:[#allocation2 + $0x248] sm:$0xc0]  ;;  %v3196_v57 = vld [vmem:[#allocation2 + $0x278] sm:$0x3f]  ;;  %7237 = vmatprep.subr.bf16.mxu0 %v9212_v63 }
 0x262   : > { %v2848_v53 = vadd.f32 %v2836_v50, %v2812_v35  ;;  %v2854_v14 = vadd.f32 %v2842_v36, %v2818_v6  ;;  %v2999_v34 = vmul.f32 %v2987_v26, %v10910_v43  ;;  %v3023_v60 = vmul.f32 %v3017_v10, %v13309_v45  ;;  %v3226_v3 = vld [vmem:[#allocation2 + $0x278] sm:$0xff]  ;;  %7310 = vmatprep.subr.bf16.mxu1 %v9215_v22  ;;  %v3274_v26 = vld [vmem:[#allocation2 + $0x2a8] sm:$0x3]  ;;  %v3346_v62 = vld [vmem:[#allocation2 + $0x368] sm:$0xc0] }
 0x263   : > { %v2626_v13 = vmax.f32 %v2614_v21, 0.0  ;;  %v2632_v27 = vmax.f32 %v2620_v18, 0.0  ;;  %v2947_v11 = vsel %vm1032_vm0, %v2938_v51, %v2946_v61  ;;  %v3071_v49 = vmul.f32 %v11142_v5, %v3059_v54  ;;  %v3268_v56 = vld [vmem:[#allocation2 + $0x278] sm:$0xfc] }
 0x264   : > { %v2890_v9 = vadd.f32 %v2878_v40, %v2848_v53  ;;  %v2896_v15 = vadd.f32 %v2878_v40, %v2854_v14  ;;  %v3035_v50 = vrot.slane %v3023_v60, 2  ;;  %v3077_v36 = vmul.f32 %v11142_v5, %v3065_v55  ;;  %7238 = vmatpush1.bf16.msra.mxu0 %v9210_v41  ;;  %v3352_v22 = vld [vmem:[#allocation2 + $0x398] sm:$0x3f] }
 0x265   : > { %v5290_v10 = vld [vmem:[#allocation3 + $0x48] sm:$0xff]  ;;  %v2638_v35 = vpack.c.bf16 %v2632_v27, %v2626_v13  ;;  %v3095_v6 = vrot.slane %v3071_v49, 4  ;;  %v3202_v63 = vmul.f32 %v3190_v42, %v10583_v30  ;;  %v3208_v21 = vmul.f32 %v3196_v57, %v10583_v30  ;;  %7311 = vmatpush1.bf16.msra.mxu1 %v9213_v12  ;;  %v3382_v53 = vld [vmem:[#allocation2 + $0x398] sm:$0xff] }
 0x266   : > { %7180 = vmatprep.mubr.bf16.mxu0 %v5290_v10  ;;  %v2968_v54 = vadd.f32 %v2938_v51, %v2890_v9  ;;  %v2974_v18 = vadd.f32 %v2947_v11, %v2896_v15  ;;  %v3103_v61 = vrot.slane %v3077_v36, 4  ;;  %v3232_v40 = vmul.f32 %v3226_v3, %v10587_v31  ;;  %v3424_v5 = vld [vmem:[#allocation2 + $0x398] sm:$0xfc]  ;;  %v3430_v13 = vld [vmem:[#allocation2 + $0x3c8] sm:$0x3] }
 0x267   : > { %v2650_v55 = vrot.slane %v2638_v35, 3  ;;  %v3280_v14 = vmul.f32 %v3268_v56, %v10591_v32  ;;  %v3286_v60 = vmul.f32 %v3274_v26, %v10591_v32  ;;  %v3358_v42 = vmul.f32 %v3346_v62, %v10595_v33  ;;  %v3503_v27 = vld [vmem:[#allocation2 + $0x488] sm:$0xc0]  ;;  %v3509_v10 = vld [vmem:[#allocation2 + $0x4b8] sm:$0x3f] }
 0x268   : > { %v3005_v57 = vadd.f32 %v2993_v20, %v2968_v54  ;;  %v3011_v41 = vadd.f32 %v2999_v34, %v2974_v18  ;;  %v3104_v12 = vsel %vm1032_vm0, %v3095_v6, %v3103_v61  ;;  %v3244_v51 = vrot.slane %v3232_v40, 2  ;;  %v3539_v54 = vld [vmem:[#allocation2 + $0x4b8] sm:$0xff] }
 0x269   : > { %2662 = vst [vmem:[#allocation3 + $0x40] sm:$0xf] %v2650_v55  ;;  %v3304_v11 = vrot.slane %v3280_v14, 4  ;;  %v3311_v49 = vrot.slane %v3286_v60, 4  ;;  %v3364_v3 = vmul.f32 %v3352_v22, %v10595_v33  ;;  %v3388_v9 = vmul.f32 %v3382_v53, %v10599_v37  ;;  %v3581_v22 = vld [vmem:[#allocation2 + $0x4b8] sm:$0xfc] }
 0x26a   : > { %v3047_v15 = vadd.f32 %v3035_v50, %v3005_v57  ;;  %v3053_v56 = vadd.f32 %v3035_v50, %v3011_v41  ;;  %v3256_v36 = vadd.f32 %v3244_v51, %v3202_v63  ;;  %v3262_v26 = vadd.f32 %v3244_v51, %v3208_v21  ;;  %v3587_v53 = vld [vmem:[#allocation2 + $0x4e8] sm:$0x3]  ;;  %v3713_v60 = vld [vmem:[#allocation2 + $0x2d8] sm:$0xc0]  ;;  %v3791_v51 = vld [vmem:[#allocation2 + $0x308] sm:$0xfc] }
 0x26b   : > { %v3312_v62 = vsel %vm1032_vm0, %v3304_v11, %v3311_v49  ;;  %v3400_v20 = vrot.slane %v3388_v9, 2  ;;  %v3436_v34 = vmul.f32 %v3424_v5, %v10603_v38  ;;  %v3442_v35 = vmul.f32 %v3430_v13, %v10603_v38  ;;  %v3719_v57 = vld [vmem:[#allocation2 + $0x308] sm:$0x3f]  ;;  %v11194_v9 = vld [vmem:[%s10284_s6 + $0x38] ss:$0 sm:$0xff] }
 0x26c   : > { %v3125_v18 = vadd.f32 %v3095_v6, %v3047_v15  ;;  %v3131_v61 = vadd.f32 %v3104_v12, %v3053_v56  ;;  %v3334_v40 = vadd.f32 %v3304_v11, %v3256_v36  ;;  %v3340_v55 = vadd.f32 %v3312_v62, %v3262_v26  ;;  %v3749_v12 = vld [vmem:[#allocation2 + $0x308] sm:$0xff]  ;;  %v3797_v56 = vld [vmem:[#allocation2 + $0x338] sm:$0x3]  ;;  %v3869_v36 = vld [vmem:[#allocation2 + $0x3f8] sm:$0xc0] }
 0x26d   : > { %v3460_v14 = vrot.slane %v3436_v34, 4  ;;  %v3467_v50 = vrot.slane %v3442_v35, 4  ;;  %v3515_v63 = vmul.f32 %v3503_v27, %v10607_v39  ;;  %v3521_v21 = vmul.f32 %v3509_v10, %v10607_v39 }
 0x26e   : > { %v3137_v5 = vadd.f32 %v3125_v18, %v10934_v19  ;;  %v3143_v13 = vadd.f32 %v3131_v61, %v10934_v19  ;;  %v3370_v41 = vadd.f32 %v3358_v42, %v3334_v40  ;;  %v3376_v6 = vadd.f32 %v3364_v3, %v3340_v55 }
 0x26f   : > { %v3468_v11 = vsel %vm1032_vm0, %v3460_v14, %v3467_v50  ;;  %v3545_v49 = vmul.f32 %v3539_v54, %v10647_v23  ;;  %v3593_v27 = vmul.f32 %v11194_v9, %v3581_v22  ;;  %v3599_v15 = vmul.f32 %v11194_v9, %v3587_v53  ;;  %v3875_v50 = vld [vmem:[#allocation2 + $0x428] sm:$0x3f] }
 0x270   : > { %v3149_v26 = vmax.f32 %v3137_v5, 0.0  ;;  %v3155_v10 = vmax.f32 %v3143_v13, 0.0  ;;  %v3412_v62 = vadd.f32 %v3400_v20, %v3370_v41  ;;  %v3418_v34 = vadd.f32 %v3400_v20, %v3376_v6  ;;  %v3905_v22 = vld [vmem:[#allocation2 + $0x428] sm:$0xff]  ;;  %v3953_v41 = vld [vmem:[#allocation2 + $0x458] sm:$0x3] }
 0x271   : > { %v3557_v42 = vrot.slane %v3545_v49, 2  ;;  %v3617_v3 = vrot.slane %v3593_v27, 4  ;;  %v3624_v35 = vrot.slane %v3599_v15, 4  ;;  %v3725_v18 = vmul.f32 %v3713_v60, %v10583_v30  ;;  %v3947_v13 = vld [vmem:[#allocation2 + $0x428] sm:$0xfc] }
 0x272   : > { %v3161_v61 = vpack.c.bf16 %v3155_v10, %v3149_v26  ;;  %v3490_v40 = vadd.f32 %v3460_v14, %v3412_v62  ;;  %v3496_v54 = vadd.f32 %v3468_v11, %v3418_v34  ;;  %v3731_v55 = vmul.f32 %v3719_v57, %v10583_v30  ;;  %v4026_v11 = vld [vmem:[#allocation2 + $0x518] sm:$0xc0]  ;;  %v4032_v10 = vld [vmem:[#allocation2 + $0x548] sm:$0x3f] }
 0x273   : > { %v3625_v53 = vsel %vm1032_vm0, %v3617_v3, %v3624_v35  ;;  %v3755_v19 = vmul.f32 %v3749_v12, %v10587_v31  ;;  %v3803_v5 = vmul.f32 %v3791_v51, %v10591_v32  ;;  %v3809_v20 = vmul.f32 %v3797_v56, %v10591_v32  ;;  %v4062_v62 = vld [vmem:[#allocation2 + $0x548] sm:$0xff] }
 0x274   : > { %v3173_v6 = vrot.slane %v3161_v61, 7  ;;  %v3527_v49 = vadd.f32 %v3515_v63, %v3490_v40  ;;  %v3533_v60 = vadd.f32 %v3521_v21, %v3496_v54  ;;  %v3881_v14 = vmul.f32 %v3869_v36, %v10595_v33 }
 0x275   : > { %v3767_v27 = vrot.slane %v3755_v19, 2  ;;  %v3827_v57 = vrot.slane %v3803_v5, 4  ;;  %v3834_v15 = vrot.slane %v3809_v20, 4  ;;  %v3887_v26 = vmul.f32 %v3875_v50, %v10595_v33  ;;  %v4104_v50 = vld [vmem:[#allocation2 + $0x548] sm:$0xfc] }
 0x276   : > { %3185 = vst [vmem:[#allocation3 + $0x40] sm:$0xf0] %v3173_v6  ;;  %v3569_v12 = vadd.f32 %v3557_v42, %v3527_v49  ;;  %v3575_v51 = vadd.f32 %v3557_v42, %v3533_v60  ;;  %v3911_v56 = vmul.f32 %v3905_v22, %v10599_v37  ;;  %v3959_v34 = vmul.f32 %v3947_v13, %v10603_v38  ;;  %v4110_v5 = vld [vmem:[#allocation2 + $0x578] sm:$0x3]  ;;  %v3189_v22 = vld [vmem:[#allocation2 + $0x240] sm:$0xc0] }
 0x277   : > { %v3779_v35 = vadd.f32 %v3767_v27, %v3725_v18  ;;  %v3785_v63 = vadd.f32 %v3767_v27, %v3731_v55  ;;  %v3835_v21 = vsel %vm1032_vm0, %v3827_v57, %v3834_v15  ;;  %v3965_v36 = vmul.f32 %v3953_v41, %v10603_v38  ;;  %v3195_v60 = vld [vmem:[#allocation2 + $0x270] sm:$0x3f]  ;;  %v13310_v13 = vld [vmem:[#allocation44_spill] sm:$0xff]  ;;  %v3273_v15 = vld [vmem:[#allocation2 + $0x2a0] sm:$0x3] }
 0x278   : > { %v3647_v19 = vadd.f32 %v3617_v3, %v3569_v12  ;;  %v3653_v61 = vadd.f32 %v3625_v53, %v3575_v51  ;;  %v3923_v40 = vrot.slane %v3911_v56, 2  ;;  %v3983_v54 = vrot.slane %v3959_v34, 4  ;;  %v3225_v53 = vld [vmem:[#allocation2 + $0x270] sm:$0xff] }
 0x279   : > { %v3857_v20 = vadd.f32 %v3827_v57, %v3779_v35  ;;  %v3863_v6 = vadd.f32 %v3835_v21, %v3785_v63  ;;  %v3990_v49 = vrot.slane %v3965_v36, 4  ;;  %v4038_v42 = vmul.f32 %v4026_v11, %v10607_v39  ;;  %v3267_v41 = vld [vmem:[#allocation2 + $0x270] sm:$0xfc]  ;;  %v3345_v11 = vld [vmem:[#allocation2 + $0x360] sm:$0xc0] }
 0x27a   : > { %v3659_v18 = vadd.f32 %v3647_v19, %v13310_v13  ;;  %v3665_v55 = vadd.f32 %v3653_v61, %v13310_v13  ;;  %v4044_v27 = vmul.f32 %v4032_v10, %v10607_v39  ;;  %v4068_v3 = vmul.f32 %v4062_v62, %v10647_v23 }
 0x27b   : > { %v3893_v12 = vadd.f32 %v3881_v14, %v3857_v20  ;;  %v3899_v51 = vadd.f32 %v3887_v26, %v3863_v6  ;;  %v3991_v57 = vsel %vm1032_vm0, %v3983_v54, %v3990_v49  ;;  %v4116_v56 = vmul.f32 %v11194_v9, %v4104_v50  ;;  %v3351_v50 = vld [vmem:[#allocation2 + $0x390] sm:$0x3f] }
 0x27c   : > { %v3671_v34 = vmax.f32 %v3659_v18, 0.0  ;;  %v3677_v35 = vmax.f32 %v3665_v55, 0.0  ;;  %v4080_v63 = vrot.slane %v4068_v3, 2  ;;  %v4122_v21 = vmul.f32 %v11194_v9, %v4110_v5  ;;  %v3381_v6 = vld [vmem:[#allocation2 + $0x390] sm:$0xff] }
 0x27d   : > { %v5289_v36 = vld [vmem:[#allocation3 + $0x40] sm:$0xff]  ;;  %v3935_v19 = vadd.f32 %v3923_v40, %v3893_v12  ;;  %v3941_v10 = vadd.f32 %v3923_v40, %v3899_v51  ;;  %v4140_v61 = vrot.slane %v4116_v56, 4  ;;  %v3201_v62 = vmul.f32 %v3189_v22, %v10703_v1  ;;  %v3423_v5 = vld [vmem:[#allocation2 + $0x390] sm:$0xfc] }
 0x27e   : > { %7181 = vmatmul.mubr.bf16.gmra.mrb[4].mxu0 %v5289_v36  ;;  %v3683_v23 = vpack.c.bf16 %v3677_v35, %v3671_v34  ;;  %v4147_v14 = vrot.slane %v4122_v21, 4  ;;  %v3207_v26 = vmul.f32 %v3195_v60, %v10703_v1  ;;  %v3231_v20 = vmul.f32 %v3225_v53, %v10707_v29  ;;  %v3429_v40 = vld [vmem:[#allocation2 + $0x3c0] sm:$0x3]  ;;  %v3502_v56 = vld [vmem:[#allocation2 + $0x480] sm:$0xc0]  ;;  %v13311_v21 = vld [vmem:[#allocation45_spill] sm:$0xff] }
 0x27f   : > { %v4013_v49 = vadd.f32 %v3983_v54, %v3935_v19  ;;  %v4019_v18 = vadd.f32 %v3991_v57, %v3941_v10  ;;  %v3279_v55 = vmul.f32 %v3267_v41, %v10711_v16  ;;  %v3285_v9 = vmul.f32 %v3273_v15, %v10711_v16  ;;  %v3508_v36 = vld [vmem:[#allocation2 + $0x4b0] sm:$0x3f] }
 0x280   : > { %v3695_v3 = vrot.slane %v3683_v23, 3  ;;  %v4148_v22 = vsel %vm1032_vm0, %v4140_v61, %v4147_v14  ;;  %v3243_v12 = vrot.slane %v3231_v20, 2  ;;  %v3357_v51 = vmul.f32 %v3345_v11, %v10721_v52  ;;  %v13312_v14 = vld [vmem:[#allocation46_spill] sm:$0xff] }
 0x281   : > { %v4050_v60 = vadd.f32 %v4038_v42, %v4013_v49  ;;  %v4056_v34 = vadd.f32 %v4044_v27, %v4019_v18  ;;  %v3303_v53 = vrot.slane %v3279_v55, 4  ;;  %v3309_v35 = vrot.slane %v3285_v9, 4  ;;  %v3538_v49 = vld [vmem:[#allocation2 + $0x4b0] sm:$0xff]  ;;  %v13313_v55 = vld [vmem:[#allocation47_spill] sm:$0xff] }
 0x282   : > { %3707 = vst [vmem:[#allocation3 + $0x68] sm:$0xf] %v3695_v3  ;;  %v3255_v54 = vadd.f32 %v3243_v12, %v3201_v62  ;;  %v3261_v57 = vadd.f32 %v3243_v12, %v3207_v26  ;;  %v3363_v41 = vmul.f32 %v3351_v50, %v10721_v52  ;;  %v3387_v15 = vmul.f32 %v3381_v6, %v13311_v21  ;;  %v3580_v18 = vld [vmem:[#allocation2 + $0x4b0] sm:$0xfc]  ;;  %v3586_v9 = vld [vmem:[#allocation2 + $0x4e0] sm:$0x3] }
 0x283   : > { %v4092_v19 = vadd.f32 %v4080_v63, %v4050_v60  ;;  %v4098_v23 = vadd.f32 %v4080_v63, %v4056_v34  ;;  %v3310_v10 = vsel %vm1032_vm0, %v3303_v53, %v3309_v35  ;;  %v3435_v20 = vmul.f32 %v3423_v5, %v13312_v14  ;;  %v3712_v3 = vld [vmem:[#allocation2 + $0x2d0] sm:$0xc0]  ;;  %v3718_v34 = vld [vmem:[#allocation2 + $0x300] sm:$0x3f] }
 0x284   : > { %v3333_v11 = vadd.f32 %v3303_v53, %v3255_v54  ;;  %v3339_v39 = vadd.f32 %v3310_v10, %v3261_v57  ;;  %v3399_v42 = vrot.slane %v3387_v15, 2  ;;  %v3441_v27 = vmul.f32 %v3429_v40, %v13312_v14  ;;  %v3748_v53 = vld [vmem:[#allocation2 + $0x300] sm:$0xff] }
 0x285   : > { %v4170_v62 = vadd.f32 %v4140_v61, %v4092_v19  ;;  %v4176_v26 = vadd.f32 %v4148_v22, %v4098_v23  ;;  %v3459_v50 = vrot.slane %v3435_v20, 4  ;;  %v3514_v6 = vmul.f32 %v3502_v56, %v13313_v55  ;;  %v3790_v35 = vld [vmem:[#allocation2 + $0x300] sm:$0xfc]  ;;  %v13314_v61 = vld [vmem:[#allocation48_spill] sm:$0xff]  ;;  %v11236_v22 = vld [vmem:[%s10284_s6 + $0x30] ss:$0 sm:$0xff] }
 0x286   : > { %v3369_v63 = vadd.f32 %v3357_v51, %v3333_v11  ;;  %v3375_v12 = vadd.f32 %v3363_v41, %v3339_v39  ;;  %v3465_v60 = vrot.slane %v3441_v27, 4  ;;  %v3520_v5 = vmul.f32 %v3508_v36, %v13313_v55  ;;  %v3796_v41 = vld [vmem:[#allocation2 + $0x330] sm:$0x3]  ;;  %v3868_v36 = vld [vmem:[#allocation2 + $0x3f0] sm:$0xc0] }
 0x287   : > { %v4182_v40 = vadd.f32 %v4170_v62, %v13310_v13  ;;  %v4188_v54 = vadd.f32 %v4176_v26, %v13310_v13  ;;  %v3544_v57 = vmul.f32 %v3538_v49, %v13314_v61  ;;  %v3592_v56 = vmul.f32 %v11236_v22, %v3580_v18 }
 0x288   : > { %v3411_v15 = vadd.f32 %v3399_v42, %v3369_v63  ;;  %v3417_v19 = vadd.f32 %v3399_v42, %v3375_v12  ;;  %v3466_v39 = vsel %vm1032_vm0, %v3459_v50, %v3465_v60  ;;  %v3598_v51 = vmul.f32 %v11236_v22, %v3586_v9  ;;  %v3874_v12 = vld [vmem:[#allocation2 + $0x420] sm:$0x3f] }
 0x289   : > { %v4194_v23 = vmax.f32 %v4182_v40, 0.0  ;;  %v4200_v10 = vmax.f32 %v4188_v54, 0.0  ;;  %v3556_v20 = vrot.slane %v3544_v57, 2  ;;  %v3616_v11 = vrot.slane %v3592_v56, 4  ;;  %v3904_v9 = vld [vmem:[#allocation2 + $0x420] sm:$0xff] }
 0x28a   : > { %v3489_v27 = vadd.f32 %v3459_v50, %v3411_v15  ;;  %v3495_v62 = vadd.f32 %v3466_v39, %v3417_v19  ;;  %v3622_v26 = vrot.slane %v3598_v51, 4  ;;  %v3724_v49 = vmul.f32 %v3712_v3, %v10703_v1  ;;  %v3946_v50 = vld [vmem:[#allocation2 + $0x420] sm:$0xfc]  ;;  %v3952_v57 = vld [vmem:[#allocation2 + $0x450] sm:$0x3] }
 0x28b   : > { %v4206_v13 = vpack.c.bf16 %v4200_v10, %v4194_v23  ;;  %v3730_v18 = vmul.f32 %v3718_v34, %v10703_v1  ;;  %v3754_v42 = vmul.f32 %v3748_v53, %v10707_v29  ;;  %v3802_v63 = vmul.f32 %v3790_v35, %v10711_v16  ;;  %v4025_v34 = vld [vmem:[#allocation2 + $0x510] sm:$0xc0]  ;;  %v4031_v23 = vld [vmem:[#allocation2 + $0x540] sm:$0x3f] }
 0x28c   : > { %v3526_v60 = vadd.f32 %v3514_v6, %v3489_v27  ;;  %v3532_v38 = vadd.f32 %v3520_v5, %v3495_v62  ;;  %v3623_v40 = vsel %vm1032_vm0, %v3616_v11, %v3622_v26  ;;  %v3808_v54 = vmul.f32 %v3796_v41, %v10711_v16  ;;  %v4061_v6 = vld [vmem:[#allocation2 + $0x540] sm:$0xff] }
 0x28d   : > { %v4218_v56 = vrot.slane %v4206_v13, 7  ;;  %v3766_v15 = vrot.slane %v3754_v42, 2  ;;  %v3826_v3 = vrot.slane %v3802_v63, 4  ;;  %v3880_v19 = vmul.f32 %v3868_v36, %v10721_v52 }
 0x28e   : > { %v3568_v39 = vadd.f32 %v3556_v20, %v3526_v60  ;;  %v3574_v53 = vadd.f32 %v3556_v20, %v3532_v38  ;;  %v3832_v51 = vrot.slane %v3808_v54, 4  ;;  %v3886_v35 = vmul.f32 %v3874_v12, %v10721_v52  ;;  %v4103_v12 = vld [vmem:[#allocation2 + $0x540] sm:$0xfc]  ;;  %v13315_v60 = vld [vmem:[#allocation49_spill] sm:$0xff] }
 0x28f   : > { %4230 = vst [vmem:[#allocation3 + $0x68] sm:$0xf0] %v4218_v56  ;;  %v3778_v5 = vadd.f32 %v3766_v15, %v3724_v49  ;;  %v3784_v10 = vadd.f32 %v3766_v15, %v3730_v18  ;;  %v3910_v41 = vmul.f32 %v3904_v9, %v13311_v21  ;;  %v3958_v27 = vmul.f32 %v3946_v50, %v13312_v14  ;;  %v4109_v56 = vld [vmem:[#allocation2 + $0x570] sm:$0x3]  ;;  %v3192_v50 = vld [vmem:[#allocation2 + $0x258] sm:$0xc0] }
 0x290   : > { %v3646_v13 = vadd.f32 %v3616_v11, %v3568_v39  ;;  %v3652_v62 = vadd.f32 %v3623_v40, %v3574_v53  ;;  %v3833_v26 = vsel %vm1032_vm0, %v3826_v3, %v3832_v51  ;;  %v3964_v36 = vmul.f32 %v3952_v57, %v13312_v14  ;;  %v3228_v11 = vld [vmem:[#allocation2 + $0x288] sm:$0xff]  ;;  %v3276_v51 = vld [vmem:[#allocation2 + $0x2b8] sm:$0x3] }
 0x291   : > { %v3856_v42 = vadd.f32 %v3826_v3, %v3778_v5  ;;  %v3862_v38 = vadd.f32 %v3833_v26, %v3784_v10  ;;  %v3922_v20 = vrot.slane %v3910_v41, 2  ;;  %v3982_v63 = vrot.slane %v3958_v27, 4  ;;  %v3198_v3 = vld [vmem:[#allocation2 + $0x288] sm:$0x3f] }
 0x292   : > { %v3658_v54 = vadd.f32 %v3646_v13, %v13315_v60  ;;  %v3664_v49 = vadd.f32 %v3652_v62, %v13315_v60  ;;  %v3988_v18 = vrot.slane %v3964_v36, 4  ;;  %v4037_v9 = vmul.f32 %v4025_v34, %v13313_v55  ;;  %v3270_v53 = vld [vmem:[#allocation2 + $0x288] sm:$0xfc]  ;;  %v3348_v13 = vld [vmem:[#allocation2 + $0x378] sm:$0xc0] }
 0x293   : > { %v3892_v40 = vadd.f32 %v3880_v19, %v3856_v42  ;;  %v3898_v15 = vadd.f32 %v3886_v35, %v3862_v38  ;;  %v4043_v39 = vmul.f32 %v4031_v23, %v13313_v55  ;;  %v4067_v57 = vmul.f32 %v4061_v6, %v13314_v61  ;;  %v3354_v38 = vld [vmem:[#allocation2 + $0x3a8] sm:$0x3f] }
 0x294   : > { %v3670_v5 = vmax.f32 %v3658_v54, 0.0  ;;  %v3676_v10 = vmax.f32 %v3664_v49, 0.0  ;;  %v3989_v41 = vsel %vm1032_vm0, %v3982_v63, %v3988_v18  ;;  %v4115_v27 = vmul.f32 %v11236_v22, %v4103_v12  ;;  %v3384_v61 = vld [vmem:[#allocation2 + $0x3a8] sm:$0xff] }
 0x295   : > { %v3934_v34 = vadd.f32 %v3922_v20, %v3892_v40  ;;  %v3940_v62 = vadd.f32 %v3922_v20, %v3898_v15  ;;  %v4079_v26 = vrot.slane %v4067_v57, 2  ;;  %v4121_v19 = vmul.f32 %v11236_v22, %v4109_v56  ;;  %v3426_v40 = vld [vmem:[#allocation2 + $0x3a8] sm:$0xfc]  ;;  %v3432_v20 = vld [vmem:[#allocation2 + $0x3d8] sm:$0x3] }
 0x296   : > { %v5294_v35 = vld [vmem:[#allocation3 + $0x68] sm:$0xff]  ;;  %v3682_v36 = vpack.c.bf16 %v3676_v10, %v3670_v5  ;;  %v4139_v23 = vrot.slane %v4115_v27, 4  ;;  %v3204_v6 = vmul.f32 %v3192_v50, %v10787_v4  ;;  %v3210_v42 = vmul.f32 %v3198_v3, %v10787_v4 }
 0x297   : > { %7117 = vmatprep.mubr.bf16.mxu1 %v5294_v35  ;;  %v4012_v54 = vadd.f32 %v3982_v63, %v3934_v34  ;;  %v4018_v49 = vadd.f32 %v3989_v41, %v3940_v62  ;;  %v4145_v18 = vrot.slane %v4121_v19, 4  ;;  %v3234_v12 = vmul.f32 %v3228_v11, %v10791_v7  ;;  %v3505_v63 = vld [vmem:[#allocation2 + $0x498] sm:$0xc0] }
 0x298   : > { %v3694_v15 = vrot.slane %v3682_v36, 3  ;;  %v3282_v22 = vmul.f32 %v3270_v53, %v10795_v28  ;;  %v3288_v56 = vmul.f32 %v3276_v51, %v10795_v28  ;;  %v3360_v57 = vmul.f32 %v3348_v13, %v10805_v25  ;;  %v3511_v51 = vld [vmem:[#allocation2 + $0x4c8] sm:$0x3f] }
 0x299   : > { %v4049_v50 = vadd.f32 %v4037_v9, %v4012_v54  ;;  %v4055_v5 = vadd.f32 %v4043_v39, %v4018_v49  ;;  %v4146_v3 = vsel %vm1032_vm0, %v4139_v23, %v4145_v18  ;;  %v3246_v10 = vrot.slane %v3234_v12, 2  ;;  %v3541_v54 = vld [vmem:[#allocation2 + $0x4c8] sm:$0xff] }
 0x29a   : > { %3706 = vst [vmem:[#allocation3 + $0x60] sm:$0xf] %v3694_v15  ;;  %v3306_v41 = vrot.slane %v3282_v22, 4  ;;  %v3315_v27 = vrot.slane %v3288_v56, 4  ;;  %v3366_v11 = vmul.f32 %v3354_v38, %v10805_v25  ;;  %v3390_v34 = vmul.f32 %v3384_v61, %v10809_v48  ;;  %v3583_v38 = vld [vmem:[#allocation2 + $0x4c8] sm:$0xfc] }
 0x29b   : > { %v4091_v62 = vadd.f32 %v4079_v26, %v4049_v50  ;;  %v4097_v19 = vadd.f32 %v4079_v26, %v4055_v5  ;;  %v3258_v53 = vadd.f32 %v3246_v10, %v3204_v6  ;;  %v3264_v35 = vadd.f32 %v3246_v10, %v3210_v42  ;;  %v3589_v22 = vld [vmem:[#allocation2 + $0x4f8] sm:$0x3]  ;;  %v3715_v56 = vld [vmem:[#allocation2 + $0x2e8] sm:$0xc0]  ;;  %v3793_v10 = vld [vmem:[#allocation2 + $0x318] sm:$0xfc] }
 0x29c   : > { %v3316_v13 = vsel %vm1032_vm0, %v3306_v41, %v3315_v27  ;;  %v3402_v9 = vrot.slane %v3390_v34, 2  ;;  %v3438_v39 = vmul.f32 %v3426_v40, %v10813_v58  ;;  %v3444_v36 = vmul.f32 %v3432_v20, %v10813_v58  ;;  %v3721_v50 = vld [vmem:[#allocation2 + $0x318] sm:$0x3f] }
 0x29d   : > { %v4169_v49 = vadd.f32 %v4139_v23, %v4091_v62  ;;  %v4175_v18 = vadd.f32 %v4146_v3, %v4097_v19  ;;  %v3336_v12 = vadd.f32 %v3306_v41, %v3258_v53  ;;  %v3342_v15 = vadd.f32 %v3316_v13, %v3264_v35  ;;  %v3751_v3 = vld [vmem:[#allocation2 + $0x318] sm:$0xff]  ;;  %v3799_v41 = vld [vmem:[#allocation2 + $0x348] sm:$0x3]  ;;  %v3871_v53 = vld [vmem:[#allocation2 + $0x408] sm:$0xc0] }
 0x29e   : > { %v3462_v61 = vrot.slane %v3438_v39, 4  ;;  %v3471_v26 = vrot.slane %v3444_v36, 4  ;;  %v3517_v6 = vmul.f32 %v3505_v63, %v10828_v59  ;;  %v3523_v42 = vmul.f32 %v3511_v51, %v10828_v59  ;;  %v11280_v62 = vld [vmem:[%s10284_s6 + $0x48] ss:$0 sm:$0xff] }
 0x29f   : > { %v4181_v40 = vadd.f32 %v4169_v49, %v13315_v60  ;;  %v4187_v20 = vadd.f32 %v4175_v18, %v13315_v60  ;;  %v3372_v5 = vadd.f32 %v3360_v57, %v3336_v12  ;;  %v3378_v23 = vadd.f32 %v3366_v11, %v3342_v15  ;;  %v3907_v60 = vld [vmem:[#allocation2 + $0x438] sm:$0xff] }
 0x2a0   : > { %v3472_v27 = vsel %vm1032_vm0, %v3462_v61, %v3471_v26  ;;  %v3547_v34 = vmul.f32 %v3541_v54, %v10832_v44  ;;  %v3595_v63 = vmul.f32 %v11280_v62, %v3583_v38  ;;  %v3601_v19 = vmul.f32 %v11280_v62, %v3589_v22  ;;  %v3877_v26 = vld [vmem:[#allocation2 + $0x438] sm:$0x3f] }
 0x2a1   : > { %v4193_v35 = vmax.f32 %v4181_v40, 0.0  ;;  %v4199_v51 = vmax.f32 %v4187_v20, 0.0  ;;  %v3414_v13 = vadd.f32 %v3402_v9, %v3372_v5  ;;  %v3420_v39 = vadd.f32 %v3402_v9, %v3378_v23  ;;  %v3949_v20 = vld [vmem:[#allocation2 + $0x438] sm:$0xfc]  ;;  %v3955_v5 = vld [vmem:[#allocation2 + $0x468] sm:$0x3] }
 0x2a2   : > { %v3559_v57 = vrot.slane %v3547_v34, 2  ;;  %v3619_v11 = vrot.slane %v3595_v63, 4  ;;  %v3628_v36 = vrot.slane %v3601_v19, 4  ;;  %v3727_v49 = vmul.f32 %v3715_v56, %v10787_v4 }
 0x2a3   : > { %v4205_v18 = vpack.c.bf16 %v4199_v51, %v4193_v35  ;;  %v3492_v12 = vadd.f32 %v3462_v61, %v3414_v13  ;;  %v3498_v15 = vadd.f32 %v3472_v27, %v3420_v39  ;;  %v3733_v54 = vmul.f32 %v3721_v50, %v10787_v4  ;;  %v4064_v35 = vld [vmem:[#allocation2 + $0x558] sm:$0xff]  ;;  %v4028_v13 = vld [vmem:[#allocation2 + $0x528] sm:$0xc0] }
 0x2a4   : > { %v3629_v38 = vsel %vm1032_vm0, %v3619_v11, %v3628_v36  ;;  %v3757_v22 = vmul.f32 %v3751_v3, %v10791_v7  ;;  %v3805_v40 = vmul.f32 %v3793_v10, %v10795_v28  ;;  %v3811_v9 = vmul.f32 %v3799_v41, %v10795_v28 }
 0x2a5   : > { %v4217_v23 = vrot.slane %v4205_v18, 7  ;;  %v3529_v34 = vadd.f32 %v3517_v6, %v3492_v12  ;;  %v3535_v56 = vadd.f32 %v3523_v42, %v3498_v15  ;;  %v3883_v61 = vmul.f32 %v3871_v53, %v10805_v25  ;;  %v4034_v53 = vld [vmem:[#allocation2 + $0x558] sm:$0x3f] }
 0x2a6   : > { %v3769_v27 = vrot.slane %v3757_v22, 2  ;;  %v3829_v63 = vrot.slane %v3805_v40, 4  ;;  %v3838_v50 = vrot.slane %v3811_v9, 4  ;;  %v3889_v19 = vmul.f32 %v3877_v26, %v10805_v25  ;;  %v4106_v22 = vld [vmem:[#allocation2 + $0x558] sm:$0xfc] }
 0x2a7   : > { %4229 = vst [vmem:[#allocation3 + $0x60] sm:$0xf0] %v4217_v23  ;;  %v3571_v51 = vadd.f32 %v3559_v57, %v3529_v34  ;;  %v3577_v3 = vadd.f32 %v3559_v57, %v3535_v56  ;;  %v3913_v10 = vmul.f32 %v3907_v60, %v10809_v48  ;;  %v3961_v41 = vmul.f32 %v3949_v20, %v10813_v58  ;;  %v4112_v23 = vld [vmem:[#allocation2 + $0x588] sm:$0x3]  ;;  %v3191_v20 = vld [vmem:[#allocation2 + $0x250] sm:$0xc0] }
 0x2a8   : > { %v3781_v39 = vadd.f32 %v3769_v27, %v3727_v49  ;;  %v3787_v36 = vadd.f32 %v3769_v27, %v3733_v54  ;;  %v3839_v6 = vsel %vm1032_vm0, %v3829_v63, %v3838_v50  ;;  %v3967_v42 = vmul.f32 %v3955_v5, %v10813_v58  ;;  %v3227_v34 = vld [vmem:[#allocation2 + $0x280] sm:$0xff] }
 0x2a9   : > { %v3649_v18 = vadd.f32 %v3619_v11, %v3571_v51  ;;  %v3655_v12 = vadd.f32 %v3629_v38, %v3577_v3  ;;  %v3925_v15 = vrot.slane %v3913_v10, 2  ;;  %v3985_v26 = vrot.slane %v3961_v41, 4  ;;  %v3197_v38 = vld [vmem:[#allocation2 + $0x280] sm:$0x3f] }
 0x2aa   : > { %v3859_v40 = vadd.f32 %v3829_v63, %v3781_v39  ;;  %v3865_v9 = vadd.f32 %v3839_v6, %v3787_v36  ;;  %v3994_v57 = vrot.slane %v3967_v42, 4  ;;  %v4040_v60 = vmul.f32 %v4028_v13, %v10828_v59  ;;  %v3269_v56 = vld [vmem:[#allocation2 + $0x280] sm:$0xfc]  ;;  %v3275_v39 = vld [vmem:[#allocation2 + $0x2b0] sm:$0x3] }
 0x2ab   : > { %v3661_v49 = vadd.f32 %v3649_v18, %v13308_v46  ;;  %v3667_v54 = vadd.f32 %v3655_v12, %v13308_v46  ;;  %v4046_v5 = vmul.f32 %v4034_v53, %v10828_v59  ;;  %v4070_v11 = vmul.f32 %v4064_v35, %v10832_v44  ;;  %v3347_v18 = vld [vmem:[#allocation2 + $0x370] sm:$0xc0] }
 0x2ac   : > { %v3895_v27 = vadd.f32 %v3883_v61, %v3859_v40  ;;  %v3901_v50 = vadd.f32 %v3889_v19, %v3865_v9  ;;  %v3995_v63 = vsel %vm1032_vm0, %v3985_v26, %v3994_v57  ;;  %v4118_v51 = vmul.f32 %v11280_v62, %v4106_v22 }
 0x2ad   : > { %v3673_v3 = vmax.f32 %v3661_v49, 0.0  ;;  %v3679_v10 = vmax.f32 %v3667_v54, 0.0  ;;  %v4082_v41 = vrot.slane %v4070_v11, 2  ;;  %v4124_v13 = vmul.f32 %v11280_v62, %v4112_v23  ;;  %v3353_v23 = vld [vmem:[#allocation2 + $0x3a0] sm:$0x3f] }
 0x2ae   : > { %v5293_v36 = vld [vmem:[#allocation3 + $0x60] sm:$0xff]  ;;  %v3937_v6 = vadd.f32 %v3925_v15, %v3895_v27  ;;  %v3943_v42 = vadd.f32 %v3925_v15, %v3901_v50  ;;  %v4142_v53 = vrot.slane %v4118_v51, 4  ;;  %v3203_v35 = vmul.f32 %v3191_v20, %v10871_v24 }
 0x2af   : > { %7118 = vmatmul.mubr.bf16.gmra.mrb[8].mxu1 %v5293_v36  ;;  %v3685_v61 = vpack.c.bf16 %v3679_v10, %v3673_v3  ;;  %v4151_v19 = vrot.slane %v4124_v13, 4  ;;  %v3209_v12 = vmul.f32 %v3197_v38, %v10871_v24  ;;  %v3233_v22 = vmul.f32 %v3227_v34, %v10875_v8  ;;  %v3383_v49 = vld [vmem:[#allocation2 + $0x3a0] sm:$0xff]  ;;  %v3431_v34 = vld [vmem:[#allocation2 + $0x3d0] sm:$0x3]  ;;  %v3504_v13 = vld [vmem:[#allocation2 + $0x490] sm:$0xc0] }
 0x2b0   : > { %v4015_v40 = vadd.f32 %v3985_v26, %v3937_v6  ;;  %v4021_v9 = vadd.f32 %v3995_v63, %v3943_v42  ;;  %v3281_v57 = vmul.f32 %v3269_v56, %v10885_v2  ;;  %v3287_v62 = vmul.f32 %v3275_v39, %v10885_v2  ;;  %v3425_v27 = vld [vmem:[#allocation2 + $0x3a0] sm:$0xfc] }
 0x2b1   : > { %v3697_v15 = vrot.slane %v3685_v61, 3  ;;  %v4152_v54 = vsel %vm1032_vm0, %v4142_v53, %v4151_v19  ;;  %v3245_v20 = vrot.slane %v3233_v22, 2  ;;  %v3359_v11 = vmul.f32 %v3347_v18, %v10889_v0  ;;  %v3510_v18 = vld [vmem:[#allocation2 + $0x4c0] sm:$0x3f] }
 0x2b2   : > { %v4052_v50 = vadd.f32 %v4040_v60, %v4015_v40  ;;  %v4058_v51 = vadd.f32 %v4046_v5, %v4021_v9  ;;  %v3305_v38 = vrot.slane %v3281_v57, 4  ;;  %v3313_v3 = vrot.slane %v3287_v62, 4  ;;  %v3588_v62 = vld [vmem:[#allocation2 + $0x4f0] sm:$0x3] }
 0x2b3   : > { %3709 = vst [vmem:[#allocation3 + $0x78] sm:$0xf] %v3697_v15  ;;  %v3257_v26 = vadd.f32 %v3245_v20, %v3203_v35  ;;  %v3263_v63 = vadd.f32 %v3245_v20, %v3209_v12  ;;  %v3365_v56 = vmul.f32 %v3353_v23, %v10889_v0  ;;  %v3389_v10 = vmul.f32 %v3383_v49, %v10893_v47  ;;  %v3540_v35 = vld [vmem:[#allocation2 + $0x4c0] sm:$0xff] }
 0x2b4   : > { %v4094_v39 = vadd.f32 %v4082_v41, %v4052_v50  ;;  %v4100_v36 = vadd.f32 %v4082_v41, %v4058_v51  ;;  %v3314_v6 = vsel %vm1032_vm0, %v3305_v38, %v3313_v3  ;;  %v3437_v42 = vmul.f32 %v3425_v27, %v10897_v17  ;;  %v3582_v12 = vld [vmem:[#allocation2 + $0x4c0] sm:$0xfc]  ;;  %v11322_v51 = vld [vmem:[%s10284_s6 + $0x40] ss:$0 sm:$0xff] }
 0x2b5   : > { %v3335_v60 = vadd.f32 %v3305_v38, %v3257_v26  ;;  %v3341_v5 = vadd.f32 %v3314_v6, %v3263_v63  ;;  %v3401_v61 = vrot.slane %v3389_v10, 2  ;;  %v3443_v19 = vmul.f32 %v3431_v34, %v10897_v17  ;;  %v3720_v26 = vld [vmem:[#allocation2 + $0x310] sm:$0x3f]  ;;  %v3798_v6 = vld [vmem:[#allocation2 + $0x340] sm:$0x3] }
 0x2b6   : > { %v4172_v22 = vadd.f32 %v4142_v53, %v4094_v39  ;;  %v4178_v40 = vadd.f32 %v4152_v54, %v4100_v36  ;;  %v3461_v9 = vrot.slane %v3437_v42, 4  ;;  %v3516_v57 = vmul.f32 %v3504_v13, %v10910_v43  ;;  %v3714_v54 = vld [vmem:[#allocation2 + $0x2e0] sm:$0xc0]  ;;  %v3750_v63 = vld [vmem:[#allocation2 + $0x310] sm:$0xff] }
 0x2b7   : > { %v3371_v41 = vadd.f32 %v3359_v11, %v3335_v60  ;;  %v3377_v23 = vadd.f32 %v3365_v56, %v3341_v5  ;;  %v3469_v49 = vrot.slane %v3443_v19, 4  ;;  %v3522_v15 = vmul.f32 %v3510_v18, %v10910_v43  ;;  %v3792_v56 = vld [vmem:[#allocation2 + $0x310] sm:$0xfc]  ;;  %v3870_v19 = vld [vmem:[#allocation2 + $0x400] sm:$0xc0] }
 0x2b8   : > { %v4184_v20 = vadd.f32 %v4172_v22, %v13308_v46  ;;  %v4190_v27 = vadd.f32 %v4178_v40, %v13308_v46  ;;  %v3546_v50 = vmul.f32 %v3540_v35, %v13309_v45  ;;  %v3594_v53 = vmul.f32 %v11322_v51, %v3582_v12  ;;  %v3876_v40 = vld [vmem:[#allocation2 + $0x430] sm:$0x3f] }
 0x2b9   : > { %v3413_v38 = vadd.f32 %v3401_v61, %v3371_v41  ;;  %v3419_v3 = vadd.f32 %v3401_v61, %v3377_v23  ;;  %v3470_v34 = vsel %vm1032_vm0, %v3461_v9, %v3469_v49  ;;  %v3600_v11 = vmul.f32 %v11322_v51, %v3588_v62 }
 0x2ba   : > { %v4196_v10 = vmax.f32 %v4184_v20, 0.0  ;;  %v4202_v13 = vmax.f32 %v4190_v27, 0.0  ;;  %v3558_v39 = vrot.slane %v3546_v50, 2  ;;  %v3618_v36 = vrot.slane %v3594_v53, 4  ;;  %v3948_v20 = vld [vmem:[#allocation2 + $0x430] sm:$0xfc] }
 0x2bb   : > { %v3491_v42 = vadd.f32 %v3461_v9, %v3413_v38  ;;  %v3497_v18 = vadd.f32 %v3470_v34, %v3419_v3  ;;  %v3626_v60 = vrot.slane %v3600_v11, 4  ;;  %v3726_v5 = vmul.f32 %v3714_v54, %v10871_v24  ;;  %v3906_v9 = vld [vmem:[#allocation2 + $0x430] sm:$0xff]  ;;  %v3954_v38 = vld [vmem:[#allocation2 + $0x460] sm:$0x3] }
 0x2bc   : > { %v4208_v35 = vpack.c.bf16 %v4202_v13, %v4196_v10  ;;  %v3732_v61 = vmul.f32 %v3720_v26, %v10871_v24  ;;  %v3756_v12 = vmul.f32 %v3750_v63, %v10875_v8  ;;  %v3804_v22 = vmul.f32 %v3792_v56, %v10885_v2  ;;  %v4033_v26 = vld [vmem:[#allocation2 + $0x550] sm:$0x3f] }
 0x2bd   : > { %v3528_v62 = vadd.f32 %v3516_v57, %v3491_v42  ;;  %v3534_v41 = vadd.f32 %v3522_v15, %v3497_v18  ;;  %v3627_v23 = vsel %vm1032_vm0, %v3618_v36, %v3626_v60  ;;  %v3810_v49 = vmul.f32 %v3798_v6, %v10885_v2  ;;  %v4027_v15 = vld [vmem:[#allocation2 + $0x520] sm:$0xc0]  ;;  %v4063_v63 = vld [vmem:[#allocation2 + $0x550] sm:$0xff] }
 0x2be   : > { %v4220_v27 = vrot.slane %v4208_v35, 7  ;;  %v3768_v50 = vrot.slane %v3756_v12, 2  ;;  %v3828_v53 = vrot.slane %v3804_v22, 4  ;;  %v3882_v54 = vmul.f32 %v3870_v19, %v10889_v0  ;;  %v4105_v42 = vld [vmem:[#allocation2 + $0x550] sm:$0xfc] }
 0x2bf   : > { %v3570_v3 = vadd.f32 %v3558_v39, %v3528_v62  ;;  %v3576_v34 = vadd.f32 %v3558_v39, %v3534_v41  ;;  %v3836_v11 = vrot.slane %v3810_v49, 4  ;;  %v3888_v57 = vmul.f32 %v3876_v40, %v10889_v0  ;;  %v9218_v18 = vld [vmem:[%s10266_s16 + $0x8a4] ss:$24 sps:$4 sm:$0xff]   ;;  %v4111_v22 = vld [vmem:[#allocation2 + $0x580] sm:$0x3] }
 0x2c0   : > { %4232 = vst [vmem:[#allocation3 + $0x78] sm:$0xf0] %v4220_v27  ;;  %v3780_v56 = vadd.f32 %v3768_v50, %v3726_v5  ;;  %v3786_v10 = vadd.f32 %v3768_v50, %v3732_v61  ;;  %v3912_v13 = vmul.f32 %v3906_v9, %v10893_v47  ;;  %v3960_v6 = vmul.f32 %v3948_v20, %v10897_v17  ;;  %v9221_v39 = vld [vmem:[%s10266_s16 + $0x2ac] ss:$24 sps:$4 sm:$0xff]   ;;  %v9216_v40 = vld [vmem:[%s10266_s16 + $0x8a0] ss:$24 sps:$4 sm:$0xff]  }
 0x2c1   : > { %v3648_v60 = vadd.f32 %v3618_v36, %v3570_v3  ;;  %v3654_v19 = vadd.f32 %v3627_v23, %v3576_v34  ;;  %v3837_v35 = vsel %vm1032_vm0, %v3828_v53, %v3836_v11  ;;  %v3966_v12 = vmul.f32 %v3954_v38, %v10897_v17  ;;  %v9219_v5 = vld [vmem:[%s10266_s16 + $0x2a8] ss:$24 sps:$4 sm:$0xff]   ;;  %7239 = vmatprep.subr.bf16.mxu0 %v9218_v18  ;;  %v9224_v20 = vld [vmem:[%s10266_s16 + $0x8d4] ss:$24 sps:$4 sm:$0xff]   ;;  %v9225_v3 = vld [vmem:[%s10266_s16 + $0x2d8] ss:$24 sps:$4 sm:$0xff]  }
 0x2c2   : > { %v3858_v61 = vadd.f32 %v3828_v53, %v3780_v56  ;;  %v3864_v62 = vadd.f32 %v3837_v35, %v3786_v10  ;;  %v3924_v41 = vrot.slane %v3912_v13, 2  ;;  %v3984_v49 = vrot.slane %v3960_v6, 4  ;;  %7312 = vmatprep.subr.bf16.mxu1 %v9221_v39  ;;  %v9222_v9 = vld [vmem:[%s10266_s16 + $0x8d0] ss:$24 sps:$4 sm:$0xff]   ;;  %v13316_v27 = vld [vmem:[#allocation52_spill] sm:$0xff]  ;;  %7240 = vmatpush1.bf16.msra.mxu0 %v9216_v40 }
 0x2c3   : > { %v3660_v36 = vadd.f32 %v3648_v60, %v13316_v27  ;;  %v3666_v23 = vadd.f32 %v3654_v19, %v13316_v27  ;;  %v3992_v50 = vrot.slane %v3966_v12, 4  ;;  %v4039_v38 = vmul.f32 %v4027_v15, %v10910_v43  ;;  %7313 = vmatpush1.bf16.msra.mxu1 %v9219_v5  ;;  %v9227_v34 = vld [vmem:[%s10266_s16 + $0x2dc] ss:$24 sps:$4 sm:$0xff]   ;;  %v4236_v13 = vld [vmem:[#allocation2 + $0x368] sm:$0xc0]  ;;  %7241 = vmatprep.subr.bf16.mxu0 %v9224_v20  ;;  %v4272_v15 = vld [vmem:[#allocation2 + $0x398] sm:$0xff] }
 0x2c4   : > { %v3894_v11 = vadd.f32 %v3882_v54, %v3858_v61  ;;  %v3900_v53 = vadd.f32 %v3888_v57, %v3864_v62  ;;  %v4045_v56 = vmul.f32 %v4033_v26, %v10910_v43  ;;  %v4069_v10 = vmul.f32 %v4063_v63, %v13309_v45  ;;  %v4242_v6 = vld [vmem:[#allocation2 + $0x398] sm:$0x3f]  ;;  %7314 = vmatprep.subr.bf16.mxu1 %v9227_v34  ;;  %v4320_v26 = vld [vmem:[#allocation2 + $0x3c8] sm:$0x3]  ;;  %v4392_v5 = vld [vmem:[#allocation2 + $0x488] sm:$0xc0] }
 0x2c5   : > { %v3672_v18 = vmax.f32 %v3660_v36, 0.0  ;;  %v3678_v39 = vmax.f32 %v3666_v23, 0.0  ;;  %v3993_v60 = vsel %vm1032_vm0, %v3984_v49, %v3992_v50  ;;  %v4117_v19 = vmul.f32 %v11322_v51, %v4105_v42  ;;  %v4314_v35 = vld [vmem:[#allocation2 + $0x398] sm:$0xfc] }
 0x2c6   : > { %v3936_v12 = vadd.f32 %v3924_v41, %v3894_v11  ;;  %v3942_v40 = vadd.f32 %v3924_v41, %v3900_v53  ;;  %v4081_v54 = vrot.slane %v4069_v10, 2  ;;  %v4123_v57 = vmul.f32 %v11322_v51, %v4111_v22  ;;  %7242 = vmatpush1.bf16.msra.mxu0 %v9222_v9  ;;  %v4398_v34 = vld [vmem:[#allocation2 + $0x4b8] sm:$0x3f] }
 0x2c7   : > { %v5296_v63 = vld [vmem:[#allocation3 + $0x78] sm:$0xff]  ;;  %v3684_v61 = vpack.c.bf16 %v3678_v39, %v3672_v18  ;;  %v4141_v62 = vrot.slane %v4117_v19, 4  ;;  %v4248_v20 = vmul.f32 %v4236_v13, %v10583_v30  ;;  %v4254_v36 = vmul.f32 %v4242_v6, %v10583_v30  ;;  %7315 = vmatpush1.bf16.msra.mxu1 %v9225_v3 }
 0x2c8   : > { %7190 = vmatprep.mubr.bf16.mxu0 %v5296_v63  ;;  %v4014_v42 = vadd.f32 %v3984_v49, %v3936_v12  ;;  %v4020_v23 = vadd.f32 %v3993_v60, %v3942_v40  ;;  %v4149_v50 = vrot.slane %v4123_v57, 4  ;;  %v4278_v41 = vmul.f32 %v4272_v15, %v10587_v31  ;;  %v4428_v11 = vld [vmem:[#allocation2 + $0x4b8] sm:$0xff]  ;;  %v4476_v49 = vld [vmem:[#allocation2 + $0x4e8] sm:$0x3] }
 0x2c9   : > { %v3696_v51 = vrot.slane %v3684_v61, 3  ;;  %v4326_v22 = vmul.f32 %v4314_v35, %v10591_v32  ;;  %v4332_v53 = vmul.f32 %v4320_v26, %v10591_v32  ;;  %v4404_v10 = vmul.f32 %v4392_v5, %v10595_v33  ;;  %v4470_v6 = vld [vmem:[#allocation2 + $0x4b8] sm:$0xfc]  ;;  %v4549_v26 = vld [vmem:[#allocation2 + $0x5a8] sm:$0xc0] }
 0x2ca   : > { %v4051_v13 = vadd.f32 %v4039_v38, %v4014_v42  ;;  %v4057_v18 = vadd.f32 %v4045_v56, %v4020_v23  ;;  %v4150_v9 = vsel %vm1032_vm0, %v4141_v62, %v4149_v50  ;;  %v4290_v3 = vrot.slane %v4278_v41, 2  ;;  %v4555_v5 = vld [vmem:[#allocation2 + $0x5d8] sm:$0x3f]  ;;  %v13317_v63 = vld [vmem:[#allocation40_spill] sm:$0xff] }
 0x2cb   : > { %3708 = vst [vmem:[#allocation3 + $0x70] sm:$0xf] %v3696_v51  ;;  %v4350_v39 = vrot.slane %v4326_v22, 4  ;;  %v4357_v60 = vrot.slane %v4332_v53, 4  ;;  %v4410_v19 = vmul.f32 %v4398_v34, %v10595_v33  ;;  %v4434_v15 = vmul.f32 %v4428_v11, %v10599_v37  ;;  %v4585_v51 = vld [vmem:[#allocation2 + $0x5d8] sm:$0xff] }
 0x2cc   : > { %v4093_v12 = vadd.f32 %v4081_v54, %v4051_v13  ;;  %v4099_v35 = vadd.f32 %v4081_v54, %v4057_v18  ;;  %v4302_v40 = vadd.f32 %v4290_v3, %v4248_v20  ;;  %v4308_v57 = vadd.f32 %v4290_v3, %v4254_v36  ;;  %v4627_v11 = vld [vmem:[#allocation2 + $0x5d8] sm:$0xfc]  ;;  %v4633_v22 = vld [vmem:[#allocation2 + $0x608] sm:$0x3]  ;;  %v13318_v36 = vld [vmem:[#allocation41_spill] sm:$0xff] }
 0x2cd   : > { %v4358_v38 = vsel %vm1032_vm0, %v4350_v39, %v4357_v60  ;;  %v4446_v56 = vrot.slane %v4434_v15, 2  ;;  %v4482_v61 = vmul.f32 %v4470_v6, %v13317_v63  ;;  %v4488_v42 = vmul.f32 %v4476_v49, %v13317_v63  ;;  %v11374_v15 = vld [vmem:[%s10284_s6 + $0x38] ss:$0 sm:$0xff] }
 0x2ce   : > { %v4171_v23 = vadd.f32 %v4141_v62, %v4093_v12  ;;  %v4177_v50 = vadd.f32 %v4150_v9, %v4099_v35  ;;  %v4380_v41 = vadd.f32 %v4350_v39, %v4302_v40  ;;  %v4386_v34 = vadd.f32 %v4358_v38, %v4308_v57  ;;  %v4759_v62 = vld [vmem:[#allocation2 + $0x3f8] sm:$0xc0]  ;;  %v13319_v39 = vld [vmem:[#allocation43_spill] sm:$0xff]  ;;  %v4765_v40 = vld [vmem:[#allocation2 + $0x428] sm:$0x3f] }
 0x2cf   : > { %v4506_v54 = vrot.slane %v4482_v61, 4  ;;  %v4513_v20 = vrot.slane %v4488_v42, 4  ;;  %v4561_v53 = vmul.f32 %v4549_v26, %v13318_v36  ;;  %v4567_v13 = vmul.f32 %v4555_v5, %v13318_v36  ;;  %v4795_v57 = vld [vmem:[#allocation2 + $0x428] sm:$0xff] }
 0x2d0   : > { %v4183_v18 = vadd.f32 %v4171_v23, %v13316_v27  ;;  %v4189_v3 = vadd.f32 %v4177_v50, %v13316_v27  ;;  %v4416_v6 = vadd.f32 %v4404_v10, %v4380_v41  ;;  %v4422_v49 = vadd.f32 %v4410_v19, %v4386_v34  ;;  %v4837_v42 = vld [vmem:[#allocation2 + $0x428] sm:$0xfc]  ;;  %v4843_v10 = vld [vmem:[#allocation2 + $0x458] sm:$0x3]  ;;  %v4915_v34 = vld [vmem:[#allocation2 + $0x518] sm:$0xc0] }
 0x2d1   : > { %v4514_v9 = vsel %vm1032_vm0, %v4506_v54, %v4513_v20  ;;  %v4591_v60 = vmul.f32 %v4585_v51, %v13319_v39  ;;  %v4639_v12 = vmul.f32 %v11374_v15, %v4627_v11  ;;  %v4645_v35 = vmul.f32 %v11374_v15, %v4633_v22  ;;  %v4921_v22 = vld [vmem:[#allocation2 + $0x548] sm:$0x3f] }
 0x2d2   : > { %v4195_v26 = vmax.f32 %v4183_v18, 0.0  ;;  %v4201_v5 = vmax.f32 %v4189_v3, 0.0  ;;  %v4458_v38 = vadd.f32 %v4446_v56, %v4416_v6  ;;  %v4464_v61 = vadd.f32 %v4446_v56, %v4422_v49  ;;  %v4951_v6 = vld [vmem:[#allocation2 + $0x548] sm:$0xff] }
 0x2d3   : > { %v4603_v19 = vrot.slane %v4591_v60, 2  ;;  %v4663_v23 = vrot.slane %v4639_v12, 4  ;;  %v4670_v50 = vrot.slane %v4645_v35, 4  ;;  %v4771_v41 = vmul.f32 %v4759_v62, %v10583_v30  ;;  %v4993_v49 = vld [vmem:[#allocation2 + $0x548] sm:$0xfc] }
 0x2d4   : > { %v4207_v51 = vpack.c.bf16 %v4201_v5, %v4195_v26  ;;  %v4536_v20 = vadd.f32 %v4506_v54, %v4458_v38  ;;  %v4542_v27 = vadd.f32 %v4514_v9, %v4464_v61  ;;  %v4777_v11 = vmul.f32 %v4765_v40, %v10583_v30  ;;  %v4999_v54 = vld [vmem:[#allocation2 + $0x578] sm:$0x3]  ;;  %v5072_v38 = vld [vmem:[#allocation2 + $0x638] sm:$0xc0] }
 0x2d5   : > { %v4671_v45 = vsel %vm1032_vm0, %v4663_v23, %v4670_v50  ;;  %v4801_v18 = vmul.f32 %v4795_v57, %v10587_v31  ;;  %v4849_v56 = vmul.f32 %v4837_v42, %v10591_v32  ;;  %v4855_v3 = vmul.f32 %v4843_v10, %v10591_v32  ;;  %v5108_v10 = vld [vmem:[#allocation2 + $0x668] sm:$0xff] }
 0x2d6   : > { %v4219_v60 = vrot.slane %v4207_v51, 7  ;;  %v4573_v12 = vadd.f32 %v4561_v53, %v4536_v20  ;;  %v4579_v62 = vadd.f32 %v4567_v13, %v4542_v27  ;;  %v4927_v35 = vmul.f32 %v4915_v34, %v10595_v33  ;;  %v5078_v13 = vld [vmem:[#allocation2 + $0x668] sm:$0x3f] }
 0x2d7   : > { %v4813_v9 = vrot.slane %v4801_v18, 2  ;;  %v4873_v26 = vrot.slane %v4849_v56, 4  ;;  %v4880_v30 = vrot.slane %v4855_v3, 4  ;;  %v4933_v40 = vmul.f32 %v4921_v22, %v10595_v33  ;;  %v5150_v20 = vld [vmem:[#allocation2 + $0x668] sm:$0xfc] }
 0x2d8   : > { %4231 = vst [vmem:[#allocation3 + $0x70] sm:$0xf0] %v4219_v60  ;;  %v4615_v5 = vadd.f32 %v4603_v19, %v4573_v12  ;;  %v4621_v31 = vadd.f32 %v4603_v19, %v4579_v62  ;;  %v4957_v57 = vmul.f32 %v4951_v6, %v10599_v37  ;;  %v5005_v32 = vmul.f32 %v4993_v49, %v13317_v63  ;;  %v5156_v56 = vld [vmem:[#allocation2 + $0x698] sm:$0x3]  ;;  %v13320_v3 = vld [vmem:[#allocation44_spill] sm:$0xff] }
 0x2d9   : > { %v4825_v61 = vadd.f32 %v4813_v9, %v4771_v41  ;;  %v4831_v42 = vadd.f32 %v4813_v9, %v4777_v11  ;;  %v4881_v27 = vsel %vm1032_vm0, %v4873_v26, %v4880_v30  ;;  %v5011_v53 = vmul.f32 %v4999_v54, %v13317_v63  ;;  %v4235_v49 = vld [vmem:[#allocation2 + $0x360] sm:$0xc0]  ;;  %v4241_v62 = vld [vmem:[#allocation2 + $0x390] sm:$0x3f] }
 0x2da   : > { %v4693_v50 = vadd.f32 %v4663_v23, %v4615_v5  ;;  %v4699_v34 = vadd.f32 %v4671_v45, %v4621_v31  ;;  %v4969_v51 = vrot.slane %v4957_v57, 2  ;;  %v5029_v33 = vrot.slane %v5005_v32, 4  ;;  %v4271_v54 = vld [vmem:[#allocation2 + $0x390] sm:$0xff]  ;;  %v4319_v57 = vld [vmem:[#allocation2 + $0x3c0] sm:$0x3] }
 0x2db   : > { %v4903_v22 = vadd.f32 %v4873_v26, %v4825_v61  ;;  %v4909_v19 = vadd.f32 %v4881_v27, %v4831_v42  ;;  %v5036_v18 = vrot.slane %v5011_v53, 4  ;;  %v5084_v37 = vmul.f32 %v5072_v38, %v13318_v36  ;;  %v4313_v9 = vld [vmem:[#allocation2 + $0x390] sm:$0xfc] }
 0x2dc   : > { %v4705_v41 = vadd.f32 %v4693_v50, %v13320_v3  ;;  %v4711_v11 = vadd.f32 %v4699_v34, %v13320_v3  ;;  %v5090_v6 = vmul.f32 %v5078_v13, %v13318_v36  ;;  %v5114_v63 = vmul.f32 %v5108_v10, %v13319_v39  ;;  %v4397_v34 = vld [vmem:[#allocation2 + $0x4b0] sm:$0x3f] }
 0x2dd   : > { %v4939_v23 = vadd.f32 %v4927_v35, %v4903_v22  ;;  %v4945_v45 = vadd.f32 %v4933_v40, %v4909_v19  ;;  %v5037_v60 = vsel %vm1032_vm0, %v5029_v33, %v5036_v18  ;;  %v5162_v12 = vmul.f32 %v11374_v15, %v5150_v20  ;;  %v4391_v40 = vld [vmem:[#allocation2 + $0x480] sm:$0xc0]  ;;  %v4427_v20 = vld [vmem:[#allocation2 + $0x4b0] sm:$0xff] }
 0x2de   : > { %v4717_v26 = vmax.f32 %v4705_v41, 0.0  ;;  %v4723_v30 = vmax.f32 %v4711_v11, 0.0  ;;  %v5126_v5 = vrot.slane %v5114_v63, 2  ;;  %v5168_v31 = vmul.f32 %v11374_v15, %v5156_v56  ;;  %v4469_v56 = vld [vmem:[#allocation2 + $0x4b0] sm:$0xfc] }
 0x2df   : > { %v5295_v32 = vld [vmem:[#allocation3 + $0x70] sm:$0xff]  ;;  %v4981_v36 = vadd.f32 %v4969_v51, %v4939_v23  ;;  %v4987_v38 = vadd.f32 %v4969_v51, %v4945_v45  ;;  %v5186_v39 = vrot.slane %v5162_v12, 4  ;;  %v4247_v35 = vmul.f32 %v4235_v49, %v10703_v1  ;;  %v4475_v23 = vld [vmem:[#allocation2 + $0x4e0] sm:$0x3] }
 0x2e0   : > { %7191 = vmatmul.mubr.bf16.gmra.mrb[8].mxu0 %v5295_v32  ;;  %v4729_v61 = vpack.c.bf16 %v4723_v30, %v4717_v26  ;;  %v5193_v42 = vrot.slane %v5168_v31, 4  ;;  %v4253_v27 = vmul.f32 %v4241_v62, %v10703_v1  ;;  %v4277_v53 = vmul.f32 %v4271_v54, %v10707_v29  ;;  %v4548_v62 = vld [vmem:[#allocation2 + $0x5a0] sm:$0xc0]  ;;  %v4554_v31 = vld [vmem:[#allocation2 + $0x5d0] sm:$0x3f] }
 0x2e1   : > { %v5059_v13 = vadd.f32 %v5029_v33, %v4981_v36  ;;  %v5065_v10 = vadd.f32 %v5037_v60, %v4987_v38  ;;  %v4325_v50 = vmul.f32 %v4313_v9, %v10711_v16  ;;  %v4331_v15 = vmul.f32 %v4319_v57, %v10711_v16  ;;  %v4584_v36 = vld [vmem:[#allocation2 + $0x5d0] sm:$0xff] }
 0x2e2   : > { %v4741_v51 = vrot.slane %v4729_v61, 3  ;;  %v5194_v22 = vsel %vm1032_vm0, %v5186_v39, %v5193_v42  ;;  %v4289_v19 = vrot.slane %v4277_v53, 2  ;;  %v4403_v18 = vmul.f32 %v4391_v40, %v10721_v52  ;;  %v4626_v38 = vld [vmem:[#allocation2 + $0x5d0] sm:$0xfc] }
 0x2e3   : > { %v5096_v41 = vadd.f32 %v5084_v37, %v5059_v13  ;;  %v5102_v11 = vadd.f32 %v5090_v6, %v5065_v10  ;;  %v4349_v63 = vrot.slane %v4325_v50, 4  ;;  %v4355_v49 = vrot.slane %v4331_v15, 4 }
 0x2e4   : > { %4753 = vst [vmem:[#allocation3 + $0x98] sm:$0xf] %v4741_v51  ;;  %v4301_v33 = vadd.f32 %v4289_v19, %v4247_v35  ;;  %v4307_v45 = vadd.f32 %v4289_v19, %v4253_v27  ;;  %v4409_v60 = vmul.f32 %v4397_v34, %v10721_v52  ;;  %v4433_v12 = vmul.f32 %v4427_v20, %v13311_v21  ;;  %v4632_v27 = vld [vmem:[#allocation2 + $0x600] sm:$0x3]  ;;  %v13321_v34 = vld [vmem:[#allocation48_spill] sm:$0xff] }
 0x2e5   : > { %v5138_v54 = vadd.f32 %v5126_v5, %v5096_v41  ;;  %v5144_v9 = vadd.f32 %v5126_v5, %v5102_v11  ;;  %v4356_v26 = vsel %vm1032_vm0, %v4349_v63, %v4355_v49  ;;  %v4481_v30 = vmul.f32 %v4469_v56, %v13312_v14  ;;  %v11416_v51 = vld [vmem:[%s10284_s6 + $0x30] ss:$0 sm:$0xff]  ;;  %v4764_v11 = vld [vmem:[#allocation2 + $0x420] sm:$0x3f] }
 0x2e6   : > { %v4379_v37 = vadd.f32 %v4349_v63, %v4301_v33  ;;  %v4385_v6 = vadd.f32 %v4356_v26, %v4307_v45  ;;  %v4445_v57 = vrot.slane %v4433_v12, 2  ;;  %v4487_v32 = vmul.f32 %v4475_v23, %v13312_v14  ;;  %v4794_v63 = vld [vmem:[#allocation2 + $0x420] sm:$0xff]  ;;  %v4914_v26 = vld [vmem:[#allocation2 + $0x510] sm:$0xc0] }
 0x2e7   : > { %v5216_v35 = vadd.f32 %v5186_v39, %v5138_v54  ;;  %v5222_v40 = vadd.f32 %v5194_v22, %v5144_v9  ;;  %v4505_v61 = vrot.slane %v4481_v30, 4  ;;  %v4560_v42 = vmul.f32 %v4548_v62, %v13313_v55  ;;  %v4758_v22 = vld [vmem:[#allocation2 + $0x3f0] sm:$0xc0]  ;;  %v4836_v49 = vld [vmem:[#allocation2 + $0x420] sm:$0xfc] }
 0x2e8   : > { %v4415_v5 = vadd.f32 %v4403_v18, %v4379_v37  ;;  %v4421_v53 = vadd.f32 %v4409_v60, %v4385_v6  ;;  %v4511_v13 = vrot.slane %v4487_v32, 4  ;;  %v4566_v10 = vmul.f32 %v4554_v31, %v13313_v55  ;;  %v4842_v60 = vld [vmem:[#allocation2 + $0x450] sm:$0x3] }
 0x2e9   : > { %v5228_v50 = vadd.f32 %v5216_v35, %v13320_v3  ;;  %v5234_v15 = vadd.f32 %v5222_v40, %v13320_v3  ;;  %v4590_v20 = vmul.f32 %v4584_v36, %v13321_v34  ;;  %v4638_v39 = vmul.f32 %v11416_v51, %v4626_v38  ;;  %v4950_v40 = vld [vmem:[#allocation2 + $0x540] sm:$0xff] }
 0x2ea   : > { %v4457_v19 = vadd.f32 %v4445_v57, %v4415_v5  ;;  %v4463_v56 = vadd.f32 %v4445_v57, %v4421_v53  ;;  %v4512_v41 = vsel %vm1032_vm0, %v4505_v61, %v4511_v13  ;;  %v4644_v18 = vmul.f32 %v11416_v51, %v4632_v27  ;;  %v4920_v57 = vld [vmem:[#allocation2 + $0x540] sm:$0x3f] }
 0x2eb   : > { %v5240_v23 = vmax.f32 %v5228_v50, 0.0  ;;  %v5246_v33 = vmax.f32 %v5234_v15, 0.0  ;;  %v4602_v45 = vrot.slane %v4590_v20, 2  ;;  %v4662_v3 = vrot.slane %v4638_v39, 4  ;;  %v4998_v50 = vld [vmem:[#allocation2 + $0x570] sm:$0x3] }
 0x2ec   : > { %v4535_v12 = vadd.f32 %v4505_v61, %v4457_v19  ;;  %v4541_v62 = vadd.f32 %v4512_v41, %v4463_v56  ;;  %v4668_v54 = vrot.slane %v4644_v18, 4  ;;  %v4770_v9 = vmul.f32 %v4758_v22, %v10703_v1  ;;  %v4992_v61 = vld [vmem:[#allocation2 + $0x540] sm:$0xfc]  ;;  %v5071_v22 = vld [vmem:[#allocation2 + $0x630] sm:$0xc0] }
 0x2ed   : > { %v5252_v30 = vpack.c.bf16 %v5246_v33, %v5240_v23  ;;  %v4776_v31 = vmul.f32 %v4764_v11, %v10703_v1  ;;  %v4800_v37 = vmul.f32 %v4794_v63, %v10707_v29  ;;  %v4848_v6 = vmul.f32 %v4836_v49, %v10711_v16  ;;  %v5077_v11 = vld [vmem:[#allocation2 + $0x660] sm:$0x3f] }
 0x2ee   : > { %v4572_v32 = vadd.f32 %v4560_v42, %v4535_v12  ;;  %v4578_v36 = vadd.f32 %v4566_v10, %v4541_v62  ;;  %v4669_v38 = vsel %vm1032_vm0, %v4662_v3, %v4668_v54  ;;  %v4854_v35 = vmul.f32 %v4842_v60, %v10711_v16  ;;  %v5107_v63 = vld [vmem:[#allocation2 + $0x660] sm:$0xff]  ;;  %v13322_v60 = vld [vmem:[#allocation49_spill] sm:$0xff] }
 0x2ef   : > { %v5264_v27 = vrot.slane %v5252_v30, 7  ;;  %v4812_v5 = vrot.slane %v4800_v37, 2  ;;  %v4872_v53 = vrot.slane %v4848_v6, 4  ;;  %v4926_v13 = vmul.f32 %v4914_v26, %v10721_v52  ;;  %v5155_v54 = vld [vmem:[#allocation2 + $0x690] sm:$0x3]  ;;  %v4274_v6 = vld [vmem:[#allocation2 + $0x3a8] sm:$0xff] }
 0x2f0   : > { %v4614_v1 = vadd.f32 %v4602_v45, %v4572_v32  ;;  %v4620_v15 = vadd.f32 %v4602_v45, %v4578_v36  ;;  %v4878_v29 = vrot.slane %v4854_v35, 4  ;;  %v4932_v20 = vmul.f32 %v4920_v57, %v10721_v52  ;;  %v5149_v45 = vld [vmem:[#allocation2 + $0x660] sm:$0xfc]  ;;  %v4244_v37 = vld [vmem:[#allocation2 + $0x3a8] sm:$0x3f] }
 0x2f1   : > { %5276 = vst [vmem:[#allocation3 + $0x98] sm:$0xf0] %v5264_v27  ;;  %v4824_v42 = vadd.f32 %v4812_v5, %v4770_v9  ;;  %v4830_v10 = vadd.f32 %v4812_v5, %v4776_v31  ;;  %v4956_v39 = vmul.f32 %v4950_v40, %v13311_v21  ;;  %v5004_v16 = vmul.f32 %v4992_v61, %v13312_v14  ;;  %v4238_v9 = vld [vmem:[#allocation2 + $0x378] sm:$0xc0]  ;;  %v4316_v57 = vld [vmem:[#allocation2 + $0x3a8] sm:$0xfc] }
 0x2f2   : > { %v4692_v19 = vadd.f32 %v4662_v3, %v4614_v1  ;;  %v4698_v56 = vadd.f32 %v4669_v38, %v4620_v15  ;;  %v4879_v41 = vsel %vm1032_vm0, %v4872_v53, %v4878_v29  ;;  %v5010_v18 = vmul.f32 %v4998_v50, %v13312_v14  ;;  %v9230_v40 = vld [vmem:[%s10266_s16 + $0x30c] ss:$24 sps:$4 sm:$0xff]  }
 0x2f3   : > { %v4902_v49 = vadd.f32 %v4872_v53, %v4824_v42  ;;  %v4908_v23 = vadd.f32 %v4879_v41, %v4830_v10  ;;  %v4968_v33 = vrot.slane %v4956_v39, 2  ;;  %v5028_v52 = vrot.slane %v5004_v16, 4  ;;  %v9233_v61 = vld [vmem:[%s10266_s16 + $0x14] ss:$24 sps:$4 sm:$0xff]   ;;  %7357 = vmatprep.subr.bf16.mxu1 %v9230_v40  ;;  %v4587_v40 = vld [vmem:[#allocation2 + $0x5e8] sm:$0xff] }
 0x2f4   : > { %v4704_v12 = vadd.f32 %v4692_v19, %v13322_v60  ;;  %v4710_v21 = vadd.f32 %v4698_v56, %v13322_v60  ;;  %v5034_v62 = vrot.slane %v5010_v18, 4  ;;  %v5083_v3 = vmul.f32 %v5071_v22, %v13313_v55  ;;  %v4322_v50 = vld [vmem:[#allocation2 + $0x3d8] sm:$0x3]  ;;  %7503 = vmatprep.subr.bf16.mxu0 %v9233_v61  ;;  %v4430_v22 = vld [vmem:[#allocation2 + $0x4c8] sm:$0xff] }
 0x2f5   : > { %v4938_v26 = vadd.f32 %v4926_v13, %v4902_v49  ;;  %v4944_v14 = vadd.f32 %v4932_v20, %v4908_v23  ;;  %v5089_v30 = vmul.f32 %v5077_v11, %v13313_v55  ;;  %v5113_v31 = vmul.f32 %v5107_v63, %v13321_v34  ;;  %v4394_v55 = vld [vmem:[#allocation2 + $0x498] sm:$0xc0]  ;;  %v4629_v61 = vld [vmem:[#allocation2 + $0x5e8] sm:$0xfc] }
 0x2f6   : > { %v4716_v32 = vmax.f32 %v4704_v12, 0.0  ;;  %v4722_v36 = vmax.f32 %v4710_v21, 0.0  ;;  %v5035_v38 = vsel %vm1032_vm0, %v5028_v52, %v5034_v62  ;;  %v5161_v35 = vmul.f32 %v11416_v51, %v5149_v45 }
 0x2f7   : > { %v4980_v27 = vadd.f32 %v4968_v33, %v4938_v26  ;;  %v4986_v5 = vadd.f32 %v4968_v33, %v4944_v14  ;;  %v5125_v53 = vrot.slane %v5113_v31, 2  ;;  %v5167_v13 = vmul.f32 %v11416_v51, %v5155_v54  ;;  %v4400_v51 = vld [vmem:[#allocation2 + $0x4c8] sm:$0x3f]  ;;  %v4551_v31 = vld [vmem:[#allocation2 + $0x5b8] sm:$0xc0] }
 0x2f8   : > { %v11443_v1 = vld [vmem:[#allocation3 + $0x98] sm:$0xff]  ;;  %v4728_v34 = vpack.c.bf16 %v4722_v36, %v4716_v32  ;;  %v5185_v15 = vrot.slane %v5161_v35, 4  ;;  %v4250_v29 = vmul.f32 %v4238_v9, %v10787_v4  ;;  %v4256_v20 = vmul.f32 %v4244_v37, %v10787_v4  ;;  %v4472_v33 = vld [vmem:[#allocation2 + $0x4c8] sm:$0xfc] }
 0x2f9   : > { %7127 = vmatprep.mubr.bf16.mxu1 %v11443_v1  ;;  %v5058_v42 = vadd.f32 %v5028_v52, %v4980_v27  ;;  %v5064_v10 = vadd.f32 %v5035_v38, %v4986_v5  ;;  %v5191_v39 = vrot.slane %v5167_v13, 4  ;;  %v4280_v16 = vmul.f32 %v4274_v6, %v10791_v7  ;;  %v4478_v52 = vld [vmem:[#allocation2 + $0x4f8] sm:$0x3]  ;;  %v4557_v37 = vld [vmem:[#allocation2 + $0x5e8] sm:$0x3f] }
 0x2fa   : > { %v4740_v19 = vrot.slane %v4728_v34, 3  ;;  %v4328_v56 = vmul.f32 %v4316_v57, %v10795_v28  ;;  %v4334_v41 = vmul.f32 %v4322_v50, %v10795_v28  ;;  %v4406_v18 = vmul.f32 %v4394_v55, %v10805_v25  ;;  %v4635_v27 = vld [vmem:[#allocation2 + $0x618] sm:$0x3] }
 0x2fb   : > { %v5095_v11 = vadd.f32 %v5083_v3, %v5058_v42  ;;  %v5101_v63 = vadd.f32 %v5089_v30, %v5064_v10  ;;  %v5192_v49 = vsel %vm1032_vm0, %v5185_v15, %v5191_v39  ;;  %v4292_v23 = vrot.slane %v4280_v16, 2  ;;  %v11465_v39 = vld [vmem:[%s10284_s6 + $0x48] ss:$0 sm:$0xff] }
 0x2fc   : > { %4752 = vst [vmem:[#allocation3 + $0x90] sm:$0xf] %v4740_v19  ;;  %v4352_v45 = vrot.slane %v4328_v56, 4  ;;  %v4361_v12 = vrot.slane %v4334_v41, 4  ;;  %v4412_v21 = vmul.f32 %v4400_v51, %v10805_v25  ;;  %v4436_v62 = vmul.f32 %v4430_v22, %v10809_v48  ;;  %v4767_v22 = vld [vmem:[#allocation2 + $0x438] sm:$0x3f] }
 0x2fd   : > { %v5137_v54 = vadd.f32 %v5125_v53, %v5095_v11  ;;  %v5143_v9 = vadd.f32 %v5125_v53, %v5101_v63  ;;  %v4304_v26 = vadd.f32 %v4292_v23, %v4250_v29  ;;  %v4310_v14 = vadd.f32 %v4292_v23, %v4256_v20  ;;  %v4797_v19 = vld [vmem:[#allocation2 + $0x438] sm:$0xff] }
 0x2fe   : > { %v4362_v3 = vsel %vm1032_vm0, %v4352_v45, %v4361_v12  ;;  %v4448_v30 = vrot.slane %v4436_v62, 2  ;;  %v4484_v6 = vmul.f32 %v4472_v33, %v10813_v58  ;;  %v4490_v57 = vmul.f32 %v4478_v52, %v10813_v58 }
 0x2ff   : > { %v5215_v32 = vadd.f32 %v5185_v15, %v5137_v54  ;;  %v5221_v36 = vadd.f32 %v5192_v49, %v5143_v9  ;;  %v4382_v38 = vadd.f32 %v4352_v45, %v4304_v26  ;;  %v4388_v35 = vadd.f32 %v4362_v3, %v4310_v14  ;;  %v4761_v15 = vld [vmem:[#allocation2 + $0x408] sm:$0xc0]  ;;  %v4923_v9 = vld [vmem:[#allocation2 + $0x558] sm:$0x3f] }
 0x300   : > { %v4508_v5 = vrot.slane %v4484_v6, 4  ;;  %v4517_v53 = vrot.slane %v4490_v57, 4  ;;  %v4563_v13 = vmul.f32 %v4551_v31, %v10828_v59  ;;  %v4569_v50 = vmul.f32 %v4557_v37, %v10828_v59  ;;  %v4917_v45 = vld [vmem:[#allocation2 + $0x528] sm:$0xc0]  ;;  %v4953_v3 = vld [vmem:[#allocation2 + $0x558] sm:$0xff] }
 0x301   : > { %v5227_v55 = vadd.f32 %v5215_v32, %v13322_v60  ;;  %v5233_v34 = vadd.f32 %v5221_v36, %v13322_v60  ;;  %v4418_v29 = vadd.f32 %v4406_v18, %v4382_v38  ;;  %v4424_v20 = vadd.f32 %v4412_v21, %v4388_v35  ;;  %v4839_v60 = vld [vmem:[#allocation2 + $0x438] sm:$0xfc]  ;;  %v4845_v18 = vld [vmem:[#allocation2 + $0x468] sm:$0x3] }
 0x302   : > { %v4518_v42 = vsel %vm1032_vm0, %v4508_v5, %v4517_v53  ;;  %v4593_v10 = vmul.f32 %v4587_v40, %v10832_v44  ;;  %v4641_v16 = vmul.f32 %v11465_v39, %v4629_v61  ;;  %v4647_v51 = vmul.f32 %v11465_v39, %v4635_v27  ;;  %v5001_v38 = vld [vmem:[#allocation2 + $0x588] sm:$0x3]  ;;  %v5074_v53 = vld [vmem:[#allocation2 + $0x648] sm:$0xc0] }
 0x303   : > { %v5239_v56 = vmax.f32 %v5227_v55, 0.0  ;;  %v5245_v41 = vmax.f32 %v5233_v34, 0.0  ;;  %v4460_v11 = vadd.f32 %v4448_v30, %v4418_v29  ;;  %v4466_v63 = vadd.f32 %v4448_v30, %v4424_v20  ;;  %v4995_v30 = vld [vmem:[#allocation2 + $0x558] sm:$0xfc] }
 0x304   : > { %v4605_v49 = vrot.slane %v4593_v10, 2  ;;  %v4665_v23 = vrot.slane %v4641_v16, 4  ;;  %v4674_v33 = vrot.slane %v4647_v51, 4  ;;  %v4773_v52 = vmul.f32 %v4761_v15, %v10787_v4  ;;  %v5080_v29 = vld [vmem:[#allocation2 + $0x678] sm:$0x3f] }
 0x305   : > { %v5251_v12 = vpack.c.bf16 %v5245_v41, %v5239_v56  ;;  %v4538_v21 = vadd.f32 %v4508_v5, %v4460_v11  ;;  %v4544_v62 = vadd.f32 %v4518_v42, %v4466_v63  ;;  %v4779_v54 = vmul.f32 %v4767_v22, %v10787_v4  ;;  %v5110_v20 = vld [vmem:[#allocation2 + $0x678] sm:$0xff]  ;;  %v5158_v56 = vld [vmem:[#allocation2 + $0x6a8] sm:$0x3] }
 0x306   : > { %v4675_v26 = vsel %vm1032_vm0, %v4665_v23, %v4674_v33  ;;  %v4803_v14 = vmul.f32 %v4797_v19, %v10791_v7  ;;  %v4851_v31 = vmul.f32 %v4839_v60, %v10795_v28  ;;  %v4857_v37 = vmul.f32 %v4845_v18, %v10795_v28  ;;  %v5152_v16 = vld [vmem:[#allocation2 + $0x678] sm:$0xfc]  ;;  %v4237_v60 = vld [vmem:[#allocation2 + $0x370] sm:$0xc0] }
 0x307   : > { %v5263_v6 = vrot.slane %v5251_v12, 7  ;;  %v4575_v57 = vadd.f32 %v4563_v13, %v4538_v21  ;;  %v4581_v32 = vadd.f32 %v4569_v50, %v4544_v62  ;;  %v4929_v36 = vmul.f32 %v4917_v45, %v10805_v25  ;;  %v4273_v45 = vld [vmem:[#allocation2 + $0x3a0] sm:$0xff] }
 0x308   : > { %v4815_v35 = vrot.slane %v4803_v14, 2  ;;  %v4875_v40 = vrot.slane %v4851_v31, 4  ;;  %v4884_v4 = vrot.slane %v4857_v37, 4  ;;  %v4935_v61 = vmul.f32 %v4923_v9, %v10805_v25  ;;  %v4315_v12 = vld [vmem:[#allocation2 + $0x3a0] sm:$0xfc] }
 0x309   : > { %5275 = vst [vmem:[#allocation3 + $0x90] sm:$0xf0] %v5263_v6  ;;  %v4617_v27 = vadd.f32 %v4605_v49, %v4575_v57  ;;  %v4623_v7 = vadd.f32 %v4605_v49, %v4581_v32  ;;  %v4959_v5 = vmul.f32 %v4953_v3, %v10809_v48  ;;  %v5007_v28 = vmul.f32 %v4995_v30, %v10813_v58  ;;  %v4393_v3 = vld [vmem:[#allocation2 + $0x490] sm:$0xc0] }
 0x30a   : > { %v4827_v55 = vadd.f32 %v4815_v35, %v4773_v52  ;;  %v4833_v34 = vadd.f32 %v4815_v35, %v4779_v54  ;;  %v4885_v13 = vsel %vm1032_vm0, %v4875_v40, %v4884_v4  ;;  %v5013_v50 = vmul.f32 %v5001_v38, %v10813_v58  ;;  %v4243_v52 = vld [vmem:[#allocation2 + $0x3a0] sm:$0x3f] }
 0x30b   : > { %v4695_v15 = vadd.f32 %v4665_v23, %v4617_v27  ;;  %v4701_v42 = vadd.f32 %v4675_v26, %v4623_v7  ;;  %v4971_v10 = vrot.slane %v4959_v5, 2  ;;  %v5031_v25 = vrot.slane %v5007_v28, 4  ;;  %v4321_v26 = vld [vmem:[#allocation2 + $0x3d0] sm:$0x3]  ;;  %v4429_v4 = vld [vmem:[#allocation2 + $0x4c0] sm:$0xff] }
 0x30c   : > { %v4905_v51 = vadd.f32 %v4875_v40, %v4827_v55  ;;  %v4911_v22 = vadd.f32 %v4885_v13, %v4833_v34  ;;  %v5040_v19 = vrot.slane %v5013_v50, 4  ;;  %v5086_v48 = vmul.f32 %v5074_v53, %v10828_v59  ;;  %v4399_v40 = vld [vmem:[#allocation2 + $0x4c0] sm:$0x3f] }
 0x30d   : > { %v4707_v41 = vadd.f32 %v4695_v15, %v13308_v46  ;;  %v4713_v11 = vadd.f32 %v4701_v42, %v13308_v46  ;;  %v5092_v63 = vmul.f32 %v5080_v29, %v10828_v59  ;;  %v5116_v58 = vmul.f32 %v5110_v20, %v10832_v44  ;;  %v4471_v53 = vld [vmem:[#allocation2 + $0x4c0] sm:$0xfc]  ;;  %v4477_v29 = vld [vmem:[#allocation2 + $0x4f0] sm:$0x3] }
 0x30e   : > { %v4941_v18 = vadd.f32 %v4929_v36, %v4905_v51  ;;  %v4947_v49 = vadd.f32 %v4935_v61, %v4911_v22  ;;  %v5041_v23 = vsel %vm1032_vm0, %v5031_v25, %v5040_v19  ;;  %v5164_v33 = vmul.f32 %v11465_v39, %v5152_v16  ;;  %v9480_v61 = vld [vmem:[#allocation3 + $0x8] sm:$0xff] }
 0x30f   : > { %v4719_v21 = vmax.f32 %v4707_v41, 0.0  ;;  %v4725_v62 = vmax.f32 %v4713_v11, 0.0  ;;  %v5128_v54 = vrot.slane %v5116_v58, 2  ;;  %v5170_v9 = vmul.f32 %v11465_v39, %v5158_v56  ;;  %v9228_v56 = vld [vmem:[%s10266_s16 + $0x308] ss:$24 sps:$4 sm:$0xff]  }
 0x310   : > { %v11489_v14 = vld [vmem:[#allocation3 + $0x90] sm:$0xff]  ;;  %v4983_v59 = vadd.f32 %v4971_v10, %v4941_v18  ;;  %v4989_v44 = vadd.f32 %v4971_v10, %v4947_v49  ;;  %v5188_v31 = vrot.slane %v5164_v33, 4  ;;  %v4249_v37 = vmul.f32 %v4237_v60, %v10871_v24  ;;  %v4586_v60 = vld [vmem:[#allocation2 + $0x5e0] sm:$0xff] }
 0x311   : > { %7128 = vmatmul.mubr.bf16.gmra.mrb[12].mxu1 %v11489_v14  ;;  %v4731_v30 = vpack.c.bf16 %v4725_v62, %v4719_v21  ;;  %v5197_v6 = vrot.slane %v5170_v9, 4  ;;  %v4255_v57 = vmul.f32 %v4243_v52, %v10871_v24  ;;  %v4279_v32 = vmul.f32 %v4273_v45, %v10875_v8  ;;  %v4628_v18 = vld [vmem:[#allocation2 + $0x5e0] sm:$0xfc] }
 0x312   : > { %v5061_v36 = vadd.f32 %v5031_v25, %v4983_v59  ;;  %v5067_v38 = vadd.f32 %v5041_v23, %v4989_v44  ;;  %v4327_v39 = vmul.f32 %v4315_v12, %v10885_v2  ;;  %v4333_v35 = vmul.f32 %v4321_v26, %v10885_v2  ;;  %7316 = vmatprep.mubr.bf16.mxu1 %v9480_v61  ;;  %v4550_v25 = vld [vmem:[#allocation2 + $0x5b0] sm:$0xc0]  ;;  %v9236_v49 = vld [vmem:[%s10266_s16 + $0x33c] ss:$24 sps:$4 sm:$0xff]   ;;  %v4634_v12 = vld [vmem:[#allocation2 + $0x610] sm:$0x3] }
 0x313   : > { %v4743_v27 = vrot.slane %v4731_v30, 3  ;;  %v5198_v7 = vsel %vm1032_vm0, %v5188_v31, %v5197_v6  ;;  %v4291_v5 = vrot.slane %v4279_v32, 2  ;;  %v4405_v28 = vmul.f32 %v4393_v3, %v10889_v0  ;;  %v9481_v26 = vld [vmem:[#allocation3] sm:$0xff] }
 0x314   : > { %v5098_v55 = vadd.f32 %v5086_v48, %v5061_v36  ;;  %v5104_v34 = vadd.f32 %v5092_v63, %v5067_v38  ;;  %v4351_v13 = vrot.slane %v4327_v39, 4  ;;  %v4359_v50 = vrot.slane %v4333_v35, 4  ;;  %v4556_v48 = vld [vmem:[#allocation2 + $0x5e0] sm:$0x3f]  ;;  %v4760_v6 = vld [vmem:[#allocation2 + $0x400] sm:$0xc0] }
 0x315   : > { %4755 = vst [vmem:[#allocation3 + $0xa8] sm:$0xf] %v4743_v27  ;;  %v4303_v20 = vadd.f32 %v4291_v5, %v4249_v37  ;;  %v4309_v15 = vadd.f32 %v4291_v5, %v4255_v57  ;;  %v4411_v42 = vmul.f32 %v4399_v40, %v10889_v0  ;;  %v4435_v10 = vmul.f32 %v4429_v4, %v10893_v47  ;;  %v13323_v37 = vld [vmem:[#allocation51_spill] sm:$0xff]  ;;  %v4766_v35 = vld [vmem:[#allocation2 + $0x430] sm:$0x3f] }
 0x316   : > { %v5140_v16 = vadd.f32 %v5128_v54, %v5098_v55  ;;  %v5146_v51 = vadd.f32 %v5128_v54, %v5104_v34  ;;  %v4360_v22 = vsel %vm1032_vm0, %v4351_v13, %v4359_v50  ;;  %v4483_v19 = vmul.f32 %v4471_v53, %v10897_v17  ;;  %v9234_v57 = vld [vmem:[%s10266_s16 + $0x338] ss:$24 sps:$4 sm:$0xff]   ;;  %v4796_v40 = vld [vmem:[#allocation2 + $0x430] sm:$0xff]  ;;  %v4844_v5 = vld [vmem:[#allocation2 + $0x460] sm:$0x3] }
 0x317   : > { %v4381_v41 = vadd.f32 %v4351_v13, %v4303_v20  ;;  %v4387_v11 = vadd.f32 %v4360_v22, %v4309_v15  ;;  %v4447_v63 = vrot.slane %v4435_v10, 2  ;;  %v4489_v58 = vmul.f32 %v4477_v29, %v10897_v17  ;;  %v4838_v4 = vld [vmem:[#allocation2 + $0x430] sm:$0xfc]  ;;  %v4916_v50 = vld [vmem:[#allocation2 + $0x520] sm:$0xc0] }
 0x318   : > { %v5218_v23 = vadd.f32 %v5188_v31, %v5140_v16  ;;  %v5224_v33 = vadd.f32 %v5198_v7, %v5146_v51  ;;  %v4507_v52 = vrot.slane %v4483_v19, 4  ;;  %v4562_v45 = vmul.f32 %v4550_v25, %v10910_v43  ;;  %v11512_v31 = vld [vmem:[%s10284_s6 + $0x40] ss:$0 sm:$0xff]  ;;  %v4922_v10 = vld [vmem:[#allocation2 + $0x550] sm:$0x3f] }
 0x319   : > { %v4417_v21 = vadd.f32 %v4405_v28, %v4381_v41  ;;  %v4423_v62 = vadd.f32 %v4411_v42, %v4387_v11  ;;  %v4515_v54 = vrot.slane %v4489_v58, 4  ;;  %v4568_v9 = vmul.f32 %v4556_v48, %v10910_v43  ;;  %7317 = vmatmul.mubr.bf16.vlgmr.msra.gmra.mrb[16].mxu1 %v9481_v26  ;;  %v9483_v28 = vld [vmem:[#allocation3 + $0x38] sm:$0xff]  ;;  %v4952_v19 = vld [vmem:[#allocation2 + $0x550] sm:$0xff] }
 0x31a   : > { %v5230_v59 = vadd.f32 %v5218_v23, %v13308_v46  ;;  %v5236_v44 = vadd.f32 %v5224_v33, %v13308_v46  ;;  %v4592_v3 = vmul.f32 %v4586_v60, %v13323_v37  ;;  %v4640_v30 = vmul.f32 %v11512_v31, %v4628_v18  ;;  %7358 = vmatpush1.bf16.msra.mxu1 %v9228_v56  ;;  %v4994_v48 = vld [vmem:[#allocation2 + $0x550] sm:$0xfc] }
 0x31b   : > { %v4459_v32 = vadd.f32 %v4447_v63, %v4417_v21  ;;  %v4465_v36 = vadd.f32 %v4447_v63, %v4423_v62  ;;  %v4516_v38 = vsel %vm1032_vm0, %v4507_v52, %v4515_v54  ;;  %v4646_v39 = vmul.f32 %v11512_v31, %v4634_v12  ;;  %7359 = vmatprep.subr.bf16.mxu1 %v9236_v49  ;;  %v9484_v49 = vld [vmem:[#allocation3 + $0x30] sm:$0xff]  ;;  %v9485_v12 = vld [vmem:[#allocation3 + $0x68] sm:$0xff] }
 0x31c   : > { %v5242_v46 = vmax.f32 %v5230_v59, 0.0  ;;  %v5248_v61 = vmax.f32 %v5236_v44, 0.0  ;;  %v4604_v27 = vrot.slane %v4592_v3, 2  ;;  %v4664_v7 = vrot.slane %v4640_v30, 4  ;;  %7326 = vmatprep.mubr.bf16.mxu1 %v9483_v28  ;;  %v5079_v26 = vld [vmem:[#allocation2 + $0x670] sm:$0x3f] }
 0x31d   : > { %v4537_v53 = vadd.f32 %v4507_v52, %v4459_v32  ;;  %v4543_v55 = vadd.f32 %v4516_v38, %v4465_v36  ;;  %v4672_v34 = vrot.slane %v4646_v39, 4  ;;  %v4772_v13 = vmul.f32 %v4760_v6, %v10871_v24  ;;  %v5151_v6 = vld [vmem:[#allocation2 + $0x670] sm:$0xfc]  ;;  %v5157_v39 = vld [vmem:[#allocation2 + $0x6a0] sm:$0x3] }
 0x31e   : > { %v5254_v29 = vpack.c.bf16 %v5248_v61, %v5242_v46  ;;  %v4778_v20 = vmul.f32 %v4766_v35, %v10871_v24  ;;  %v4802_v15 = vmul.f32 %v4796_v40, %v10875_v8  ;;  %v4850_v42 = vmul.f32 %v4838_v4, %v10885_v2  ;;  %7360 = vmatpush1.bf16.msra.mxu1 %v9234_v57  ;;  %v5000_v24 = vld [vmem:[#allocation2 + $0x580] sm:$0x3]  ;;  %v11536_v46 = vld [vmem:[%s10284_s6 + $0x28] sm:$0xff] }
 0x31f   : > { %v4574_v25 = vadd.f32 %v4562_v45, %v4537_v53  ;;  %v4580_v16 = vadd.f32 %v4568_v9, %v4543_v55  ;;  %v4673_v51 = vsel %vm1032_vm0, %v4664_v7, %v4672_v34  ;;  %v4856_v22 = vmul.f32 %v4844_v5, %v10885_v2  ;;  %v5073_v45 = vld [vmem:[#allocation2 + $0x640] sm:$0xc0]  ;;  %v851_v28 = vld [vmem:[#allocation2 + $0x28] sm:$0xc0]  ;;  %v9242_v53 = vld [vmem:[%s10266_s16 + $0x36c] ss:$24 sps:$4 sm:$0xff]  }
 0x320   : > { %v5266_v56 = vrot.slane %v5254_v29, 7  ;;  %v4814_v41 = vrot.slane %v4802_v15, 2  ;;  %v4874_v11 = vrot.slane %v4850_v42, 4  ;;  %v4928_v63 = vmul.f32 %v4916_v50, %v10889_v0  ;;  %v857_v29 = vld [vmem:[#allocation2 + $0x58] sm:$0x3f]  ;;  %7361 = vmatprep.subr.bf16.mxu1 %v9242_v53 }
 0x321   : > { %v4616_v58 = vadd.f32 %v4604_v27, %v4574_v25  ;;  %v4622_v8 = vadd.f32 %v4604_v27, %v4580_v16  ;;  %v4882_v60 = vrot.slane %v4856_v22, 4  ;;  %v4934_v18 = vmul.f32 %v4922_v10, %v10889_v0  ;;  %7327 = vmatmul.mubr.bf16.gmra.mrb[20].mxu1 %v9484_v49  ;;  %v5109_v0 = vld [vmem:[#allocation2 + $0x670] sm:$0xff]  ;;  %v13326_v16 = vld [vmem:[#allocation34_spill] sm:$0xff] }
 0x322   : > { %5278 = vst [vmem:[#allocation3 + $0xa8] sm:$0xf0] %v5266_v56  ;;  %v4826_v23 = vadd.f32 %v4814_v41, %v4772_v13  ;;  %v4832_v33 = vadd.f32 %v4814_v41, %v4778_v20  ;;  %v4958_v2 = vmul.f32 %v4952_v19, %v10893_v47  ;;  %v5006_v52 = vmul.f32 %v4994_v48, %v10897_v17  ;;  %v13324_v47 = vld [vmem:[#allocation52_spill] sm:$0xff]  ;;  %v13325_v10 = vld [vmem:[#allocation33_spill] sm:$0xff]  ;;  %v977_v22 = vld [vmem:[#allocation2 + $0x58] sm:$0xfc] }
 0x323   : > { %7336 = vmatprep.mubr.bf16.mxu1 %v9485_v12  ;;  %v4694_v21 = vadd.f32 %v4664_v7, %v4616_v58  ;;  %v4700_v62 = vadd.f32 %v4673_v51, %v4622_v8  ;;  %v4883_v54 = vsel %vm1032_vm0, %v4874_v11, %v4882_v60  ;;  %v5012_v9 = vmul.f32 %v5000_v24, %v10897_v17  ;;  %v9240_v20 = vld [vmem:[%s10266_s16 + $0x368] ss:$24 sps:$4 sm:$0xff]   ;;  %v9248_v19 = vld [vmem:[%s10266_s16 + $0x39c] ss:$24 sps:$4 sm:$0xff]   ;;  %v9246_v58 = vld [vmem:[%s10266_s16 + $0x398] ss:$24 sps:$4 sm:$0xff]  }
 0x324   : > { %v4904_v59 = vadd.f32 %v4874_v11, %v4826_v23  ;;  %v4910_v44 = vadd.f32 %v4883_v54, %v4832_v33  ;;  %v4970_v3 = vrot.slane %v4958_v2, 2  ;;  %v5030_v30 = vrot.slane %v5006_v52, 4  ;;  %v9486_v48 = vld [vmem:[#allocation3 + $0x60] sm:$0xff]  ;;  %v983_v11 = vld [vmem:[#allocation2 + $0x88] sm:$0x3]  ;;  %7362 = vmatpush1.bf16.msra.mxu1 %v9240_v20  ;;  %v9487_v20 = vld [vmem:[#allocation3 + $0x18] sm:$0xff] }
 0x325   : > { %v4706_v57 = vadd.f32 %v4694_v21, %v13324_v47  ;;  %v4712_v32 = vadd.f32 %v4700_v62, %v13324_v47  ;;  %v5038_v36 = vrot.slane %v5012_v9, 4  ;;  %v5085_v38 = vmul.f32 %v5073_v45, %v10910_v43  ;;  %7363 = vmatprep.subr.bf16.mxu1 %v9248_v19  ;;  %v1081_v45 = vld [vmem:[#allocation2 + $0x148] sm:$0xc0]  ;;  %v1087_v62 = vld [vmem:[#allocation2 + $0x178] sm:$0x3f] }
 0x326   : > { %v4940_v35 = vadd.f32 %v4928_v63, %v4904_v59  ;;  %v4946_v40 = vadd.f32 %v4934_v18, %v4910_v44  ;;  %v5091_v17 = vmul.f32 %v5079_v26, %v10910_v43  ;;  %v5115_v4 = vmul.f32 %v5109_v0, %v13323_v37  ;;  %v911_v43 = vld [vmem:[#allocation2 + $0x58] sm:$0xff]  ;;  %v13327_v63 = vld [vmem:[#allocation35_spill] sm:$0xff]  ;;  %v13328_v54 = vld [vmem:[#allocation36_spill] sm:$0xff] }
 0x327   : > { %v4718_v61 = vmax.f32 %v4706_v57, 0.0  ;;  %v4724_v27 = vmax.f32 %v4712_v32, 0.0  ;;  %v5039_v7 = vsel %vm1032_vm0, %v5030_v30, %v5038_v36  ;;  %v5163_v5 = vmul.f32 %v11512_v31, %v5151_v6  ;;  %v11568_v26 = vld [vmem:[#allocation2 + $0x178] sm:$0xff]  ;;  %v13329_v0 = vld [vmem:[#allocation37_spill] sm:$0xff]  ;;  %v1213_v6 = vld [vmem:[#allocation2 + $0x1a8] sm:$0x3] }
 0x328   : > { %v4982_v55 = vadd.f32 %v4970_v3, %v4940_v35  ;;  %v4988_v34 = vadd.f32 %v4970_v3, %v4946_v40  ;;  %v5127_v13 = vrot.slane %v5115_v4, 2  ;;  %v5169_v50 = vmul.f32 %v11512_v31, %v5157_v39  ;;  %v13330_v57 = vld [vmem:[#allocation38_spill] sm:$0xff]  ;;  %7364 = vmatpush1.bf16.msra.mxu1 %v9246_v58  ;;  %v1442_v58 = vld [vmem:[#allocation2 + $0x2c8] sm:$0x3] }
 0x329   : > { %v5302_v37 = vld [vmem:[#allocation3 + $0xa8] sm:$0xff]  ;;  %v4730_v15 = vpack.c.bf16 %v4724_v27, %v4718_v61  ;;  %v5187_v42 = vrot.slane %v5163_v5, 4  ;;  %v11545_v25 = vrot.slane %v11536_v46, %v13325_v10  ;;  %v11549_v51 = vrot.slane %v11536_v46, %v13326_v16  ;;  %7337 = vmatmul.mubr.bf16.gmra.mrb[24].mxu1 %v9486_v48  ;;  %v11583_v27 = vld [vmem:[%s10284_s6 + $0x58] ss:$0 sm:$0xff] }
 0x32a   : > { %7200 = vmatprep.mubr.bf16.mxu0 %v5302_v37  ;;  %v5060_v31 = vadd.f32 %v5030_v30, %v4982_v55  ;;  %v5066_v56 = vadd.f32 %v5039_v7, %v4988_v34  ;;  %v5195_v41 = vrot.slane %v5169_v50, 4  ;;  %v11554_v24 = vrot.slane %v11536_v46, %v13327_v63  ;;  %7346 = vmatprep.mubr.bf16.mxu1 %v11443_v1  ;;  %v1207_v30 = vld [vmem:[#allocation2 + $0x178] sm:$0xfc] }
 0x32b   : > { %v4742_v8 = vrot.slane %v4730_v15, 3  ;;  %v887_v60 = vmul.f32 %v11545_v25, %v851_v28  ;;  %v893_v18 = vmul.f32 %v11545_v25, %v857_v29  ;;  %v941_v49 = vmul.f32 %v11549_v51, %v911_v43  ;;  %v1310_v29 = vld [vmem:[#allocation2 + $0x268] sm:$0xc0]  ;;  %v1316_v43 = vld [vmem:[#allocation2 + $0x298] sm:$0x3f] }
 0x32c   : > { %v5097_v23 = vadd.f32 %v5085_v38, %v5060_v31  ;;  %v5103_v33 = vadd.f32 %v5091_v17, %v5066_v56  ;;  %v5196_v2 = vsel %vm1032_vm0, %v5187_v42, %v5195_v41  ;;  %v1013_v52 = vmul.f32 %v11554_v24, %v977_v22  ;;  %v13331_v22 = vld [vmem:[#allocation39_spill] sm:$0xff]  ;;  %v11595_v48 = vld [vmem:[#allocation2 + $0x298] sm:$0xff] }
 0x32d   : > { %4754 = vst [vmem:[#allocation3 + $0xa0] sm:$0xf] %v4742_v8  ;;  %v953_v12 = vrot.slane %v941_v49, 2  ;;  %v1019_v21 = vmul.f32 %v11554_v24, %v983_v11  ;;  %v11566_v9 = vrot.slane %v11536_v46, %v13328_v54  ;;  %v11572_v1 = vrot.slane %v11536_v46, %v13329_v0  ;;  %v1624_v8 = vld [vmem:[#allocation2 + $0xb8] sm:$0xc0] }
 0x32e   : > { %v5139_v59 = vadd.f32 %v5127_v13, %v5097_v23  ;;  %v5145_v44 = vadd.f32 %v5127_v13, %v5103_v33  ;;  %v1038_v3 = vrot.slane %v1013_v52, 4  ;;  %v11576_v32 = vrot.slane %v11536_v46, %v13330_v57 }
 0x32f   : > { %v965_v36 = vadd.f32 %v953_v12, %v887_v60  ;;  %v971_v38 = vadd.f32 %v953_v12, %v893_v18  ;;  %v1049_v39 = vrot.slane %v1019_v21, 4  ;;  %v1117_v35 = vmul.f32 %v11566_v9, %v1081_v45  ;;  %v1630_v12 = vld [vmem:[#allocation2 + $0xe8] sm:$0x3f] }
 0x330   : > { %v5217_v40 = vadd.f32 %v5187_v42, %v5139_v59  ;;  %v5223_v17 = vadd.f32 %v5196_v2, %v5145_v44  ;;  %v1123_v4 = vmul.f32 %v11566_v9, %v1087_v62  ;;  %v1171_v61 = vmul.f32 %v11572_v1, %v11568_v26  ;;  %v1660_v21 = vld [vmem:[#allocation2 + $0xe8] sm:$0xff] }
 0x331   : > { %v1050_v7 = vsel %vm1032_vm0, %v1038_v3, %v1049_v39  ;;  %v1068_v5 = vadd.f32 %v1038_v3, %v965_v36  ;;  %v1243_v28 = vmul.f32 %v11576_v32, %v1207_v30  ;;  %v1249_v53 = vmul.f32 %v11576_v32, %v1213_v6  ;;  %7347 = vmatmul.mubr.bf16.gmra.mrb[28].mxu1 %v11489_v14  ;;  %v1436_v14 = vld [vmem:[#allocation2 + $0x298] sm:$0xfc]  ;;  %v11609_v59 = vld [vmem:[%s10260_s1] sm:$0x3f]  ;;  %v1708_v6 = vld [vmem:[#allocation2 + $0x118] sm:$0x3] }
 0x332   : > { %v5229_v55 = vadd.f32 %v5217_v40, %v13324_v47  ;;  %v5235_v34 = vadd.f32 %v5223_v17, %v13324_v47  ;;  %v1074_v13 = vadd.f32 %v1050_v7, %v971_v38  ;;  %v1183_v50 = vrot.slane %v1171_v61, 2  ;;  %7389 = vmatprep.mubr.bf16.mxu1 %v9487_v20  ;;  %v13332_v47 = vld [vmem:[#allocation42_spill] sm:$0xff]  ;;  %v1702_v30 = vld [vmem:[#allocation2 + $0xe8] sm:$0xfc] }
 0x333   : > { %v1129_v37 = vadd.f32 %v1117_v35, %v1068_v5  ;;  %v1267_v15 = vrot.slane %v1243_v28, 4  ;;  %v1278_v42 = vrot.slane %v1249_v53, 4  ;;  %v11593_v19 = vrot.slane %v11536_v46, %v13331_v22  ;;  %v1781_v36 = vld [vmem:[#allocation2 + $0x1d8] sm:$0xc0]  ;;  %v1787_v17 = vld [vmem:[#allocation2 + $0x208] sm:$0x3f] }
 0x334   : > { %v5241_v31 = vmax.f32 %v5229_v55, 0.0  ;;  %v5247_v56 = vmax.f32 %v5235_v34, 0.0  ;;  %v1135_v41 = vadd.f32 %v1123_v4, %v1074_v13  ;;  %v11599_v11 = vrot.slane %v11536_v46, %v13332_v47  ;;  %v11618_v28 = vld [vmem:[#allocation2 + $0x208] sm:$0xff] }
 0x335   : > { %v1195_v60 = vadd.f32 %v1183_v50, %v1129_v37  ;;  %v1279_v18 = vsel %vm1032_vm0, %v1267_v15, %v1278_v42  ;;  %v1346_v49 = vmul.f32 %v11593_v19, %v1310_v29  ;;  %v1352_v23 = vmul.f32 %v11593_v19, %v1316_v43 }
 0x336   : > { %v5253_v33 = vpack.c.bf16 %v5247_v56, %v5241_v31  ;;  %v1201_v2 = vadd.f32 %v1183_v50, %v1135_v41  ;;  %v1400_v52 = vmul.f32 %v11599_v11, %v11595_v48  ;;  %v1472_v45 = vmul.f32 %v11583_v27, %v1436_v14  ;;  %v1859_v50 = vld [vmem:[#allocation2 + $0x208] sm:$0xfc] }
 0x337   : > { %v1297_v46 = vadd.f32 %v1267_v15, %v1195_v60  ;;  %v1478_v62 = vmul.f32 %v11583_v27, %v1442_v58  ;;  %v11613_v44 = vrot.slane %v11609_v59, %v13330_v57  ;;  %v1636_v3 = vmul.f32 %v1624_v8, %v11545_v25  ;;  %v1865_v15 = vld [vmem:[#allocation2 + $0x238] sm:$0x3] }
 0x338   : > { %v5265_v38 = vrot.slane %v5253_v33, 7  ;;  %v1303_v39 = vadd.f32 %v1279_v18, %v1201_v2  ;;  %v1412_v35 = vrot.slane %v1400_v52, 2  ;;  %v1496_v40 = vrot.slane %v1472_v45, 4  ;;  %v1938_v18 = vld [vmem:[#allocation2 + $0x2f8] sm:$0xc0]  ;;  %v11630_v45 = vld [vmem:[#allocation2 + $0x328] sm:$0xff] }
 0x339   : > { %v1358_v4 = vadd.f32 %v1346_v49, %v1297_v46  ;;  %v1507_v61 = vrot.slane %v1478_v62, 4  ;;  %v1642_v7 = vmul.f32 %v1630_v12, %v11545_v25  ;;  %v1666_v5 = vmul.f32 %v1660_v21, %v11549_v51  ;;  %v1944_v49 = vld [vmem:[#allocation2 + $0x328] sm:$0x3f] }
 0x33a   : > { %5277 = vst [vmem:[#allocation3 + $0xa0] sm:$0xf0] %v5265_v38  ;;  %v1364_v53 = vadd.f32 %v1352_v23, %v1303_v39  ;;  %v1714_v55 = vmul.f32 %v1702_v30, %v11554_v24  ;;  %v1720_v34 = vmul.f32 %v1708_v6, %v11554_v24  ;;  %v1793_v13 = vmul.f32 %v1781_v36, %v11566_v9  ;;  %v2022_v30 = vld [vmem:[#allocation2 + $0x358] sm:$0x3] }
 0x33b   : > { %v1424_v29 = vadd.f32 %v1412_v35, %v1358_v4  ;;  %v1508_v43 = vsel %vm1032_vm0, %v1496_v40, %v1507_v61  ;;  %v1678_v20 = vrot.slane %v1666_v5, 2  ;;  %v1799_v37 = vmul.f32 %v1787_v17, %v11566_v9 }
 0x33c   : > { %v1430_v42 = vadd.f32 %v1412_v35, %v1364_v53  ;;  %v1738_v14 = vrot.slane %v1714_v55, 4  ;;  %v1749_v31 = vrot.slane %v1720_v34, 4  ;;  %v1823_v56 = vmul.f32 %v11618_v28, %v11572_v1 }
 0x33d   : > { %v1526_v41 = vadd.f32 %v1496_v40, %v1424_v29  ;;  %v1690_v58 = vadd.f32 %v1678_v20, %v1636_v3  ;;  %v1696_v8 = vadd.f32 %v1678_v20, %v1642_v7  ;;  %v1871_v60 = vmul.f32 %v1859_v50, %v11576_v32  ;;  %v2016_v3 = vld [vmem:[#allocation2 + $0x328] sm:$0xfc]  ;;  %v11639_v7 = vld [vmem:[%s10284_s6 + $0x20] sm:$0xff]  ;;  %v856_v29 = vld [vmem:[#allocation2 + $0x50] sm:$0x3f] }
 0x33e   : > { %v1532_v23 = vadd.f32 %v1508_v43, %v1430_v42  ;;  %v1750_v33 = vsel %vm1032_vm0, %v1738_v14, %v1749_v31  ;;  %v1835_v2 = vrot.slane %v1823_v56, 2  ;;  %v1877_v52 = vmul.f32 %v1865_v15, %v11576_v32  ;;  %v850_v50 = vld [vmem:[#allocation2 + $0x20] sm:$0xc0] }
 0x33f   : > { %v1569_v12 = vadd.f32 %v11613_v44, %v1526_v41  ;;  %v1768_v21 = vadd.f32 %v1738_v14, %v1690_v58  ;;  %v1774_v46 = vadd.f32 %v1750_v33, %v1696_v8  ;;  %v1895_v62 = vrot.slane %v1871_v60, 4 }
 0x340   : > { %v1575_v6 = vadd.f32 %v11613_v44, %v1532_v23  ;;  %v1906_v36 = vrot.slane %v1877_v52, 4  ;;  %v1950_v38 = vmul.f32 %v1938_v18, %v11593_v19  ;;  %v1956_v39 = vmul.f32 %v1944_v49, %v11593_v19  ;;  %v976_v18 = vld [vmem:[#allocation2 + $0x50] sm:$0xfc]  ;;  %v982_v49 = vld [vmem:[#allocation2 + $0x80] sm:$0x3] }
 0x341   : > { %v5301_v35 = vld [vmem:[#allocation3 + $0xa0] sm:$0xff]  ;;  %v1581_v40 = vmax.f32 %v1569_v12, 0.0  ;;  %v1805_v17 = vadd.f32 %v1793_v13, %v1768_v21  ;;  %v1811_v4 = vadd.f32 %v1799_v37, %v1774_v46  ;;  %v1980_v61 = vmul.f32 %v11630_v45, %v11599_v11  ;;  %v910_v37 = vld [vmem:[#allocation2 + $0x50] sm:$0xff] }
 0x342   : > { %7201 = vmatmul.mubr.bf16.gmra.mrb[12].mxu0 %v5301_v35  ;;  %v1587_v5 = vmax.f32 %v1575_v6, 0.0  ;;  %v1907_v53 = vsel %vm1032_vm0, %v1895_v62, %v1906_v36  ;;  %v2028_v55 = vmul.f32 %v11583_v27, %v2016_v3  ;;  %v2034_v34 = vmul.f32 %v11583_v27, %v2022_v30  ;;  %v1080_v12 = vld [vmem:[#allocation2 + $0x140] sm:$0xc0]  ;;  %v1086_v21 = vld [vmem:[#allocation2 + $0x170] sm:$0x3f] }
 0x343   : > { %v1847_v43 = vadd.f32 %v1835_v2, %v1805_v17  ;;  %v1853_v20 = vadd.f32 %v1835_v2, %v1811_v4  ;;  %v1992_v15 = vrot.slane %v1980_v61, 2  ;;  %v11646_v13 = vrot.slane %v11639_v7, %v13325_v10  ;;  %v1206_v17 = vld [vmem:[#allocation2 + $0x170] sm:$0xfc] }
 0x344   : > { %v1593_v42 = vpack.c.bf16 %v1587_v5, %v1581_v40  ;;  %v2052_v14 = vrot.slane %v2028_v55, 4  ;;  %v2063_v31 = vrot.slane %v2034_v34, 4  ;;  %v11650_v56 = vrot.slane %v11639_v7, %v13326_v16  ;;  %v11670_v40 = vld [vmem:[#allocation2 + $0x170] sm:$0xff] }
 0x345   : > { %v1925_v41 = vadd.f32 %v1895_v62, %v1847_v43  ;;  %v1931_v58 = vadd.f32 %v1907_v53, %v1853_v20  ;;  %v886_v8 = vmul.f32 %v11646_v13, %v850_v50  ;;  %v892_v60 = vmul.f32 %v11646_v13, %v856_v29  ;;  %v1212_v53 = vld [vmem:[#allocation2 + $0x1a0] sm:$0x3] }
 0x346   : > { %v1605_v23 = vrot.slane %v1593_v42, 3  ;;  %v2064_v33 = vsel %vm1032_vm0, %v2052_v14, %v2063_v31  ;;  %v940_v2 = vmul.f32 %v11650_v56, %v910_v37  ;;  %v11658_v52 = vrot.slane %v11639_v7, %v13327_v63  ;;  %v1309_v31 = vld [vmem:[#allocation2 + $0x260] sm:$0xc0] }
 0x347   : > { %v1962_v46 = vadd.f32 %v1950_v38, %v1925_v41  ;;  %v1968_v62 = vadd.f32 %v1956_v39, %v1931_v58  ;;  %v11662_v3 = vrot.slane %v11639_v7, %v13328_v54  ;;  %v11666_v30 = vrot.slane %v11639_v7, %v13329_v0  ;;  %v12380_v54 = vld [vmem:[%s449_s19] sm:$0x3f] }
 0x348   : > { %1617 = vst [vmem:[#allocation3 + $0x28] sm:$0xf] %v1605_v23  ;;  %v952_v6 = vrot.slane %v940_v2, 2  ;;  %v1012_v36 = vmul.f32 %v11658_v52, %v976_v18  ;;  %v1018_v35 = vmul.f32 %v11658_v52, %v982_v49  ;;  %v11674_v38 = vrot.slane %v11639_v7, %v13330_v57  ;;  %v1315_v18 = vld [vmem:[#allocation2 + $0x290] sm:$0x3f] }
 0x349   : > { %v2004_v39 = vadd.f32 %v1992_v15, %v1962_v46  ;;  %v2010_v4 = vadd.f32 %v1992_v15, %v1968_v62  ;;  %v1116_v61 = vmul.f32 %v11662_v3, %v1080_v12  ;;  %v1122_v5 = vmul.f32 %v11662_v3, %v1086_v21  ;;  %v11690_v49 = vld [vmem:[%s10284_s6 + $0x50] ss:$0 sm:$0xff]  ;;  %v1435_v2 = vld [vmem:[#allocation2 + $0x290] sm:$0xfc] }
 0x34a   : > { %v964_v55 = vadd.f32 %v952_v6, %v886_v8  ;;  %v970_v34 = vadd.f32 %v952_v6, %v892_v60  ;;  %v1037_v50 = vrot.slane %v1012_v36, 4  ;;  %v1047_v29 = vrot.slane %v1018_v35, 4  ;;  %v1441_v6 = vld [vmem:[#allocation2 + $0x2c0] sm:$0x3] }
 0x34b   : > { %v2082_v43 = vadd.f32 %v2052_v14, %v2004_v39  ;;  %v2088_v20 = vadd.f32 %v2064_v33, %v2010_v4  ;;  %v1170_v37 = vmul.f32 %v11666_v30, %v11670_v40  ;;  %v1242_v42 = vmul.f32 %v11674_v38, %v1206_v17  ;;  %v11694_v39 = vld [vmem:[#allocation2 + $0x290] sm:$0xff] }
 0x34c   : > { %v1048_v15 = vsel %vm1032_vm0, %v1037_v50, %v1047_v29  ;;  %v1067_v41 = vadd.f32 %v1037_v50, %v964_v55  ;;  %v1248_v58 = vmul.f32 %v11674_v38, %v1212_v53  ;;  %v11685_v8 = vrot.slane %v11639_v7, %v13331_v22  ;;  %v1623_v4 = vld [vmem:[#allocation2 + $0xb0] sm:$0xc0]  ;;  %v1629_v50 = vld [vmem:[#allocation2 + $0xe0] sm:$0x3f] }
 0x34d   : > { %v2094_v60 = vadd.f32 %v2082_v43, %v11613_v44  ;;  %v2100_v14 = vadd.f32 %v2088_v20, %v11613_v44  ;;  %v1073_v23 = vadd.f32 %v1048_v15, %v970_v34  ;;  %v1182_v33 = vrot.slane %v1170_v37, 2  ;;  %v1659_v37 = vld [vmem:[#allocation2 + $0xe0] sm:$0xff] }
 0x34e   : > { %v1128_v12 = vadd.f32 %v1116_v61, %v1067_v41  ;;  %v1266_v21 = vrot.slane %v1242_v42, 4  ;;  %v1276_v46 = vrot.slane %v1248_v58, 4  ;;  %v1345_v62 = vmul.f32 %v11685_v8, %v1309_v31  ;;  %v1701_v42 = vld [vmem:[#allocation2 + $0xe0] sm:$0xfc]  ;;  %v1780_v58 = vld [vmem:[#allocation2 + $0x1d0] sm:$0xc0] }
 0x34f   : > { %v2106_v36 = vmax.f32 %v2094_v60, 0.0  ;;  %v2112_v35 = vmax.f32 %v2100_v14, 0.0  ;;  %v1134_v17 = vadd.f32 %v1122_v5, %v1073_v23  ;;  %v1351_v22 = vmul.f32 %v11685_v8, %v1315_v18 }
 0x350   : > { %v1194_v53 = vadd.f32 %v1182_v33, %v1128_v12  ;;  %v1277_v55 = vsel %vm1032_vm0, %v1266_v21, %v1276_v46  ;;  %v11699_v34 = vrot.slane %v11639_v7, %v13332_v47  ;;  %v1471_v61 = vmul.f32 %v11690_v49, %v1435_v2  ;;  %v1707_v7 = vld [vmem:[#allocation2 + $0x110] sm:$0x3]  ;;  %v11713_v46 = vld [vmem:[#allocation2 + $0x200] sm:$0xff] }
 0x351   : > { %v2118_v29 = vpack.c.bf16 %v2112_v35, %v2106_v36  ;;  %v1200_v43 = vadd.f32 %v1182_v33, %v1134_v17  ;;  %v1477_v20 = vmul.f32 %v11690_v49, %v1441_v6  ;;  %v11705_v5 = vrot.slane %v11609_v59, %v13329_v0  ;;  %v1786_v33 = vld [vmem:[#allocation2 + $0x200] sm:$0x3f] }
 0x352   : > { %v1296_v31 = vadd.f32 %v1266_v21, %v1194_v53  ;;  %v1399_v15 = vmul.f32 %v11699_v34, %v11694_v39  ;;  %v1495_v41 = vrot.slane %v1471_v61, 4  ;;  %v1635_v47 = vmul.f32 %v1623_v4, %v11646_v13  ;;  %v1858_v6 = vld [vmem:[#allocation2 + $0x200] sm:$0xfc]  ;;  %v1864_v53 = vld [vmem:[#allocation2 + $0x230] sm:$0x3] }
 0x353   : > { %v2130_v18 = vrot.slane %v2118_v29, 7  ;;  %v1302_v60 = vadd.f32 %v1277_v55, %v1200_v43  ;;  %v1505_v14 = vrot.slane %v1477_v20, 4  ;;  %v1641_v23 = vmul.f32 %v1629_v50, %v11646_v13 }
 0x354   : > { %v1357_v2 = vadd.f32 %v1345_v62, %v1296_v31  ;;  %v1411_v59 = vrot.slane %v1399_v15, 2  ;;  %v1665_v12 = vmul.f32 %v1659_v37, %v11650_v56  ;;  %v1713_v21 = vmul.f32 %v1701_v42, %v11658_v52  ;;  %v1937_v37 = vld [vmem:[#allocation2 + $0x2f0] sm:$0xc0] }
 0x355   : > { %2142 = vst [vmem:[#allocation3 + $0x28] sm:$0xf0] %v2130_v18  ;;  %v1363_v36 = vadd.f32 %v1351_v22, %v1302_v60  ;;  %v1506_v35 = vsel %vm1032_vm0, %v1495_v41, %v1505_v14  ;;  %v1719_v17 = vmul.f32 %v1707_v7, %v11658_v52  ;;  %v1792_v4 = vmul.f32 %v1780_v58, %v11662_v3  ;;  %v1943_v58 = vld [vmem:[#allocation2 + $0x320] sm:$0x3f]  ;;  %v9254_v60 = vld [vmem:[%s10266_s16 + $0x3cc] ss:$24 sps:$4 sm:$0xff]  }
 0x356   : > { %v1423_v55 = vadd.f32 %v1411_v59, %v1357_v2  ;;  %v1677_v62 = vrot.slane %v1665_v12, 2  ;;  %v1737_v61 = vrot.slane %v1713_v21, 4  ;;  %v1798_v50 = vmul.f32 %v1786_v33, %v11662_v3  ;;  %v11723_v18 = vld [vmem:[#allocation2 + $0x320] sm:$0xff]  ;;  %v9252_v21 = vld [vmem:[%s10266_s16 + $0x3c8] ss:$24 sps:$4 sm:$0xff]   ;;  %7365 = vmatprep.subr.bf16.mxu1 %v9254_v60 }
 0x357   : > { %v1429_v29 = vadd.f32 %v1411_v59, %v1363_v36  ;;  %v1747_v43 = vrot.slane %v1719_v17, 4  ;;  %v1822_v20 = vmul.f32 %v11713_v46, %v11666_v30  ;;  %v1870_v22 = vmul.f32 %v1858_v6, %v11674_v38  ;;  %v2015_v12 = vld [vmem:[#allocation2 + $0x320] sm:$0xfc]  ;;  %v2021_v36 = vld [vmem:[#allocation2 + $0x350] sm:$0x3]  ;;  %7366 = vmatpush1.bf16.msra.mxu1 %v9252_v21 }
 0x358   : > { %v1525_v42 = vadd.f32 %v1495_v41, %v1423_v55  ;;  %v1689_v31 = vadd.f32 %v1677_v62, %v1635_v47  ;;  %v1695_v15 = vadd.f32 %v1677_v62, %v1641_v23  ;;  %v1876_v7 = vmul.f32 %v1864_v53, %v11674_v38  ;;  %v9260_v17 = vld [vmem:[%s10266_s16 + $0x3fc] ss:$24 sps:$4 sm:$0xff]  }
 0x359   : > { %v1531_v14 = vadd.f32 %v1506_v35, %v1429_v29  ;;  %v1748_v33 = vsel %vm1032_vm0, %v1737_v61, %v1747_v43  ;;  %v1834_v2 = vrot.slane %v1822_v20, 2  ;;  %v1894_v59 = vrot.slane %v1870_v22, 4  ;;  %v2148_v29 = vld [vmem:[#allocation2 + $0x148] sm:$0xc0]  ;;  %v2154_v43 = vld [vmem:[#allocation2 + $0x178] sm:$0x3f]  ;;  %7367 = vmatprep.subr.bf16.mxu1 %v9260_v17 }
 0x35a   : > { %v1568_v6 = vadd.f32 %v11705_v5, %v1525_v42  ;;  %v1767_v41 = vadd.f32 %v1737_v61, %v1689_v31  ;;  %v1773_v47 = vadd.f32 %v1748_v33, %v1695_v15  ;;  %v1904_v23 = vrot.slane %v1876_v7, 4  ;;  %v9258_v20 = vld [vmem:[%s10266_s16 + $0x3f8] ss:$24 sps:$4 sm:$0xff]   ;;  %v2232_v33 = vld [vmem:[#allocation2 + $0x1a8] sm:$0x3] }
 0x35b   : > { %v1574_v53 = vadd.f32 %v11705_v5, %v1531_v14  ;;  %v1949_v55 = vmul.f32 %v1937_v37, %v11685_v8  ;;  %v1955_v35 = vmul.f32 %v1943_v58, %v11685_v8  ;;  %v1979_v62 = vmul.f32 %v11723_v18, %v11699_v34  ;;  %v2226_v14 = vld [vmem:[#allocation2 + $0x178] sm:$0xfc]  ;;  %7368 = vmatpush1.bf16.msra.mxu1 %v9258_v20 }
 0x35c   : > { %v5286_v22 = vld [vmem:[#allocation3 + $0x28] sm:$0xff]  ;;  %v1580_v61 = vmax.f32 %v1568_v6, 0.0  ;;  %v1804_v42 = vadd.f32 %v1792_v4, %v1767_v41  ;;  %v1810_v31 = vadd.f32 %v1798_v50, %v1773_v47  ;;  %v1905_v15 = vsel %vm1032_vm0, %v1894_v59, %v1904_v23 }
 0x35d   : > { %7243 = vmatprep.mubr.bf16.mxu0 %v5286_v22  ;;  %v1586_v7 = vmax.f32 %v1574_v53, 0.0  ;;  %v1991_v60 = vrot.slane %v1979_v62, 2  ;;  %v2027_v37 = vmul.f32 %v11690_v49, %v2015_v12  ;;  %v2033_v58 = vmul.f32 %v11690_v49, %v2021_v36  ;;  %v2304_v4 = vld [vmem:[#allocation2 + $0x268] sm:$0xc0]  ;;  %v2310_v62 = vld [vmem:[#allocation2 + $0x298] sm:$0x3f] }
 0x35e   : > { %v1846_v57 = vadd.f32 %v1834_v2, %v1804_v42  ;;  %v1852_v0 = vadd.f32 %v1834_v2, %v1810_v31  ;;  %v2160_v21 = vmul.f32 %v2148_v29, %v11545_v25  ;;  %v2166_v6 = vmul.f32 %v2154_v43, %v11545_v25 }
 0x35f   : > { %v1592_v50 = vpack.c.bf16 %v1586_v7, %v1580_v61  ;;  %v2051_v41 = vrot.slane %v2027_v37, 4  ;;  %v2061_v47 = vrot.slane %v2033_v58, 4  ;;  %v2190_v23 = vmul.f32 %v11568_v26, %v11549_v51  ;;  %v2382_v61 = vld [vmem:[#allocation2 + $0x298] sm:$0xfc]  ;;  %v2388_v26 = vld [vmem:[#allocation2 + $0x2c8] sm:$0x3] }
 0x360   : > { %v1924_v17 = vadd.f32 %v1894_v59, %v1846_v57  ;;  %v1930_v12 = vadd.f32 %v1905_v15, %v1852_v0  ;;  %v2238_v36 = vmul.f32 %v2226_v14, %v11554_v24  ;;  %v2244_v53 = vmul.f32 %v2232_v33, %v11554_v24  ;;  %v2461_v15 = vld [vmem:[#allocation2 + $0x388] sm:$0xc0] }
 0x361   : > { %v1604_v2 = vrot.slane %v1592_v50, 3  ;;  %v2062_v29 = vsel %vm1032_vm0, %v2051_v41, %v2061_v47  ;;  %v2202_v22 = vrot.slane %v2190_v23, 2  ;;  %v2316_v43 = vmul.f32 %v2304_v4, %v11566_v9 }
 0x362   : > { %v1961_v42 = vadd.f32 %v1949_v55, %v1924_v17  ;;  %v1967_v31 = vadd.f32 %v1955_v35, %v1930_v12  ;;  %v2262_v7 = vrot.slane %v2238_v36, 4  ;;  %v2273_v37 = vrot.slane %v2244_v53, 4  ;;  %v2467_v55 = vld [vmem:[#allocation2 + $0x3b8] sm:$0x3f]  ;;  %v2545_v53 = vld [vmem:[#allocation2 + $0x3e8] sm:$0x3] }
 0x363   : > { %1616 = vst [vmem:[#allocation3 + $0x20] sm:$0xf] %v1604_v2  ;;  %v2214_v57 = vadd.f32 %v2202_v22, %v2160_v21  ;;  %v2220_v0 = vadd.f32 %v2202_v22, %v2166_v6  ;;  %v2322_v59 = vmul.f32 %v2310_v62, %v11566_v9  ;;  %v2346_v20 = vmul.f32 %v11595_v48, %v11572_v1  ;;  %v11753_v21 = vld [vmem:[#allocation2 + $0x3b8] sm:$0xff] }
 0x364   : > { %v2003_v58 = vadd.f32 %v1991_v60, %v1961_v42  ;;  %v2009_v14 = vadd.f32 %v1991_v60, %v1967_v31  ;;  %v2274_v33 = vsel %vm1032_vm0, %v2262_v7, %v2273_v37  ;;  %v2394_v4 = vmul.f32 %v2382_v61, %v11576_v32  ;;  %v2539_v6 = vld [vmem:[#allocation2 + $0x3b8] sm:$0xfc] }
 0x365   : > { %v2292_v35 = vadd.f32 %v2262_v7, %v2214_v57  ;;  %v2298_v50 = vadd.f32 %v2274_v33, %v2220_v0  ;;  %v2358_v47 = vrot.slane %v2346_v20, 2  ;;  %v2400_v23 = vmul.f32 %v2388_v26, %v11576_v32  ;;  %v2677_v57 = vld [vmem:[#allocation2 + $0x208] sm:$0x3f] }
 0x366   : > { %v2081_v17 = vadd.f32 %v2051_v41, %v2003_v58  ;;  %v2087_v12 = vadd.f32 %v2062_v29, %v2009_v14  ;;  %v2418_v36 = vrot.slane %v2394_v4, 4  ;;  %v2473_v48 = vmul.f32 %v2461_v15, %v11593_v19  ;;  %v2671_v41 = vld [vmem:[#allocation2 + $0x1d8] sm:$0xc0]  ;;  %v2749_v0 = vld [vmem:[#allocation2 + $0x208] sm:$0xfc] }
 0x367   : > { %v2328_v60 = vadd.f32 %v2316_v43, %v2292_v35  ;;  %v2334_v62 = vadd.f32 %v2322_v59, %v2298_v50  ;;  %v2429_v2 = vrot.slane %v2400_v23, 4  ;;  %v2479_v22 = vmul.f32 %v2467_v55, %v11593_v19  ;;  %v2755_v14 = vld [vmem:[#allocation2 + $0x238] sm:$0x3]  ;;  %v2827_v50 = vld [vmem:[#allocation2 + $0x2f8] sm:$0xc0] }
 0x368   : > { %v2093_v61 = vadd.f32 %v2081_v17, %v11705_v5  ;;  %v2099_v42 = vadd.f32 %v2087_v12, %v11705_v5  ;;  %v2503_v31 = vmul.f32 %v11753_v21, %v11599_v11  ;;  %v2551_v7 = vmul.f32 %v11583_v27, %v2539_v6  ;;  %v2833_v12 = vld [vmem:[#allocation2 + $0x328] sm:$0x3f] }
 0x369   : > { %v2370_v29 = vadd.f32 %v2358_v47, %v2328_v60  ;;  %v2376_v37 = vadd.f32 %v2358_v47, %v2334_v62  ;;  %v2430_v26 = vsel %vm1032_vm0, %v2418_v36, %v2429_v2  ;;  %v2557_v43 = vmul.f32 %v11583_v27, %v2545_v53  ;;  %v2905_v2 = vld [vmem:[#allocation2 + $0x328] sm:$0xfc] }
 0x36a   : > { %v2105_v59 = vmax.f32 %v2093_v61, 0.0  ;;  %v2111_v20 = vmax.f32 %v2099_v42, 0.0  ;;  %v2515_v15 = vrot.slane %v2503_v31, 2  ;;  %v2575_v58 = vrot.slane %v2551_v7, 4 }
 0x36b   : > { %v2448_v33 = vadd.f32 %v2418_v36, %v2370_v29  ;;  %v2454_v4 = vadd.f32 %v2430_v26, %v2376_v37  ;;  %v2586_v55 = vrot.slane %v2557_v43, 4  ;;  %v2683_v35 = vmul.f32 %v2671_v41, %v11545_v25  ;;  %v2911_v41 = vld [vmem:[#allocation2 + $0x358] sm:$0x3] }
 0x36c   : > { %v2117_v23 = vpack.c.bf16 %v2111_v20, %v2105_v59  ;;  %v2689_v47 = vmul.f32 %v2677_v57, %v11545_v25  ;;  %v2713_v6 = vmul.f32 %v11618_v28, %v11549_v51  ;;  %v2761_v17 = vmul.f32 %v2749_v0, %v11554_v24  ;;  %v2984_v0 = vld [vmem:[#allocation2 + $0x418] sm:$0xc0] }
 0x36d   : > { %v2485_v53 = vadd.f32 %v2473_v48, %v2448_v33  ;;  %v2491_v60 = vadd.f32 %v2479_v22, %v2454_v4  ;;  %v2587_v62 = vsel %vm1032_vm0, %v2575_v58, %v2586_v55  ;;  %v2767_v36 = vmul.f32 %v2755_v14, %v11554_v24  ;;  %v11778_v4 = vld [vmem:[#allocation2 + $0x448] sm:$0xff] }
 0x36e   : > { %v2129_v61 = vrot.slane %v2117_v23, 7  ;;  %v2725_v42 = vrot.slane %v2713_v6, 2  ;;  %v2785_v31 = vrot.slane %v2761_v17, 4  ;;  %v2839_v7 = vmul.f32 %v2827_v50, %v11566_v9 }
 0x36f   : > { %v2527_v29 = vadd.f32 %v2515_v15, %v2485_v53  ;;  %v2533_v37 = vadd.f32 %v2515_v15, %v2491_v60  ;;  %v2796_v26 = vrot.slane %v2767_v36, 4  ;;  %v2845_v28 = vmul.f32 %v2833_v12, %v11566_v9  ;;  %v2990_v15 = vld [vmem:[#allocation2 + $0x448] sm:$0x3f]  ;;  %v3068_v12 = vld [vmem:[#allocation2 + $0x478] sm:$0x3] }
 0x370   : > { %2141 = vst [vmem:[#allocation3 + $0x20] sm:$0xf0] %v2129_v61  ;;  %v2737_v43 = vadd.f32 %v2725_v42, %v2683_v35  ;;  %v2743_v48 = vadd.f32 %v2725_v42, %v2689_v47  ;;  %v2869_v22 = vmul.f32 %v11630_v45, %v11572_v1  ;;  %v2917_v57 = vmul.f32 %v2905_v2, %v11576_v32  ;;  %v3062_v47 = vld [vmem:[#allocation2 + $0x448] sm:$0xfc]  ;;  %v9231_v53 = vld [vmem:[%s10266_s16 + $0x10] ss:$24 sps:$4 sm:$0xff]  }
 0x371   : > { %v2605_v59 = vadd.f32 %v2575_v58, %v2527_v29  ;;  %v2611_v20 = vadd.f32 %v2587_v62, %v2533_v37  ;;  %v2797_v14 = vsel %vm1032_vm0, %v2785_v31, %v2796_v26  ;;  %v2923_v33 = vmul.f32 %v2911_v41, %v11576_v32  ;;  %v2147_v61 = vld [vmem:[#allocation2 + $0x140] sm:$0xc0]  ;;  %v2153_v42 = vld [vmem:[#allocation2 + $0x170] sm:$0x3f] }
 0x372   : > { %v2815_v55 = vadd.f32 %v2785_v31, %v2737_v43  ;;  %v2821_v50 = vadd.f32 %v2797_v14, %v2743_v48  ;;  %v2881_v35 = vrot.slane %v2869_v22, 2  ;;  %v2941_v23 = vrot.slane %v2917_v57, 4  ;;  %v9239_v31 = vld [vmem:[%s10266_s16 + $0x44] ss:$24 sps:$4 sm:$0xff]  }
 0x373   : > { %v2617_v45 = vadd.f32 %v2605_v59, %v11613_v44  ;;  %v2623_v6 = vadd.f32 %v2611_v20, %v11613_v44  ;;  %v2952_v58 = vrot.slane %v2923_v33, 4  ;;  %v2996_v17 = vmul.f32 %v2984_v0, %v11593_v19  ;;  %v2225_v43 = vld [vmem:[#allocation2 + $0x170] sm:$0xfc]  ;;  %v2303_v0 = vld [vmem:[#allocation2 + $0x260] sm:$0xc0] }
 0x374   : > { %v2851_v60 = vadd.f32 %v2839_v7, %v2815_v55  ;;  %v2857_v62 = vadd.f32 %v2845_v28, %v2821_v50  ;;  %v3002_v36 = vmul.f32 %v2990_v15, %v11593_v19  ;;  %v3026_v2 = vmul.f32 %v11778_v4, %v11599_v11  ;;  %v2231_v28 = vld [vmem:[#allocation2 + $0x1a0] sm:$0x3] }
 0x375   : > { %v2629_v41 = vmax.f32 %v2617_v45, 0.0  ;;  %v2635_v29 = vmax.f32 %v2623_v6, 0.0  ;;  %v2953_v37 = vsel %vm1032_vm0, %v2941_v23, %v2952_v58  ;;  %v3074_v26 = vmul.f32 %v11583_v27, %v3062_v47  ;;  %v2309_v45 = vld [vmem:[#allocation2 + $0x290] sm:$0x3f] }
 0x376   : > { %v2893_v48 = vadd.f32 %v2881_v35, %v2851_v60  ;;  %v2899_v22 = vadd.f32 %v2881_v35, %v2857_v62  ;;  %v3038_v57 = vrot.slane %v3026_v2, 2  ;;  %v3080_v7 = vmul.f32 %v11583_v27, %v3068_v12  ;;  %v9237_v27 = vld [vmem:[%s10266_s16 + $0x40] ss:$24 sps:$4 sm:$0xff]   ;;  %v2381_v62 = vld [vmem:[#allocation2 + $0x290] sm:$0xfc] }
 0x377   : > { %v5285_v59 = vld [vmem:[#allocation3 + $0x20] sm:$0xff]  ;;  %v2641_v20 = vpack.c.bf16 %v2635_v29, %v2629_v41  ;;  %v3098_v14 = vrot.slane %v3074_v26, 4  ;;  %v2159_v33 = vmul.f32 %v2147_v61, %v11646_v13  ;;  %v2165_v15 = vmul.f32 %v2153_v42, %v11646_v13 }
 0x378   : > { %7244 = vmatmul.mubr.bf16.vlgmr.msra.gmra.mrb[0].mxu0 %v5285_v59  ;;  %v2971_v55 = vadd.f32 %v2941_v23, %v2893_v48  ;;  %v2977_v50 = vadd.f32 %v2953_v37, %v2899_v22  ;;  %v3109_v47 = vrot.slane %v3080_v7, 4  ;;  %v2189_v35 = vmul.f32 %v11670_v40, %v11650_v56  ;;  %v2387_v41 = vld [vmem:[#allocation2 + $0x2c0] sm:$0x3] }
 0x379   : > { %7504 = vmatpush1.bf16.msra.mxu0 %v9231_v53  ;;  %v2653_v6 = vrot.slane %v2641_v20, 3  ;;  %v2237_v58 = vmul.f32 %v2225_v43, %v11658_v52  ;;  %v2243_v12 = vmul.f32 %v2231_v28, %v11658_v52  ;;  %v2315_v60 = vmul.f32 %v2303_v0, %v11662_v3  ;;  %v9245_v29 = vld [vmem:[%s10266_s16 + $0x74] ss:$24 sps:$4 sm:$0xff]   ;;  %v11807_v20 = vld [vmem:[#allocation2 + $0x3b0] sm:$0xff] }
 0x37a   : > { %7505 = vmatprep.subr.bf16.mxu0 %v9239_v31  ;;  %v3008_v2 = vadd.f32 %v2996_v17, %v2971_v55  ;;  %v3014_v23 = vadd.f32 %v3002_v36, %v2977_v50  ;;  %v3110_v61 = vsel %vm1032_vm0, %v3098_v14, %v3109_v47  ;;  %v2201_v42 = vrot.slane %v2189_v35, 2  ;;  %v2460_v17 = vld [vmem:[#allocation2 + $0x380] sm:$0xc0]  ;;  %v2466_v36 = vld [vmem:[#allocation2 + $0x3b0] sm:$0x3f] }
 0x37b   : > { %2665 = vst [vmem:[#allocation3 + $0x58] sm:$0xf] %v2653_v6  ;;  %v2261_v40 = vrot.slane %v2237_v58, 4  ;;  %v2271_v53 = vrot.slane %v2243_v12, 4  ;;  %v2321_v37 = vmul.f32 %v2309_v45, %v11662_v3  ;;  %v2345_v26 = vmul.f32 %v11694_v39, %v11666_v30  ;;  %v9243_v55 = vld [vmem:[%s10266_s16 + $0x70] ss:$24 sps:$4 sm:$0xff]  }
 0x37c   : > { %v3050_v43 = vadd.f32 %v3038_v57, %v3008_v2  ;;  %v3056_v48 = vadd.f32 %v3038_v57, %v3014_v23  ;;  %v2213_v22 = vadd.f32 %v2201_v42, %v2159_v33  ;;  %v2219_v31 = vadd.f32 %v2201_v42, %v2165_v15  ;;  %v2538_v33 = vld [vmem:[#allocation2 + $0x3b0] sm:$0xfc]  ;;  %v2544_v15 = vld [vmem:[#allocation2 + $0x3e0] sm:$0x3] }
 0x37d   : > { %7506 = vmatpush1.bf16.msra.mxu0 %v9237_v27  ;;  %v2272_v7 = vsel %vm1032_vm0, %v2261_v40, %v2271_v53  ;;  %v2357_v28 = vrot.slane %v2345_v26, 2  ;;  %v2393_v0 = vmul.f32 %v2381_v62, %v11674_v38  ;;  %v2399_v59 = vmul.f32 %v2387_v41, %v11674_v38  ;;  %v9251_v35 = vld [vmem:[%s10266_s16 + $0xa4] ss:$24 sps:$4 sm:$0xff]   ;;  %v2670_v23 = vld [vmem:[#allocation2 + $0x1d0] sm:$0xc0] }
 0x37e   : > { %v3128_v50 = vadd.f32 %v3098_v14, %v3050_v43  ;;  %v3134_v39 = vadd.f32 %v3110_v61, %v3056_v48  ;;  %v2291_v47 = vadd.f32 %v2261_v40, %v2213_v22  ;;  %v2297_v57 = vadd.f32 %v2272_v7, %v2219_v31  ;;  %7507 = vmatprep.subr.bf16.mxu0 %v9245_v29  ;;  %v2676_v40 = vld [vmem:[#allocation2 + $0x200] sm:$0x3f] }
 0x37f   : > { %v2417_v45 = vrot.slane %v2393_v0, 4  ;;  %v2427_v27 = vrot.slane %v2399_v59, 4  ;;  %v2472_v6 = vmul.f32 %v2460_v17, %v11685_v8  ;;  %v2478_v58 = vmul.f32 %v2466_v36, %v11685_v8  ;;  %v2748_v53 = vld [vmem:[#allocation2 + $0x200] sm:$0xfc]  ;;  %v2826_v59 = vld [vmem:[#allocation2 + $0x2f0] sm:$0xc0] }
 0x380   : > { %v3140_v12 = vadd.f32 %v3128_v50, %v11613_v44  ;;  %v3146_v62 = vadd.f32 %v3134_v39, %v11613_v44  ;;  %v2327_v2 = vadd.f32 %v2315_v60, %v2291_v47  ;;  %v2333_v14 = vadd.f32 %v2321_v37, %v2297_v57  ;;  %v9249_v26 = vld [vmem:[%s10266_s16 + $0xa0] ss:$24 sps:$4 sm:$0xff]   ;;  %v2754_v37 = vld [vmem:[#allocation2 + $0x230] sm:$0x3]  ;;  %v9257_v31 = vld [vmem:[%s10266_s16 + $0xd4] ss:$24 sps:$4 sm:$0xff]  }
 0x381   : > { %v2428_v61 = vsel %vm1032_vm0, %v2417_v45, %v2427_v27  ;;  %v2502_v42 = vmul.f32 %v11807_v20, %v11699_v34  ;;  %v2550_v41 = vmul.f32 %v11690_v49, %v2538_v33  ;;  %v2556_v29 = vmul.f32 %v11690_v49, %v2544_v15  ;;  %7508 = vmatpush1.bf16.msra.mxu0 %v9243_v55  ;;  %v2832_v57 = vld [vmem:[#allocation2 + $0x320] sm:$0x3f] }
 0x382   : > { %v3152_v43 = vmax.f32 %v3140_v12, 0.0  ;;  %v3158_v48 = vmax.f32 %v3146_v62, 0.0  ;;  %v2369_v22 = vadd.f32 %v2357_v28, %v2327_v2  ;;  %v2375_v60 = vadd.f32 %v2357_v28, %v2333_v14  ;;  %7509 = vmatprep.subr.bf16.mxu0 %v9251_v35  ;;  %v2904_v27 = vld [vmem:[#allocation2 + $0x320] sm:$0xfc]  ;;  %v9255_v12 = vld [vmem:[%s10266_s16 + $0xd0] ss:$24 sps:$4 sm:$0xff]  }
 0x383   : > { %v2514_v17 = vrot.slane %v2502_v42, 2  ;;  %v2574_v36 = vrot.slane %v2550_v41, 4  ;;  %v2584_v7 = vrot.slane %v2556_v29, 4  ;;  %v2682_v0 = vmul.f32 %v2670_v23, %v11646_v13  ;;  %v2910_v23 = vld [vmem:[#allocation2 + $0x350] sm:$0x3] }
 0x384   : > { %v3164_v50 = vpack.c.bf16 %v3158_v48, %v3152_v43  ;;  %v2447_v39 = vadd.f32 %v2417_v45, %v2369_v22  ;;  %v2453_v47 = vadd.f32 %v2428_v61, %v2375_v60  ;;  %v2688_v55 = vmul.f32 %v2676_v40, %v11646_v13  ;;  %v9263_v61 = vld [vmem:[%s10266_s16 + $0x104] ss:$24 sps:$4 sm:$0xff]   ;;  %v2989_v43 = vld [vmem:[#allocation2 + $0x440] sm:$0x3f] }
 0x385   : > { %v2585_v33 = vsel %vm1032_vm0, %v2574_v36, %v2584_v7  ;;  %v2712_v28 = vmul.f32 %v11713_v46, %v11650_v56  ;;  %v2760_v15 = vmul.f32 %v2748_v53, %v11658_v52  ;;  %v2766_v35 = vmul.f32 %v2754_v37, %v11658_v52  ;;  %7510 = vmatpush1.bf16.msra.mxu0 %v9249_v26  ;;  %v11838_v48 = vld [vmem:[#allocation2 + $0x440] sm:$0xff] }
 0x386   : > { %v3176_v62 = vrot.slane %v3164_v50, 7  ;;  %v2484_v2 = vadd.f32 %v2472_v6, %v2447_v39  ;;  %v2490_v45 = vadd.f32 %v2478_v58, %v2453_v47  ;;  %v2838_v14 = vmul.f32 %v2826_v59, %v11662_v3  ;;  %7511 = vmatprep.subr.bf16.mxu0 %v9257_v31  ;;  %v2983_v58 = vld [vmem:[#allocation2 + $0x410] sm:$0xc0]  ;;  %v3061_v7 = vld [vmem:[#allocation2 + $0x440] sm:$0xfc] }
 0x387   : > { %v2724_v42 = vrot.slane %v2712_v28, 2  ;;  %v2784_v41 = vrot.slane %v2760_v15, 4  ;;  %v2794_v29 = vrot.slane %v2766_v35, 4  ;;  %v2844_v46 = vmul.f32 %v2832_v57, %v11662_v3  ;;  %v9266_v59 = vld [vmem:[%s10266_s16 + $0x42c] ss:$24 sps:$4 sm:$0xff]  }
 0x388   : > { %3188 = vst [vmem:[#allocation3 + $0x58] sm:$0xf0] %v3176_v62  ;;  %v2526_v40 = vadd.f32 %v2514_v17, %v2484_v2  ;;  %v2532_v53 = vadd.f32 %v2514_v17, %v2490_v45  ;;  %v2868_v26 = vmul.f32 %v11723_v18, %v11666_v30  ;;  %v11836_v6 = vmul.f32 %v2904_v27, %v11674_v38  ;;  %v9261_v17 = vld [vmem:[%s10266_s16 + $0x100] ss:$24 sps:$4 sm:$0xff]   ;;  %v9269_v15 = vld [vmem:[%s10266_s16 + $0x134] ss:$24 sps:$4 sm:$0xff]  }
 0x389   : > { %v2736_v22 = vadd.f32 %v2724_v42, %v2682_v0  ;;  %v2742_v60 = vadd.f32 %v2724_v42, %v2688_v55  ;;  %v2795_v37 = vsel %vm1032_vm0, %v2784_v41, %v2794_v29  ;;  %v2922_v31 = vmul.f32 %v2910_v23, %v11674_v38  ;;  %7512 = vmatpush1.bf16.msra.mxu0 %v9255_v12  ;;  %v3194_v57 = vld [vmem:[#allocation2 + $0x268] sm:$0xc0]  ;;  %v3067_v62 = vld [vmem:[#allocation2 + $0x470] sm:$0x3]  ;;  %v3200_v12 = vld [vmem:[#allocation2 + $0x298] sm:$0x3f] }
 0x38a   : > { %v2604_v18 = vadd.f32 %v2574_v36, %v2526_v40  ;;  %v2610_v50 = vadd.f32 %v2585_v33, %v2532_v53  ;;  %v2880_v39 = vrot.slane %v2868_v26, 2  ;;  %v2940_v47 = vrot.slane %v11836_v6, 4  ;;  %7513 = vmatprep.subr.bf16.mxu0 %v9263_v61  ;;  %v9264_v28 = vld [vmem:[%s10266_s16 + $0x428] ss:$24 sps:$4 sm:$0xff]   ;;  %7369 = vmatprep.subr.bf16.mxu1 %v9266_v59  ;;  %v9272_v2 = vld [vmem:[%s10266_s16 + $0x45c] ss:$24 sps:$4 sm:$0xff]  }
 0x38b   : > { %v2814_v0 = vadd.f32 %v2784_v41, %v2736_v22  ;;  %v2820_v55 = vadd.f32 %v2795_v37, %v2742_v60  ;;  %v2950_v35 = vrot.slane %v2922_v31, 4  ;;  %v2995_v27 = vmul.f32 %v2983_v58, %v11685_v8  ;;  %v3230_v61 = vld [vmem:[#allocation2 + $0x298] sm:$0xff]  ;;  %7370 = vmatpush1.bf16.msra.mxu1 %v9264_v28  ;;  %v3278_v6 = vld [vmem:[#allocation2 + $0x2c8] sm:$0x3] }
 0x38c   : > { %v2616_v36 = vadd.f32 %v2604_v18, %v11705_v5  ;;  %v2622_v33 = vadd.f32 %v2610_v50, %v11705_v5  ;;  %v3001_v45 = vmul.f32 %v2989_v43, %v11685_v8  ;;  %v11854_v23 = vmul.f32 %v11838_v48, %v11699_v34  ;;  %v3272_v42 = vld [vmem:[#allocation2 + $0x298] sm:$0xfc]  ;;  %v9275_v43 = vld [vmem:[%s10266_s16 + $0x164] ss:$24 sps:$4 sm:$0xff]   ;;  %7371 = vmatprep.subr.bf16.mxu1 %v9272_v2 }
 0x38d   : > { %v9270_v41 = vld [vmem:[%s10266_s16 + $0x458] ss:$24 sps:$4 sm:$0xff]   ;;  %v2850_v29 = vadd.f32 %v2838_v14, %v2814_v0  ;;  %v2856_v40 = vadd.f32 %v2844_v46, %v2820_v55  ;;  %v2951_v53 = vsel %vm1032_vm0, %v2940_v47, %v2950_v35  ;;  %v11859_v26 = vmul.f32 %v11690_v49, %v3061_v7  ;;  %7514 = vmatpush1.bf16.msra.mxu0 %v9261_v17  ;;  %v9278_v14 = vld [vmem:[%s10266_s16 + $0x48c] ss:$24 sps:$4 sm:$0xff]   ;;  %v3350_v17 = vld [vmem:[#allocation2 + $0x388] sm:$0xc0] }
 0x38e   : > { %v9267_v58 = vld [vmem:[%s10266_s16 + $0x130] ss:$24 sps:$4 sm:$0xff]   ;;  %v2628_v22 = vmax.f32 %v2616_v36, 0.0  ;;  %v2634_v60 = vmax.f32 %v2622_v33, 0.0  ;;  %v3037_v37 = vrot.slane %v11854_v23, 2  ;;  %v3079_v31 = vmul.f32 %v11690_v49, %v3067_v62  ;;  %7515 = vmatprep.subr.bf16.mxu0 %v9269_v15 }
 0x38f   : > { %v5292_v46 = vld [vmem:[#allocation3 + $0x58] sm:$0xff]  ;;  %v2892_v59 = vadd.f32 %v2880_v39, %v2850_v29  ;;  %v2898_v18 = vadd.f32 %v2880_v39, %v2856_v40  ;;  %v3097_v7 = vrot.slane %v11859_v26, 4  ;;  %v3206_v50 = vmul.f32 %v3194_v57, %v11545_v25  ;;  %7372 = vmatpush1.bf16.msra.mxu1 %v9270_v41  ;;  %v9276_v15 = vld [vmem:[%s10266_s16 + $0x488] ss:$24 sps:$4 sm:$0xff]  }
 0x390   : > { %7253 = vmatprep.mubr.bf16.mxu0 %v5292_v46  ;;  %v2640_v28 = vpack.c.bf16 %v2634_v60, %v2628_v22  ;;  %v3107_v0 = vrot.slane %v3079_v31, 4  ;;  %v3212_v55 = vmul.f32 %v3200_v12, %v11545_v25  ;;  %v3236_v49 = vmul.f32 %v3230_v61, %v11549_v51  ;;  %v3356_v57 = vld [vmem:[#allocation2 + $0x3b8] sm:$0x3f]  ;;  %v9273_v33 = vld [vmem:[%s10266_s16 + $0x160] ss:$24 sps:$4 sm:$0xff]   ;;  %7373 = vmatprep.subr.bf16.mxu1 %v9278_v14 }
 0x391   : > { %v2970_v35 = vadd.f32 %v2940_v47, %v2892_v59  ;;  %v2976_v62 = vadd.f32 %v2951_v53, %v2898_v18  ;;  %v3284_v39 = vmul.f32 %v3272_v42, %v11554_v24  ;;  %v3290_v2 = vmul.f32 %v3278_v6, %v11554_v24  ;;  %v3428_v36 = vld [vmem:[#allocation2 + $0x3b8] sm:$0xfc]  ;;  %7516 = vmatpush1.bf16.msra.mxu0 %v9267_v58  ;;  %v9284_v47 = vld [vmem:[%s10266_s16 + $0x4bc] ss:$24 sps:$4 sm:$0xff]   ;;  %v3507_v46 = vld [vmem:[#allocation2 + $0x4a8] sm:$0xc0] }
 0x392   : > { %v2652_v23 = vrot.slane %v2640_v28, 3  ;;  %v3108_v29 = vsel %vm1032_vm0, %v3097_v7, %v3107_v0  ;;  %v3248_v12 = vrot.slane %v3236_v49, 2  ;;  %v3362_v61 = vmul.f32 %v3350_v17, %v11566_v9  ;;  %7517 = vmatprep.subr.bf16.mxu0 %v9275_v43  ;;  %v9281_v41 = vld [vmem:[%s10266_s16 + $0x194] ss:$24 sps:$4 sm:$0xff]   ;;  %v3434_v6 = vld [vmem:[#allocation2 + $0x3e8] sm:$0x3] }
 0x393   : > { %v3007_v40 = vadd.f32 %v2995_v27, %v2970_v35  ;;  %v3013_v53 = vadd.f32 %v3001_v45, %v2976_v62  ;;  %v3308_v42 = vrot.slane %v3284_v39, 4  ;;  %v3319_v26 = vrot.slane %v3290_v2, 4  ;;  %7374 = vmatpush1.bf16.msra.mxu1 %v9276_v15  ;;  %v9282_v43 = vld [vmem:[%s10266_s16 + $0x4b8] ss:$24 sps:$4 sm:$0xff]   ;;  %v3591_v2 = vld [vmem:[#allocation2 + $0x508] sm:$0x3] }
 0x394   : > { %2664 = vst [vmem:[#allocation3 + $0x50] sm:$0xf] %v2652_v23  ;;  %v3260_v58 = vadd.f32 %v3248_v12, %v3206_v50  ;;  %v3266_v22 = vadd.f32 %v3248_v12, %v3212_v55  ;;  %v3368_v60 = vmul.f32 %v3356_v57, %v11566_v9  ;;  %v3392_v31 = vmul.f32 %v11753_v21, %v11572_v1  ;;  %v3513_v18 = vld [vmem:[#allocation2 + $0x4d8] sm:$0x3f] }
 0x395   : > { %v3049_v14 = vadd.f32 %v3037_v37, %v3007_v40  ;;  %v3055_v59 = vadd.f32 %v3037_v37, %v3013_v53  ;;  %v3320_v27 = vsel %vm1032_vm0, %v3308_v42, %v3319_v26  ;;  %v3440_v45 = vmul.f32 %v3428_v36, %v11576_v32  ;;  %7518 = vmatpush1.bf16.msra.mxu0 %v9273_v33  ;;  %v9279_v50 = vld [vmem:[%s10266_s16 + $0x190] ss:$24 sps:$4 sm:$0xff]   ;;  %v9287_v37 = vld [vmem:[%s10266_s16 + $0x1c4] ss:$24 sps:$4 sm:$0xff]  }
 0x396   : > { %v3338_v17 = vadd.f32 %v3308_v42, %v3260_v58  ;;  %v3344_v28 = vadd.f32 %v3320_v27, %v3266_v22  ;;  %v3404_v0 = vrot.slane %v3392_v31, 2  ;;  %v3446_v55 = vmul.f32 %v3434_v6, %v11576_v32  ;;  %v11886_v21 = vld [vmem:[#allocation2 + $0x4d8] sm:$0xff]  ;;  %7519 = vmatprep.subr.bf16.mxu0 %v9281_v41  ;;  %7375 = vmatprep.subr.bf16.mxu1 %v9284_v47  ;;  %v9288_v53 = vld [vmem:[%s10266_s16 + $0x4e8] ss:$24 sps:$4 sm:$0xff]  }
 0x397   : > { %v3585_v49 = vld [vmem:[#allocation2 + $0x4d8] sm:$0xfc]  ;;  %v3127_v15 = vadd.f32 %v3097_v7, %v3049_v14  ;;  %v3133_v35 = vadd.f32 %v3108_v29, %v3055_v59  ;;  %v3464_v62 = vrot.slane %v3440_v45, 4  ;;  %v3519_v39 = vmul.f32 %v3507_v46, %v11593_v19  ;;  %7376 = vmatpush1.bf16.msra.mxu1 %v9282_v43  ;;  %v11898_v47 = vld [vmem:[%s10284_s6 + $0x58] ss:$0 sm:$0xff]  ;;  %v3753_v26 = vld [vmem:[#allocation2 + $0x328] sm:$0xff] }
 0x398   : > { %v9290_v57 = vld [vmem:[%s10266_s16 + $0x4ec] ss:$24 sps:$4 sm:$0xff]   ;;  %v3374_v36 = vadd.f32 %v3362_v61, %v3338_v17  ;;  %v3380_v33 = vadd.f32 %v3368_v60, %v3344_v28  ;;  %v3475_v23 = vrot.slane %v3446_v55, 4  ;;  %v3525_v12 = vmul.f32 %v3513_v18, %v11593_v19  ;;  %v3717_v40 = vld [vmem:[#allocation2 + $0x2f8] sm:$0xc0] }
 0x399   : > { %v3139_v41 = vadd.f32 %v3127_v15, %v11705_v5  ;;  %v3145_v7 = vadd.f32 %v3133_v35, %v11705_v5  ;;  %v3549_v29 = vmul.f32 %v11886_v21, %v11599_v11  ;;  %v11901_v42 = vmul.f32 %v11898_v47, %v3585_v49  ;;  %v3723_v61 = vld [vmem:[#allocation2 + $0x328] sm:$0x3f]  ;;  %7520 = vmatpush1.bf16.msra.mxu0 %v9279_v50  ;;  %v3801_v43 = vld [vmem:[#allocation2 + $0x358] sm:$0x3]  ;;  %v3873_v49 = vld [vmem:[#allocation2 + $0x418] sm:$0xc0] }
 0x39a   : > { %v9285_v6 = vld [vmem:[%s10266_s16 + $0x1c0] ss:$24 sps:$4 sm:$0xff]   ;;  %v3416_v58 = vadd.f32 %v3404_v0, %v3374_v36  ;;  %v3422_v22 = vadd.f32 %v3404_v0, %v3380_v33  ;;  %v3476_v60 = vsel %vm1032_vm0, %v3464_v62, %v3475_v23  ;;  %v3603_v31 = vmul.f32 %v11898_v47, %v3591_v2  ;;  %7521 = vmatprep.subr.bf16.mxu0 %v9287_v37  ;;  %v9293_v14 = vld [vmem:[%s10266_s16 + $0x1f4] ss:$24 sps:$4 sm:$0xff]  }
 0x39b   : > { %v3795_v46 = vld [vmem:[#allocation2 + $0x328] sm:$0xfc]  ;;  %v3151_v59 = vmax.f32 %v3139_v41, 0.0  ;;  %v3157_v27 = vmax.f32 %v3145_v7, 0.0  ;;  %v3561_v45 = vrot.slane %v3549_v29, 2  ;;  %v3621_v18 = vrot.slane %v11901_v42, 4  ;;  %7377 = vmatprep.subr.bf16.mxu1 %v9290_v57 }
 0x39c   : > { %v9296_v50 = vld [vmem:[%s10266_s16 + $0x51c] ss:$24 sps:$4 sm:$0xff]   ;;  %v3494_v17 = vadd.f32 %v3464_v62, %v3416_v58  ;;  %v3500_v28 = vadd.f32 %v3476_v60, %v3422_v22  ;;  %v3632_v0 = vrot.slane %v3603_v31, 4  ;;  %v3729_v55 = vmul.f32 %v3717_v40, %v11545_v25  ;;  %7378 = vmatpush1.bf16.msra.mxu1 %v9288_v53  ;;  %v9294_v15 = vld [vmem:[%s10266_s16 + $0x518] ss:$24 sps:$4 sm:$0xff]  }
 0x39d   : > { %v3163_v35 = vpack.c.bf16 %v3157_v27, %v3151_v59  ;;  %v3735_v37 = vmul.f32 %v3723_v61, %v11545_v25  ;;  %v3759_v2 = vmul.f32 %v3753_v26, %v11549_v51  ;;  %v3807_v36 = vmul.f32 %v3795_v46, %v11554_v24  ;;  %v3879_v33 = vld [vmem:[#allocation2 + $0x448] sm:$0x3f]  ;;  %7522 = vmatpush1.bf16.msra.mxu0 %v9285_v6  ;;  %v9291_v57 = vld [vmem:[%s10266_s16 + $0x1f0] ss:$24 sps:$4 sm:$0xff]   ;;  %v3957_v7 = vld [vmem:[#allocation2 + $0x478] sm:$0x3] }
 0x39e   : > { %v3531_v62 = vadd.f32 %v3519_v39, %v3494_v17  ;;  %v3537_v23 = vadd.f32 %v3525_v12, %v3500_v28  ;;  %v3633_v41 = vsel %vm1032_vm0, %v3621_v18, %v3632_v0  ;;  %v3813_v40 = vmul.f32 %v3801_v43, %v11554_v24  ;;  %v3951_v53 = vld [vmem:[#allocation2 + $0x448] sm:$0xfc]  ;;  %7523 = vmatprep.subr.bf16.mxu0 %v9293_v14  ;;  %v9302_v6 = vld [vmem:[%s10266_s16 + $0x54c] ss:$24 sps:$4 sm:$0xff]   ;;  %v4030_v27 = vld [vmem:[#allocation2 + $0x538] sm:$0xc0] }
 0x39f   : > { %v9299_v29 = vld [vmem:[%s10266_s16 + $0x224] ss:$24 sps:$4 sm:$0xff]   ;;  %v3175_v42 = vrot.slane %v3163_v35, 7  ;;  %v3771_v61 = vrot.slane %v3759_v2, 2  ;;  %v3831_v26 = vrot.slane %v3807_v36, 4  ;;  %v3885_v58 = vmul.f32 %v3873_v49, %v11566_v9  ;;  %7379 = vmatprep.subr.bf16.mxu1 %v9296_v50 }
 0x3a0   : > { %v3573_v22 = vadd.f32 %v3561_v45, %v3531_v62  ;;  %v3579_v39 = vadd.f32 %v3561_v45, %v3537_v23  ;;  %v3842_v12 = vrot.slane %v3813_v40, 4  ;;  %v3891_v60 = vmul.f32 %v3879_v33, %v11566_v9  ;;  %7380 = vmatpush1.bf16.msra.mxu1 %v9294_v15  ;;  %v9300_v31 = vld [vmem:[%s10266_s16 + $0x548] ss:$24 sps:$4 sm:$0xff]   ;;  %v9308_v35 = vld [vmem:[%s10266_s16 + $0x57c] ss:$24 sps:$4 sm:$0xff]  }
 0x3a1   : > { %3187 = vst [vmem:[#allocation3 + $0x50] sm:$0xf0] %v3175_v42  ;;  %v3783_v46 = vadd.f32 %v3771_v61, %v3729_v55  ;;  %v3789_v43 = vadd.f32 %v3771_v61, %v3735_v37  ;;  %v3915_v14 = vmul.f32 %v11778_v4, %v11572_v1  ;;  %v3963_v59 = vmul.f32 %v3951_v53, %v11576_v32  ;;  %v11925_v50 = vld [vmem:[#allocation2 + $0x568] sm:$0xff]  ;;  %v9305_v55 = vld [vmem:[%s10266_s16 + $0x254] ss:$24 sps:$4 sm:$0xff]  }
 0x3a2   : > { %7524 = vmatpush1.bf16.msra.mxu0 %v9291_v57  ;;  %v9297_v45 = vld [vmem:[%s10266_s16 + $0x220] ss:$24 sps:$4 sm:$0xff]   ;;  %v3651_v17 = vadd.f32 %v3621_v18, %v3573_v22  ;;  %v3657_v28 = vadd.f32 %v3633_v41, %v3579_v39  ;;  %v3843_v0 = vsel %vm1032_vm0, %v3831_v26, %v3842_v12  ;;  %v3969_v49 = vmul.f32 %v3957_v7, %v11576_v32  ;;  %v3199_v23 = vld [vmem:[#allocation2 + $0x290] sm:$0x3f]  ;;  %v4114_v53 = vld [vmem:[#allocation2 + $0x598] sm:$0x3] }
 0x3a3   : > { %v4036_v15 = vld [vmem:[#allocation2 + $0x568] sm:$0x3f]  ;;  %7525 = vmatprep.subr.bf16.mxu0 %v9299_v29  ;;  %v3861_v37 = vadd.f32 %v3831_v26, %v3783_v46  ;;  %v3867_v4 = vadd.f32 %v3843_v0, %v3789_v43  ;;  %v3927_v2 = vrot.slane %v3915_v14, 2  ;;  %v3987_v36 = vrot.slane %v3963_v59, 4  ;;  %v3193_v62 = vld [vmem:[#allocation2 + $0x260] sm:$0xc0]  ;;  %7381 = vmatprep.subr.bf16.mxu1 %v9302_v6 }
 0x3a4   : > { %v4108_v33 = vld [vmem:[#allocation2 + $0x568] sm:$0xfc]  ;;  %v3663_v18 = vadd.f32 %v3651_v17, %v11613_v44  ;;  %v3669_v57 = vadd.f32 %v3657_v28, %v11613_v44  ;;  %v3998_v41 = vrot.slane %v3969_v49, 4  ;;  %v4042_v40 = vmul.f32 %v4030_v27, %v11593_v19  ;;  %7382 = vmatpush1.bf16.msra.mxu1 %v9300_v31  ;;  %v9306_v7 = vld [vmem:[%s10266_s16 + $0x578] ss:$24 sps:$4 sm:$0xff]   ;;  %v3229_v22 = vld [vmem:[#allocation2 + $0x290] sm:$0xff] }
 0x3a5   : > { %v3897_v29 = vadd.f32 %v3885_v58, %v3861_v37  ;;  %v3903_v42 = vadd.f32 %v3891_v60, %v3867_v4  ;;  %v4048_v61 = vmul.f32 %v4036_v15, %v11593_v19  ;;  %v4072_v26 = vmul.f32 %v11925_v50, %v11599_v11  ;;  %v3271_v6 = vld [vmem:[#allocation2 + $0x290] sm:$0xfc]  ;;  %v3277_v31 = vld [vmem:[#allocation2 + $0x2c0] sm:$0x3]  ;;  %7383 = vmatprep.subr.bf16.mxu1 %v9308_v35  ;;  %v3349_v28 = vld [vmem:[#allocation2 + $0x380] sm:$0xc0] }
 0x3a6   : > { %7526 = vmatpush1.bf16.msra.mxu0 %v9297_v45  ;;  %v9314_v39 = vld [vmem:[%s10266_s16 + $0x5ac] ss:$24 sps:$4 sm:$0xff]   ;;  %v3675_v12 = vmax.f32 %v3663_v18, 0.0  ;;  %v3681_v46 = vmax.f32 %v3669_v57, 0.0  ;;  %v3999_v43 = vsel %vm1032_vm0, %v3987_v36, %v3998_v41  ;;  %v11942_v14 = vmul.f32 %v11898_v47, %v4108_v33  ;;  %v9303_v58 = vld [vmem:[%s10266_s16 + $0x250] ss:$24 sps:$4 sm:$0xff]  }
 0x3a7   : > { %7527 = vmatprep.subr.bf16.mxu0 %v9305_v55  ;;  %v3939_v60 = vadd.f32 %v3927_v2, %v3897_v29  ;;  %v3945_v59 = vadd.f32 %v3927_v2, %v3903_v42  ;;  %v4084_v27 = vrot.slane %v4072_v26, 2  ;;  %v4126_v17 = vmul.f32 %v11898_v47, %v4114_v53  ;;  %v9311_v45 = vld [vmem:[%s10266_s16 + $0x284] ss:$24 sps:$4 sm:$0xff]   ;;  %v9312_v55 = vld [vmem:[%s10266_s16 + $0x5a8] ss:$24 sps:$4 sm:$0xff]  }
 0x3a8   : > { %v5291_v0 = vld [vmem:[#allocation3 + $0x50] sm:$0xff]  ;;  %v3687_v49 = vpack.c.bf16 %v3681_v46, %v3675_v12  ;;  %v4144_v15 = vrot.slane %v11942_v14, 4  ;;  %v3205_v37 = vmul.f32 %v3193_v62, %v11646_v13  ;;  %v3211_v4 = vmul.f32 %v3199_v23, %v11646_v13  ;;  %7384 = vmatpush1.bf16.msra.mxu1 %v9306_v7  ;;  %v9320_v41 = vld [vmem:[%s10266_s16 + $0x5dc] ss:$24 sps:$4 sm:$0xff]   ;;  %v9309_v42 = vld [vmem:[%s10266_s16 + $0x280] ss:$24 sps:$4 sm:$0xff]  }
 0x3a9   : > { %7254 = vmatmul.mubr.bf16.gmra.mrb[4].mxu0 %v5291_v0  ;;  %v4017_v35 = vadd.f32 %v3987_v36, %v3939_v60  ;;  %v4023_v2 = vadd.f32 %v3999_v43, %v3945_v59  ;;  %v4155_v33 = vrot.slane %v4126_v17, 4  ;;  %v3235_v18 = vmul.f32 %v3229_v22, %v11650_v56  ;;  %v3355_v57 = vld [vmem:[#allocation2 + $0x3b0] sm:$0x3f]  ;;  %7385 = vmatprep.subr.bf16.mxu1 %v9314_v39  ;;  %v3433_v46 = vld [vmem:[#allocation2 + $0x3e0] sm:$0x3] }
 0x3aa   : > { %v3699_v53 = vrot.slane %v3687_v49, 3  ;;  %v3283_v29 = vmul.f32 %v3271_v6, %v11658_v52  ;;  %v3289_v62 = vmul.f32 %v3277_v31, %v11658_v52  ;;  %v3361_v23 = vmul.f32 %v3349_v28, %v11662_v3  ;;  %v3427_v7 = vld [vmem:[#allocation2 + $0x3b0] sm:$0xfc]  ;;  %7528 = vmatpush1.bf16.msra.mxu0 %v9303_v58  ;;  %v9317_v39 = vld [vmem:[%s10266_s16 + $0x2b4] ss:$24 sps:$4 sm:$0xff]  }
 0x3ab   : > { %v4054_v36 = vadd.f32 %v4042_v40, %v4017_v35  ;;  %v4060_v26 = vadd.f32 %v4048_v61, %v4023_v2  ;;  %v4156_v12 = vsel %vm1032_vm0, %v4144_v15, %v4155_v33  ;;  %v3247_v22 = vrot.slane %v3235_v18, 2  ;;  %7529 = vmatprep.subr.bf16.mxu0 %v9311_v45  ;;  %v9318_v58 = vld [vmem:[%s10266_s16 + $0x5d8] ss:$24 sps:$4 sm:$0xff]   ;;  %v3512_v28 = vld [vmem:[#allocation2 + $0x4d0] sm:$0x3f] }
 0x3ac   : > { %3711 = vst [vmem:[#allocation3 + $0x88] sm:$0xf] %v3699_v53  ;;  %v3307_v43 = vrot.slane %v3283_v29, 4  ;;  %v3317_v6 = vrot.slane %v3289_v62, 4  ;;  %v3367_v14 = vmul.f32 %v3355_v57, %v11662_v3  ;;  %v3391_v31 = vmul.f32 %v11807_v20, %v11666_v30  ;;  %7386 = vmatpush1.bf16.msra.mxu1 %v9312_v55  ;;  %v3506_v17 = vld [vmem:[#allocation2 + $0x4a0] sm:$0xc0] }
 0x3ad   : > { %v4096_v40 = vadd.f32 %v4084_v27, %v4054_v36  ;;  %v4102_v61 = vadd.f32 %v4084_v27, %v4060_v26  ;;  %v3259_v60 = vadd.f32 %v3247_v22, %v3205_v37  ;;  %v3265_v59 = vadd.f32 %v3247_v22, %v3211_v4  ;;  %7387 = vmatprep.subr.bf16.mxu1 %v9320_v41  ;;  %v9326_v45 = vld [vmem:[%s10266_s16 + $0x60c] ss:$24 sps:$4 sm:$0xff]   ;;  %v9315_v55 = vld [vmem:[%s10266_s16 + $0x2b0] ss:$24 sps:$4 sm:$0xff]   ;;  %v3590_v57 = vld [vmem:[#allocation2 + $0x500] sm:$0x3] }
 0x3ae   : > { %v3318_v0 = vsel %vm1032_vm0, %v3307_v43, %v3317_v6  ;;  %v3403_v49 = vrot.slane %v3391_v31, 2  ;;  %v3439_v35 = vmul.f32 %v3427_v7, %v11674_v38  ;;  %v3445_v2 = vmul.f32 %v3433_v46, %v11674_v38  ;;  %v11967_v20 = vld [vmem:[#allocation2 + $0x4d0] sm:$0xff]  ;;  %7530 = vmatpush1.bf16.msra.mxu0 %v9309_v42  ;;  %v3722_v46 = vld [vmem:[#allocation2 + $0x320] sm:$0x3f] }
 0x3af   : > { %v4174_v27 = vadd.f32 %v4144_v15, %v4096_v40  ;;  %v4180_v37 = vadd.f32 %v4156_v12, %v4102_v61  ;;  %v3337_v4 = vadd.f32 %v3307_v43, %v3259_v60  ;;  %v3343_v33 = vadd.f32 %v3318_v0, %v3265_v59  ;;  %v3584_v18 = vld [vmem:[#allocation2 + $0x4d0] sm:$0xfc]  ;;  %7531 = vmatprep.subr.bf16.mxu0 %v9317_v39  ;;  %v3752_v39 = vld [vmem:[#allocation2 + $0x320] sm:$0xff]  ;;  %v11981_v40 = vld [vmem:[%s10284_s6 + $0x50] ss:$0 sm:$0xff] }
 0x3b0   : > { %v9323_v41 = vld [vmem:[%s10266_s16 + $0x2e4] ss:$24 sps:$4 sm:$0xff]   ;;  %v3463_v53 = vrot.slane %v3439_v35, 4  ;;  %v3473_v29 = vrot.slane %v3445_v2, 4  ;;  %v3518_v62 = vmul.f32 %v3506_v17, %v11685_v8  ;;  %v3524_v7 = vmul.f32 %v3512_v28, %v11685_v8  ;;  %v3716_v36 = vld [vmem:[#allocation2 + $0x2f0] sm:$0xc0]  ;;  %7388 = vmatpush1.bf16.msra.mxu1 %v9318_v58 }
 0x3b1   : > { %v9324_v42 = vld [vmem:[%s10266_s16 + $0x608] ss:$24 sps:$4 sm:$0xff]   ;;  %v4186_v15 = vadd.f32 %v4174_v27, %v11613_v44  ;;  %v4192_v26 = vadd.f32 %v4180_v37, %v11613_v44  ;;  %v3373_v12 = vadd.f32 %v3361_v23, %v3337_v4  ;;  %v3379_v22 = vadd.f32 %v3367_v14, %v3343_v33  ;;  %7430 = vmatprep.subr.bf16.mxu1 %v9326_v45  ;;  %v9332_v43 = vld [vmem:[%s10266_s16 + $0x63c] ss:$24 sps:$4 sm:$0xff]   ;;  %v3800_v23 = vld [vmem:[#allocation2 + $0x350] sm:$0x3] }
 0x3b2   : > { %v3474_v6 = vsel %vm1032_vm0, %v3463_v53, %v3473_v29  ;;  %v3548_v31 = vmul.f32 %v11967_v20, %v11699_v34  ;;  %v11984_v58 = vmul.f32 %v11981_v40, %v3584_v18  ;;  %v3602_v61 = vmul.f32 %v11981_v40, %v3590_v57  ;;  %v3794_v60 = vld [vmem:[#allocation2 + $0x320] sm:$0xfc]  ;;  %7532 = vmatpush1.bf16.msra.mxu0 %v9315_v55  ;;  %v3872_v0 = vld [vmem:[#allocation2 + $0x410] sm:$0xc0]  ;;  %v9492_v18 = vld [vmem:[#allocation3 + $0x48] sm:$0xff] }
 0x3b3   : > { %v9321_v14 = vld [vmem:[%s10266_s16 + $0x2e0] ss:$24 sps:$4 sm:$0xff]   ;;  %v4198_v59 = vmax.f32 %v4186_v15, 0.0  ;;  %v4204_v17 = vmax.f32 %v4192_v26, 0.0  ;;  %v3415_v28 = vadd.f32 %v3403_v49, %v3373_v12  ;;  %v3421_v45 = vadd.f32 %v3403_v49, %v3379_v22  ;;  %7533 = vmatprep.subr.bf16.mxu0 %v9323_v41  ;;  %v9329_v35 = vld [vmem:[%s10266_s16 + $0x314] ss:$24 sps:$4 sm:$0xff]  }
 0x3b4   : > { %v9491_v2 = vld [vmem:[#allocation3 + $0x10] sm:$0xff]  ;;  %v3560_v27 = vrot.slane %v3548_v31, 2  ;;  %v3620_v37 = vrot.slane %v11984_v58, 4  ;;  %v3630_v4 = vrot.slane %v3602_v61, 4  ;;  %v3728_v33 = vmul.f32 %v3716_v36, %v11646_v13  ;;  %v9330_v55 = vld [vmem:[%s10266_s16 + $0x638] ss:$24 sps:$4 sm:$0xff]  }
 0x3b5   : > { %7390 = vmatmul.mubr.bf16.vlgmr.msra.gmra.mrb[16].mxu1 %v9491_v2  ;;  %v4210_v57 = vpack.c.bf16 %v4204_v17, %v4198_v59  ;;  %v3493_v29 = vadd.f32 %v3463_v53, %v3415_v28  ;;  %v3499_v15 = vadd.f32 %v3474_v6, %v3421_v45  ;;  %v3734_v49 = vmul.f32 %v3722_v46, %v11646_v13  ;;  %v3878_v41 = vld [vmem:[#allocation2 + $0x440] sm:$0x3f]  ;;  %v9338_v26 = vld [vmem:[%s10266_s16 + $0x66c] ss:$24 sps:$4 sm:$0xff]   ;;  %v9336_v28 = vld [vmem:[%s10266_s16 + $0x668] ss:$24 sps:$4 sm:$0xff]  }
 0x3b6   : > { %7431 = vmatpush1.bf16.msra.mxu1 %v9324_v42  ;;  %7399 = vmatprep.mubr.bf16.mxu1 %v9492_v18  ;;  %v3631_v12 = vsel %vm1032_vm0, %v3620_v37, %v3630_v4  ;;  %v3758_v22 = vmul.f32 %v3752_v39, %v11650_v56  ;;  %v3806_v31 = vmul.f32 %v3794_v60, %v11658_v52  ;;  %v3950_v42 = vld [vmem:[#allocation2 + $0x440] sm:$0xfc]  ;;  %v3956_v46 = vld [vmem:[#allocation2 + $0x470] sm:$0x3] }
 0x3b7   : > { %7432 = vmatprep.subr.bf16.mxu1 %v9332_v43  ;;  %v3812_v36 = vmul.f32 %v3800_v23, %v11658_v52  ;;  %7534 = vmatpush1.bf16.msra.mxu0 %v9321_v14  ;;  %v4222_v58 = vrot.slane %v4210_v57, 7  ;;  %v3530_v61 = vadd.f32 %v3518_v62, %v3493_v29  ;;  %v3536_v53 = vadd.f32 %v3524_v7, %v3499_v15  ;;  %v4029_v7 = vld [vmem:[#allocation2 + $0x530] sm:$0xc0]  ;;  %v9344_v45 = vld [vmem:[%s10266_s16 + $0x69c] ss:$24 sps:$4 sm:$0xff]  }
 0x3b8   : > { %v3884_v6 = vmul.f32 %v3872_v0, %v11662_v3  ;;  %7576 = vmatprep.subr.bf16.mxu0 %v9329_v35  ;;  %v3770_v43 = vrot.slane %v3758_v22, 2  ;;  %v3830_v59 = vrot.slane %v3806_v31, 4  ;;  %v3890_v39 = vmul.f32 %v3878_v41, %v11662_v3  ;;  %v12007_v18 = vld [vmem:[#allocation2 + $0x560] sm:$0xff]  ;;  %v4113_v31 = vld [vmem:[#allocation2 + $0x590] sm:$0x3] }
 0x3b9   : > { %v3840_v17 = vrot.slane %v3812_v36, 4  ;;  %4234 = vst [vmem:[#allocation3 + $0x88] sm:$0xf0] %v4222_v58  ;;  %v3572_v60 = vadd.f32 %v3560_v27, %v3530_v61  ;;  %v3578_v23 = vadd.f32 %v3560_v27, %v3536_v53  ;;  %v3914_v14 = vmul.f32 %v11838_v48, %v11666_v30  ;;  %v4107_v48 = vld [vmem:[#allocation2 + $0x560] sm:$0xfc] }
 0x3ba   : > { %7433 = vmatpush1.bf16.msra.mxu1 %v9330_v55  ;;  %v3962_v62 = vmul.f32 %v3950_v42, %v11674_v38  ;;  %v3782_v0 = vadd.f32 %v3770_v43, %v3728_v33  ;;  %v3788_v35 = vadd.f32 %v3770_v43, %v3734_v49  ;;  %v3968_v4 = vmul.f32 %v3956_v46, %v11674_v38  ;;  %v4035_v55 = vld [vmem:[#allocation2 + $0x560] sm:$0x3f]  ;;  %v9494_v42 = vld [vmem:[#allocation3 + $0x78] sm:$0xff]  ;;  %v4240_v53 = vld [vmem:[#allocation2 + $0x388] sm:$0xc0] }
 0x3bb   : > { %7434 = vmatprep.subr.bf16.mxu1 %v9338_v26  ;;  %v3841_v2 = vsel %vm1032_vm0, %v3830_v59, %v3840_v17  ;;  %v3650_v57 = vadd.f32 %v3620_v37, %v3572_v60  ;;  %v3656_v27 = vadd.f32 %v3631_v12, %v3578_v23  ;;  %v3926_v29 = vrot.slane %v3914_v14, 2  ;;  %v9493_v41 = vld [vmem:[#allocation3 + $0x40] sm:$0xff]  ;;  %v9350_v46 = vld [vmem:[%s10266_s16 + $0x6cc] ss:$24 sps:$4 sm:$0xff]  }
 0x3bc   : > { %v3986_v15 = vrot.slane %v3962_v62, 4  ;;  %v3860_v26 = vadd.f32 %v3830_v59, %v3782_v0  ;;  %v3866_v22 = vadd.f32 %v3841_v2, %v3788_v35  ;;  %v3996_v33 = vrot.slane %v3968_v4, 4  ;;  %v9342_v36 = vld [vmem:[%s10266_s16 + $0x698] ss:$24 sps:$4 sm:$0xff]   ;;  %v4324_v2 = vld [vmem:[#allocation2 + $0x3e8] sm:$0x3] }
 0x3bd   : > { %7400 = vmatmul.mubr.bf16.gmra.mrb[20].mxu1 %v9493_v41  ;;  %v4041_v49 = vmul.f32 %v4029_v7, %v11685_v8  ;;  %v3662_v58 = vadd.f32 %v3650_v57, %v11705_v5  ;;  %v3668_v37 = vadd.f32 %v3656_v27, %v11705_v5  ;;  %v4047_v12 = vmul.f32 %v4035_v55, %v11685_v8  ;;  %v4246_v60 = vld [vmem:[#allocation2 + $0x3b8] sm:$0x3f]  ;;  %v4396_v57 = vld [vmem:[#allocation2 + $0x4a8] sm:$0xc0] }
 0x3be   : > { %7435 = vmatpush1.bf16.msra.mxu1 %v9336_v28  ;;  %7409 = vmatprep.mubr.bf16.mxu1 %v9494_v42  ;;  %v4071_v61 = vmul.f32 %v12007_v18, %v11699_v34  ;;  %v3896_v43 = vadd.f32 %v3884_v6, %v3860_v26  ;;  %v3902_v59 = vadd.f32 %v3890_v39, %v3866_v22  ;;  %v4276_v23 = vld [vmem:[#allocation2 + $0x3b8] sm:$0xff]  ;;  %v9348_v27 = vld [vmem:[%s10266_s16 + $0x6c8] ss:$24 sps:$4 sm:$0xff]  }
 0x3bf   : > { %7436 = vmatprep.subr.bf16.mxu1 %v9344_v45  ;;  %v3997_v17 = vsel %vm1032_vm0, %v3986_v15, %v3996_v33  ;;  %v12019_v28 = vmul.f32 %v11981_v40, %v4107_v48  ;;  %v4318_v14 = vld [vmem:[#allocation2 + $0x3b8] sm:$0xfc]  ;;  %v3674_v62 = vmax.f32 %v3662_v58, 0.0  ;;  %v3680_v7 = vmax.f32 %v3668_v37, 0.0  ;;  %v9356_v33 = vld [vmem:[%s10266_s16 + $0x6fc] ss:$24 sps:$4 sm:$0xff]  }
 0x3c0   : > { %v4083_v0 = vrot.slane %v4071_v61, 2  ;;  %v4125_v35 = vmul.f32 %v11981_v40, %v4113_v31  ;;  %v12022_v45 = vld [vmem:[#allocation3 + $0x88] sm:$0xff]  ;;  %v3938_v6 = vadd.f32 %v3926_v29, %v3896_v43  ;;  %v3944_v39 = vadd.f32 %v3926_v29, %v3902_v59  ;;  %v4402_v37 = vld [vmem:[#allocation2 + $0x4d8] sm:$0x3f] }
 0x3c1   : > { %v4143_v4 = vrot.slane %v12019_v28, 4  ;;  %v4252_v55 = vmul.f32 %v4240_v53, %v11545_v25  ;;  %7263 = vmatprep.mubr.bf16.mxu0 %v12022_v45  ;;  %v3686_v48 = vpack.c.bf16 %v3680_v7, %v3674_v62  ;;  %v4258_v26 = vmul.f32 %v4246_v60, %v11545_v25  ;;  %v4474_v59 = vld [vmem:[#allocation2 + $0x4d8] sm:$0xfc]  ;;  %v9495_v28 = vld [vmem:[#allocation3 + $0x70] sm:$0xff]  ;;  %v9496_v62 = vld [vmem:[#allocation3 + $0xa8] sm:$0xff] }
 0x3c2   : > { %7437 = vmatpush1.bf16.msra.mxu1 %v9342_v36  ;;  %v4153_v41 = vrot.slane %v4125_v35, 4  ;;  %v4282_v22 = vmul.f32 %v4276_v23, %v11549_v51  ;;  %v4016_v31 = vadd.f32 %v3986_v15, %v3938_v6  ;;  %v4022_v42 = vadd.f32 %v3997_v17, %v3944_v39  ;;  %v4480_v23 = vld [vmem:[#allocation2 + $0x508] sm:$0x3]  ;;  %v4553_v39 = vld [vmem:[#allocation2 + $0x5c8] sm:$0xc0] }
 0x3c3   : > { %7438 = vmatprep.subr.bf16.mxu1 %v9350_v46  ;;  %v4330_v29 = vmul.f32 %v4318_v14, %v11554_v24  ;;  %v4336_v58 = vmul.f32 %v4324_v2, %v11554_v24  ;;  %v3698_v36 = vrot.slane %v3686_v48, 3  ;;  %v4408_v43 = vmul.f32 %v4396_v57, %v11566_v9  ;;  %v9354_v14 = vld [vmem:[%s10266_s16 + $0x6f8] ss:$24 sps:$4 sm:$0xff]  }
 0x3c4   : > { %v4154_v61 = vsel %vm1032_vm0, %v4143_v4, %v4153_v41  ;;  %v4294_v53 = vrot.slane %v4282_v22, 2  ;;  %v4053_v60 = vadd.f32 %v4041_v49, %v4016_v31  ;;  %v4059_v46 = vadd.f32 %v4047_v12, %v4022_v42  ;;  %v9362_v49 = vld [vmem:[%s10266_s16 + $0x72c] ss:$24 sps:$4 sm:$0xff]  }
 0x3c5   : > { %7410 = vmatmul.mubr.bf16.gmra.mrb[24].mxu1 %v9495_v28  ;;  %v4354_v15 = vrot.slane %v4330_v29, 4  ;;  %v4365_v17 = vrot.slane %v4336_v58, 4  ;;  %3710 = vst [vmem:[#allocation3 + $0x80] sm:$0xf] %v3698_v36  ;;  %v4414_v2 = vmul.f32 %v4402_v37, %v11566_v9  ;;  %v4438_v6 = vmul.f32 %v11886_v21, %v11572_v1  ;;  %v4559_v41 = vld [vmem:[#allocation2 + $0x5f8] sm:$0x3f] }
 0x3c6   : > { %7439 = vmatpush1.bf16.msra.mxu1 %v9348_v27  ;;  %7419 = vmatprep.mubr.bf16.mxu1 %v9496_v62  ;;  %v4306_v7 = vadd.f32 %v4294_v53, %v4252_v55  ;;  %v4312_v35 = vadd.f32 %v4294_v53, %v4258_v26  ;;  %v4095_v57 = vadd.f32 %v4083_v0, %v4053_v60  ;;  %v4589_v42 = vld [vmem:[#allocation2 + $0x5f8] sm:$0xff]  ;;  %v9360_v36 = vld [vmem:[%s10266_s16 + $0x728] ss:$24 sps:$4 sm:$0xff]  }
 0x3c7   : > { %7440 = vmatprep.subr.bf16.mxu1 %v9356_v33  ;;  %v4101_v12 = vadd.f32 %v4083_v0, %v4059_v46  ;;  %v4366_v48 = vsel %vm1032_vm0, %v4354_v15, %v4365_v17  ;;  %v4486_v27 = vmul.f32 %v4474_v59, %v11576_v32  ;;  %v4450_v55 = vrot.slane %v4438_v6, 2  ;;  %v4631_v29 = vld [vmem:[#allocation2 + $0x5f8] sm:$0xfc]  ;;  %v4637_v0 = vld [vmem:[#allocation2 + $0x628] sm:$0x3] }
 0x3c8   : > { %v4384_v22 = vadd.f32 %v4354_v15, %v4306_v7  ;;  %v4390_v31 = vadd.f32 %v4366_v48, %v4312_v35  ;;  %v4492_v26 = vmul.f32 %v4480_v23, %v11576_v32  ;;  %v4173_v21 = vadd.f32 %v4143_v4, %v4095_v57  ;;  %v9368_v46 = vld [vmem:[%s10266_s16 + $0x75c] ss:$24 sps:$4 sm:$0xff]   ;;  %v4763_v23 = vld [vmem:[#allocation2 + $0x418] sm:$0xc0] }
 0x3c9   : > { %v4179_v58 = vadd.f32 %v4154_v61, %v4101_v12  ;;  %v4510_v33 = vrot.slane %v4486_v27, 4  ;;  %v4565_v37 = vmul.f32 %v4553_v39, %v11593_v19  ;;  %v4571_v60 = vmul.f32 %v4559_v41, %v11593_v19  ;;  %v4769_v62 = vld [vmem:[#allocation2 + $0x448] sm:$0x3f]  ;;  %v4847_v39 = vld [vmem:[#allocation2 + $0x478] sm:$0x3] }
 0x3ca   : > { %7441 = vmatpush1.bf16.msra.mxu1 %v9354_v14  ;;  %v4420_v53 = vadd.f32 %v4408_v43, %v4384_v22  ;;  %v4426_v28 = vadd.f32 %v4414_v2, %v4390_v31  ;;  %v4521_v59 = vrot.slane %v4492_v26, 4  ;;  %v4185_v15 = vadd.f32 %v4173_v21, %v11705_v5  ;;  %v4799_v2 = vld [vmem:[#allocation2 + $0x448] sm:$0xff]  ;;  %v9366_v41 = vld [vmem:[%s10266_s16 + $0x758] ss:$24 sps:$4 sm:$0xff]   ;;  %v9374_v21 = vld [vmem:[%s10266_s16 + $0x78c] ss:$24 sps:$4 sm:$0xff]  }
 0x3cb   : > { %7442 = vmatprep.subr.bf16.mxu1 %v9362_v49  ;;  %v4191_v17 = vadd.f32 %v4179_v58, %v11705_v5  ;;  %v4595_v4 = vmul.f32 %v4589_v42, %v11599_v11  ;;  %v4643_v61 = vmul.f32 %v11898_v47, %v4631_v29  ;;  %v4649_v35 = vmul.f32 %v11898_v47, %v4637_v0  ;;  %v4841_v6 = vld [vmem:[#allocation2 + $0x448] sm:$0xfc]  ;;  %v12053_v49 = vld [vmem:[#allocation3 + $0xa0] sm:$0xff]  ;;  %v4919_v29 = vld [vmem:[#allocation2 + $0x538] sm:$0xc0] }
 0x3cc   : > { %v4462_v14 = vadd.f32 %v4450_v55, %v4420_v53  ;;  %v4468_v7 = vadd.f32 %v4450_v55, %v4426_v28  ;;  %v4522_v43 = vsel %vm1032_vm0, %v4510_v33, %v4521_v59  ;;  %v4197_v57 = vmax.f32 %v4185_v15, 0.0  ;;  %v12057_v22 = vld [vmem:[#allocation3 + $0x28] sm:$0xff] }
 0x3cd   : > { %7420 = vmatmul.mubr.bf16.gmra.mrb[28].mxu1 %v12053_v49  ;;  %v4203_v12 = vmax.f32 %v4191_v17, 0.0  ;;  %v4607_v48 = vrot.slane %v4595_v4, 2  ;;  %v4667_v27 = vrot.slane %v4643_v61, 4  ;;  %v4678_v26 = vrot.slane %v4649_v35, 4  ;;  %v4925_v28 = vld [vmem:[#allocation2 + $0x568] sm:$0x3f] }
 0x3ce   : > { %7443 = vmatpush1.bf16.msra.mxu1 %v9360_v36  ;;  %7462 = vmatprep.mubr.bf16.mxu1 %v12057_v22  ;;  %v4540_v31 = vadd.f32 %v4510_v33, %v4462_v14  ;;  %v4546_v55 = vadd.f32 %v4522_v43, %v4468_v7  ;;  %v4775_v42 = vmul.f32 %v4763_v23, %v11545_v25  ;;  %v4997_v4 = vld [vmem:[#allocation2 + $0x568] sm:$0xfc]  ;;  %v5003_v61 = vld [vmem:[#allocation2 + $0x598] sm:$0x3] }
 0x3cf   : > { %7444 = vmatprep.subr.bf16.mxu1 %v9368_v46  ;;  %v4209_v58 = vpack.c.bf16 %v4203_v12, %v4197_v57  ;;  %v4781_v0 = vmul.f32 %v4769_v62, %v11545_v25  ;;  %v4805_v53 = vmul.f32 %v4799_v2, %v11549_v51  ;;  %v4853_v36 = vmul.f32 %v4841_v6, %v11554_v24  ;;  %v9372_v25 = vld [vmem:[%s10266_s16 + $0x788] ss:$24 sps:$4 sm:$0xff]  }
 0x3d0   : > { %v4577_v59 = vadd.f32 %v4565_v37, %v4540_v31  ;;  %v4583_v15 = vadd.f32 %v4571_v60, %v4546_v55  ;;  %v4679_v33 = vsel %vm1032_vm0, %v4667_v27, %v4678_v26  ;;  %v4859_v17 = vmul.f32 %v4847_v39, %v11554_v24  ;;  %v9380_v60 = vld [vmem:[%s10266_s16 + $0x7bc] ss:$24 sps:$4 sm:$0xff]   ;;  %v5076_v39 = vld [vmem:[#allocation2 + $0x658] sm:$0xc0] }
 0x3d1   : > { %v4221_v46 = vrot.slane %v4209_v58, 7  ;;  %v4817_v23 = vrot.slane %v4805_v53, 2  ;;  %v4877_v14 = vrot.slane %v4853_v36, 4  ;;  %v4931_v7 = vmul.f32 %v4919_v29, %v11566_v9  ;;  %v5112_v31 = vld [vmem:[#allocation2 + $0x688] sm:$0xff]  ;;  %v9378_v58 = vld [vmem:[%s10266_s16 + $0x7b8] ss:$24 sps:$4 sm:$0xff]  }
 0x3d2   : > { %7445 = vmatpush1.bf16.msra.mxu1 %v9366_v41  ;;  %v4619_v51 = vadd.f32 %v4607_v48, %v4577_v59  ;;  %v4625_v62 = vadd.f32 %v4607_v48, %v4583_v15  ;;  %v4888_v43 = vrot.slane %v4859_v17, 4  ;;  %v4937_v37 = vmul.f32 %v4925_v28, %v11566_v9  ;;  %v5082_v9 = vld [vmem:[#allocation2 + $0x688] sm:$0x3f]  ;;  %v5160_v53 = vld [vmem:[#allocation2 + $0x6b8] sm:$0x3] }
 0x3d3   : > { %7446 = vmatprep.subr.bf16.mxu1 %v9374_v21  ;;  %4233 = vst [vmem:[#allocation3 + $0x80] sm:$0xf0] %v4221_v46  ;;  %v4829_v35 = vadd.f32 %v4817_v23, %v4775_v42  ;;  %v4835_v2 = vadd.f32 %v4817_v23, %v4781_v0  ;;  %v4961_v24 = vmul.f32 %v11925_v50, %v11572_v1  ;;  %v5154_v21 = vld [vmem:[#allocation2 + $0x688] sm:$0xfc]  ;;  %v4245_v17 = vld [vmem:[#allocation2 + $0x3b0] sm:$0x3f] }
 0x3d4   : > { %v5009_v6 = vmul.f32 %v4997_v4, %v11576_v32  ;;  %v4697_v57 = vadd.f32 %v4667_v27, %v4619_v51  ;;  %v4703_v12 = vadd.f32 %v4679_v33, %v4625_v62  ;;  %v4889_v41 = vsel %vm1032_vm0, %v4877_v14, %v4888_v43  ;;  %v4239_v33 = vld [vmem:[#allocation2 + $0x380] sm:$0xc0]  ;;  %v4275_v4 = vld [vmem:[#allocation2 + $0x3b0] sm:$0xff]  ;;  %v4323_v51 = vld [vmem:[#allocation2 + $0x3e0] sm:$0x3] }
 0x3d5   : > { %v5015_v48 = vmul.f32 %v5003_v61, %v11576_v32  ;;  %v4907_v55 = vadd.f32 %v4877_v14, %v4829_v35  ;;  %v4913_v26 = vadd.f32 %v4889_v41, %v4835_v2  ;;  %v4973_v42 = vrot.slane %v4961_v24, 2  ;;  %v9386_v32 = vld [vmem:[%s10266_s16 + $0x7ec] ss:$24 sps:$4 sm:$0xff]  }
 0x3d6   : > { %v5033_v29 = vrot.slane %v5009_v6, 4  ;;  %7447 = vmatpush1.bf16.msra.mxu1 %v9372_v25  ;;  %v4709_v1 = vadd.f32 %v4697_v57, %v11613_v44  ;;  %v4715_v50 = vadd.f32 %v4703_v12, %v11613_v44  ;;  %v5088_v0 = vmul.f32 %v5076_v39, %v11593_v19  ;;  %v4317_v25 = vld [vmem:[#allocation2 + $0x3b0] sm:$0xfc]  ;;  %v9392_v39 = vld [vmem:[%s10266_s16 + $0x81c] ss:$24 sps:$4 sm:$0xff]  }
 0x3d7   : > { %v5044_v27 = vrot.slane %v5015_v48, 4  ;;  %7448 = vmatprep.subr.bf16.mxu1 %v9380_v60  ;;  %v4943_v36 = vadd.f32 %v4931_v7, %v4907_v55  ;;  %v4949_v28 = vadd.f32 %v4937_v37, %v4913_v26  ;;  %v5094_v59 = vmul.f32 %v5082_v9, %v11593_v19  ;;  %v4395_v37 = vld [vmem:[#allocation2 + $0x4a0] sm:$0xc0]  ;;  %v4401_v48 = vld [vmem:[#allocation2 + $0x4d0] sm:$0x3f] }
 0x3d8   : > { %v5118_v15 = vmul.f32 %v5112_v31, %v11599_v11  ;;  %v4721_v61 = vmax.f32 %v4709_v1, 0.0  ;;  %v4727_v46 = vmax.f32 %v4715_v50, 0.0  ;;  %v5166_v14 = vmul.f32 %v11898_v47, %v5154_v21  ;;  %v9384_v11 = vld [vmem:[%s10266_s16 + $0x7e8] ss:$24 sps:$4 sm:$0xff]   ;;  %v4479_v50 = vld [vmem:[#allocation2 + $0x500] sm:$0x3] }
 0x3d9   : > { %v5045_v23 = vsel %vm1032_vm0, %v5033_v29, %v5044_v27  ;;  %v4985_v62 = vadd.f32 %v4973_v42, %v4943_v36  ;;  %v4991_v7 = vadd.f32 %v4973_v42, %v4949_v28  ;;  %v5172_v19 = vmul.f32 %v11898_v47, %v5160_v53  ;;  %v4473_v42 = vld [vmem:[#allocation2 + $0x4d0] sm:$0xfc]  ;;  %v9390_v27 = vld [vmem:[%s10266_s16 + $0x818] ss:$24 sps:$4 sm:$0xff]  }
 0x3da   : > { %v5130_v43 = vrot.slane %v5118_v15, 2  ;;  %7449 = vmatpush1.bf16.msra.mxu1 %v9378_v58  ;;  %v12087_v60 = vld [vmem:[#allocation3 + $0x80] sm:$0xff]  ;;  %v4733_v35 = vpack.c.bf16 %v4727_v46, %v4721_v61  ;;  %v5190_v2 = vrot.slane %v5166_v14, 4  ;;  %v4251_v24 = vmul.f32 %v4239_v33, %v11646_v13  ;;  %v9398_v15 = vld [vmem:[%s10266_s16 + $0x84c] ss:$24 sps:$4 sm:$0xff]  }
 0x3db   : > { %v4257_v6 = vmul.f32 %v4245_v17, %v11646_v13  ;;  %7450 = vmatprep.subr.bf16.mxu1 %v9386_v32  ;;  %7264 = vmatmul.mubr.bf16.gmra.mrb[8].mxu0 %v12087_v60  ;;  %v5063_v57 = vadd.f32 %v5033_v29, %v4985_v62  ;;  %v5069_v12 = vadd.f32 %v5045_v23, %v4991_v7  ;;  %v5201_v41 = vrot.slane %v5172_v19, 4  ;;  %v4558_v61 = vld [vmem:[#allocation2 + $0x5f0] sm:$0x3f] }
 0x3dc   : > { %v4281_v47 = vmul.f32 %v4275_v4, %v11650_v56  ;;  %v4745_v9 = vrot.slane %v4733_v35, 3  ;;  %v4329_v31 = vmul.f32 %v4317_v25, %v11658_v52  ;;  %v4335_v55 = vmul.f32 %v4323_v51, %v11658_v52  ;;  %v4552_v4 = vld [vmem:[#allocation2 + $0x5c0] sm:$0xc0]  ;;  %v4588_v51 = vld [vmem:[#allocation2 + $0x5f0] sm:$0xff] }
 0x3dd   : > { %v4407_v26 = vmul.f32 %v4395_v37, %v11662_v3  ;;  %v5100_v21 = vadd.f32 %v5088_v0, %v5063_v57  ;;  %v5106_v58 = vadd.f32 %v5094_v59, %v5069_v12  ;;  %v5202_v1 = vsel %vm1032_vm0, %v5190_v2, %v5201_v41  ;;  %v4630_v37 = vld [vmem:[#allocation2 + $0x5f0] sm:$0xfc]  ;;  %v9404_v57 = vld [vmem:[%s10266_s16 + $0x87c] ss:$24 sps:$4 sm:$0xff]  }
 0x3de   : > { %v4293_v29 = vrot.slane %v4281_v47, 2  ;;  %7451 = vmatpush1.bf16.msra.mxu1 %v9384_v11  ;;  %4757 = vst [vmem:[#allocation3 + $0xb8] sm:$0xf] %v4745_v9  ;;  %v4353_v53 = vrot.slane %v4329_v31, 4  ;;  %v4363_v32 = vrot.slane %v4335_v55, 4  ;;  %v4413_v36 = vmul.f32 %v4401_v48, %v11662_v3 }
 0x3df   : > { %v4437_v28 = vmul.f32 %v11967_v20, %v11666_v30  ;;  %7452 = vmatprep.subr.bf16.mxu1 %v9392_v39  ;;  %v5142_v33 = vadd.f32 %v5130_v43, %v5100_v21  ;;  %v5148_v17 = vadd.f32 %v5130_v43, %v5106_v58  ;;  %v4485_v14 = vmul.f32 %v4473_v42, %v11674_v38  ;;  %v4636_v43 = vld [vmem:[#allocation2 + $0x620] sm:$0x3]  ;;  %v9396_v11 = vld [vmem:[%s10266_s16 + $0x848] ss:$24 sps:$4 sm:$0xff]   ;;  %v4840_v58 = vld [vmem:[#allocation2 + $0x440] sm:$0xfc] }
 0x3e0   : > { %v4305_v0 = vadd.f32 %v4293_v29, %v4251_v24  ;;  %v4311_v59 = vadd.f32 %v4293_v29, %v4257_v6  ;;  %v4364_v46 = vsel %vm1032_vm0, %v4353_v53, %v4363_v32  ;;  %v4491_v25 = vmul.f32 %v4479_v50, %v11674_v38  ;;  %v4762_v48 = vld [vmem:[#allocation2 + $0x410] sm:$0xc0]  ;;  %v4768_v9 = vld [vmem:[#allocation2 + $0x440] sm:$0x3f] }
 0x3e1   : > { %v4449_v23 = vrot.slane %v4437_v28, 2  ;;  %v5220_v62 = vadd.f32 %v5190_v2, %v5142_v33  ;;  %v5226_v20 = vadd.f32 %v5202_v1, %v5148_v17  ;;  %v4509_v35 = vrot.slane %v4485_v14, 4  ;;  %v4846_v1 = vld [vmem:[#allocation2 + $0x470] sm:$0x3]  ;;  %v4918_v29 = vld [vmem:[#allocation2 + $0x530] sm:$0xc0] }
 0x3e2   : > { %v4383_v7 = vadd.f32 %v4353_v53, %v4305_v0  ;;  %v4389_v19 = vadd.f32 %v4364_v46, %v4311_v59  ;;  %7453 = vmatpush1.bf16.msra.mxu1 %v9390_v27  ;;  %v4519_v24 = vrot.slane %v4491_v25, 4  ;;  %v4564_v6 = vmul.f32 %v4552_v4, %v11685_v8  ;;  %v4798_v53 = vld [vmem:[#allocation2 + $0x440] sm:$0xff]  ;;  %v9410_v0 = vld [vmem:[%s10266_s16 + $0x8ac] ss:$24 sps:$4 sm:$0xff]  }
 0x3e3   : > { %v4570_v39 = vmul.f32 %v4558_v61, %v11685_v8  ;;  %7454 = vmatprep.subr.bf16.mxu1 %v9398_v15  ;;  %v5232_v12 = vadd.f32 %v5220_v62, %v11613_v44  ;;  %v5238_v41 = vadd.f32 %v5226_v20, %v11613_v44  ;;  %v4594_v55 = vmul.f32 %v4588_v51, %v11699_v34  ;;  %v9402_v32 = vld [vmem:[%s10266_s16 + $0x878] ss:$24 sps:$4 sm:$0xff]  }
 0x3e4   : > { %v4419_v2 = vadd.f32 %v4407_v26, %v4383_v7  ;;  %v4425_v47 = vadd.f32 %v4413_v36, %v4389_v19  ;;  %v4520_v31 = vsel %vm1032_vm0, %v4509_v35, %v4519_v24  ;;  %v4642_v42 = vmul.f32 %v11981_v40, %v4630_v37  ;;  %v12117_v36 = vpop.f32.mrb[0].mxu1  ;;  %v4924_v14 = vld [vmem:[#allocation2 + $0x560] sm:$0x3f]  ;;  %v5002_v24 = vld [vmem:[#allocation2 + $0x590] sm:$0x3] }
 0x3e5   : > { %v4648_v21 = vmul.f32 %v11981_v40, %v4636_v43  ;;  %v5244_v50 = vmax.f32 %v5232_v12, 0.0  ;;  %v5250_v27 = vmax.f32 %v5238_v41, 0.0  ;;  %v4606_v28 = vrot.slane %v4594_v55, 2  ;;  %v12121_v59 = vpop.f32.mrb[1].mxu1  ;;  %v4996_v19 = vld [vmem:[#allocation2 + $0x560] sm:$0xfc] }
 0x3e6   : > { %v4461_v44 = vadd.f32 %v4449_v23, %v4419_v2  ;;  %v4467_v26 = vadd.f32 %v4449_v23, %v4425_v47  ;;  %7455 = vmatpush1.bf16.msra.mxu1 %v9396_v11  ;;  %v4666_v15 = vrot.slane %v4642_v42, 4  ;;  %v4774_v17 = vmul.f32 %v4762_v48, %v11646_v13  ;;  %v12124_v25 = vpop.f32.mrb[2].mxu1  ;;  %v9416_v47 = vld [vmem:[%s10266_s16 + $0x8dc] ss:$24 sps:$4 sm:$0xff]  }
 0x3e7   : > { %v4676_v33 = vrot.slane %v4648_v21, 4  ;;  %7456 = vmatprep.subr.bf16.mxu1 %v9404_v57  ;;  %v5256_v4 = vpack.c.bf16 %v5250_v27, %v5244_v50  ;;  %v4780_v23 = vmul.f32 %v4768_v9, %v11646_v13  ;;  %v4804_v62 = vmul.f32 %v4798_v53, %v11650_v56  ;;  %v9408_v13 = vld [vmem:[%s10266_s16 + $0x8a8] ss:$24 sps:$4 sm:$0xff]   ;;  %v12132_v57 = vpop.f32.mrb[3].mxu1  ;;  %v9414_v50 = vld [vmem:[%s10266_s16 + $0x8d8] ss:$24 sps:$4 sm:$0xff]  }
 0x3e8   : > { %v4539_v61 = vadd.f32 %v4509_v35, %v4461_v44  ;;  %v4545_v46 = vadd.f32 %v4520_v31, %v4467_v26  ;;  %v4852_v20 = vmul.f32 %v4840_v58, %v11658_v52  ;;  %v4858_v7 = vmul.f32 %v4846_v1, %v11658_v52  ;;  %v5111_v1 = vld [vmem:[#allocation2 + $0x680] sm:$0xff] }
 0x3e9   : > { %v4677_v51 = vsel %vm1032_vm0, %v4666_v15, %v4676_v33  ;;  %v5268_v37 = vrot.slane %v5256_v4, 7  ;;  %v4930_v35 = vmul.f32 %v4918_v29, %v11662_v3  ;;  %v4816_v12 = vrot.slane %v4804_v62, 2  ;;  %v5153_v29 = vld [vmem:[#allocation2 + $0x680] sm:$0xfc] }
 0x3ea   : > { %v4576_v43 = vadd.f32 %v4564_v6, %v4539_v61  ;;  %v4582_v11 = vadd.f32 %v4570_v39, %v4545_v46  ;;  %7457 = vmatpush1.bf16.msra.mxu1 %v9402_v32  ;;  %v4876_v41 = vrot.slane %v4852_v20, 4  ;;  %v4886_v2 = vrot.slane %v4858_v7, 4  ;;  %v12143_v53 = vld [vmem:[%s10266_s16 + $0x614] ss:$24 sps:$4 sm:$0xff]  }
 0x3eb   : > { %v4936_v56 = vmul.f32 %v4924_v14, %v11662_v3  ;;  %7458 = vmatprep.subr.bf16.mxu1 %v9410_v0  ;;  %5280 = vst [vmem:[#allocation3 + $0xb8] sm:$0xf0] %v5268_v37  ;;  %v4960_v6 = vmul.f32 %v12007_v18, %v11666_v30  ;;  %v5008_v39 = vmul.f32 %v4996_v19, %v11674_v38  ;;  %v5159_v18 = vld [vmem:[#allocation2 + $0x6b0] sm:$0x3] }
 0x3ec   : > { %v4618_v52 = vadd.f32 %v4606_v28, %v4576_v43  ;;  %v4624_v48 = vadd.f32 %v4606_v28, %v4582_v11  ;;  %v4828_v9 = vadd.f32 %v4816_v12, %v4774_v17  ;;  %v4834_v31 = vadd.f32 %v4816_v12, %v4780_v23  ;;  %v5075_v28 = vld [vmem:[#allocation2 + $0x650] sm:$0xc0]  ;;  %v12160_v37 = vld [vmem:[%s10266_s16 + $0x644] ss:$24 sps:$4 sm:$0xff]   ;;  %v12163_v12 = vld [vmem:[#allocation3 + $0x20] sm:$0xff] }
 0x3ed   : > { %v4887_v55 = vsel %vm1032_vm0, %v4876_v41, %v4886_v2  ;;  %v5014_v42 = vmul.f32 %v5002_v24, %v11674_v38  ;;  %v5032_v58 = vrot.slane %v5008_v39, 4  ;;  %v4972_v26 = vrot.slane %v4960_v6, 2  ;;  %v12170_v2 = vld [vmem:[#allocation3 + $0x58] sm:$0xff] }
 0x3ee   : > { %v4696_v21 = vadd.f32 %v4666_v15, %v4618_v52  ;;  %v4702_v3 = vadd.f32 %v4677_v51, %v4624_v48  ;;  %7459 = vmatpush1.bf16.msra.mxu1 %v9408_v13  ;;  %v4906_v27 = vadd.f32 %v4876_v41, %v4828_v9  ;;  %v4912_v44 = vadd.f32 %v4887_v55, %v4834_v31  ;;  %v5081_v15 = vld [vmem:[#allocation2 + $0x680] sm:$0x3f]  ;;  %v12152_v51 = vld [vmem:[%s10266_s16 + $0x610] ss:$24 sps:$4 sm:$0xff]  }
 0x3ef   : > { %v5042_v30 = vrot.slane %v5014_v42, 4  ;;  %7460 = vmatprep.subr.bf16.mxu1 %v9416_v47  ;;  %v5117_v0 = vmul.f32 %v5111_v1, %v11699_v34  ;;  %v5165_v4 = vmul.f32 %v11981_v40, %v5153_v29  ;;  %v5171_v14 = vmul.f32 %v11981_v40, %v5159_v18  ;;  %v12175_v52 = vld [vmem:[%s10266_s16 + $0x674] ss:$24 sps:$4 sm:$0xff]   ;;  %v12180_v9 = vld [vmem:[%s10266_s16 + $0x670] ss:$24 sps:$4 sm:$0xff]  }
 0x3f0   : > { %v4708_v32 = vadd.f32 %v4696_v21, %v11705_v5  ;;  %v4714_v38 = vadd.f32 %v4702_v3, %v11705_v5  ;;  %v4942_v33 = vadd.f32 %v4930_v35, %v4906_v27  ;;  %v4948_v17 = vadd.f32 %v4936_v56, %v4912_v44  ;;  %v12184_v42 = vld [vmem:[%s10266_s16 + $0x6a4] ss:$24 sps:$4 sm:$0xff]   ;;  %v12193_v1 = vld [vmem:[%s10266_s16 + $0x6a0] ss:$24 sps:$4 sm:$0xff]   ;;  %v12198_v27 = vld [vmem:[%s10266_s16 + $0x6d4] ss:$24 sps:$4 sm:$0xff]  }
 0x3f1   : > { %v5043_v23 = vsel %vm1032_vm0, %v5032_v58, %v5042_v30  ;;  %v5087_v19 = vmul.f32 %v5075_v28, %v11685_v8  ;;  %v5093_v34 = vmul.f32 %v5081_v15, %v11685_v8  ;;  %v5189_v40 = vrot.slane %v5165_v4, 4  ;;  %v12168_v8 = vld [vmem:[%s10266_s16 + $0x640] ss:$24 sps:$4 sm:$0xff]   ;;  %v12202_v44 = vld [vmem:[%s10266_s16 + $0x6d0] ss:$24 sps:$4 sm:$0xff]   ;;  %v12226_v15 = vpop.f32.mrb[4].mxu1 }
 0x3f2   : > { %v4720_v61 = vmax.f32 %v4708_v32, 0.0  ;;  %v4726_v46 = vmax.f32 %v4714_v38, 0.0  ;;  %7461 = vmatpush1.bf16.msra.mxu1 %v9414_v50  ;;  %v12154_v62 = vld [vmem:[#allocation3 + $0xb8] sm:$0xff]  ;;  %v4984_v20 = vadd.f32 %v4972_v26, %v4942_v33  ;;  %v4990_v7 = vadd.f32 %v4972_v26, %v4948_v17  ;;  %v12206_v30 = vld [vmem:[%s10266_s16 + $0x704] ss:$24 sps:$4 sm:$0xff]   ;;  %v12236_v4 = vpop.f32.mrb[5].mxu1 }
 0x3f3   : > { %8709 = vmatprep.subr.bf16.mxu1 %v12143_v53  ;;  %7273 = vmatprep.mubr.bf16.mxu0 %v12154_v62  ;;  %v5199_v11 = vrot.slane %v5171_v14, 4  ;;  %v5129_v13 = vrot.slane %v5117_v0, 2  ;;  %v12211_v18 = vld [vmem:[%s10266_s16 + $0x700] ss:$24 sps:$4 sm:$0xff]   ;;  %v12216_v32 = vld [vmem:[%s10266_s16 + $0x734] ss:$24 sps:$4 sm:$0xff]  }
 0x3f4   : > { %v4732_v43 = vpack.c.bf16 %v4726_v46, %v4720_v61  ;;  %v5062_v35 = vadd.f32 %v5032_v58, %v4984_v20  ;;  %v5068_v24 = vadd.f32 %v5043_v23, %v4990_v7  ;;  %v12188_v58 = vld [vmem:[#allocation3 + $0x50] sm:$0xff]  ;;  %v9502_v17 = vld [vmem:[#allocation3 + $0x8] sm:$0xff]  ;;  %v12240_v61 = vld [vmem:[%s10266_s16 + $0x794] ss:$24 sps:$4 sm:$0xff]   ;;  %v12242_v46 = vpop.f32.mrb[6].mxu1 }
 0x3f5   : > { %7463 = vmatmul.mubr.bf16.vlgmr.msra.gmra.mrb[16].mxu1 %v12163_v12  ;;  %v5200_v48 = vsel %vm1032_vm0, %v5189_v40, %v5199_v11  ;;  %13333 = vst [vmem:[#allocation50_spill] sm:$0xff] %v12188_v58  ;;  %v12220_v38 = vld [vmem:[%s10266_s16 + $0x730] ss:$24 sps:$4 sm:$0xff]   ;;  %v12224_v28 = vld [vmem:[%s10266_s16 + $0x764] ss:$24 sps:$4 sm:$0xff]   ;;  %v12245_v23 = vpop.f32.mrb[7].mxu1 }
 0x3f6   : > { %v4744_v41 = vrot.slane %v4732_v43, 3  ;;  %8725 = vmatpush1.bf16.msra.mxu1 %v12152_v51  ;;  %7472 = vmatprep.mubr.bf16.mxu1 %v12170_v2  ;;  %v5099_v56 = vadd.f32 %v5087_v19, %v5062_v35  ;;  %v5105_v47 = vadd.f32 %v5093_v34, %v5068_v24  ;;  %v12234_v0 = vld [vmem:[%s10266_s16 + $0x760] ss:$24 sps:$4 sm:$0xff]   ;;  %v9327_v14 = vld [vmem:[%s10266_s16 + $0x310] ss:$24 sps:$4 sm:$0xff]   ;;  %v12257_v43 = vpop.f32.mrb[8].mxu1 }
 0x3f7   : > { %8710 = vmatprep.subr.bf16.mxu1 %v12160_v37  ;;  %v9335_v20 = vld [vmem:[%s10266_s16 + $0x344] ss:$24 sps:$4 sm:$0xff]   ;;  %v12251_v7 = vld [vmem:[%s10266_s16 + $0x790] ss:$24 sps:$4 sm:$0xff]   ;;  %v9503_v34 = vld [vmem:[#allocation3] sm:$0xff]  ;;  %13334 = vst [vmem:[#allocation45_spill] sm:$0xff] %v12257_v43 }
 0x3f8   : > { %4756 = vst [vmem:[#allocation3 + $0xb0] sm:$0xf] %v4744_v41  ;;  %v5141_v6 = vadd.f32 %v5129_v13, %v5099_v56  ;;  %v5147_v39 = vadd.f32 %v5129_v13, %v5105_v47  ;;  %v12255_v19 = vld [vmem:[%s10266_s16 + $0x7c4] ss:$24 sps:$4 sm:$0xff]   ;;  %v12260_v11 = vpop.f32.mrb[9].mxu1 }
 0x3f9   : > { %13335 = vst [vmem:[#allocation46_spill] sm:$0xff] %v12260_v11  ;;  %v9341_v35 = vld [vmem:[%s10266_s16 + $0x374] ss:$24 sps:$4 sm:$0xff]   ;;  %v12265_v24 = vld [vmem:[%s10266_s16 + $0x7c0] ss:$24 sps:$4 sm:$0xff]   ;;  %v12267_v13 = vpop.f32.mrb[10].mxu1 }
 0x3fa   : > { %8726 = vmatpush1.bf16.msra.mxu1 %v12168_v8  ;;  %v5219_v31 = vadd.f32 %v5189_v40, %v5141_v6  ;;  %v5225_v55 = vadd.f32 %v5200_v48, %v5147_v39  ;;  %v9504_v40 = vld [vmem:[#allocation3 + $0x38] sm:$0xff]  ;;  %13336 = vst [vmem:[#allocation47_spill] sm:$0xff] %v12267_v13  ;;  %v12273_v56 = vpop.f32.mrb[11].mxu1  ;;  %v9347_v48 = vld [vmem:[%s10266_s16 + $0x3a4] ss:$24 sps:$4 sm:$0xff]  }
 0x3fb   : > { %8711 = vmatprep.subr.bf16.mxu1 %v12175_v52  ;;  %v12271_v41 = vld [vmem:[%s10266_s16 + $0x7f4] ss:$24 sps:$4 sm:$0xff]   ;;  %13337 = vst [vmem:[#allocation40_spill] sm:$0xff] %v12273_v56  ;;  %v9339_v47 = vld [vmem:[%s10266_s16 + $0x370] ss:$24 sps:$4 sm:$0xff]  }
 0x3fc   : > { %v5231_v21 = vadd.f32 %v5219_v31, %v11705_v5  ;;  %v5237_v3 = vadd.f32 %v5225_v55, %v11705_v5  ;;  %v12279_v6 = vld [vmem:[%s10266_s16 + $0x7f0] ss:$24 sps:$4 sm:$0xff]   ;;  %v12283_v39 = vld [vmem:[%s10266_s16 + $0x824] ss:$24 sps:$4 sm:$0xff]   ;;  %v12285_v55 = vpop.f32.mrb[12].mxu1 }
 0x3fd   : > { %7473 = vmatmul.mubr.bf16.gmra.mrb[20].mxu1 %v12188_v58  ;;  %v9505_v31 = vld [vmem:[#allocation3 + $0x30] sm:$0xff]  ;;  %13338 = vst [vmem:[#allocation41_spill] sm:$0xff] %v12285_v55 }
 0x3fe   : > { %8727 = vmatpush1.bf16.msra.mxu1 %v12180_v9  ;;  %7482 = vmatprep.mubr.bf16.mxu1 %v12022_v45  ;;  %v5243_v29 = vmax.f32 %v5231_v21, 0.0  ;;  %v5249_v50 = vmax.f32 %v5237_v3, 0.0  ;;  %v9345_v21 = vld [vmem:[%s10266_s16 + $0x3a0] ss:$24 sps:$4 sm:$0xff]  }
 0x3ff   : > { %8712 = vmatprep.subr.bf16.mxu1 %v12184_v42  ;;  %v9506_v3 = vld [vmem:[#allocation3 + $0x68] sm:$0xff] }
 0x400   : > { %v5255_v5 = vpack.c.bf16 %v5249_v50, %v5243_v29  ;;  %v12288_v29 = vpop.f32.mrb[13].mxu1  ;;  %v9353_v50 = vld [vmem:[%s10266_s16 + $0x3d4] ss:$24 sps:$4 sm:$0xff]  }
 0x401   : > { %13339 = vst [vmem:[#allocation43_spill] sm:$0xff] %v12288_v29  ;;  %v9375_v29 = vld [vmem:[%s10266_s16 + $0x490] ss:$24 sps:$4 sm:$0xff]  }
 0x402   : > { %8728 = vmatpush1.bf16.msra.mxu1 %v12193_v1  ;;  %v5267_v26 = vrot.slane %v5255_v5, 7  ;;  %v12293_v5 = vld [vmem:[%s10266_s16 + $0x820] ss:$24 sps:$4 sm:$0xff]  }
 0x403   : > { %8713 = vmatprep.subr.bf16.mxu1 %v12198_v27 }
 0x404   : > { %5279 = vst [vmem:[#allocation3 + $0xb0] sm:$0xf0] %v5267_v26  ;;  %v12295_v26 = vpop.f32.mrb[14].mxu1 }
 0x405   : > { %7483 = vmatmul.mubr.bf16.gmra.mrb[24].mxu1 %v12087_v60  ;;  %13340 = vst [vmem:[#allocation44_spill] sm:$0xff] %v12295_v26  ;;  %v12337_v26 = vld [vmem:[%s10266_s16 + $0x8e0] ss:$24 sps:$4 sm:$0xff]  }
 0x406   : > { %8729 = vmatpush1.bf16.msra.mxu1 %v12202_v44  ;;  %7492 = vmatprep.mubr.bf16.mxu1 %v12154_v62 }
 0x407   : > { %8714 = vmatprep.subr.bf16.mxu1 %v12206_v30 }
 0x40a   : > { %8730 = vmatpush1.bf16.msra.mxu1 %v12211_v18 }
 0x40b   : > { %8715 = vmatprep.subr.bf16.mxu1 %v12216_v32  ;;  %v12228_v33 = vld [vmem:[#allocation3 + $0xb0] sm:$0xff] }
 0x40c   : > { %7274 = vmatmul.mubr.bf16.gmra.mrb[12].mxu0 %v12228_v33 }
 0x40d   : > { %7493 = vmatmul.mubr.bf16.gmra.mrb[28].mxu1 %v12228_v33  ;;  %7535 = vmatprep.mubr.bf16.mxu0 %v9502_v17  ;;  %v12299_v17 = vld [vmem:[%s10266_s16 + $0x854] ss:$24 sps:$4 sm:$0xff]  }
 0x40e   : > { %8731 = vmatpush1.bf16.msra.mxu1 %v12220_v38  ;;  %7701 = vmatprep.mubr.bf16.mxu1 %v12022_v45  ;;  %v9333_v45 = vld [vmem:[%s10266_s16 + $0x340] ss:$24 sps:$4 sm:$0xff]  }
 0x40f   : > { %8716 = vmatprep.subr.bf16.mxu1 %v12224_v28 }
 0x412   : > { %8732 = vmatpush1.bf16.msra.mxu1 %v12234_v0 }
 0x413   : > { %8717 = vmatprep.subr.bf16.mxu1 %v12240_v61 }
 0x414   : > { %7536 = vmatmul.mubr.bf16.vlgmr.msra.gmra.mrb[16].mxu0 %v9503_v34  ;;  %v9359_v34 = vld [vmem:[%s10266_s16 + $0x404] ss:$24 sps:$4 sm:$0xff]  }
 0x415   : > { %7577 = vmatpush1.bf16.msra.mxu0 %v9327_v14  ;;  %7545 = vmatprep.mubr.bf16.mxu0 %v9504_v40  ;;  %v12301_v14 = vpop.f32.mrb[15].mxu1  ;;  %v12311_v40 = vld [vmem:[%s10266_s16 + $0x884] ss:$24 sps:$4 sm:$0xff]  }
 0x416   : > { %7578 = vmatprep.subr.bf16.mxu0 %v9335_v20  ;;  %8733 = vmatpush1.bf16.msra.mxu1 %v12251_v7  ;;  %13341 = vst [vmem:[#allocation48_spill] sm:$0xff] %v12301_v14  ;;  %v9351_v20 = vld [vmem:[%s10266_s16 + $0x3d0] ss:$24 sps:$4 sm:$0xff]   ;;  %v9369_v14 = vld [vmem:[%s10266_s16 + $0x460] ss:$24 sps:$4 sm:$0xff]  }
 0x417   : > { %8718 = vmatprep.subr.bf16.mxu1 %v12255_v19 }
 0x419   : > { %7579 = vmatpush1.bf16.msra.mxu0 %v9333_v45  ;;  %v12307_v45 = vld [vmem:[%s10266_s16 + $0x850] ss:$24 sps:$4 sm:$0xff]  }
 0x41a   : > { %7580 = vmatprep.subr.bf16.mxu0 %v9341_v35  ;;  %8734 = vmatpush1.bf16.msra.mxu1 %v12265_v24  ;;  %v9507_v35 = vld [vmem:[#allocation3 + $0x60] sm:$0xff] }
 0x41b   : > { %8719 = vmatprep.subr.bf16.mxu1 %v12271_v41 }
 0x41c   : > { %7546 = vmatmul.mubr.bf16.gmra.mrb[20].mxu0 %v9505_v31  ;;  %v9365_v31 = vld [vmem:[%s10266_s16 + $0x434] ss:$24 sps:$4 sm:$0xff]  }
 0x41d   : > { %7581 = vmatpush1.bf16.msra.mxu0 %v9339_v47  ;;  %7555 = vmatprep.mubr.bf16.mxu0 %v9506_v3  ;;  %v9357_v47 = vld [vmem:[%s10266_s16 + $0x400] ss:$24 sps:$4 sm:$0xff]   ;;  %v12321_v3 = vld [vmem:[%s10266_s16 + $0x8b4] ss:$24 sps:$4 sm:$0xff]  }
 0x41e   : > { %7582 = vmatprep.subr.bf16.mxu0 %v9347_v48  ;;  %8735 = vmatpush1.bf16.msra.mxu1 %v12279_v6  ;;  %v9508_v48 = vld [vmem:[#allocation3 + $0x98] sm:$0xff] }
 0x41f   : > { %8720 = vmatprep.subr.bf16.mxu1 %v12283_v39 }
 0x421   : > { %7583 = vmatpush1.bf16.msra.mxu0 %v9345_v21  ;;  %v12317_v21 = vld [vmem:[%s10266_s16 + $0x880] ss:$24 sps:$4 sm:$0xff]  }
 0x422   : > { %7584 = vmatprep.subr.bf16.mxu0 %v9353_v50  ;;  %8736 = vmatpush1.bf16.msra.mxu1 %v12293_v5  ;;  %v9363_v50 = vld [vmem:[%s10266_s16 + $0x430] ss:$24 sps:$4 sm:$0xff]  }
 0x423   : > { %8721 = vmatprep.subr.bf16.mxu1 %v12299_v17 }
 0x424   : > { %7556 = vmatmul.mubr.bf16.gmra.mrb[24].mxu0 %v9507_v35  ;;  %v12331_v35 = vld [vmem:[%s10266_s16 + $0x8e4] ss:$24 sps:$4 sm:$0xff]  }
 0x425   : > { %7585 = vmatpush1.bf16.msra.mxu0 %v9351_v20  ;;  %7565 = vmatprep.mubr.bf16.mxu0 %v9508_v48  ;;  %v9371_v20 = vld [vmem:[%s10266_s16 + $0x464] ss:$24 sps:$4 sm:$0xff]  }
 0x426   : > { %7586 = vmatprep.subr.bf16.mxu0 %v9359_v34  ;;  %8737 = vmatpush1.bf16.msra.mxu1 %v12307_v45  ;;  %v12327_v34 = vld [vmem:[%s10266_s16 + $0x8b0] ss:$24 sps:$4 sm:$0xff]  }
 0x427   : > { %8722 = vmatprep.subr.bf16.mxu1 %v12311_v40  ;;  %v9509_v48 = vld [vmem:[#allocation3 + $0x90] sm:$0xff] }
 0x429   : > { %7587 = vmatpush1.bf16.msra.mxu0 %v9357_v47  ;;  %v9510_v47 = vld [vmem:[#allocation3 + $0x18] sm:$0xff] }
 0x42a   : > { %7588 = vmatprep.subr.bf16.mxu0 %v9365_v31  ;;  %8738 = vmatpush1.bf16.msra.mxu1 %v12317_v21  ;;  %v9377_v31 = vld [vmem:[%s10266_s16 + $0x494] ss:$24 sps:$4 sm:$0xff]  }
 0x42b   : > { %8723 = vmatprep.subr.bf16.mxu1 %v12321_v3 }
 0x42c   : > { %7566 = vmatmul.mubr.bf16.gmra.mrb[28].mxu0 %v9509_v48  ;;  %v9383_v48 = vld [vmem:[%s10266_s16 + $0x4c4] ss:$24 sps:$4 sm:$0xff]  }
 0x42d   : > { %7589 = vmatpush1.bf16.msra.mxu0 %v9363_v50  ;;  %7608 = vmatprep.mubr.bf16.mxu0 %v9510_v47  ;;  %v9381_v50 = vld [vmem:[%s10266_s16 + $0x4c0] ss:$24 sps:$4 sm:$0xff]   ;;  %v9395_v47 = vld [vmem:[%s10266_s16 + $0x524] ss:$24 sps:$4 sm:$0xff]  }
 0x42e   : > { %7590 = vmatprep.subr.bf16.mxu0 %v9371_v20  ;;  %8739 = vmatpush1.bf16.msra.mxu1 %v12327_v34  ;;  %v9389_v20 = vld [vmem:[%s10266_s16 + $0x4f4] ss:$24 sps:$4 sm:$0xff]  }
 0x42f   : > { %8724 = vmatprep.subr.bf16.mxu1 %v12331_v35 }
 0x431   : > { %7591 = vmatpush1.bf16.msra.mxu0 %v9369_v14  ;;  %v9387_v14 = vld [vmem:[%s10266_s16 + $0x4f0] ss:$24 sps:$4 sm:$0xff]  }
 0x432   : > { %7592 = vmatprep.subr.bf16.mxu0 %v9377_v31  ;;  %8740 = vmatpush1.bf16.msra.mxu1 %v12337_v26  ;;  %v9393_v31 = vld [vmem:[%s10266_s16 + $0x520] ss:$24 sps:$4 sm:$0xff]  }
 0x435   : > { %7593 = vmatpush1.bf16.msra.mxu0 %v9375_v29  ;;  %7702 = vmatmul.mubr.bf16.vlgmr.msra.gmra.mrb[32].mxu1 %v12087_v60  ;;  %v9401_v60 = vld [vmem:[%s10266_s16 + $0x554] ss:$24 sps:$4 sm:$0xff]   ;;  %v9399_v29 = vld [vmem:[%s10266_s16 + $0x550] ss:$24 sps:$4 sm:$0xff]  }
 0x436   : > { %7594 = vmatprep.subr.bf16.mxu0 %v9383_v48  ;;  %7711 = vmatprep.mubr.bf16.mxu1 %v12154_v62  ;;  %v9407_v48 = vld [vmem:[%s10266_s16 + $0x584] ss:$24 sps:$4 sm:$0xff]  }
 0x437   : > { %v12356_v62 = vld [vmem:[%s431_s8] sm:$0x3f] }
 0x438   : > { %13342 = vst [vmem:[#allocation49_spill] sm:$0xff] %v12356_v62 }
 0x439   : > { %7595 = vmatpush1.bf16.msra.mxu0 %v9381_v50  ;;  %v9405_v50 = vld [vmem:[%s10266_s16 + $0x580] ss:$24 sps:$4 sm:$0xff]  }
 0x43a   : > { %7596 = vmatprep.subr.bf16.mxu0 %v9389_v20  ;;  %v9413_v20 = vld [vmem:[%s10266_s16 + $0x5b4] ss:$24 sps:$4 sm:$0xff]  }
 0x43d   : > { %7597 = vmatpush1.bf16.msra.mxu0 %v9387_v14  ;;  %7712 = vmatmul.mubr.bf16.gmra.mrb[36].mxu1 %v12228_v33  ;;  %v12362_v33 = vrot.slane %v12356_v62, %v13325_v10  ;;  %v12366_v14 = vrot.slane %v12356_v62, %v13326_v16  ;;  %v9417_v62 = vld [vmem:[%s10266_s16 + $0x5e0] ss:$24 sps:$4 sm:$0xff]  }
 0x43e   : > { %7598 = vmatprep.subr.bf16.mxu0 %v9395_v47  ;;  %v9411_v47 = vld [vmem:[%s10266_s16 + $0x5b0] ss:$24 sps:$4 sm:$0xff]  }
 0x441   : > { %7599 = vmatpush1.bf16.msra.mxu0 %v9393_v31  ;;  %v9419_v31 = vld [vmem:[%s10266_s16 + $0x5e4] ss:$24 sps:$4 sm:$0xff]  }
 0x442   : > { %7600 = vmatprep.subr.bf16.mxu0 %v9401_v60  ;;  %v12372_v60 = vld [vmem:[%s440_s21] sm:$0x3f] }
 0x443   : > { %v12387_v63 = vrot.slane %v12372_v60, %v13325_v10  ;;  %v12393_v13 = vrot.slane %v12372_v60, %v13326_v16 }
 0x445   : > { %7601 = vmatpush1.bf16.msra.mxu0 %v9399_v29  ;;  %v7100_v29 = vadd.f32 %v12117_v36, %v12362_v33  ;;  %v7106_v36 = vadd.f32 %v12132_v57, %v12366_v14 }
 0x446   : > { %7602 = vmatprep.subr.bf16.mxu0 %v9407_v48  ;;  %v7102_v48 = vadd.f32 %v12121_v59, %v12366_v14 }
 0x449   : > { %7603 = vmatpush1.bf16.msra.mxu0 %v9405_v50  ;;  %v7104_v50 = vadd.f32 %v12124_v25, %v12362_v33  ;;  %v12397_v25 = vrot.slane %v12380_v54, %v13325_v10 }
 0x44a   : > { %7604 = vmatprep.subr.bf16.mxu0 %v9413_v20 }
 0x44b   : > { %v7245_v55 = vpop.f32.mrb[0].mxu0 }
 0x44c   : > { %v8742_v20 = vadd.f32 %v7245_v55, %v7100_v29  ;;  %v7247_v56 = vpop.f32.mrb[1].mxu0 }
 0x44d   : > { %7605 = vmatpush1.bf16.msra.mxu0 %v9411_v47  ;;  %v8744_v59 = vadd.f32 %v7247_v56, %v7102_v48  ;;  %v7249_v47 = vpop.f32.mrb[2].mxu0 }
 0x44e   : > { %7606 = vmatprep.subr.bf16.mxu0 %v9419_v31  ;;  %v7722_v11 = vmax.f32 %v8742_v20, 0.0  ;;  %v8746_v55 = vadd.f32 %v7249_v47, %v7104_v50  ;;  %v7251_v29 = vpop.f32.mrb[3].mxu0  ;;  %v12401_v31 = vrot.slane %v12380_v54, %v13326_v16 }
 0x44f   : > { %v7723_v43 = vmax.f32 %v8744_v59, 0.0  ;;  %v8748_v58 = vadd.f32 %v7251_v29, %v7106_v36  ;;  %v9511_v59 = vld [vmem:[#allocation3 + $0x10] sm:$0xff]  ;;  %v9514_v29 = vld [vmem:[#allocation3 + $0x78] sm:$0xff] }
 0x450   : > { %v7802_v57 = vmul.f32 %v12387_v63, %v7722_v11  ;;  %v7728_v56 = vmax.f32 %v8746_v55, 0.0  ;;  %v9512_v11 = vld [vmem:[#allocation3 + $0x48] sm:$0xff] }
 0x451   : > { %7607 = vmatpush1.bf16.msra.mxu0 %v9417_v62  ;;  %v7803_v48 = vmul.f32 %v12393_v13, %v7723_v43  ;;  %v7729_v20 = vmax.f32 %v8748_v58, 0.0 }
 0x452   : > { %7649 = vmatprep.subr.bf16.mxu0 %v12143_v53  ;;  %v12407_v10 = vadd.f32 %v12397_v25, %v7802_v57  ;;  %v7808_v50 = vmul.f32 %v12387_v63, %v7728_v56  ;;  %v9516_v57 = vld [vmem:[#allocation3 + $0xa8] sm:$0xff] }
 0x453   : > { %v12411_v16 = vadd.f32 %v12401_v31, %v7803_v48  ;;  %v7809_v62 = vmul.f32 %v12393_v13, %v7729_v20 }
 0x454   : > { %7609 = vmatmul.mubr.bf16.vlgmr.msra.gmra.mrb[16].mxu0 %v9511_v59  ;;  %v12417_v58 = vadd.f32 %v12397_v25, %v7808_v50 }
 0x455   : > { %7650 = vmatpush1.bf16.msra.mxu0 %v12152_v51  ;;  %7618 = vmatprep.mubr.bf16.mxu0 %v9512_v11  ;;  %v12422_v36 = vadd.f32 %v12401_v31, %v7809_v62  ;;  %v9513_v51 = vld [vmem:[#allocation3 + $0x40] sm:$0xff] }
 0x456   : > { %7651 = vmatprep.subr.bf16.mxu0 %v12160_v37  ;;  %v9515_v37 = vld [vmem:[#allocation3 + $0x70] sm:$0xff] }
 0x459   : > { %7652 = vmatpush1.bf16.msra.mxu0 %v12168_v8 }
 0x45a   : > { %7653 = vmatprep.subr.bf16.mxu0 %v12175_v52  ;;  %v7114_v52 = vadd.f32 %v12242_v46, %v12362_v33 }
 0x45c   : > { %7619 = vmatmul.mubr.bf16.gmra.mrb[20].mxu0 %v9513_v51 }
 0x45d   : > { %7654 = vmatpush1.bf16.msra.mxu0 %v12180_v9  ;;  %7628 = vmatprep.mubr.bf16.mxu0 %v9514_v29 }
 0x45e   : > { %7655 = vmatprep.subr.bf16.mxu0 %v12184_v42 }
 0x461   : > { %7656 = vmatpush1.bf16.msra.mxu0 %v12193_v1  ;;  %v7116_v1 = vadd.f32 %v12245_v23, %v12366_v14 }
 0x462   : > { %7657 = vmatprep.subr.bf16.mxu0 %v12198_v27 }
 0x464   : > { %7629 = vmatmul.mubr.bf16.gmra.mrb[24].mxu0 %v9515_v37 }
 0x465   : > { %7658 = vmatpush1.bf16.msra.mxu0 %v12202_v44  ;;  %7638 = vmatprep.mubr.bf16.mxu0 %v9516_v57 }
 0x466   : > { %7659 = vmatprep.subr.bf16.mxu0 %v12206_v30 }
 0x469   : > { %7660 = vmatpush1.bf16.msra.mxu0 %v12211_v18 }
 0x46a   : > { %7661 = vmatprep.subr.bf16.mxu0 %v12216_v32 }
 0x46c   : > { %7639 = vmatmul.mubr.bf16.gmra.mrb[28].mxu0 %v12053_v49  ;;  %v7110_v49 = vadd.f32 %v12226_v15, %v12362_v33 }
 0x46d   : > { %7662 = vmatpush1.bf16.msra.mxu0 %v12220_v38  ;;  %7681 = vmatprep.mubr.bf16.mxu0 %v12057_v22  ;;  %v7112_v22 = vadd.f32 %v12236_v4, %v12366_v14 }
 0x46e   : > { %7663 = vmatprep.subr.bf16.mxu0 %v12224_v28 }
 0x471   : > { %7664 = vmatpush1.bf16.msra.mxu0 %v12234_v0 }
 0x472   : > { %7665 = vmatprep.subr.bf16.mxu0 %v12240_v61 }
 0x475   : > { %7666 = vmatpush1.bf16.msra.mxu0 %v12251_v7 }
 0x476   : > { %7667 = vmatprep.subr.bf16.mxu0 %v12255_v19 }
 0x479   : > { %7668 = vmatpush1.bf16.msra.mxu0 %v12265_v24 }
 0x47a   : > { %7669 = vmatprep.subr.bf16.mxu0 %v12271_v41 }
 0x47c   : > { %v7255_v8 = vpop.f32.mrb[4].mxu0 }
 0x47d   : > { %7670 = vmatpush1.bf16.msra.mxu0 %v12279_v6  ;;  %v8750_v9 = vadd.f32 %v7255_v8, %v7110_v49  ;;  %v7257_v42 = vpop.f32.mrb[5].mxu0 }
 0x47e   : > { %7671 = vmatprep.subr.bf16.mxu0 %v12283_v39  ;;  %v8752_v27 = vadd.f32 %v7257_v42, %v7112_v22  ;;  %v7259_v44 = vpop.f32.mrb[6].mxu0 }
 0x47f   : > { %v7734_v30 = vmax.f32 %v8750_v9, 0.0  ;;  %v8754_v18 = vadd.f32 %v7259_v44, %v7114_v52  ;;  %v7261_v32 = vpop.f32.mrb[7].mxu0 }
 0x480   : > { %v7735_v38 = vmax.f32 %v8752_v27, 0.0  ;;  %v8756_v28 = vadd.f32 %v7261_v32, %v7116_v1 }
 0x481   : > { %7672 = vmatpush1.bf16.msra.mxu0 %v12293_v5  ;;  %v7814_v15 = vmul.f32 %v12387_v63, %v7734_v30  ;;  %v7740_v0 = vmax.f32 %v8754_v18, 0.0 }
 0x482   : > { %7673 = vmatprep.subr.bf16.mxu0 %v12299_v17  ;;  %v7815_v4 = vmul.f32 %v12393_v13, %v7735_v38  ;;  %v7741_v61 = vmax.f32 %v8756_v28, 0.0  ;;  %v13348_v28 = vld [vmem:[#allocation35_spill] sm:$0xff] }
 0x483   : > { %v12461_v46 = vadd.f32 %v12397_v25, %v7814_v15  ;;  %v7820_v23 = vmul.f32 %v12387_v63, %v7740_v0  ;;  %v13349_v15 = vld [vmem:[#allocation49_spill] sm:$0xff] }
 0x484   : > { %v12466_v7 = vadd.f32 %v12401_v31, %v7815_v4  ;;  %v7821_v19 = vmul.f32 %v12393_v13, %v7741_v61  ;;  %v12518_v0 = vrot.slane %v13349_v15, %v13348_v28  ;;  %v13350_v4 = vld [vmem:[#allocation36_spill] sm:$0xff] }
 0x485   : > { %7674 = vmatpush1.bf16.msra.mxu0 %v12307_v45  ;;  %v12472_v41 = vadd.f32 %v12397_v25, %v7820_v23  ;;  %v13343_v45 = vld [vmem:[#allocation50_spill] sm:$0xff]  ;;  %v12522_v61 = vrot.slane %v13349_v15, %v13350_v4 }
 0x486   : > { %7675 = vmatprep.subr.bf16.mxu0 %v12311_v40  ;;  %v12476_v39 = vadd.f32 %v12401_v31, %v7821_v19  ;;  %v13344_v40 = vld [vmem:[#allocation45_spill] sm:$0xff] }
 0x487   : > { %v7120_v56 = vadd.f32 %v13344_v40, %v12362_v33 }
 0x489   : > { %7676 = vmatpush1.bf16.msra.mxu0 %v12317_v21  ;;  %v13345_v21 = vld [vmem:[#allocation46_spill] sm:$0xff] }
 0x48a   : > { %7677 = vmatprep.subr.bf16.mxu0 %v12321_v3  ;;  %v7122_v48 = vadd.f32 %v13345_v21, %v12366_v14  ;;  %v13346_v3 = vld [vmem:[#allocation47_spill] sm:$0xff]  ;;  %v12532_v21 = vrot.slane %v12372_v60, %v13350_v4 }
 0x48d   : > { %7678 = vmatpush1.bf16.msra.mxu0 %v12327_v34  ;;  %v7124_v34 = vadd.f32 %v13346_v3, %v12362_v33  ;;  %v12536_v3 = vrot.slane %v12380_v54, %v13348_v28 }
 0x48e   : > { %7679 = vmatprep.subr.bf16.mxu0 %v12331_v35 }
 0x491   : > { %7680 = vmatpush1.bf16.msra.mxu0 %v12337_v26  ;;  %v13347_v26 = vld [vmem:[#allocation40_spill] sm:$0xff] }
 0x492   : > { %v7126_v59 = vadd.f32 %v13347_v26, %v12366_v14  ;;  %v12541_v26 = vrot.slane %v12380_v54, %v13350_v4 }
 0x494   : > { %7682 = vmatmul.mubr.bf16.vlgmr.msra.gmra.mrb[16].mxu0 %v12163_v12 }
 0x495   : > { %7691 = vmatprep.mubr.bf16.mxu0 %v12170_v2 }
 0x49c   : > { %7692 = vmatmul.mubr.bf16.gmra.mrb[20].mxu0 %v13343_v45  ;;  %v12527_v45 = vrot.slane %v12372_v60, %v13348_v28 }
 0x4ae   : > { %v7265_v20 = vpop.f32.mrb[8].mxu0 }
 0x4af   : > { %v8758_v50 = vadd.f32 %v7265_v20, %v7120_v56  ;;  %v7267_v35 = vpop.f32.mrb[9].mxu0 }
 0x4b0   : > { %v8760_v12 = vadd.f32 %v7267_v35, %v7122_v48  ;;  %v7269_v62 = vpop.f32.mrb[10].mxu0 }
 0x4b1   : > { %v7746_v2 = vmax.f32 %v8758_v50, 0.0  ;;  %v8762_v11 = vadd.f32 %v7269_v62, %v7124_v34  ;;  %v7271_v51 = vpop.f32.mrb[11].mxu0 }
 0x4b2   : > { %v7747_v29 = vmax.f32 %v8760_v12, 0.0  ;;  %v8764_v37 = vadd.f32 %v7271_v51, %v7126_v59 }
 0x4b3   : > { %v7826_v57 = vmul.f32 %v12387_v63, %v7746_v2  ;;  %v7752_v49 = vmax.f32 %v8762_v11, 0.0 }
 0x4b4   : > { %v7827_v22 = vmul.f32 %v12393_v13, %v7747_v29  ;;  %v7753_v8 = vmax.f32 %v8764_v37, 0.0 }
 0x4b5   : > { %v12499_v52 = vadd.f32 %v12397_v25, %v7826_v57  ;;  %v7832_v9 = vmul.f32 %v12387_v63, %v7752_v49 }
 0x4b6   : > { %v12503_v42 = vadd.f32 %v12401_v31, %v7827_v22  ;;  %v7833_v1 = vmul.f32 %v12393_v13, %v7753_v8 }
 0x4b7   : > { %v12508_v44 = vadd.f32 %v12397_v25, %v7832_v9 }
 0x4b8   : > { %v12512_v18 = vadd.f32 %v12401_v31, %v7833_v1 }
 0x4c8   : > { %v7464_v23 = vpop.f32.mrb[16].mxu1 }
 0x4c9   : > { %v8773_v19 = vadd.f32 %v7464_v23, %v12518_v0  ;;  %v7466_v40 = vpop.f32.mrb[17].mxu1 }
 0x4ca   : > { %v8774_v56 = vadd.f32 %v7466_v40, %v12522_v61  ;;  %v7468_v48 = vpop.f32.mrb[18].mxu1 }
 0x4cb   : > { %v7724_v20 = vmax.f32 %v8773_v19, 0.0  ;;  %v8775_v34 = vadd.f32 %v7468_v48, %v12518_v0  ;;  %v7470_v50 = vpop.f32.mrb[19].mxu1 }
 0x4cc   : > { %v7725_v35 = vmax.f32 %v8774_v56, 0.0  ;;  %v8776_v59 = vadd.f32 %v7470_v50, %v12522_v61 }
 0x4cd   : > { %v7804_v12 = vmul.f32 %v12527_v45, %v7724_v20  ;;  %v7730_v62 = vmax.f32 %v8775_v34, 0.0 }
 0x4ce   : > { %v7805_v2 = vmul.f32 %v12532_v21, %v7725_v35  ;;  %v7731_v11 = vmax.f32 %v8776_v59, 0.0 }
 0x4cf   : > { %v12547_v51 = vadd.f32 %v12536_v3, %v7804_v12  ;;  %v7810_v29 = vmul.f32 %v12527_v45, %v7730_v62 }
 0x4d0   : > { %v12551_v37 = vadd.f32 %v12541_v26, %v7805_v2  ;;  %v7811_v57 = vmul.f32 %v12532_v21, %v7731_v11  ;;  %v7474_v49 = vpop.f32.mrb[20].mxu1 }
 0x4d1   : > { %v12556_v8 = vadd.f32 %v12536_v3, %v7810_v29  ;;  %v8777_v9 = vadd.f32 %v7474_v49, %v12518_v0  ;;  %v7476_v1 = vpop.f32.mrb[21].mxu1 }
 0x4d2   : > { %v12561_v4 = vadd.f32 %v12541_v26, %v7811_v57  ;;  %v8778_v23 = vadd.f32 %v7476_v1, %v12522_v61  ;;  %v7478_v19 = vpop.f32.mrb[22].mxu1 }
 0x4d3   : > { %v7736_v56 = vmax.f32 %v8777_v9, 0.0  ;;  %v8779_v48 = vadd.f32 %v7478_v19, %v12518_v0  ;;  %v7480_v20 = vpop.f32.mrb[23].mxu1 }
 0x4d4   : > { %v7737_v50 = vmax.f32 %v8778_v23, 0.0  ;;  %v8780_v35 = vadd.f32 %v7480_v20, %v12522_v61 }
 0x4d5   : > { %v7816_v59 = vmul.f32 %v12527_v45, %v7736_v56  ;;  %v7742_v12 = vmax.f32 %v8779_v48, 0.0 }
 0x4d6   : > { %v7817_v62 = vmul.f32 %v12532_v21, %v7737_v50  ;;  %v7743_v2 = vmax.f32 %v8780_v35, 0.0 }
 0x4d7   : > { %v12571_v11 = vadd.f32 %v12536_v3, %v7816_v59  ;;  %v7822_v29 = vmul.f32 %v12527_v45, %v7742_v12  ;;  %v13352_v59 = vld [vmem:[#allocation43_spill] sm:$0xff] }
 0x4d8   : > { %v12575_v57 = vadd.f32 %v12541_v26, %v7817_v62  ;;  %v7823_v49 = vmul.f32 %v12532_v21, %v7743_v2  ;;  %v7484_v9 = vpop.f32.mrb[24].mxu1 }
 0x4d9   : > { %v12580_v23 = vadd.f32 %v12536_v3, %v7822_v29  ;;  %v8781_v19 = vadd.f32 %v7484_v9, %v12518_v0  ;;  %v7486_v56 = vpop.f32.mrb[25].mxu1 }
 0x4da   : > { %v12585_v20 = vadd.f32 %v12541_v26, %v7823_v49  ;;  %v8782_v50 = vadd.f32 %v7486_v56, %v12522_v61  ;;  %v7488_v35 = vpop.f32.mrb[26].mxu1  ;;  %v13351_v56 = vld [vmem:[#allocation41_spill] sm:$0xff] }
 0x4db   : > { %v7748_v12 = vmax.f32 %v8781_v19, 0.0  ;;  %v8783_v62 = vadd.f32 %v7488_v35, %v12518_v0  ;;  %v7490_v2 = vpop.f32.mrb[27].mxu1  ;;  %v7130_v17 = vadd.f32 %v13351_v56, %v12362_v33  ;;  %v7132_v19 = vadd.f32 %v13352_v59, %v12366_v14 }
 0x4dc   : > { %v7749_v38 = vmax.f32 %v8782_v50, 0.0  ;;  %v8784_v9 = vadd.f32 %v7490_v2, %v12522_v61  ;;  %v13353_v50 = vld [vmem:[#allocation44_spill] sm:$0xff] }
 0x4dd   : > { %v7828_v32 = vmul.f32 %v12527_v45, %v7748_v12  ;;  %v7754_v30 = vmax.f32 %v8783_v62, 0.0  ;;  %v7134_v2 = vadd.f32 %v13353_v50, %v12362_v33  ;;  %v13354_v12 = vld [vmem:[#allocation48_spill] sm:$0xff] }
 0x4de   : > { %v7829_v49 = vmul.f32 %v12532_v21, %v7749_v38  ;;  %v7755_v27 = vmax.f32 %v8784_v9, 0.0  ;;  %v7136_v62 = vadd.f32 %v13354_v12, %v12366_v14 }
 0x4df   : > { %v12599_v35 = vadd.f32 %v12536_v3, %v7828_v32  ;;  %v7834_v29 = vmul.f32 %v12527_v45, %v7754_v30  ;;  %v7275_v5 = vpop.f32.mrb[12].mxu0 }
 0x4e0   : > { %v12607_v38 = vadd.f32 %v12541_v26, %v7829_v49  ;;  %v7835_v9 = vmul.f32 %v12532_v21, %v7755_v27  ;;  %v7494_v56 = vpop.f32.mrb[28].mxu1  ;;  %v8766_v48 = vadd.f32 %v7275_v5, %v7130_v17  ;;  %v7277_v59 = vpop.f32.mrb[13].mxu0 }
 0x4e1   : > { %v12612_v1 = vadd.f32 %v12536_v3, %v7834_v29  ;;  %v8785_v30 = vadd.f32 %v7494_v56, %v12518_v0  ;;  %v7496_v33 = vpop.f32.mrb[29].mxu1  ;;  %v8768_v50 = vadd.f32 %v7277_v59, %v7132_v19  ;;  %v7279_v6 = vpop.f32.mrb[14].mxu0 }
 0x4e2   : > { %v12617_v49 = vadd.f32 %v12541_v26, %v7835_v9  ;;  %v8786_v27 = vadd.f32 %v7496_v33, %v12522_v61  ;;  %v7498_v12 = vpop.f32.mrb[30].mxu1  ;;  %v7758_v5 = vmax.f32 %v8766_v48, 0.0  ;;  %v8770_v17 = vadd.f32 %v7279_v6, %v7134_v2  ;;  %v7281_v24 = vpop.f32.mrb[15].mxu0 }
 0x4e3   : > { %v7760_v29 = vmax.f32 %v8785_v30, 0.0  ;;  %v7500_v34 = vpop.f32.mrb[31].mxu1  ;;  %v7759_v40 = vmax.f32 %v8768_v50, 0.0  ;;  %v8772_v56 = vadd.f32 %v7281_v24, %v7136_v62  ;;  %v8787_v33 = vadd.f32 %v7498_v12, %v12518_v0 }
 0x4e4   : > { %v7761_v59 = vmax.f32 %v8786_v27, 0.0  ;;  %v7838_v14 = vmul.f32 %v12387_v63, %v7758_v5  ;;  %v7764_v55 = vmax.f32 %v8770_v17, 0.0  ;;  %v8788_v30 = vadd.f32 %v7500_v34, %v12522_v61 }
 0x4e5   : > { %v7840_v9 = vmul.f32 %v12527_v45, %v7760_v29  ;;  %v7839_v48 = vmul.f32 %v12393_v13, %v7759_v40  ;;  %v7765_v6 = vmax.f32 %v8772_v56, 0.0  ;;  %v7766_v27 = vmax.f32 %v8787_v33, 0.0 }
 0x4e6   : > { %v7841_v2 = vmul.f32 %v12532_v21, %v7761_v59  ;;  %v12629_v50 = vadd.f32 %v12397_v25, %v7838_v14  ;;  %v7844_v24 = vmul.f32 %v12387_v63, %v7764_v55  ;;  %v7767_v12 = vmax.f32 %v8788_v30, 0.0 }
 0x4e7   : > { %v12633_v62 = vadd.f32 %v12536_v3, %v7840_v9  ;;  %v12636_v5 = vadd.f32 %v12401_v31, %v7839_v48  ;;  %v7845_v0 = vmul.f32 %v12393_v13, %v7765_v6  ;;  %v7846_v55 = vmul.f32 %v12527_v45, %v7766_v27 }
 0x4e8   : > { %v12640_v40 = vadd.f32 %v12541_v26, %v7841_v2  ;;  %v12644_v34 = vadd.f32 %v12397_v25, %v7844_v24  ;;  %v7847_v29 = vmul.f32 %v12532_v21, %v7767_v12  ;;  %v13356_v12 = vld [vmem:[#allocation38_spill] sm:$0xff] }
 0x4e9   : > { %v12650_v17 = vadd.f32 %v12401_v31, %v7845_v0  ;;  %v12656_v59 = vadd.f32 %v12536_v3, %v7846_v55  ;;  %v13355_v0 = vld [vmem:[#allocation37_spill] sm:$0xff] }
 0x4ea   : > { %v12660_v9 = vadd.f32 %v12541_v26, %v7847_v29  ;;  %v12666_v3 = vrot.slane %v13349_v15, %v13355_v0  ;;  %v12670_v26 = vrot.slane %v13349_v15, %v13356_v12  ;;  %v12677_v63 = vrot.slane %v12372_v60, %v13355_v0 }
 0x4eb   : > { %v12682_v15 = vrot.slane %v12372_v60, %v13356_v12 }
 0x508   : > { %v7703_v31 = vpop.f32.mrb[32].mxu1 }
 0x509   : > { %v7705_v48 = vpop.f32.mrb[33].mxu1 }
 0x50a   : > { %v7707_v6 = vpop.f32.mrb[34].mxu1 }
 0x50b   : > { %v7709_v2 = vpop.f32.mrb[35].mxu1 }
 0x510   : > { %v7713_v30 = vpop.f32.mrb[36].mxu1 }
 0x511   : > { %v7715_v21 = vpop.f32.mrb[37].mxu1 }
 0x512   : > { %v7717_v24 = vpop.f32.mrb[38].mxu1 }
 0x513   : > { %v7719_v27 = vpop.f32.mrb[39].mxu1 }
 0x537   : > { %v7630_v55 = vpop.f32.mrb[24].mxu0 }
 0x538   : > { %v8797_v29 = vadd.f32 %v7630_v55, %v12666_v3  ;;  %v7632_v33 = vpop.f32.mrb[25].mxu0  ;;  %v12686_v55 = vrot.slane %v12380_v54, %v13355_v0 }
 0x539   : > { %v8799_v45 = vadd.f32 %v7632_v33, %v12670_v26  ;;  %v7634_v25 = vpop.f32.mrb[26].mxu0 }
 0x53a   : > { %v8801_v56 = vadd.f32 %v7634_v25, %v12666_v3  ;;  %v7636_v13 = vpop.f32.mrb[27].mxu0  ;;  %v8798_v14 = vadd.f32 %v8797_v29, %v7703_v31  ;;  %v12690_v25 = vrot.slane %v12380_v54, %v13356_v12 }
 0x53b   : > { %v8803_v61 = vadd.f32 %v7636_v13, %v12670_v26  ;;  %v8800_v19 = vadd.f32 %v8799_v45, %v7705_v48 }
 0x53c   : > { %v7750_v33 = vmax.f32 %v8798_v14, 0.0  ;;  %v8802_v32 = vadd.f32 %v8801_v56, %v7707_v6 }
 0x53d   : > { %v7751_v47 = vmax.f32 %v8800_v19, 0.0  ;;  %v8804_v28 = vadd.f32 %v8803_v61, %v7709_v2 }
 0x53e   : > { %v7830_v31 = vmul.f32 %v12677_v63, %v7750_v33  ;;  %v7756_v13 = vmax.f32 %v8802_v32, 0.0 }
 0x53f   : > { %v7640_v29 = vpop.f32.mrb[28].mxu0  ;;  %v7831_v60 = vmul.f32 %v12682_v15, %v7751_v47  ;;  %v7757_v22 = vmax.f32 %v8804_v28, 0.0 }
 0x540   : > { %v8805_v45 = vadd.f32 %v7640_v29, %v12666_v3  ;;  %v7642_v48 = vpop.f32.mrb[29].mxu0  ;;  %v12696_v0 = vadd.f32 %v12686_v55, %v7830_v31  ;;  %v7836_v14 = vmul.f32 %v12677_v63, %v7756_v13 }
 0x541   : > { %v8807_v54 = vadd.f32 %v7642_v48, %v12670_v26  ;;  %v7644_v56 = vpop.f32.mrb[30].mxu0  ;;  %v12701_v19 = vadd.f32 %v12690_v25, %v7831_v60  ;;  %v7837_v32 = vmul.f32 %v12682_v15, %v7757_v22 }
 0x542   : > { %v8809_v61 = vadd.f32 %v7644_v56, %v12666_v3  ;;  %v7646_v47 = vpop.f32.mrb[31].mxu0  ;;  %v12707_v6 = vadd.f32 %v12686_v55, %v7836_v14  ;;  %v8806_v2 = vadd.f32 %v8805_v45, %v7713_v30 }
 0x543   : > { %v8811_v12 = vadd.f32 %v7646_v47, %v12670_v26  ;;  %v12712_v31 = vadd.f32 %v12690_v25, %v7837_v32  ;;  %v8808_v13 = vadd.f32 %v8807_v54, %v7715_v21 }
 0x544   : > { %v7762_v22 = vmax.f32 %v8806_v2, 0.0  ;;  %v8810_v60 = vadd.f32 %v8809_v61, %v7717_v24 }
 0x545   : > { %v7763_v56 = vmax.f32 %v8808_v13, 0.0  ;;  %v8812_v28 = vadd.f32 %v8811_v12, %v7719_v27 }
 0x546   : > { %v7842_v14 = vmul.f32 %v12677_v63, %v7762_v22  ;;  %v7768_v43 = vmax.f32 %v8810_v60, 0.0 }
 0x547   : > { %v7843_v30 = vmul.f32 %v12682_v15, %v7763_v56  ;;  %v7769_v45 = vmax.f32 %v8812_v28, 0.0 }
 0x548   : > { %v12719_v47 = vadd.f32 %v12686_v55, %v7842_v14  ;;  %v7848_v32 = vmul.f32 %v12677_v63, %v7768_v43 }
 0x549   : > { %v12723_v21 = vadd.f32 %v12690_v25, %v7843_v30  ;;  %v7849_v24 = vmul.f32 %v12682_v15, %v7769_v45 }
 0x54a   : > { %v12728_v27 = vadd.f32 %v12686_v55, %v7848_v32 }
 0x54b   : > { %v12732_v2 = vadd.f32 %v12690_v25, %v7849_v24 }
 0x54d   : > { %13357 = vst [vmem:[#allocation51_spill] sm:$0xff] %v12732_v2 }
 0x567   : > { %v7683_v43 = vpop.f32.mrb[16].mxu0 }
 0x568   : > { %v8789_v13 = vadd.f32 %v7683_v43, %v12666_v3  ;;  %v7685_v22 = vpop.f32.mrb[17].mxu0 }
 0x569   : > { %v8790_v60 = vadd.f32 %v7685_v22, %v12670_v26  ;;  %v7687_v56 = vpop.f32.mrb[18].mxu0 }
 0x56a   : > { %v7726_v14 = vmax.f32 %v8789_v13, 0.0  ;;  %v8791_v30 = vadd.f32 %v7687_v56, %v12666_v3  ;;  %v7689_v45 = vpop.f32.mrb[19].mxu0 }
 0x56b   : > { %v7727_v32 = vmax.f32 %v8790_v60, 0.0  ;;  %v8792_v61 = vadd.f32 %v7689_v45, %v12670_v26 }
 0x56c   : > { %v7806_v24 = vmul.f32 %v12677_v63, %v7726_v14  ;;  %v7732_v54 = vmax.f32 %v8791_v30, 0.0 }
 0x56d   : > { %v7807_v28 = vmul.f32 %v12682_v15, %v7727_v32  ;;  %v7733_v12 = vmax.f32 %v8792_v61, 0.0 }
 0x56e   : > { %v12743_v48 = vadd.f32 %v12686_v55, %v7806_v24  ;;  %v7812_v43 = vmul.f32 %v12677_v63, %v7732_v54 }
 0x56f   : > { %v12747_v22 = vadd.f32 %v12690_v25, %v7807_v28  ;;  %v7813_v13 = vmul.f32 %v12682_v15, %v7733_v12  ;;  %v7693_v56 = vpop.f32.mrb[20].mxu0 }
 0x570   : > { %v12752_v45 = vadd.f32 %v12686_v55, %v7812_v43  ;;  %v8793_v14 = vadd.f32 %v7693_v56, %v12666_v3  ;;  %v7695_v30 = vpop.f32.mrb[21].mxu0 }
 0x571   : > { %v12757_v32 = vadd.f32 %v12690_v25, %v7813_v13  ;;  %v8794_v54 = vadd.f32 %v7695_v30, %v12670_v26  ;;  %v7697_v28 = vpop.f32.mrb[22].mxu0 }
 0x572   : > { %v7738_v12 = vmax.f32 %v8793_v14, 0.0  ;;  %v8795_v29 = vadd.f32 %v7697_v28, %v12666_v3  ;;  %v7699_v33 = vpop.f32.mrb[23].mxu0  ;;  %v13365_v28 = vmax.f32 (!%p8704_p3), %v12417_v58, 0.0 }
 0x573   : > { %v7941_v43 = vmax.f32 %v12757_v32, 0.0  ;;  %v7739_v60 = vmax.f32 %v8794_v54, 0.0  ;;  %v8796_v56 = vadd.f32 %v7699_v33, %v12670_v26 }
 0x574   : > { %v7818_v53 = vmul.f32 %v12677_v63, %v7738_v12  ;;  %v7744_v61 = vmax.f32 %v8795_v29, 0.0  ;;  %7988 = vst [vmem:[#allocation2 + $0x1e0] sm:$0xff] (!%p8704_p3), %v13365_v28  ;;  %v13367_v12 = vmax.f32 (!%p8704_p3), %v12556_v8, 0.0  ;;  %v13377_v28 = vmax.f32 (!%p8704_p3), %v12585_v20, 0.0 }
 0x575   : > { %v7819_v13 = vmul.f32 %v12682_v15, %v7739_v60  ;;  %v7745_v2 = vmax.f32 %v8796_v56, 0.0  ;;  %7981 = sbr.rel (%p8704_p3) target bundleno = 1422 (0x58e), region = 80  ;;  %v13368_v56 = vmax.f32 (!%p8704_p3), %v12561_v4, 0.0  ;;  %7993 = vst [vmem:[#allocation2 + $0x208] sm:$0xff] (!%p8704_p3), %v7941_v43 }
 0x576   : > { %v12767_v30 = vadd.f32 %v12686_v55, %v7818_v53  ;;  %v7824_v24 = vmul.f32 %v12677_v63, %v7744_v61  ;;  %v13359_v63 = vmax.f32 (!%p8704_p3), %v12407_v10, 0.0  ;;  %v13364_v61 = vmax.f32 (!%p8704_p3), %v12747_v22, 0.0  ;;  %7990 = vst [vmem:[#allocation2 + $0x1f0] sm:$0xff] (!%p8704_p3), %v13367_v12  ;;  %8003 = vst [vmem:[#allocation2 + $0x318] sm:$0xff] (!%p8704_p3), %v13377_v28 }
 0x577   : > { %v12771_v14 = vadd.f32 %v12690_v25, %v7819_v13  ;;  %v7825_v3 = vmul.f32 %v12682_v15, %v7745_v2  ;;  %v13360_v15 = vmax.f32 (!%p8704_p3), %v12411_v16, 0.0  ;;  %v13362_v2 = vmax.f32 (!%p8704_p3), %v12551_v37, 0.0  ;;  %7991 = vst [vmem:[#allocation2 + $0x1f8] sm:$0xff] (!%p8704_p3), %v13368_v56 }
 0x578   : > { %v7946_v54 = vmax.f32 %v12767_v30, 0.0  ;;  %v12776_v26 = vadd.f32 %v12686_v55, %v7824_v24  ;;  %7982 = vst [vmem:[#allocation2 + $0x150] sm:$0xff] (!%p8704_p3), %v13359_v63  ;;  %v13361_v55 = vmax.f32 (!%p8704_p3), %v12547_v51, 0.0  ;;  %7987 = vst [vmem:[#allocation2 + $0x178] sm:$0xff] (!%p8704_p3), %v13364_v61  ;;  %v13366_v24 = vmax.f32 (!%p8704_p3), %v12422_v36, 0.0 }
 0x579   : > { %v13230_v33 = vmax.f32 %v12771_v14, 0.0  ;;  %v12780_v29 = vadd.f32 %v12690_v25, %v7825_v3  ;;  %7983 = vst [vmem:[#allocation2 + $0x158] sm:$0xff] (!%p8704_p3), %v13360_v15  ;;  %7985 = vst [vmem:[#allocation2 + $0x168] sm:$0xff] (!%p8704_p3), %v13362_v2  ;;  %v13363_v25 = vmax.f32 (!%p8704_p3), %v12743_v48, 0.0  ;;  %v13369_v13 = vmax.f32 (!%p8704_p3), %v12752_v45, 0.0 }
 0x57a   : > { %v13229_v53 = vmax.f32 %v12776_v26, 0.0  ;;  %7984 = vst [vmem:[#allocation2 + $0x160] sm:$0xff] (!%p8704_p3), %v13361_v55  ;;  %7989 = vst [vmem:[#allocation2 + $0x1e8] sm:$0xff] (!%p8704_p3), %v13366_v24  ;;  %v13370_v3 = vmax.f32 (!%p8704_p3), %v12461_v46, 0.0  ;;  %v13371_v63 = vmax.f32 (!%p8704_p3), %v12466_v7, 0.0  ;;  %v13372_v15 = vmax.f32 (!%p8704_p3), %v12571_v11, 0.0 }
 0x57b   : > { %v13228_v60 = vmax.f32 %v12780_v29, 0.0  ;;  %7986 = vst [vmem:[#allocation2 + $0x170] sm:$0xff] (!%p8704_p3), %v13363_v25  ;;  %7992 = vst [vmem:[#allocation2 + $0x200] sm:$0xff] (!%p8704_p3), %v13369_v13  ;;  %v13373_v55 = vmax.f32 (!%p8704_p3), %v12575_v57, 0.0  ;;  %v13374_v2 = vmax.f32 (!%p8704_p3), %v12472_v41, 0.0  ;;  %v13375_v25 = vmax.f32 (!%p8704_p3), %v12476_v39, 0.0 }
 0x57c   : > { %7994 = vst [vmem:[#allocation2 + $0x270] sm:$0xff] %v13370_v3  ;;  %7995 = vst [vmem:[#allocation2 + $0x278] sm:$0xff] %v13371_v63  ;;  %v13376_v61 = vmax.f32 %v12580_v23, 0.0  ;;  %v13378_v24 = vmax.f32 %v12499_v52, 0.0  ;;  %v13379_v12 = vmax.f32 %v12503_v42, 0.0  ;;  %v13380_v56 = vmax.f32 %v12599_v35, 0.0 }
 0x57d   : > { %7996 = vst [vmem:[#allocation2 + $0x280] sm:$0xff] %v13372_v15  ;;  %7997 = vst [vmem:[#allocation2 + $0x288] sm:$0xff] %v13373_v55  ;;  %v13381_v13 = vmax.f32 %v12607_v38, 0.0  ;;  %v13382_v3 = vmax.f32 %v12696_v0, 0.0  ;;  %v13383_v63 = vmax.f32 %v12701_v19, 0.0  ;;  %v13384_v15 = vmax.f32 %v12508_v44, 0.0 }
 0x57e   : > { %7998 = vst [vmem:[#allocation2 + $0x290] sm:$0xff] %v7946_v54  ;;  %7999 = vst [vmem:[#allocation2 + $0x298] sm:$0xff] %v13230_v33  ;;  %v13385_v55 = vmax.f32 %v12512_v18, 0.0  ;;  %v13389_v28 = vmax.f32 %v12712_v31, 0.0 }
 0x57f   : > { %8000 = vst [vmem:[#allocation2 + $0x300] sm:$0xff] %v13374_v2  ;;  %8001 = vst [vmem:[#allocation2 + $0x308] sm:$0xff] %v13375_v25  ;;  %v13386_v2 = vmax.f32 %v12612_v1, 0.0  ;;  %v13387_v25 = vmax.f32 %v12617_v49, 0.0 }
 0x580   : > { %8002 = vst [vmem:[#allocation2 + $0x310] sm:$0xff] %v13376_v61  ;;  %8004 = vst [vmem:[#allocation2 + $0x320] sm:$0xff] %v13229_v53  ;;  %v13388_v61 = vmax.f32 %v12707_v6, 0.0 }
 0x581   : > { %8005 = vst [vmem:[#allocation2 + $0x328] sm:$0xff] %v13228_v60  ;;  %8006 = vst [vmem:[#allocation2 + $0x390] sm:$0xff] %v13378_v24  ;;  %v13390_v24 = vmax.f32 %v12629_v50, 0.0 }
 0x582   : > { %8007 = vst [vmem:[#allocation2 + $0x398] sm:$0xff] %v13379_v12  ;;  %8008 = vst [vmem:[#allocation2 + $0x3a0] sm:$0xff] %v13380_v56  ;;  %v13391_v12 = vmax.f32 %v12636_v5, 0.0  ;;  %v13392_v56 = vmax.f32 %v12633_v62, 0.0 }
 0x583   : > { %8009 = vst [vmem:[#allocation2 + $0x3a8] sm:$0xff] %v13381_v13  ;;  %8010 = vst [vmem:[#allocation2 + $0x3b0] sm:$0xff] %v13382_v3  ;;  %v13393_v13 = vmax.f32 %v12640_v40, 0.0  ;;  %v13394_v3 = vmax.f32 %v12719_v47, 0.0 }
 0x584   : > { %8011 = vst [vmem:[#allocation2 + $0x3b8] sm:$0xff] %v13383_v63  ;;  %8012 = vst [vmem:[#allocation2 + $0x420] sm:$0xff] %v13384_v15  ;;  %v13395_v63 = vmax.f32 %v12723_v21, 0.0  ;;  %v13396_v15 = vmax.f32 %v12644_v34, 0.0 }
 0x585   : > { %8013 = vst [vmem:[#allocation2 + $0x428] sm:$0xff] %v13385_v55  ;;  %8014 = vst [vmem:[#allocation2 + $0x430] sm:$0xff] %v13386_v2  ;;  %v13397_v55 = vmax.f32 %v12650_v17, 0.0  ;;  %v13398_v2 = vmax.f32 %v12656_v59, 0.0 }
 0x586   : > { %8015 = vst [vmem:[#allocation2 + $0x438] sm:$0xff] %v13387_v25  ;;  %8016 = vst [vmem:[#allocation2 + $0x440] sm:$0xff] %v13388_v61  ;;  %v13399_v25 = vmax.f32 %v12660_v9, 0.0  ;;  %v13400_v61 = vmax.f32 %v12728_v27, 0.0 }
 0x587   : > { %8017 = vst [vmem:[#allocation2 + $0x448] sm:$0xff] %v13389_v28  ;;  %8018 = vst [vmem:[#allocation2 + $0x4b0] sm:$0xff] %v13390_v24  ;;  %v13401_v28 = vld [vmem:[#allocation51_spill] sm:$0xff] }
 0x588   : > { %8019 = vst [vmem:[#allocation2 + $0x4b8] sm:$0xff] %v13391_v12  ;;  %8020 = vst [vmem:[#allocation2 + $0x4c0] sm:$0xff] %v13392_v56  ;;  %v13402_v24 = vmax.f32 %v13401_v28, 0.0 }
 0x589   : > { %8021 = vst [vmem:[#allocation2 + $0x4c8] sm:$0xff] %v13393_v13  ;;  %8022 = vst [vmem:[#allocation2 + $0x4d0] sm:$0xff] %v13394_v3 }
 0x58a   : > { %8023 = vst [vmem:[#allocation2 + $0x4d8] sm:$0xff] %v13395_v63  ;;  %8024 = vst [vmem:[#allocation2 + $0x540] sm:$0xff] %v13396_v15 }
 0x58b   : > { %8025 = vst [vmem:[#allocation2 + $0x548] sm:$0xff] %v13397_v55  ;;  %8026 = vst [vmem:[#allocation2 + $0x550] sm:$0xff] %v13398_v2 }
 0x58c   : > { %8027 = vst [vmem:[#allocation2 + $0x558] sm:$0xff] %v13399_v25  ;;  %8028 = vst [vmem:[#allocation2 + $0x560] sm:$0xff] %v13400_v61 }
 0x58d   : > { %8029 = vst [vmem:[#allocation2 + $0x568] sm:$0xff] %v13402_v24 }
 0x58e PF: > { %s13403_s22 = sld [smem:[#allocation24_spill]] }
 0x594   : > { %p8705_p6 = scmp.ne.s32.totalorder %s13403_s22, 2 }
 0x595   : > { %v8034_v12 = vld [vmem:[%s10249_s10] sm:$0xff] (!%p8705_p6)  ;;  %v8035_v56 = vld [vmem:[%s10249_s10 + $0x8] sm:$0xff] (!%p8705_p6)  ;;  %v8036_v13 = vld [vmem:[%s10249_s10 + $0x10] sm:$0xff] (!%p8705_p6)  ;;  %v13404_v3 = vmax.f32 (!%p8705_p6), %v12407_v10, 0.0  ;;  %v13405_v15 = vmax.f32 (!%p8705_p6), %v12411_v16, 0.0  ;;  %v13406_v2 = vmax.f32 (!%p8705_p6), %v12547_v51, 0.0 }
 0x596   : > { %8033 = sbr.rel (%p8705_p6) target bundleno = 1457 (0x5b1), region = 84  ;;  %v8037_v61 = vld [vmem:[%s10249_s10 + $0x18] sm:$0xff] (!%p8705_p6)  ;;  %v8038_v28 = vld [vmem:[%s10249_s10 + $0x20] sm:$0xff] (!%p8705_p6)  ;;  %v8039_v24 = vld [vmem:[%s10249_s10 + $0x28] sm:$0xff] (!%p8705_p6)  ;;  %v13407_v60 = vmax.f32 (!%p8705_p6), %v12551_v37, 0.0  ;;  %v13408_v33 = vmax.f32 (!%p8705_p6), %v12743_v48, 0.0 }
 0x597   : > { %v8082_v63 = vadd.f32 (!%p8705_p6), %v8034_v12, %v13404_v3  ;;  %v8083_v55 = vadd.f32 (!%p8705_p6), %v8035_v56, %v13405_v15  ;;  %v8084_v25 = vadd.f32 (!%p8705_p6), %v8036_v13, %v13406_v2  ;;  %v13409_v16 = vmax.f32 (!%p8705_p6), %v12747_v22, 0.0  ;;  %v8040_v51 = vld [vmem:[%s10249_s10 + $0x30] sm:$0xff] (!%p8705_p6)  ;;  %v8041_v56 = vld [vmem:[%s10249_s10 + $0x38] sm:$0xff] (!%p8705_p6)  ;;  %v8042_v13 = vld [vmem:[%s10249_s10 + $0x40] sm:$0xff] (!%p8705_p6) }
 0x598   : > { %v8085_v53 = vadd.f32 (!%p8705_p6), %v8037_v61, %v13407_v60  ;;  %v8086_v10 = vadd.f32 (!%p8705_p6), %v8038_v28, %v13408_v33  ;;  %v13410_v37 = vmax.f32 (!%p8705_p6), %v12417_v58, 0.0  ;;  %v13411_v48 = vmax.f32 (!%p8705_p6), %v12422_v36, 0.0  ;;  %v8043_v15 = vld [vmem:[%s10249_s10 + $0x48] sm:$0xff] (!%p8705_p6)  ;;  %v8044_v2 = vld [vmem:[%s10249_s10 + $0x50] sm:$0xff] (!%p8705_p6)  ;;  %v8045_v61 = vld [vmem:[%s10249_s10 + $0x58] sm:$0xff] (!%p8705_p6) }
 0x599   : > { %v8087_v12 = vadd.f32 (!%p8705_p6), %v8039_v24, %v13409_v16  ;;  %8130 = vst [vmem:[%s10286_s29] sm:$0xff] (!%p8705_p6), %v8082_v63  ;;  %8131 = vst [vmem:[%s10286_s29 + $0x8] sm:$0xff] (!%p8705_p6), %v8083_v55  ;;  %v13412_v22 = vmax.f32 (!%p8705_p6), %v12556_v8, 0.0  ;;  %v13413_v58 = vmax.f32 (!%p8705_p6), %v12561_v4, 0.0  ;;  %v13414_v36 = vmax.f32 (!%p8705_p6), %v12752_v45, 0.0  ;;  %v8047_v28 = vld [vmem:[%s10249_s10 + $0x68] sm:$0xff] (!%p8705_p6)  ;;  %v8048_v24 = vld [vmem:[%s10249_s10 + $0x70] sm:$0xff] (!%p8705_p6) }
 0x59a   : > { %8132 = vst [vmem:[%s10286_s29 + $0x10] sm:$0xff] (!%p8705_p6), %v8084_v25  ;;  %v8088_v60 = vadd.f32 (!%p8705_p6), %v8040_v51, %v13410_v37  ;;  %v8089_v33 = vadd.f32 (!%p8705_p6), %v8041_v56, %v13411_v48  ;;  %8133 = vst [vmem:[%s10286_s29 + $0x18] sm:$0xff] (!%p8705_p6), %v8085_v53  ;;  %v8093_v8 = vadd.f32 (!%p8705_p6), %v8045_v61, %v7941_v43  ;;  %v8046_v25 = vld [vmem:[%s10249_s10 + $0x60] sm:$0xff] (!%p8705_p6)  ;;  %v13415_v4 = vmax.f32 (!%p8705_p6), %v12461_v46, 0.0  ;;  %v8049_v16 = vld [vmem:[%s10249_s10 + $0x78] sm:$0xff] (!%p8705_p6) }
 0x59b   : > { %v8090_v3 = vadd.f32 (!%p8705_p6), %v8042_v13, %v13412_v22  ;;  %8134 = vst [vmem:[%s10286_s29 + $0x20] sm:$0xff] (!%p8705_p6), %v8086_v10  ;;  %8135 = vst [vmem:[%s10286_s29 + $0x28] sm:$0xff] (!%p8705_p6), %v8087_v12  ;;  %v8091_v63 = vadd.f32 (!%p8705_p6), %v8043_v15, %v13413_v58  ;;  %v8092_v55 = vadd.f32 (!%p8705_p6), %v8044_v2, %v13414_v36  ;;  %v13416_v45 = vmax.f32 (!%p8705_p6), %v12466_v7, 0.0  ;;  %v8050_v12 = vld [vmem:[%s10249_s10 + $0x80] sm:$0xff] (!%p8705_p6)  ;;  %v8051_v51 = vld [vmem:[%s10249_s10 + $0x88] sm:$0xff] (!%p8705_p6) }
 0x59c   : > { %8136 = vst [vmem:[%s10286_s29 + $0x30] sm:$0xff] (!%p8705_p6), %v8088_v60  ;;  %8137 = vst [vmem:[%s10286_s29 + $0x38] sm:$0xff] (!%p8705_p6), %v8089_v33  ;;  %v8094_v53 = vadd.f32 (!%p8705_p6), %v8046_v25, %v13415_v4  ;;  %v13417_v32 = vmax.f32 (!%p8705_p6), %v12571_v11, 0.0  ;;  %v13418_v46 = vmax.f32 (!%p8705_p6), %v12575_v57, 0.0  ;;  %v8098_v7 = vadd.f32 (!%p8705_p6), %v8050_v12, %v7946_v54  ;;  %v8052_v37 = vld [vmem:[%s10249_s10 + $0x90] sm:$0xff] (!%p8705_p6)  ;;  %v8053_v60 = vld [vmem:[%s10249_s10 + $0x98] sm:$0xff] (!%p8705_p6) }
 0x59d   : > { %8138 = vst [vmem:[%s10286_s29 + $0x40] sm:$0xff] %v8090_v3  ;;  %v8095_v10 = vadd.f32 %v8047_v28, %v13416_v45  ;;  %8139 = vst [vmem:[%s10286_s29 + $0x48] sm:$0xff] %v8091_v63  ;;  %v13419_v11 = vmax.f32 %v12771_v14, 0.0  ;;  %v8054_v48 = vld [vmem:[%s10249_s10 + $0xa0] sm:$0xff]  ;;  %v13420_v57 = vmax.f32 %v12472_v41, 0.0  ;;  %v13421_v30 = vmax.f32 %v12476_v39, 0.0 }
 0x59e   : > { %v8096_v43 = vadd.f32 %v8048_v24, %v13417_v32  ;;  %8140 = vst [vmem:[%s10286_s29 + $0x50] sm:$0xff] %v8092_v55  ;;  %8141 = vst [vmem:[%s10286_s29 + $0x58] sm:$0xff] %v8093_v8  ;;  %v8097_v56 = vadd.f32 %v8049_v16, %v13418_v46  ;;  %v13422_v14 = vmax.f32 %v12580_v23, 0.0  ;;  %v8055_v3 = vld [vmem:[%s10249_s10 + $0xa8] sm:$0xff]  ;;  %v8056_v15 = vld [vmem:[%s10249_s10 + $0xb0] sm:$0xff]  ;;  %v13423_v41 = vmax.f32 %v12585_v20, 0.0 }
 0x59f   : > { %v8099_v13 = vadd.f32 %v8051_v51, %v13419_v11  ;;  %8142 = vst [vmem:[%s10286_s29 + $0x60] sm:$0xff] %v8094_v53  ;;  %8143 = vst [vmem:[%s10286_s29 + $0x68] sm:$0xff] %v8095_v10  ;;  %v8100_v33 = vadd.f32 %v8052_v37, %v13420_v57  ;;  %v8101_v54 = vadd.f32 %v8053_v60, %v13421_v30  ;;  %v8057_v2 = vld [vmem:[%s10249_s10 + $0xb8] sm:$0xff]  ;;  %v13424_v39 = vmax.f32 %v12776_v26, 0.0  ;;  %v8058_v36 = vld [vmem:[%s10249_s10 + $0xc0] sm:$0xff] }
 0x5a0   : > { %8144 = vst [vmem:[%s10286_s29 + $0x70] sm:$0xff] %v8096_v43  ;;  %v8102_v22 = vadd.f32 %v8054_v48, %v13422_v14  ;;  %8145 = vst [vmem:[%s10286_s29 + $0x78] sm:$0xff] %v8097_v56  ;;  %v8103_v61 = vadd.f32 %v8055_v3, %v13423_v41  ;;  %v13425_v23 = vmax.f32 %v12780_v29, 0.0  ;;  %v8059_v55 = vld [vmem:[%s10249_s10 + $0xc8] sm:$0xff]  ;;  %v8060_v8 = vld [vmem:[%s10249_s10 + $0xd0] sm:$0xff]  ;;  %v13426_v20 = vmax.f32 %v12499_v52, 0.0 }
 0x5a1   : > { %8146 = vst [vmem:[%s10286_s29 + $0x80] sm:$0xff] %v8098_v7  ;;  %8147 = vst [vmem:[%s10286_s29 + $0x88] sm:$0xff] %v8099_v13  ;;  %v8104_v58 = vadd.f32 %v8056_v15, %v13424_v39  ;;  %v13427_v26 = vmax.f32 %v12503_v42, 0.0  ;;  %v13428_v29 = vmax.f32 %v12599_v35, 0.0  ;;  %v8061_v4 = vld [vmem:[%s10249_s10 + $0xd8] sm:$0xff]  ;;  %v8062_v53 = vld [vmem:[%s10249_s10 + $0xe0] sm:$0xff] }
 0x5a2   : > { %v8105_v63 = vadd.f32 %v8057_v2, %v13425_v23  ;;  %8148 = vst [vmem:[%s10286_s29 + $0x90] sm:$0xff] %v8100_v33  ;;  %8149 = vst [vmem:[%s10286_s29 + $0x98] sm:$0xff] %v8101_v54  ;;  %v8106_v25 = vadd.f32 %v8058_v36, %v13426_v20  ;;  %v8063_v45 = vld [vmem:[%s10249_s10 + $0xe8] sm:$0xff]  ;;  %v13429_v52 = vmax.f32 %v12607_v38, 0.0  ;;  %v13430_v42 = vmax.f32 %v12696_v0, 0.0  ;;  %v8064_v16 = vld [vmem:[%s10249_s10 + $0xf0] sm:$0xff] }
 0x5a3   : > { %8150 = vst [vmem:[%s10286_s29 + $0xa0] sm:$0xff] %v8102_v22  ;;  %v8107_v28 = vadd.f32 %v8059_v55, %v13427_v26  ;;  %v8108_v24 = vadd.f32 %v8060_v8, %v13428_v29  ;;  %8151 = vst [vmem:[%s10286_s29 + $0xa8] sm:$0xff] %v8103_v61  ;;  %v13431_v35 = vmax.f32 %v12701_v19, 0.0  ;;  %v8065_v12 = vld [vmem:[%s10249_s10 + $0xf8] sm:$0xff]  ;;  %v8066_v51 = vld [vmem:[%s10249_s10 + $0x100] sm:$0xff]  ;;  %v13432_v38 = vmax.f32 %v12508_v44, 0.0 }
 0x5a4   : > { %8152 = vst [vmem:[%s10286_s29 + $0xb0] sm:$0xff] %v8104_v58  ;;  %8153 = vst [vmem:[%s10286_s29 + $0xb8] sm:$0xff] %v8105_v63  ;;  %v8109_v10 = vadd.f32 %v8061_v4, %v13429_v52  ;;  %v8110_v32 = vadd.f32 %v8062_v53, %v13430_v42  ;;  %v13433_v0 = vmax.f32 %v12512_v18, 0.0  ;;  %v13434_v19 = vmax.f32 %v12612_v1, 0.0  ;;  %v8067_v11 = vld [vmem:[%s10249_s10 + $0x108] sm:$0xff]  ;;  %v8068_v13 = vld [vmem:[%s10249_s10 + $0x110] sm:$0xff] }
 0x5a5   : > { %v8111_v43 = vadd.f32 %v8063_v45, %v13431_v35  ;;  %8154 = vst [vmem:[%s10286_s29 + $0xc0] sm:$0xff] %v8106_v25  ;;  %8155 = vst [vmem:[%s10286_s29 + $0xc8] sm:$0xff] %v8107_v28  ;;  %v8112_v46 = vadd.f32 %v8064_v16, %v13432_v38  ;;  %v8069_v37 = vld [vmem:[%s10249_s10 + $0x118] sm:$0xff]  ;;  %v13435_v44 = vmax.f32 %v12617_v49, 0.0  ;;  %v13436_v18 = vmax.f32 %v12707_v6, 0.0  ;;  %v8070_v33 = vld [vmem:[%s10249_s10 + $0x120] sm:$0xff] }
 0x5a6   : > { %8156 = vst [vmem:[%s10286_s29 + $0xd0] sm:$0xff] %v8108_v24  ;;  %v8113_v56 = vadd.f32 %v8065_v12, %v13433_v0  ;;  %v8114_v7 = vadd.f32 %v8066_v51, %v13434_v19  ;;  %8157 = vst [vmem:[%s10286_s29 + $0xd8] sm:$0xff] %v8109_v10  ;;  %v13437_v1 = vmax.f32 %v12712_v31, 0.0  ;;  %v8071_v30 = vld [vmem:[%s10249_s10 + $0x128] sm:$0xff]  ;;  %v8072_v54 = vld [vmem:[%s10249_s10 + $0x130] sm:$0xff]  ;;  %v13438_v49 = vmax.f32 %v12629_v50, 0.0 }
 0x5a7   : > { %8158 = vst [vmem:[%s10286_s29 + $0xe0] sm:$0xff] %v8110_v32  ;;  %8159 = vst [vmem:[%s10286_s29 + $0xe8] sm:$0xff] %v8111_v43  ;;  %v8115_v60 = vadd.f32 %v8067_v11, %v13435_v44  ;;  %v8116_v48 = vadd.f32 %v8068_v13, %v13436_v18  ;;  %v13439_v6 = vmax.f32 %v12636_v5, 0.0  ;;  %v13440_v31 = vmax.f32 %v12633_v62, 0.0  ;;  %v8073_v15 = vld [vmem:[%s10249_s10 + $0x138] sm:$0xff]  ;;  %v8074_v2 = vld [vmem:[%s10249_s10 + $0x140] sm:$0xff] }
 0x5a8   : > { %v8117_v57 = vadd.f32 %v8069_v37, %v13437_v1  ;;  %8160 = vst [vmem:[%s10286_s29 + $0xf0] sm:$0xff] %v8112_v46  ;;  %8161 = vst [vmem:[%s10286_s29 + $0xf8] sm:$0xff] %v8113_v56  ;;  %v8118_v14 = vadd.f32 %v8070_v33, %v13438_v49  ;;  %v8075_v41 = vld [vmem:[%s10249_s10 + $0x148] sm:$0xff]  ;;  %v13441_v50 = vmax.f32 %v12640_v40, 0.0  ;;  %v13442_v5 = vmax.f32 %v12719_v47, 0.0  ;;  %v8076_v23 = vld [vmem:[%s10249_s10 + $0x150] sm:$0xff] }
 0x5a9   : > { %8162 = vst [vmem:[%s10286_s29 + $0x100] sm:$0xff] %v8114_v7  ;;  %v8119_v22 = vadd.f32 %v8071_v30, %v13439_v6  ;;  %v8120_v3 = vadd.f32 %v8072_v54, %v13440_v31  ;;  %8163 = vst [vmem:[%s10286_s29 + $0x108] sm:$0xff] %v8115_v60  ;;  %v13443_v62 = vmax.f32 %v12723_v21, 0.0  ;;  %v8077_v63 = vld [vmem:[%s10249_s10 + $0x158] sm:$0xff]  ;;  %v8078_v36 = vld [vmem:[%s10249_s10 + $0x160] sm:$0xff]  ;;  %v13444_v40 = vmax.f32 %v12644_v34, 0.0 }
 0x5aa   : > { %8164 = vst [vmem:[%s10286_s29 + $0x110] sm:$0xff] %v8116_v48  ;;  %8165 = vst [vmem:[%s10286_s29 + $0x118] sm:$0xff] %v8117_v57  ;;  %v8121_v61 = vadd.f32 %v8073_v15, %v13441_v50  ;;  %v8122_v39 = vadd.f32 %v8074_v2, %v13442_v5  ;;  %v13445_v47 = vmax.f32 %v12650_v17, 0.0  ;;  %v13446_v21 = vmax.f32 %v12656_v59, 0.0  ;;  %v8079_v25 = vld [vmem:[%s10249_s10 + $0x168] sm:$0xff]  ;;  %v8080_v26 = vld [vmem:[%s10249_s10 + $0x170] sm:$0xff] }
 0x5ab   : > { %v8123_v58 = vadd.f32 %v8075_v41, %v13443_v62  ;;  %8166 = vst [vmem:[%s10286_s29 + $0x120] sm:$0xff] %v8118_v14  ;;  %8167 = vst [vmem:[%s10286_s29 + $0x128] sm:$0xff] %v8119_v22  ;;  %v8124_v55 = vadd.f32 %v8076_v23, %v13444_v40  ;;  %v8081_v28 = vld [vmem:[%s10249_s10 + $0x178] sm:$0xff]  ;;  %v13447_v29 = vmax.f32 %v12660_v9, 0.0  ;;  %v13448_v34 = vmax.f32 %v12728_v27, 0.0  ;;  %v13449_v53 = vld [vmem:[#allocation51_spill] sm:$0xff] }
 0x5ac   : > { %8168 = vst [vmem:[%s10286_s29 + $0x130] sm:$0xff] %v8120_v3  ;;  %v8125_v8 = vadd.f32 %v8077_v63, %v13445_v47  ;;  %v8126_v20 = vadd.f32 %v8078_v36, %v13446_v21  ;;  %8169 = vst [vmem:[%s10286_s29 + $0x138] sm:$0xff] %v8121_v61  ;;  %v13450_v17 = vmax.f32 %v13449_v53, 0.0 }
 0x5ad   : > { %8170 = vst [vmem:[%s10286_s29 + $0x140] sm:$0xff] %v8122_v39  ;;  %8171 = vst [vmem:[%s10286_s29 + $0x148] sm:$0xff] %v8123_v58  ;;  %v8127_v24 = vadd.f32 %v8079_v25, %v13447_v29  ;;  %v8128_v4 = vadd.f32 %v8080_v26, %v13448_v34 }
 0x5ae   : > { %v8129_v45 = vadd.f32 %v8081_v28, %v13450_v17  ;;  %8172 = vst [vmem:[%s10286_s29 + $0x150] sm:$0xff] %v8124_v55  ;;  %8173 = vst [vmem:[%s10286_s29 + $0x158] sm:$0xff] %v8125_v8 }
 0x5af   : > { %8174 = vst [vmem:[%s10286_s29 + $0x160] sm:$0xff] %v8126_v20  ;;  %8175 = vst [vmem:[%s10286_s29 + $0x168] sm:$0xff] %v8127_v24 }
 0x5b0   : > { %8176 = vst [vmem:[%s10286_s29 + $0x170] sm:$0xff] %v8128_v4  ;;  %8177 = vst [vmem:[%s10286_s29 + $0x178] sm:$0xff] %v8129_v45 }
 0x5b1 PF: > { %s13451_s10 = sld [smem:[#allocation25_spill]]  ;;  %s8192_s15 = sshll.u32 %s10286_s29, 4  ;;  %s13081_s15 = int_to_ptr.vmem [resolvable:$true] %s8192_s15 }
 0x5b2   : > { %s13452_s16 = sld [smem:[#allocation58_spill]]  ;;  %s8179_s8 = scalar_lea.sflag [#allocation6], %s10245_s7 }
 0x5b3   : > { %s9697_s21 = scalar_lea.vmem %s13081_s15, 6144  ;;  %p13453_p0 = scmp.ne.s32.totalorder %s13265_s14, 0 }
 0x5b4   : > { %p9698_p12 = scmp.ne.s32.totalorder %s13081_s15, %s9697_s21  ;;  %s9844_s17 = smov [#allocation15]  }
 0x5b5   : > { %s9701_s19 = sshll.u32 %s9844_s17, 4  ;;  %s9702_s19 = int_to_ptr.vmem [resolvable:$false] %s9701_s19 }
 0x5b6   : > { %p9699_p5 = pnand %p9698_p12, %p13453_p0  ;;  %s9703_s24 = scalar_lea.vmem %s9702_s19, 12288 }
 0x5b7   : > { %s8901_s18 = smul.u32 6144, %s13451_s10  ;;  %p9704_p4 = scmp.lt.s32.totalorder %s13081_s15, %s9702_s19 }
 0x5b8   : > { %p9700_p8 = pneg %p9699_p5  ;;  %p9705_p7 = scmp.lt.s32.totalorder %s9703_s24, %s9697_s21 }
 0x5b9   : > { %s13079_s30 = scalar_lea.hbm %s13452_s16, %s8901_s18 }
 0x5ba   : > { %p9706_p10 = por %p9705_p7, %p9704_p4 }
 0x5bc   : > { %p9707_p1 = pnand %p9706_p10, %p9700_p8 }
 0x5be   : > { %9710 = shalt.err (!%p9707_p1)
}
 0x5bf   : > { %s9711_s0 = scalar_lea.hbm %s13079_s30, 6144  ;;  %s9715_s20 = scalar_lea.hbm %s13452_s16, 12288 }
 0x5c0   : > { %p9712_p11 = scmp.ne.s32.totalorder %s13079_s30, %s9711_s0  ;;  %p9716_p13 = scmp.lt.u32.totalorder %s13079_s30, %s13452_s16 }
 0x5c1   : > { %p9717_p3 = scmp.lt.u32.totalorder %s9715_s20, %s9711_s0  ;;  %p9719_p12 = scmp.lt.u32.totalorder %s9711_s0, %s13079_s30 }
 0x5c2   : > { %p9713_p9 = pnand %p9712_p11, %p13453_p0 }
 0x5c3   : > { %p9718_p6 = por %p9717_p3, %p9716_p13 }
 0x5c4   : > { %p9714_p2 = pneg %p9713_p9 }
 0x5c5   : > { %p9720_p5 = por %p9719_p12, %p9718_p6 }
 0x5c7   : > { %p9721_p8 = pnand %p9720_p5, %p9714_p2 }
 0x5c9   : > { %9724 = shalt.err (!%p9721_p8)
}
 0x5ca   : > { %s9845_s29 = smov 768   ;;  %s9846_s23 = smov 48  }
 0x5cb   : > { %8914 = dma.vmem_to_hbm [thread:$0]  (%p13453_p0), %s13081_s15, 6144, %s13079_s30, %s8179_s8, %s9845_s29, %s9845_s29, %s9846_s23  }
 0x5cc PF: > { %p8940_p4 = scmp.ge.s32.totalorder %s9831_s11, 2  ;;  %s8207_s22 = sand.u32 1, %s9803_s27  }
 0x5cd   : > { %p13454_p7 = scmp.ne.s32.totalorder %s13267_s4, 0  ;;  %s8208_s10 = scalar_lea.sflag [#allocation6], %s8207_s22 }
 0x5cf   : > { %p8936_p10 = pnand %p8940_p4, %p13454_p7 }
 0x5d1   : > { %9786 = dma.done.wait (!%p8936_p10), %s8208_s10, 6144  }
 0x5d2   : > { %9788 = vsyncadd (!%p8936_p10), %s8208_s10, 4294961152  ;;  %s32_s11 = sadd.s32 1, %s9831_s11   ;;  %s13455_s24 = sld [smem:[#allocation21_spill]] }
 0x5d3   : > { %p29_p1 = scmp.ge.s32.totalorder %s32_s11, 8   ;;  %s13456_s25 = sld [smem:[#allocation22_spill]] }
 0x5d4   : > { %s13457_s26 = sld [smem:[#allocation28_spill]]  ;;  %s13458_s14 = sld [smem:[#allocation23_spill]] }
 0x5d5   : > { %s13459_s29 = sld [smem:[#allocation32_spill]]  ;;  %s13460_s8 = sld [smem:[#allocation26_spill]] }
 0x5d6   : > { %s13461_s7 = sld [smem:[#allocation27_spill]]  ;;  %s13462_s10 = sld [smem:[#allocation31_spill]] }
 0x5d7   : > { %s13463_s27 = smov %s9807_s28  ;;  %s13465_s30 = smov %s9823_s9 }
 0x5d8   :  { %31 = sbr.rel (!%p29_p1) target bundleno = 22 (0x16), region = 182 }
 0x5da   : > { %s13464_s28 = smov %s13458_s14 }
 0x5dc   : > { %s13466_s9 = smov %s13461_s7 }
 0x5df   :  { %8213 = vsyncpa [#allocation5], 1 }
 0x5e0   :  { %8215 = vsyncpa [#allocation5 + $0x1], 1 }
 0x5e1   :  { %8216 = vsyncpa [#allocation8], 1 }
 0x5e2   :  { %8218 = vsyncpa [#allocation8 + $0x1], 1 }
 0x5e3   :  { %8219 = vsyncpa [#allocation11], 1 }
 0x5e4   :  { %8221 = vsyncpa [#allocation11 + $0x1], 1 }
 0x5e5   :  { %8222 = vsyncpa [#allocation14], 1 }
 0x5e6   :  { %8224 = vsyncpa [#allocation14 + $0x1], 1 }
 0x5e7   :  { %8225 = vsyncpa [#allocation6], 1 }
 0x5e8   :  { %8227 = vsyncpa [#allocation6 + $0x1], 1 }

</bundles_post_ra>
